<compile_context>
chip_gen: v5e
topology: v5e:2x2
jax: 0.10.0
libtpu: 0.0.40
codegen_flags: <defaults>
</compile_context>

<pallas_src>
import numpy as np

import jax
import jax.numpy as jnp
from jax.experimental import pallas as pl
from jax.experimental.pallas import tpu as pltpu

_BN_EPS = 1e-5


def _round_up(x, m):
    return (x + m - 1) // m * m


# ----------------------------------------------------------------------------
# Trace-time constants
# ----------------------------------------------------------------------------
def _conv2_tap_maps(H, W, stride):
    """0/1 selection matrices for a 3x3 / pad-1 / stride-s conv.

    T[k, r_out, r_in] = 1 iff output pixel r_out reads input pixel r_in for tap
    k = ki*3 + kj (zero-padding positions simply have an all-zero row segment).
    """
    Ho = (H - 1) // stride + 1
    Wo = (W - 1) // stride + 1
    r_out = np.arange(Ho * Wo)
    ho, wo = r_out // Wo, r_out % Wo
    taps = []
    for ki in range(3):
        for kj in range(3):
            hi = ho * stride + ki - 1
            wi = wo * stride + kj - 1
            valid = (hi >= 0) & (hi < H) & (wi >= 0) & (wi < W)
            r_in = hi * W + wi
            t = np.zeros((Ho * Wo, H * W), np.float32)
            idx = np.where(valid)[0]
            t[idx, r_in[idx]] = 1.0
            taps.append(t)
    return jnp.asarray(np.stack(taps), dtype=jnp.bfloat16), Ho, Wo


def _fold_bn(w, bias, bn):
    """Fold BN(conv(x) + bias) -> (x @ (w*scale)) + shift  (scale over out-ch)."""
    scale = bn['gamma'] / jnp.sqrt(bn['var'] + _BN_EPS)
    shift = (bias - bn['mean']) * scale + bn['beta']
    wf = (w * scale).astype(jnp.bfloat16)          # scale broadcasts over last dim
    return wf, shift.reshape(1, -1).astype(jnp.float32)


def im2col(x, kh, kw, stride, pad):
    """x: (B, H, W, C) NHWC -> (B, Ho, Wo, kh*kw*C) patches (only used for the stem)."""
    B, H, W, C = x.shape
    xp = jnp.pad(x, ((0, 0), (pad, pad), (pad, pad), (0, 0)))
    Ho = (H + 2 * pad - kh) // stride + 1
    Wo = (W + 2 * pad - kw) // stride + 1
    cols = []
    for i in range(kh):
        for j in range(kw):
            cols.append(xp[:, i:i + stride * Ho:stride, j:j + stride * Wo:stride, :])
    return jnp.concatenate(cols, axis=-1), Ho, Wo


# ----------------------------------------------------------------------------
# Fused bottleneck-block kernel
# ----------------------------------------------------------------------------
def _make_block_kernel(*, has_stem, strided, has_down, fuse_head):
    def kernel(*refs):
        it = iter(refs)
        x_ref = next(it)
        t_ref = next(it)                                  # (9, HWo, HW) bf16
        if has_stem:
            w0_ref, b0_ref = next(it), next(it)
        w1_ref, b1_ref = next(it), next(it)
        w2_ref, b2_ref = next(it), next(it)
        w3_ref, b3_ref = next(it), next(it)
        if has_down:
            wd_ref, bd_ref = next(it), next(it)
        if fuse_head:
            f1w_ref, f1b_ref, f2w_ref, f2b_ref = next(it), next(it), next(it), next(it)
        o_ref = next(it)

        x = x_ref[0]                                      # (HW, Cin) bf16
        if has_stem:
            # Stem: conv1(8x8) + bn1 + relu, fused (dropout1 = identity in eval).
            x = jnp.dot(x, w0_ref[...], preferred_element_type=jnp.float32) + b0_ref[...]
            x = jnp.maximum(x, 0.0).astype(jnp.bfloat16)

        # conv1 (1x1) + bn1 + relu
        y1 = jnp.dot(x, w1_ref[...], preferred_element_type=jnp.float32) + b1_ref[...]
        y1 = jnp.maximum(y1, 0.0).astype(jnp.bfloat16)    # (HW, Cm)

        # conv2 (3x3, pad 1, stride s) + bn2 + relu: 9 gather-taps, all in VMEM.
        n_out = t_ref.shape[1]
        cm = w1_ref.shape[1]
        acc = jnp.zeros((n_out, cm), jnp.float32)
        for k in range(9):
            if (not strided) and k == 4:                  # centre tap is identity
                g = y1
            else:
                g = jnp.dot(t_ref[k], y1,
                            preferred_element_type=jnp.float32).astype(jnp.bfloat16)
            acc = acc + jnp.dot(g, w2_ref[k], preferred_element_type=jnp.float32)
        y2 = jnp.maximum(acc + b2_ref[...], 0.0).astype(jnp.bfloat16)   # (HWo, Cm)

        # identity path (centre tap = strided spatial subsample)
        if strided:
            idn = jnp.dot(t_ref[4], x,
                          preferred_element_type=jnp.float32).astype(jnp.bfloat16)
        else:
            idn = x

        # conv3 (1x1) + bn3 + relu  (ReLU before the residual add, per the spec)
        y3 = jnp.dot(y2, w3_ref[...], preferred_element_type=jnp.float32) + b3_ref[...]
        y3 = jnp.maximum(y3, 0.0)

        if has_down:
            idf = jnp.dot(idn, wd_ref[...], preferred_element_type=jnp.float32) + bd_ref[...]
        else:
            idf = idn.astype(jnp.float32)

        out = jnp.maximum(y3 + idf, 0.0)                  # (HWo, C4) f32

        if fuse_head:
            # AdaptiveAvgPool2d((1,1)) + flatten + (dropout2=identity) + fc1 + fc2, f32.
            pooled = jnp.mean(out, axis=0, keepdims=True)                  # (1, C4)
            h = jnp.dot(pooled, f1w_ref[...],
                        preferred_element_type=jnp.float32) + f1b_ref[...]
            h = jnp.dot(h, f2w_ref[...],
                        preferred_element_type=jnp.float32) + f2b_ref[...]
            o_ref[0] = h                                                   # (1, out_pad)
        else:
            o_ref[0] = out.astype(o_ref.dtype)
    return kernel


def _resident_spec(a):
    """Full-array VMEM block, same block for every grid step (stays resident)."""
    zero = (0,) * a.ndim
    return pl.BlockSpec(tuple(a.shape), lambda i, _z=zero: _z)


def fused_block(x, p, H, W, *, stem=None, head=None, out_pad=None):
    """One bottleneck block (optionally with fused stem / fused head) as a single
    pallas_call.  x: (B, H*W, Cin) bf16, batch-major flat spatial layout."""
    B, HW, Cin = x.shape
    stride = p['stride']
    strided = stride != 1
    has_down = p['down'] is not None
    has_stem = stem is not None
    fuse_head = head is not None
    cm = p['conv1_w'].shape[-1]
    c4 = p['conv3_w'].shape[-1]

    taps, Ho, Wo = _conv2_tap_maps(H, W, stride)      # (9, HWo, HW) bf16 constant
    HWo = Ho * Wo

    args, specs = [], []

    def add(a, spec):
        args.append(a)
        specs.append(spec)

    add(x.astype(jnp.bfloat16), pl.BlockSpec((1, HW, Cin), lambda i: (i, 0, 0)))
    add(taps, _resident_spec(taps))

    if has_stem:
        w0, b0 = _fold_bn(stem['w'], stem['b'], stem['bn'])
        add(w0, _resident_spec(w0)); add(b0, _resident_spec(b0))

    w1, b1 = _fold_bn(p['conv1_w'], p['conv1_b'], p['bn1'])
    add(w1, _resident_spec(w1)); add(b1, _resident_spec(b1))
    w2, b2 = _fold_bn(p['conv2_w'].reshape(9, cm, cm), p['conv2_b'], p['bn2'])
    add(w2, _resident_spec(w2)); add(b2, _resident_spec(b2))
    w3, b3 = _fold_bn(p['conv3_w'], p['conv3_b'], p['bn3'])
    add(w3, _resident_spec(w3)); add(b3, _resident_spec(b3))

    if has_down:
        d = p['down']
        wd, bd = _fold_bn(d['conv_w'], d['conv_b'], d['bn'])
        add(wd, _resident_spec(wd)); add(bd, _resident_spec(bd))

    if fuse_head:
        osz = head['fc2_w'].shape[1]
        f1w = head['fc1_w'].astype(jnp.float32)
        f1b = head['fc1_b'].reshape(1, -1).astype(jnp.float32)
        f2w = jnp.pad(head['fc2_w'], ((0, 0), (0, out_pad - osz))).astype(jnp.float32)
        f2b = jnp.pad(head['fc2_b'], ((0, out_pad - osz),)).reshape(1, out_pad).astype(jnp.float32)
        for a in (f1w, f1b, f2w, f2b):
            add(a, _resident_spec(a))

    if fuse_head:
        out_shape = jax.ShapeDtypeStruct((B, 1, out_pad), jnp.float32)
        out_spec = pl.BlockSpec((1, 1, out_pad), lambda i: (i, 0, 0))
    else:
        out_shape = jax.ShapeDtypeStruct((B, HWo, c4), jnp.bfloat16)
        out_spec = pl.BlockSpec((1, HWo, c4), lambda i: (i, 0, 0))

    kernel = _make_block_kernel(has_stem=has_stem, strided=strided,
                                has_down=has_down, fuse_head=fuse_head)

    out = pl.pallas_call(
        kernel,
        out_shape=out_shape,
        grid=(B,),
        in_specs=specs,
        out_specs=out_spec,
        compiler_params=pltpu.CompilerParams(
            dimension_semantics=("parallel",),      # one image per grid step
            vmem_limit_bytes=32 * 1024 * 1024),     # explicit: safe on v7x too
    )(*args)
    return out, Ho, Wo


# ----------------------------------------------------------------------------
# Parameter init (matches the GEMM layouts used by the kernels)
# ----------------------------------------------------------------------------
def _conv_init(key, cin, cout, kh, kw):
    kw_, kb_ = jax.random.split(key)
    fan_in = cin * kh * kw
    w = jax.random.normal(kw_, (kh * kw * cin, cout), jnp.float32) / jnp.sqrt(fan_in)
    b = 0.01 * jax.random.normal(kb_, (cout,), jnp.float32)
    return w, b


def _bn_init(key, c):
    k1, k2, k3, k4 = jax.random.split(key, 4)
    return dict(
        gamma=1.0 + 0.1 * jax.random.normal(k1, (c,), jnp.float32),
        beta=0.1 * jax.random.normal(k2, (c,), jnp.float32),
        mean=0.1 * jax.random.normal(k3, (c,), jnp.float32),
        var=1.0 + 0.1 * jax.random.uniform(k4, (c,), jnp.float32),
    )


def _block_init(key, cin, cout, stride, need_down):
    keys = jax.random.split(key, 8)
    p = {'stride': stride}
    p['conv1_w'], p['conv1_b'] = _conv_init(keys[0], cin, cout, 1, 1)
    p['bn1'] = _bn_init(keys[1], cout)
    p['conv2_w'], p['conv2_b'] = _conv_init(keys[2], cout, cout, 3, 3)
    p['bn2'] = _bn_init(keys[3], cout)
    p['conv3_w'], p['conv3_b'] = _conv_init(keys[4], cout, cout * 4, 1, 1)
    p['bn3'] = _bn_init(keys[5], cout * 4)
    if need_down:
        dw, db = _conv_init(keys[6], cin, cout * 4, 1, 1)
        p['down'] = {'conv_w': dw, 'conv_b': db, 'bn': _bn_init(keys[7], cout * 4)}
    else:
        p['down'] = None
    return p


def init_params(key, layers, output_size):
    keys = jax.random.split(key, 8)
    params = {}
    # stem: Conv2d(1, 64, kernel=8, stride=1, padding=1) + BN
    params['conv1_w'], params['conv1_b'] = _conv_init(keys[0], 1, 64, 8, 8)
    params['bn1'] = _bn_init(keys[1], 64)

    in_ch = 64
    layer_specs = [(layers[0], 64, 1), (layers[1], 64, 2), (layers[2], 128, 2)]
    for li, (nblocks, cout, stride) in enumerate(layer_specs):
        lkeys = jax.random.split(keys[2 + li], max(nblocks, 2))
        need_down = (stride != 1) or (in_ch != cout * 4)
        blocks = [_block_init(lkeys[0], in_ch, cout, stride, need_down)]
        in_ch = cout * 4
        for bi in range(1, nblocks):
            blocks.append(_block_init(lkeys[bi], in_ch, cout, 1, False))
        params[f'layer{li + 1}'] = blocks

    kf1, kb1, kf2, kb2 = jax.random.split(keys[5], 4)
    params['fc1_w'] = jax.random.normal(kf1, (512, 1024), jnp.float32) / jnp.sqrt(512.0)
    params['fc1_b'] = 0.01 * jax.random.normal(kb1, (1024,), jnp.float32)
    params['fc2_w'] = jax.random.normal(kf2, (1024, output_size), jnp.float32) / jnp.sqrt(1024.0)
    params['fc2_b'] = 0.01 * jax.random.normal(kb2, (output_size,), jnp.float32)
    return params


# ----------------------------------------------------------------------------
# Forward pass
# ----------------------------------------------------------------------------
def resnet_forward(x, params, output_size):
    # x: (B, H, W) -- the PyTorch forward unsqueezes the channel dim -> 1 channel.
    B, H, W = x.shape
    x4 = x[..., None].astype(jnp.bfloat16)                 # (B, H, W, 1) NHWC

    # Stem im2col stays XLA-side (1-channel, tiny); the stem GEMM itself is fused
    # into the first block kernel below.
    cols, Hc, Wc = im2col(x4, 8, 8, 1, 1)                  # (B, 11, 11, 64)
    act = cols.reshape(B, Hc * Wc, 64)

    out_pad = _round_up(output_size, 128)
    stem = dict(w=params['conv1_w'], b=params['conv1_b'], bn=params['bn1'])

    blocks = [blk for name in ('layer1', 'layer2', 'layer3') for blk in params[name]]
    for idx, blk in enumerate(blocks):
        act, Hc, Wc = fused_block(
            act, blk, Hc, Wc,
            stem=stem if idx == 0 else None,
            head=params if idx == len(blocks) - 1 else None,
            out_pad=out_pad)

    # act: (B, 1, out_pad) f32 (head fused into the last block kernel)
    return act.reshape(B, out_pad)[:, :output_size]


# ----------------------------------------------------------------------------
if __name__ == "__main__":
    key = jax.random.PRNGKey(0)
    kp, kx = jax.random.split(key)

    B, H, W = 2, 16, 16          # input (B, H, W); forward adds the channel dim -> 1
    layers = [1, 1, 1]           # one bottleneck block per stage (small config)
    output_size = 10

    params = init_params(kp, layers, output_size)
    x = jax.random.normal(kx, (B, H, W), dtype=jnp.float32)

    fwd = jax.jit(lambda inp: resnet_forward(inp, params, output_size))
    out = jax.block_until_ready(fwd(x))
    assert out.shape == (B, output_size), out.shape
    assert jnp.all(jnp.isfinite(out))
    print("KERNEL_OK")
</pallas_src>

<mosaic_0001>
module attributes {stable_mosaic.version = 11 : i64} {
  func.func @kernel(%arg0: i32, %arg1: memref<1x121x256xbf16, #tpu.memory_space<vmem>>, %arg2: memref<9x36x121xbf16, #tpu.memory_space<vmem>>, %arg3: memref<256x64xbf16, #tpu.memory_space<vmem>>, %arg4: memref<1x64xf32, #tpu.memory_space<vmem>>, %arg5: memref<9x64x64xbf16, #tpu.memory_space<vmem>>, %arg6: memref<1x64xf32, #tpu.memory_space<vmem>>, %arg7: memref<64x256xbf16, #tpu.memory_space<vmem>>, %arg8: memref<1x256xf32, #tpu.memory_space<vmem>>, %arg9: memref<256x256xbf16, #tpu.memory_space<vmem>>, %arg10: memref<1x256xf32, #tpu.memory_space<vmem>>, %arg11: memref<1x36x256xbf16, #tpu.memory_space<vmem>>) attributes {dimension_semantics = [#tpu.dimension_semantics<parallel>], iteration_bounds = array<i64: 2>, scalar_prefetch = 0 : i64, scratch_operands = 0 : i64, tpu.core_type = #tpu.core_type<tc>, window_params = [{transform_indices = @transform_0, window_bounds = array<i64: 1, 121, 256>}, {pipeline_mode = #tpu.pipeline_mode<synchronous>, transform_indices = @transform_1, window_bounds = array<i64: 9, 36, 121>}, {pipeline_mode = #tpu.pipeline_mode<synchronous>, transform_indices = @transform_2, window_bounds = array<i64: 256, 64>}, {pipeline_mode = #tpu.pipeline_mode<synchronous>, transform_indices = @transform_3, window_bounds = array<i64: 1, 64>}, {pipeline_mode = #tpu.pipeline_mode<synchronous>, transform_indices = @transform_4, window_bounds = array<i64: 9, 64, 64>}, {pipeline_mode = #tpu.pipeline_mode<synchronous>, transform_indices = @transform_5, window_bounds = array<i64: 1, 64>}, {pipeline_mode = #tpu.pipeline_mode<synchronous>, transform_indices = @transform_6, window_bounds = array<i64: 64, 256>}, {pipeline_mode = #tpu.pipeline_mode<synchronous>, transform_indices = @transform_7, window_bounds = array<i64: 1, 256>}, {pipeline_mode = #tpu.pipeline_mode<synchronous>, transform_indices = @transform_8, window_bounds = array<i64: 256, 256>}, {pipeline_mode = #tpu.pipeline_mode<synchronous>, transform_indices = @transform_9, window_bounds = array<i64: 1, 256>}, {transform_indices = @transform_10, window_bounds = array<i64: 1, 36, 256>}]} {
    %c0 = arith.constant 0 : index
    %c0_0 = arith.constant 0 : index
    %c0_1 = arith.constant 0 : index
    %0 = vector.load %arg1[%c0, %c0_0, %c0_1] : memref<1x121x256xbf16, #tpu.memory_space<vmem>>, vector<1x121x256xbf16>
    %1 = vector.shape_cast %0 : vector<1x121x256xbf16> to vector<121x256xbf16>
    %c0_2 = arith.constant 0 : index
    %c0_3 = arith.constant 0 : index
    %2 = vector.load %arg3[%c0_2, %c0_3] : memref<256x64xbf16, #tpu.memory_space<vmem>>, vector<256x64xbf16>
    %cst = arith.constant dense<0.000000e+00> : vector<121x64xf32>
    %3 = tpu.matmul %1, %2, %cst {dimension_numbers = #tpu.dot_dimension_numbers<[1], [0], [0], [1], [0, 0, 1, 1], [], []>} : vector<121x256xbf16>, vector<256x64xbf16>, vector<121x64xf32> -> vector<121x64xf32>
    %c0_4 = arith.constant 0 : index
    %c0_5 = arith.constant 0 : index
    %4 = vector.load %arg4[%c0_4, %c0_5] : memref<1x64xf32, #tpu.memory_space<vmem>>, vector<1x64xf32>
    %5 = vector.broadcast %4 : vector<1x64xf32> to vector<121x64xf32>
    %6 = arith.addf %3, %5 : vector<121x64xf32>
    %cst_6 = arith.constant 0.000000e+00 : f32
    %7 = vector.broadcast %cst_6 : f32 to vector<121x64xf32>
    %8 = arith.maximumf %6, %7 : vector<121x64xf32>
    %9 = arith.truncf %8 : vector<121x64xf32> to vector<121x64xbf16>
    %cst_7 = arith.constant 0.000000e+00 : f32
    %10 = vector.broadcast %cst_7 : f32 to vector<36x64xf32>
    %c0_8 = arith.constant 0 : index
    %c0_9 = arith.constant 0 : index
    %c0_10 = arith.constant 0 : index
    %11 = vector.load %arg2[%c0_8, %c0_9, %c0_10] : memref<9x36x121xbf16, #tpu.memory_space<vmem>>, vector<1x36x121xbf16>
    %12 = vector.shape_cast %11 : vector<1x36x121xbf16> to vector<36x121xbf16>
    %cst_11 = arith.constant dense<0.000000e+00> : vector<36x64xf32>
    %13 = tpu.matmul %12, %9, %cst_11 {dimension_numbers = #tpu.dot_dimension_numbers<[1], [0], [0], [1], [0, 0, 1, 1], [], []>} : vector<36x121xbf16>, vector<121x64xbf16>, vector<36x64xf32> -> vector<36x64xf32>
    %14 = arith.truncf %13 : vector<36x64xf32> to vector<36x64xbf16>
    %c0_12 = arith.constant 0 : index
    %c0_13 = arith.constant 0 : index
    %c0_14 = arith.constant 0 : index
    %15 = vector.load %arg5[%c0_12, %c0_13, %c0_14] : memref<9x64x64xbf16, #tpu.memory_space<vmem>>, vector<1x64x64xbf16>
    %16 = vector.shape_cast %15 : vector<1x64x64xbf16> to vector<64x64xbf16>
    %cst_15 = arith.constant dense<0.000000e+00> : vector<36x64xf32>
    %17 = tpu.matmul %14, %16, %cst_15 {dimension_numbers = #tpu.dot_dimension_numbers<[1], [0], [0], [1], [0, 0, 1, 1], [], []>} : vector<36x64xbf16>, vector<64x64xbf16>, vector<36x64xf32> -> vector<36x64xf32>
    %18 = arith.addf %10, %17 : vector<36x64xf32>
    %c1 = arith.constant 1 : index
    %c0_16 = arith.constant 0 : index
    %c0_17 = arith.constant 0 : index
    %19 = vector.load %arg2[%c1, %c0_16, %c0_17] : memref<9x36x121xbf16, #tpu.memory_space<vmem>>, vector<1x36x121xbf16>
    %20 = vector.shape_cast %19 : vector<1x36x121xbf16> to vector<36x121xbf16>
    %cst_18 = arith.constant dense<0.000000e+00> : vector<36x64xf32>
    %21 = tpu.matmul %20, %9, %cst_18 {dimension_numbers = #tpu.dot_dimension_numbers<[1], [0], [0], [1], [0, 0, 1, 1], [], []>} : vector<36x121xbf16>, vector<121x64xbf16>, vector<36x64xf32> -> vector<36x64xf32>
    %22 = arith.truncf %21 : vector<36x64xf32> to vector<36x64xbf16>
    %c1_19 = arith.constant 1 : index
    %c0_20 = arith.constant 0 : index
    %c0_21 = arith.constant 0 : index
    %23 = vector.load %arg5[%c1_19, %c0_20, %c0_21] : memref<9x64x64xbf16, #tpu.memory_space<vmem>>, vector<1x64x64xbf16>
    %24 = vector.shape_cast %23 : vector<1x64x64xbf16> to vector<64x64xbf16>
    %cst_22 = arith.constant dense<0.000000e+00> : vector<36x64xf32>
    %25 = tpu.matmul %22, %24, %cst_22 {dimension_numbers = #tpu.dot_dimension_numbers<[1], [0], [0], [1], [0, 0, 1, 1], [], []>} : vector<36x64xbf16>, vector<64x64xbf16>, vector<36x64xf32> -> vector<36x64xf32>
    %26 = arith.addf %18, %25 : vector<36x64xf32>
    %c2 = arith.constant 2 : index
    %c0_23 = arith.constant 0 : index
    %c0_24 = arith.constant 0 : index
    %27 = vector.load %arg2[%c2, %c0_23, %c0_24] : memref<9x36x121xbf16, #tpu.memory_space<vmem>>, vector<1x36x121xbf16>
    %28 = vector.shape_cast %27 : vector<1x36x121xbf16> to vector<36x121xbf16>
    %cst_25 = arith.constant dense<0.000000e+00> : vector<36x64xf32>
    %29 = tpu.matmul %28, %9, %cst_25 {dimension_numbers = #tpu.dot_dimension_numbers<[1], [0], [0], [1], [0, 0, 1, 1], [], []>} : vector<36x121xbf16>, vector<121x64xbf16>, vector<36x64xf32> -> vector<36x64xf32>
    %30 = arith.truncf %29 : vector<36x64xf32> to vector<36x64xbf16>
    %c2_26 = arith.constant 2 : index
    %c0_27 = arith.constant 0 : index
    %c0_28 = arith.constant 0 : index
    %31 = vector.load %arg5[%c2_26, %c0_27, %c0_28] : memref<9x64x64xbf16, #tpu.memory_space<vmem>>, vector<1x64x64xbf16>
    %32 = vector.shape_cast %31 : vector<1x64x64xbf16> to vector<64x64xbf16>
    %cst_29 = arith.constant dense<0.000000e+00> : vector<36x64xf32>
    %33 = tpu.matmul %30, %32, %cst_29 {dimension_numbers = #tpu.dot_dimension_numbers<[1], [0], [0], [1], [0, 0, 1, 1], [], []>} : vector<36x64xbf16>, vector<64x64xbf16>, vector<36x64xf32> -> vector<36x64xf32>
    %34 = arith.addf %26, %33 : vector<36x64xf32>
    %c3 = arith.constant 3 : index
    %c0_30 = arith.constant 0 : index
    %c0_31 = arith.constant 0 : index
    %35 = vector.load %arg2[%c3, %c0_30, %c0_31] : memref<9x36x121xbf16, #tpu.memory_space<vmem>>, vector<1x36x121xbf16>
    %36 = vector.shape_cast %35 : vector<1x36x121xbf16> to vector<36x121xbf16>
    %cst_32 = arith.constant dense<0.000000e+00> : vector<36x64xf32>
    %37 = tpu.matmul %36, %9, %cst_32 {dimension_numbers = #tpu.dot_dimension_numbers<[1], [0], [0], [1], [0, 0, 1, 1], [], []>} : vector<36x121xbf16>, vector<121x64xbf16>, vector<36x64xf32> -> vector<36x64xf32>
    %38 = arith.truncf %37 : vector<36x64xf32> to vector<36x64xbf16>
    %c3_33 = arith.constant 3 : index
    %c0_34 = arith.constant 0 : index
    %c0_35 = arith.constant 0 : index
    %39 = vector.load %arg5[%c3_33, %c0_34, %c0_35] : memref<9x64x64xbf16, #tpu.memory_space<vmem>>, vector<1x64x64xbf16>
    %40 = vector.shape_cast %39 : vector<1x64x64xbf16> to vector<64x64xbf16>
    %cst_36 = arith.constant dense<0.000000e+00> : vector<36x64xf32>
    %41 = tpu.matmul %38, %40, %cst_36 {dimension_numbers = #tpu.dot_dimension_numbers<[1], [0], [0], [1], [0, 0, 1, 1], [], []>} : vector<36x64xbf16>, vector<64x64xbf16>, vector<36x64xf32> -> vector<36x64xf32>
    %42 = arith.addf %34, %41 : vector<36x64xf32>
    %c4 = arith.constant 4 : index
    %c0_37 = arith.constant 0 : index
    %c0_38 = arith.constant 0 : index
    %43 = vector.load %arg2[%c4, %c0_37, %c0_38] : memref<9x36x121xbf16, #tpu.memory_space<vmem>>, vector<1x36x121xbf16>
    %44 = vector.shape_cast %43 : vector<1x36x121xbf16> to vector<36x121xbf16>
    %cst_39 = arith.constant dense<0.000000e+00> : vector<36x64xf32>
    %45 = tpu.matmul %44, %9, %cst_39 {dimension_numbers = #tpu.dot_dimension_numbers<[1], [0], [0], [1], [0, 0, 1, 1], [], []>} : vector<36x121xbf16>, vector<121x64xbf16>, vector<36x64xf32> -> vector<36x64xf32>
    %46 = arith.truncf %45 : vector<36x64xf32> to vector<36x64xbf16>
    %c4_40 = arith.constant 4 : index
    %c0_41 = arith.constant 0 : index
    %c0_42 = arith.constant 0 : index
    %47 = vector.load %arg5[%c4_40, %c0_41, %c0_42] : memref<9x64x64xbf16, #tpu.memory_space<vmem>>, vector<1x64x64xbf16>
    %48 = vector.shape_cast %47 : vector<1x64x64xbf16> to vector<64x64xbf16>
    %cst_43 = arith.constant dense<0.000000e+00> : vector<36x64xf32>
    %49 = tpu.matmul %46, %48, %cst_43 {dimension_numbers = #tpu.dot_dimension_numbers<[1], [0], [0], [1], [0, 0, 1, 1], [], []>} : vector<36x64xbf16>, vector<64x64xbf16>, vector<36x64xf32> -> vector<36x64xf32>
    %50 = arith.addf %42, %49 : vector<36x64xf32>
    %c5 = arith.constant 5 : index
    %c0_44 = arith.constant 0 : index
    %c0_45 = arith.constant 0 : index
    %51 = vector.load %arg2[%c5, %c0_44, %c0_45] : memref<9x36x121xbf16, #tpu.memory_space<vmem>>, vector<1x36x121xbf16>
    %52 = vector.shape_cast %51 : vector<1x36x121xbf16> to vector<36x121xbf16>
    %cst_46 = arith.constant dense<0.000000e+00> : vector<36x64xf32>
    %53 = tpu.matmul %52, %9, %cst_46 {dimension_numbers = #tpu.dot_dimension_numbers<[1], [0], [0], [1], [0, 0, 1, 1], [], []>} : vector<36x121xbf16>, vector<121x64xbf16>, vector<36x64xf32> -> vector<36x64xf32>
    %54 = arith.truncf %53 : vector<36x64xf32> to vector<36x64xbf16>
    %c5_47 = arith.constant 5 : index
    %c0_48 = arith.constant 0 : index
    %c0_49 = arith.constant 0 : index
    %55 = vector.load %arg5[%c5_47, %c0_48, %c0_49] : memref<9x64x64xbf16, #tpu.memory_space<vmem>>, vector<1x64x64xbf16>
    %56 = vector.shape_cast %55 : vector<1x64x64xbf16> to vector<64x64xbf16>
    %cst_50 = arith.constant dense<0.000000e+00> : vector<36x64xf32>
    %57 = tpu.matmul %54, %56, %cst_50 {dimension_numbers = #tpu.dot_dimension_numbers<[1], [0], [0], [1], [0, 0, 1, 1], [], []>} : vector<36x64xbf16>, vector<64x64xbf16>, vector<36x64xf32> -> vector<36x64xf32>
    %58 = arith.addf %50, %57 : vector<36x64xf32>
    %c6 = arith.constant 6 : index
    %c0_51 = arith.constant 0 : index
    %c0_52 = arith.constant 0 : index
    %59 = vector.load %arg2[%c6, %c0_51, %c0_52] : memref<9x36x121xbf16, #tpu.memory_space<vmem>>, vector<1x36x121xbf16>
    %60 = vector.shape_cast %59 : vector<1x36x121xbf16> to vector<36x121xbf16>
    %cst_53 = arith.constant dense<0.000000e+00> : vector<36x64xf32>
    %61 = tpu.matmul %60, %9, %cst_53 {dimension_numbers = #tpu.dot_dimension_numbers<[1], [0], [0], [1], [0, 0, 1, 1], [], []>} : vector<36x121xbf16>, vector<121x64xbf16>, vector<36x64xf32> -> vector<36x64xf32>
    %62 = arith.truncf %61 : vector<36x64xf32> to vector<36x64xbf16>
    %c6_54 = arith.constant 6 : index
    %c0_55 = arith.constant 0 : index
    %c0_56 = arith.constant 0 : index
    %63 = vector.load %arg5[%c6_54, %c0_55, %c0_56] : memref<9x64x64xbf16, #tpu.memory_space<vmem>>, vector<1x64x64xbf16>
    %64 = vector.shape_cast %63 : vector<1x64x64xbf16> to vector<64x64xbf16>
    %cst_57 = arith.constant dense<0.000000e+00> : vector<36x64xf32>
    %65 = tpu.matmul %62, %64, %cst_57 {dimension_numbers = #tpu.dot_dimension_numbers<[1], [0], [0], [1], [0, 0, 1, 1], [], []>} : vector<36x64xbf16>, vector<64x64xbf16>, vector<36x64xf32> -> vector<36x64xf32>
    %66 = arith.addf %58, %65 : vector<36x64xf32>
    %c7 = arith.constant 7 : index
    %c0_58 = arith.constant 0 : index
    %c0_59 = arith.constant 0 : index
    %67 = vector.load %arg2[%c7, %c0_58, %c0_59] : memref<9x36x121xbf16, #tpu.memory_space<vmem>>, vector<1x36x121xbf16>
    %68 = vector.shape_cast %67 : vector<1x36x121xbf16> to vector<36x121xbf16>
    %cst_60 = arith.constant dense<0.000000e+00> : vector<36x64xf32>
    %69 = tpu.matmul %68, %9, %cst_60 {dimension_numbers = #tpu.dot_dimension_numbers<[1], [0], [0], [1], [0, 0, 1, 1], [], []>} : vector<36x121xbf16>, vector<121x64xbf16>, vector<36x64xf32> -> vector<36x64xf32>
    %70 = arith.truncf %69 : vector<36x64xf32> to vector<36x64xbf16>
    %c7_61 = arith.constant 7 : index
    %c0_62 = arith.constant 0 : index
    %c0_63 = arith.constant 0 : index
    %71 = vector.load %arg5[%c7_61, %c0_62, %c0_63] : memref<9x64x64xbf16, #tpu.memory_space<vmem>>, vector<1x64x64xbf16>
    %72 = vector.shape_cast %71 : vector<1x64x64xbf16> to vector<64x64xbf16>
    %cst_64 = arith.constant dense<0.000000e+00> : vector<36x64xf32>
    %73 = tpu.matmul %70, %72, %cst_64 {dimension_numbers = #tpu.dot_dimension_numbers<[1], [0], [0], [1], [0, 0, 1, 1], [], []>} : vector<36x64xbf16>, vector<64x64xbf16>, vector<36x64xf32> -> vector<36x64xf32>
    %74 = arith.addf %66, %73 : vector<36x64xf32>
    %c8 = arith.constant 8 : index
    %c0_65 = arith.constant 0 : index
    %c0_66 = arith.constant 0 : index
    %75 = vector.load %arg2[%c8, %c0_65, %c0_66] : memref<9x36x121xbf16, #tpu.memory_space<vmem>>, vector<1x36x121xbf16>
    %76 = vector.shape_cast %75 : vector<1x36x121xbf16> to vector<36x121xbf16>
    %cst_67 = arith.constant dense<0.000000e+00> : vector<36x64xf32>
    %77 = tpu.matmul %76, %9, %cst_67 {dimension_numbers = #tpu.dot_dimension_numbers<[1], [0], [0], [1], [0, 0, 1, 1], [], []>} : vector<36x121xbf16>, vector<121x64xbf16>, vector<36x64xf32> -> vector<36x64xf32>
    %78 = arith.truncf %77 : vector<36x64xf32> to vector<36x64xbf16>
    %c8_68 = arith.constant 8 : index
    %c0_69 = arith.constant 0 : index
    %c0_70 = arith.constant 0 : index
    %79 = vector.load %arg5[%c8_68, %c0_69, %c0_70] : memref<9x64x64xbf16, #tpu.memory_space<vmem>>, vector<1x64x64xbf16>
    %80 = vector.shape_cast %79 : vector<1x64x64xbf16> to vector<64x64xbf16>
    %cst_71 = arith.constant dense<0.000000e+00> : vector<36x64xf32>
    %81 = tpu.matmul %78, %80, %cst_71 {dimension_numbers = #tpu.dot_dimension_numbers<[1], [0], [0], [1], [0, 0, 1, 1], [], []>} : vector<36x64xbf16>, vector<64x64xbf16>, vector<36x64xf32> -> vector<36x64xf32>
    %82 = arith.addf %74, %81 : vector<36x64xf32>
    %c0_72 = arith.constant 0 : index
    %c0_73 = arith.constant 0 : index
    %83 = vector.load %arg6[%c0_72, %c0_73] : memref<1x64xf32, #tpu.memory_space<vmem>>, vector<1x64xf32>
    %84 = vector.broadcast %83 : vector<1x64xf32> to vector<36x64xf32>
    %85 = arith.addf %82, %84 : vector<36x64xf32>
    %cst_74 = arith.constant 0.000000e+00 : f32
    %86 = vector.broadcast %cst_74 : f32 to vector<36x64xf32>
    %87 = arith.maximumf %85, %86 : vector<36x64xf32>
    %88 = arith.truncf %87 : vector<36x64xf32> to vector<36x64xbf16>
    %c4_75 = arith.constant 4 : index
    %c0_76 = arith.constant 0 : index
    %c0_77 = arith.constant 0 : index
    %89 = vector.load %arg2[%c4_75, %c0_76, %c0_77] : memref<9x36x121xbf16, #tpu.memory_space<vmem>>, vector<1x36x121xbf16>
    %90 = vector.shape_cast %89 : vector<1x36x121xbf16> to vector<36x121xbf16>
    %cst_78 = arith.constant dense<0.000000e+00> : vector<36x256xf32>
    %91 = tpu.matmul %90, %1, %cst_78 {dimension_numbers = #tpu.dot_dimension_numbers<[1], [0], [0], [1], [0, 0, 1, 1], [], []>} : vector<36x121xbf16>, vector<121x256xbf16>, vector<36x256xf32> -> vector<36x256xf32>
    %92 = arith.truncf %91 : vector<36x256xf32> to vector<36x256xbf16>
    %c0_79 = arith.constant 0 : index
    %c0_80 = arith.constant 0 : index
    %93 = vector.load %arg7[%c0_79, %c0_80] : memref<64x256xbf16, #tpu.memory_space<vmem>>, vector<64x256xbf16>
    %cst_81 = arith.constant dense<0.000000e+00> : vector<36x256xf32>
    %94 = tpu.matmul %88, %93, %cst_81 {dimension_numbers = #tpu.dot_dimension_numbers<[1], [0], [0], [1], [0, 0, 1, 1], [], []>} : vector<36x64xbf16>, vector<64x256xbf16>, vector<36x256xf32> -> vector<36x256xf32>
    %c0_82 = arith.constant 0 : index
    %c0_83 = arith.constant 0 : index
    %95 = vector.load %arg8[%c0_82, %c0_83] : memref<1x256xf32, #tpu.memory_space<vmem>>, vector<1x256xf32>
    %96 = vector.broadcast %95 : vector<1x256xf32> to vector<36x256xf32>
    %97 = arith.addf %94, %96 : vector<36x256xf32>
    %cst_84 = arith.constant 0.000000e+00 : f32
    %98 = vector.broadcast %cst_84 : f32 to vector<36x256xf32>
    %99 = arith.maximumf %97, %98 : vector<36x256xf32>
    %c0_85 = arith.constant 0 : index
    %c0_86 = arith.constant 0 : index
    %100 = vector.load %arg9[%c0_85, %c0_86] : memref<256x256xbf16, #tpu.memory_space<vmem>>, vector<256x256xbf16>
    %cst_87 = arith.constant dense<0.000000e+00> : vector<36x256xf32>
    %101 = tpu.matmul %92, %100, %cst_87 {dimension_numbers = #tpu.dot_dimension_numbers<[1], [0], [0], [1], [0, 0, 1, 1], [], []>} : vector<36x256xbf16>, vector<256x256xbf16>, vector<36x256xf32> -> vector<36x256xf32>
    %c0_88 = arith.constant 0 : index
    %c0_89 = arith.constant 0 : index
    %102 = vector.load %arg10[%c0_88, %c0_89] : memref<1x256xf32, #tpu.memory_space<vmem>>, vector<1x256xf32>
    %103 = vector.broadcast %102 : vector<1x256xf32> to vector<36x256xf32>
    %104 = arith.addf %101, %103 : vector<36x256xf32>
    %105 = arith.addf %99, %104 : vector<36x256xf32>
    %cst_90 = arith.constant 0.000000e+00 : f32
    %106 = vector.broadcast %cst_90 : f32 to vector<36x256xf32>
    %107 = arith.maximumf %105, %106 : vector<36x256xf32>
    %108 = arith.truncf %107 : vector<36x256xf32> to vector<36x256xbf16>
    %c0_91 = arith.constant 0 : index
    %c0_92 = arith.constant 0 : index
    %c0_93 = arith.constant 0 : index
    %109 = vector.load %arg11[%c0_91, %c0_92, %c0_93] : memref<1x36x256xbf16, #tpu.memory_space<vmem>>, vector<1x36x256xbf16>
    %110 = vector.shape_cast %109 : vector<1x36x256xbf16> to vector<36x256xbf16>
    %111 = vector.shape_cast %108 : vector<36x256xbf16> to vector<1x36x256xbf16>
    tpu.vector_store %arg11[%c0_91, %c0_92, %c0_93], %111 {strides = array<i32>} : memref<1x36x256xbf16, #tpu.memory_space<vmem>>, vector<1x36x256xbf16>,
    return
  }
  func.func @transform_0(%arg0: i32) -> (i32, i32, i32) {
    %c0_i32 = arith.constant 0 : i32
    %c0_i32_0 = arith.constant 0 : i32
    %c0_i32_1 = arith.constant 0 : i32
    return %arg0, %c0_i32, %c0_i32_0 : i32, i32, i32
  }
  func.func @transform_1(%arg0: i32) -> (i32, i32, i32) {
    %c0_i32 = arith.constant 0 : i32
    %c0_i32_0 = arith.constant 0 : i32
    %c0_i32_1 = arith.constant 0 : i32
    %c0_i32_2 = arith.constant 0 : i32
    return %c0_i32, %c0_i32_0, %c0_i32_1 : i32, i32, i32
  }
  func.func @transform_2(%arg0: i32) -> (i32, i32) {
    %c0_i32 = arith.constant 0 : i32
    %c0_i32_0 = arith.constant 0 : i32
    %c0_i32_1 = arith.constant 0 : i32
    return %c0_i32, %c0_i32_0 : i32, i32
  }
  func.func @transform_3(%arg0: i32) -> (i32, i32) {
    %c0_i32 = arith.constant 0 : i32
    %c0_i32_0 = arith.constant 0 : i32
    %c0_i32_1 = arith.constant 0 : i32
    return %c0_i32, %c0_i32_0 : i32, i32
  }
  func.func @transform_4(%arg0: i32) -> (i32, i32, i32) {
    %c0_i32 = arith.constant 0 : i32
    %c0_i32_0 = arith.constant 0 : i32
    %c0_i32_1 = arith.constant 0 : i32
    %c0_i32_2 = arith.constant 0 : i32
    return %c0_i32, %c0_i32_0, %c0_i32_1 : i32, i32, i32
  }
  func.func @transform_5(%arg0: i32) -> (i32, i32) {
    %c0_i32 = arith.constant 0 : i32
    %c0_i32_0 = arith.constant 0 : i32
    %c0_i32_1 = arith.constant 0 : i32
    return %c0_i32, %c0_i32_0 : i32, i32
  }
  func.func @transform_6(%arg0: i32) -> (i32, i32) {
    %c0_i32 = arith.constant 0 : i32
    %c0_i32_0 = arith.constant 0 : i32
    %c0_i32_1 = arith.constant 0 : i32
    return %c0_i32, %c0_i32_0 : i32, i32
  }
  func.func @transform_7(%arg0: i32) -> (i32, i32) {
    %c0_i32 = arith.constant 0 : i32
    %c0_i32_0 = arith.constant 0 : i32
    %c0_i32_1 = arith.constant 0 : i32
    return %c0_i32, %c0_i32_0 : i32, i32
  }
  func.func @transform_8(%arg0: i32) -> (i32, i32) {
    %c0_i32 = arith.constant 0 : i32
    %c0_i32_0 = arith.constant 0 : i32
    %c0_i32_1 = arith.constant 0 : i32
    return %c0_i32, %c0_i32_0 : i32, i32
  }
  func.func @transform_9(%arg0: i32) -> (i32, i32) {
    %c0_i32 = arith.constant 0 : i32
    %c0_i32_0 = arith.constant 0 : i32
    %c0_i32_1 = arith.constant 0 : i32
    return %c0_i32, %c0_i32_0 : i32, i32
  }
  func.func @transform_10(%arg0: i32) -> (i32, i32, i32) {
    %c0_i32 = arith.constant 0 : i32
    %c0_i32_0 = arith.constant 0 : i32
    %c0_i32_1 = arith.constant 0 : i32
    return %arg0, %c0_i32, %c0_i32_0 : i32, i32, i32
  }
}

module attributes {stable_mosaic.version = 11 : i64} {
  func.func @kernel(%arg0: i32, %arg1: memref<1x121x64xbf16, #tpu.memory_space<vmem>>, %arg2: memref<9x121x121xbf16, #tpu.memory_space<vmem>>, %arg3: memref<64x64xbf16, #tpu.memory_space<vmem>>, %arg4: memref<1x64xf32, #tpu.memory_space<vmem>>, %arg5: memref<64x64xbf16, #tpu.memory_space<vmem>>, %arg6: memref<1x64xf32, #tpu.memory_space<vmem>>, %arg7: memref<9x64x64xbf16, #tpu.memory_space<vmem>>, %arg8: memref<1x64xf32, #tpu.memory_space<vmem>>, %arg9: memref<64x256xbf16, #tpu.memory_space<vmem>>, %arg10: memref<1x256xf32, #tpu.memory_space<vmem>>, %arg11: memref<64x256xbf16, #tpu.memory_space<vmem>>, %arg12: memref<1x256xf32, #tpu.memory_space<vmem>>, %arg13: memref<1x121x256xbf16, #tpu.memory_space<vmem>>) attributes {dimension_semantics = [#tpu.dimension_semantics<parallel>], iteration_bounds = array<i64: 2>, scalar_prefetch = 0 : i64, scratch_operands = 0 : i64, tpu.core_type = #tpu.core_type<tc>, window_params = [{transform_indices = @transform_0, window_bounds = array<i64: 1, 121, 64>}, {pipeline_mode = #tpu.pipeline_mode<synchronous>, transform_indices = @transform_1, window_bounds = array<i64: 9, 121, 121>}, {pipeline_mode = #tpu.pipeline_mode<synchronous>, transform_indices = @transform_2, window_bounds = array<i64: 64, 64>}, {pipeline_mode = #tpu.pipeline_mode<synchronous>, transform_indices = @transform_3, window_bounds = array<i64: 1, 64>}, {pipeline_mode = #tpu.pipeline_mode<synchronous>, transform_indices = @transform_4, window_bounds = array<i64: 64, 64>}, {pipeline_mode = #tpu.pipeline_mode<synchronous>, transform_indices = @transform_5, window_bounds = array<i64: 1, 64>}, {pipeline_mode = #tpu.pipeline_mode<synchronous>, transform_indices = @transform_6, window_bounds = array<i64: 9, 64, 64>}, {pipeline_mode = #tpu.pipeline_mode<synchronous>, transform_indices = @transform_7, window_bounds = array<i64: 1, 64>}, {pipeline_mode = #tpu.pipeline_mode<synchronous>, transform_indices = @transform_8, window_bounds = array<i64: 64, 256>}, {pipeline_mode = #tpu.pipeline_mode<synchronous>, transform_indices = @transform_9, window_bounds = array<i64: 1, 256>}, {pipeline_mode = #tpu.pipeline_mode<synchronous>, transform_indices = @transform_10, window_bounds = array<i64: 64, 256>}, {pipeline_mode = #tpu.pipeline_mode<synchronous>, transform_indices = @transform_11, window_bounds = array<i64: 1, 256>}, {transform_indices = @transform_12, window_bounds = array<i64: 1, 121, 256>}]} {
    %c0 = arith.constant 0 : index
    %c0_0 = arith.constant 0 : index
    %c0_1 = arith.constant 0 : index
    %0 = vector.load %arg1[%c0, %c0_0, %c0_1] : memref<1x121x64xbf16, #tpu.memory_space<vmem>>, vector<1x121x64xbf16>
    %1 = vector.shape_cast %0 : vector<1x121x64xbf16> to vector<121x64xbf16>
    %c0_2 = arith.constant 0 : index
    %c0_3 = arith.constant 0 : index
    %2 = vector.load %arg3[%c0_2, %c0_3] : memref<64x64xbf16, #tpu.memory_space<vmem>>, vector<64x64xbf16>
    %cst = arith.constant dense<0.000000e+00> : vector<121x64xf32>
    %3 = tpu.matmul %1, %2, %cst {dimension_numbers = #tpu.dot_dimension_numbers<[1], [0], [0], [1], [0, 0, 1, 1], [], []>} : vector<121x64xbf16>, vector<64x64xbf16>, vector<121x64xf32> -> vector<121x64xf32>
    %c0_4 = arith.constant 0 : index
    %c0_5 = arith.constant 0 : index
    %4 = vector.load %arg4[%c0_4, %c0_5] : memref<1x64xf32, #tpu.memory_space<vmem>>, vector<1x64xf32>
    %5 = vector.broadcast %4 : vector<1x64xf32> to vector<121x64xf32>
    %6 = arith.addf %3, %5 : vector<121x64xf32>
    %cst_6 = arith.constant 0.000000e+00 : f32
    %7 = vector.broadcast %cst_6 : f32 to vector<121x64xf32>
    %8 = arith.maximumf %6, %7 : vector<121x64xf32>
    %9 = arith.truncf %8 : vector<121x64xf32> to vector<121x64xbf16>
    %c0_7 = arith.constant 0 : index
    %c0_8 = arith.constant 0 : index
    %10 = vector.load %arg5[%c0_7, %c0_8] : memref<64x64xbf16, #tpu.memory_space<vmem>>, vector<64x64xbf16>
    %cst_9 = arith.constant dense<0.000000e+00> : vector<121x64xf32>
    %11 = tpu.matmul %9, %10, %cst_9 {dimension_numbers = #tpu.dot_dimension_numbers<[1], [0], [0], [1], [0, 0, 1, 1], [], []>} : vector<121x64xbf16>, vector<64x64xbf16>, vector<121x64xf32> -> vector<121x64xf32>
    %c0_10 = arith.constant 0 : index
    %c0_11 = arith.constant 0 : index
    %12 = vector.load %arg6[%c0_10, %c0_11] : memref<1x64xf32, #tpu.memory_space<vmem>>, vector<1x64xf32>
    %13 = vector.broadcast %12 : vector<1x64xf32> to vector<121x64xf32>
    %14 = arith.addf %11, %13 : vector<121x64xf32>
    %cst_12 = arith.constant 0.000000e+00 : f32
    %15 = vector.broadcast %cst_12 : f32 to vector<121x64xf32>
    %16 = arith.maximumf %14, %15 : vector<121x64xf32>
    %17 = arith.truncf %16 : vector<121x64xf32> to vector<121x64xbf16>
    %cst_13 = arith.constant 0.000000e+00 : f32
    %18 = vector.broadcast %cst_13 : f32 to vector<121x64xf32>
    %c0_14 = arith.constant 0 : index
    %c0_15 = arith.constant 0 : index
    %c0_16 = arith.constant 0 : index
    %19 = vector.load %arg2[%c0_14, %c0_15, %c0_16] : memref<9x121x121xbf16, #tpu.memory_space<vmem>>, vector<1x121x121xbf16>
    %20 = vector.shape_cast %19 : vector<1x121x121xbf16> to vector<121x121xbf16>
    %cst_17 = arith.constant dense<0.000000e+00> : vector<121x64xf32>
    %21 = tpu.matmul %20, %17, %cst_17 {dimension_numbers = #tpu.dot_dimension_numbers<[1], [0], [0], [1], [0, 0, 1, 1], [], []>} : vector<121x121xbf16>, vector<121x64xbf16>, vector<121x64xf32> -> vector<121x64xf32>
    %22 = arith.truncf %21 : vector<121x64xf32> to vector<121x64xbf16>
    %c0_18 = arith.constant 0 : index
    %c0_19 = arith.constant 0 : index
    %c0_20 = arith.constant 0 : index
    %23 = vector.load %arg7[%c0_18, %c0_19, %c0_20] : memref<9x64x64xbf16, #tpu.memory_space<vmem>>, vector<1x64x64xbf16>
    %24 = vector.shape_cast %23 : vector<1x64x64xbf16> to vector<64x64xbf16>
    %cst_21 = arith.constant dense<0.000000e+00> : vector<121x64xf32>
    %25 = tpu.matmul %22, %24, %cst_21 {dimension_numbers = #tpu.dot_dimension_numbers<[1], [0], [0], [1], [0, 0, 1, 1], [], []>} : vector<121x64xbf16>, vector<64x64xbf16>, vector<121x64xf32> -> vector<121x64xf32>
    %26 = arith.addf %18, %25 : vector<121x64xf32>
    %c1 = arith.constant 1 : index
    %c0_22 = arith.constant 0 : index
    %c0_23 = arith.constant 0 : index
    %27 = vector.load %arg2[%c1, %c0_22, %c0_23] : memref<9x121x121xbf16, #tpu.memory_space<vmem>>, vector<1x121x121xbf16>
    %28 = vector.shape_cast %27 : vector<1x121x121xbf16> to vector<121x121xbf16>
    %cst_24 = arith.constant dense<0.000000e+00> : vector<121x64xf32>
    %29 = tpu.matmul %28, %17, %cst_24 {dimension_numbers = #tpu.dot_dimension_numbers<[1], [0], [0], [1], [0, 0, 1, 1], [], []>} : vector<121x121xbf16>, vector<121x64xbf16>, vector<121x64xf32> -> vector<121x64xf32>
    %30 = arith.truncf %29 : vector<121x64xf32> to vector<121x64xbf16>
    %c1_25 = arith.constant 1 : index
    %c0_26 = arith.constant 0 : index
    %c0_27 = arith.constant 0 : index
    %31 = vector.load %arg7[%c1_25, %c0_26, %c0_27] : memref<9x64x64xbf16, #tpu.memory_space<vmem>>, vector<1x64x64xbf16>
    %32 = vector.shape_cast %31 : vector<1x64x64xbf16> to vector<64x64xbf16>
    %cst_28 = arith.constant dense<0.000000e+00> : vector<121x64xf32>
    %33 = tpu.matmul %30, %32, %cst_28 {dimension_numbers = #tpu.dot_dimension_numbers<[1], [0], [0], [1], [0, 0, 1, 1], [], []>} : vector<121x64xbf16>, vector<64x64xbf16>, vector<121x64xf32> -> vector<121x64xf32>
    %34 = arith.addf %26, %33 : vector<121x64xf32>
    %c2 = arith.constant 2 : index
    %c0_29 = arith.constant 0 : index
    %c0_30 = arith.constant 0 : index
    %35 = vector.load %arg2[%c2, %c0_29, %c0_30] : memref<9x121x121xbf16, #tpu.memory_space<vmem>>, vector<1x121x121xbf16>
    %36 = vector.shape_cast %35 : vector<1x121x121xbf16> to vector<121x121xbf16>
    %cst_31 = arith.constant dense<0.000000e+00> : vector<121x64xf32>
    %37 = tpu.matmul %36, %17, %cst_31 {dimension_numbers = #tpu.dot_dimension_numbers<[1], [0], [0], [1], [0, 0, 1, 1], [], []>} : vector<121x121xbf16>, vector<121x64xbf16>, vector<121x64xf32> -> vector<121x64xf32>
    %38 = arith.truncf %37 : vector<121x64xf32> to vector<121x64xbf16>
    %c2_32 = arith.constant 2 : index
    %c0_33 = arith.constant 0 : index
    %c0_34 = arith.constant 0 : index
    %39 = vector.load %arg7[%c2_32, %c0_33, %c0_34] : memref<9x64x64xbf16, #tpu.memory_space<vmem>>, vector<1x64x64xbf16>
    %40 = vector.shape_cast %39 : vector<1x64x64xbf16> to vector<64x64xbf16>
    %cst_35 = arith.constant dense<0.000000e+00> : vector<121x64xf32>
    %41 = tpu.matmul %38, %40, %cst_35 {dimension_numbers = #tpu.dot_dimension_numbers<[1], [0], [0], [1], [0, 0, 1, 1], [], []>} : vector<121x64xbf16>, vector<64x64xbf16>, vector<121x64xf32> -> vector<121x64xf32>
    %42 = arith.addf %34, %41 : vector<121x64xf32>
    %c3 = arith.constant 3 : index
    %c0_36 = arith.constant 0 : index
    %c0_37 = arith.constant 0 : index
    %43 = vector.load %arg2[%c3, %c0_36, %c0_37] : memref<9x121x121xbf16, #tpu.memory_space<vmem>>, vector<1x121x121xbf16>
    %44 = vector.shape_cast %43 : vector<1x121x121xbf16> to vector<121x121xbf16>
    %cst_38 = arith.constant dense<0.000000e+00> : vector<121x64xf32>
    %45 = tpu.matmul %44, %17, %cst_38 {dimension_numbers = #tpu.dot_dimension_numbers<[1], [0], [0], [1], [0, 0, 1, 1], [], []>} : vector<121x121xbf16>, vector<121x64xbf16>, vector<121x64xf32> -> vector<121x64xf32>
    %46 = arith.truncf %45 : vector<121x64xf32> to vector<121x64xbf16>
    %c3_39 = arith.constant 3 : index
    %c0_40 = arith.constant 0 : index
    %c0_41 = arith.constant 0 : index
    %47 = vector.load %arg7[%c3_39, %c0_40, %c0_41] : memref<9x64x64xbf16, #tpu.memory_space<vmem>>, vector<1x64x64xbf16>
    %48 = vector.shape_cast %47 : vector<1x64x64xbf16> to vector<64x64xbf16>
    %cst_42 = arith.constant dense<0.000000e+00> : vector<121x64xf32>
    %49 = tpu.matmul %46, %48, %cst_42 {dimension_numbers = #tpu.dot_dimension_numbers<[1], [0], [0], [1], [0, 0, 1, 1], [], []>} : vector<121x64xbf16>, vector<64x64xbf16>, vector<121x64xf32> -> vector<121x64xf32>
    %50 = arith.addf %42, %49 : vector<121x64xf32>
    %c4 = arith.constant 4 : index
    %c0_43 = arith.constant 0 : index
    %c0_44 = arith.constant 0 : index
    %51 = vector.load %arg7[%c4, %c0_43, %c0_44] : memref<9x64x64xbf16, #tpu.memory_space<vmem>>, vector<1x64x64xbf16>
    %52 = vector.shape_cast %51 : vector<1x64x64xbf16> to vector<64x64xbf16>
    %cst_45 = arith.constant dense<0.000000e+00> : vector<121x64xf32>
    %53 = tpu.matmul %17, %52, %cst_45 {dimension_numbers = #tpu.dot_dimension_numbers<[1], [0], [0], [1], [0, 0, 1, 1], [], []>} : vector<121x64xbf16>, vector<64x64xbf16>, vector<121x64xf32> -> vector<121x64xf32>
    %54 = arith.addf %50, %53 : vector<121x64xf32>
    %c5 = arith.constant 5 : index
    %c0_46 = arith.constant 0 : index
    %c0_47 = arith.constant 0 : index
    %55 = vector.load %arg2[%c5, %c0_46, %c0_47] : memref<9x121x121xbf16, #tpu.memory_space<vmem>>, vector<1x121x121xbf16>
    %56 = vector.shape_cast %55 : vector<1x121x121xbf16> to vector<121x121xbf16>
    %cst_48 = arith.constant dense<0.000000e+00> : vector<121x64xf32>
    %57 = tpu.matmul %56, %17, %cst_48 {dimension_numbers = #tpu.dot_dimension_numbers<[1], [0], [0], [1], [0, 0, 1, 1], [], []>} : vector<121x121xbf16>, vector<121x64xbf16>, vector<121x64xf32> -> vector<121x64xf32>
    %58 = arith.truncf %57 : vector<121x64xf32> to vector<121x64xbf16>
    %c5_49 = arith.constant 5 : index
    %c0_50 = arith.constant 0 : index
    %c0_51 = arith.constant 0 : index
    %59 = vector.load %arg7[%c5_49, %c0_50, %c0_51] : memref<9x64x64xbf16, #tpu.memory_space<vmem>>, vector<1x64x64xbf16>
    %60 = vector.shape_cast %59 : vector<1x64x64xbf16> to vector<64x64xbf16>
    %cst_52 = arith.constant dense<0.000000e+00> : vector<121x64xf32>
    %61 = tpu.matmul %58, %60, %cst_52 {dimension_numbers = #tpu.dot_dimension_numbers<[1], [0], [0], [1], [0, 0, 1, 1], [], []>} : vector<121x64xbf16>, vector<64x64xbf16>, vector<121x64xf32> -> vector<121x64xf32>
    %62 = arith.addf %54, %61 : vector<121x64xf32>
    %c6 = arith.constant 6 : index
    %c0_53 = arith.constant 0 : index
    %c0_54 = arith.constant 0 : index
    %63 = vector.load %arg2[%c6, %c0_53, %c0_54] : memref<9x121x121xbf16, #tpu.memory_space<vmem>>, vector<1x121x121xbf16>
    %64 = vector.shape_cast %63 : vector<1x121x121xbf16> to vector<121x121xbf16>
    %cst_55 = arith.constant dense<0.000000e+00> : vector<121x64xf32>
    %65 = tpu.matmul %64, %17, %cst_55 {dimension_numbers = #tpu.dot_dimension_numbers<[1], [0], [0], [1], [0, 0, 1, 1], [], []>} : vector<121x121xbf16>, vector<121x64xbf16>, vector<121x64xf32> -> vector<121x64xf32>
    %66 = arith.truncf %65 : vector<121x64xf32> to vector<121x64xbf16>
    %c6_56 = arith.constant 6 : index
    %c0_57 = arith.constant 0 : index
    %c0_58 = arith.constant 0 : index
    %67 = vector.load %arg7[%c6_56, %c0_57, %c0_58] : memref<9x64x64xbf16, #tpu.memory_space<vmem>>, vector<1x64x64xbf16>
    %68 = vector.shape_cast %67 : vector<1x64x64xbf16> to vector<64x64xbf16>
    %cst_59 = arith.constant dense<0.000000e+00> : vector<121x64xf32>
    %69 = tpu.matmul %66, %68, %cst_59 {dimension_numbers = #tpu.dot_dimension_numbers<[1], [0], [0], [1], [0, 0, 1, 1], [], []>} : vector<121x64xbf16>, vector<64x64xbf16>, vector<121x64xf32> -> vector<121x64xf32>
    %70 = arith.addf %62, %69 : vector<121x64xf32>
    %c7 = arith.constant 7 : index
    %c0_60 = arith.constant 0 : index
    %c0_61 = arith.constant 0 : index
    %71 = vector.load %arg2[%c7, %c0_60, %c0_61] : memref<9x121x121xbf16, #tpu.memory_space<vmem>>, vector<1x121x121xbf16>
    %72 = vector.shape_cast %71 : vector<1x121x121xbf16> to vector<121x121xbf16>
    %cst_62 = arith.constant dense<0.000000e+00> : vector<121x64xf32>
    %73 = tpu.matmul %72, %17, %cst_62 {dimension_numbers = #tpu.dot_dimension_numbers<[1], [0], [0], [1], [0, 0, 1, 1], [], []>} : vector<121x121xbf16>, vector<121x64xbf16>, vector<121x64xf32> -> vector<121x64xf32>
    %74 = arith.truncf %73 : vector<121x64xf32> to vector<121x64xbf16>
    %c7_63 = arith.constant 7 : index
    %c0_64 = arith.constant 0 : index
    %c0_65 = arith.constant 0 : index
    %75 = vector.load %arg7[%c7_63, %c0_64, %c0_65] : memref<9x64x64xbf16, #tpu.memory_space<vmem>>, vector<1x64x64xbf16>
    %76 = vector.shape_cast %75 : vector<1x64x64xbf16> to vector<64x64xbf16>
    %cst_66 = arith.constant dense<0.000000e+00> : vector<121x64xf32>
    %77 = tpu.matmul %74, %76, %cst_66 {dimension_numbers = #tpu.dot_dimension_numbers<[1], [0], [0], [1], [0, 0, 1, 1], [], []>} : vector<121x64xbf16>, vector<64x64xbf16>, vector<121x64xf32> -> vector<121x64xf32>
    %78 = arith.addf %70, %77 : vector<121x64xf32>
    %c8 = arith.constant 8 : index
    %c0_67 = arith.constant 0 : index
    %c0_68 = arith.constant 0 : index
    %79 = vector.load %arg2[%c8, %c0_67, %c0_68] : memref<9x121x121xbf16, #tpu.memory_space<vmem>>, vector<1x121x121xbf16>
    %80 = vector.shape_cast %79 : vector<1x121x121xbf16> to vector<121x121xbf16>
    %cst_69 = arith.constant dense<0.000000e+00> : vector<121x64xf32>
    %81 = tpu.matmul %80, %17, %cst_69 {dimension_numbers = #tpu.dot_dimension_numbers<[1], [0], [0], [1], [0, 0, 1, 1], [], []>} : vector<121x121xbf16>, vector<121x64xbf16>, vector<121x64xf32> -> vector<121x64xf32>
    %82 = arith.truncf %81 : vector<121x64xf32> to vector<121x64xbf16>
    %c8_70 = arith.constant 8 : index
    %c0_71 = arith.constant 0 : index
    %c0_72 = arith.constant 0 : index
    %83 = vector.load %arg7[%c8_70, %c0_71, %c0_72] : memref<9x64x64xbf16, #tpu.memory_space<vmem>>, vector<1x64x64xbf16>
    %84 = vector.shape_cast %83 : vector<1x64x64xbf16> to vector<64x64xbf16>
    %cst_73 = arith.constant dense<0.000000e+00> : vector<121x64xf32>
    %85 = tpu.matmul %82, %84, %cst_73 {dimension_numbers = #tpu.dot_dimension_numbers<[1], [0], [0], [1], [0, 0, 1, 1], [], []>} : vector<121x64xbf16>, vector<64x64xbf16>, vector<121x64xf32> -> vector<121x64xf32>
    %86 = arith.addf %78, %85 : vector<121x64xf32>
    %c0_74 = arith.constant 0 : index
    %c0_75 = arith.constant 0 : index
    %87 = vector.load %arg8[%c0_74, %c0_75] : memref<1x64xf32, #tpu.memory_space<vmem>>, vector<1x64xf32>
    %88 = vector.broadcast %87 : vector<1x64xf32> to vector<121x64xf32>
    %89 = arith.addf %86, %88 : vector<121x64xf32>
    %cst_76 = arith.constant 0.000000e+00 : f32
    %90 = vector.broadcast %cst_76 : f32 to vector<121x64xf32>
    %91 = arith.maximumf %89, %90 : vector<121x64xf32>
    %92 = arith.truncf %91 : vector<121x64xf32> to vector<121x64xbf16>
    %c0_77 = arith.constant 0 : index
    %c0_78 = arith.constant 0 : index
    %93 = vector.load %arg9[%c0_77, %c0_78] : memref<64x256xbf16, #tpu.memory_space<vmem>>, vector<64x256xbf16>
    %cst_79 = arith.constant dense<0.000000e+00> : vector<121x256xf32>
    %94 = tpu.matmul %92, %93, %cst_79 {dimension_numbers = #tpu.dot_dimension_numbers<[1], [0], [0], [1], [0, 0, 1, 1], [], []>} : vector<121x64xbf16>, vector<64x256xbf16>, vector<121x256xf32> -> vector<121x256xf32>
    %c0_80 = arith.constant 0 : index
    %c0_81 = arith.constant 0 : index
    %95 = vector.load %arg10[%c0_80, %c0_81] : memref<1x256xf32, #tpu.memory_space<vmem>>, vector<1x256xf32>
    %96 = vector.broadcast %95 : vector<1x256xf32> to vector<121x256xf32>
    %97 = arith.addf %94, %96 : vector<121x256xf32>
    %cst_82 = arith.constant 0.000000e+00 : f32
    %98 = vector.broadcast %cst_82 : f32 to vector<121x256xf32>
    %99 = arith.maximumf %97, %98 : vector<121x256xf32>
    %c0_83 = arith.constant 0 : index
    %c0_84 = arith.constant 0 : index
    %100 = vector.load %arg11[%c0_83, %c0_84] : memref<64x256xbf16, #tpu.memory_space<vmem>>, vector<64x256xbf16>
    %cst_85 = arith.constant dense<0.000000e+00> : vector<121x256xf32>
    %101 = tpu.matmul %9, %100, %cst_85 {dimension_numbers = #tpu.dot_dimension_numbers<[1], [0], [0], [1], [0, 0, 1, 1], [], []>} : vector<121x64xbf16>, vector<64x256xbf16>, vector<121x256xf32> -> vector<121x256xf32>
    %c0_86 = arith.constant 0 : index
    %c0_87 = arith.constant 0 : index
    %102 = vector.load %arg12[%c0_86, %c0_87] : memref<1x256xf32, #tpu.memory_space<vmem>>, vector<1x256xf32>
    %103 = vector.broadcast %102 : vector<1x256xf32> to vector<121x256xf32>
    %104 = arith.addf %101, %103 : vector<121x256xf32>
    %105 = arith.addf %99, %104 : vector<121x256xf32>
    %cst_88 = arith.constant 0.000000e+00 : f32
    %106 = vector.broadcast %cst_88 : f32 to vector<121x256xf32>
    %107 = arith.maximumf %105, %106 : vector<121x256xf32>
    %108 = arith.truncf %107 : vector<121x256xf32> to vector<121x256xbf16>
    %c0_89 = arith.constant 0 : index
    %c0_90 = arith.constant 0 : index
    %c0_91 = arith.constant 0 : index
    %109 = vector.load %arg13[%c0_89, %c0_90, %c0_91] : memref<1x121x256xbf16, #tpu.memory_space<vmem>>, vector<1x121x256xbf16>
    %110 = vector.shape_cast %109 : vector<1x121x256xbf16> to vector<121x256xbf16>
    %111 = vector.shape_cast %108 : vector<121x256xbf16> to vector<1x121x256xbf16>
    tpu.vector_store %arg13[%c0_89, %c0_90, %c0_91], %111 {strides = array<i32>} : memref<1x121x256xbf16, #tpu.memory_space<vmem>>, vector<1x121x256xbf16>,
    return
  }
  func.func @transform_0(%arg0: i32) -> (i32, i32, i32) {
    %c0_i32 = arith.constant 0 : i32
    %c0_i32_0 = arith.constant 0 : i32
    %c0_i32_1 = arith.constant 0 : i32
    return %arg0, %c0_i32, %c0_i32_0 : i32, i32, i32
  }
  func.func @transform_1(%arg0: i32) -> (i32, i32, i32) {
    %c0_i32 = arith.constant 0 : i32
    %c0_i32_0 = arith.constant 0 : i32
    %c0_i32_1 = arith.constant 0 : i32
    %c0_i32_2 = arith.constant 0 : i32
    return %c0_i32, %c0_i32_0, %c0_i32_1 : i32, i32, i32
  }
  func.func @transform_2(%arg0: i32) -> (i32, i32) {
    %c0_i32 = arith.constant 0 : i32
    %c0_i32_0 = arith.constant 0 : i32
    %c0_i32_1 = arith.constant 0 : i32
    return %c0_i32, %c0_i32_0 : i32, i32
  }
  func.func @transform_3(%arg0: i32) -> (i32, i32) {
    %c0_i32 = arith.constant 0 : i32
    %c0_i32_0 = arith.constant 0 : i32
    %c0_i32_1 = arith.constant 0 : i32
    return %c0_i32, %c0_i32_0 : i32, i32
  }
  func.func @transform_4(%arg0: i32) -> (i32, i32) {
    %c0_i32 = arith.constant 0 : i32
    %c0_i32_0 = arith.constant 0 : i32
    %c0_i32_1 = arith.constant 0 : i32
    return %c0_i32, %c0_i32_0 : i32, i32
  }
  func.func @transform_5(%arg0: i32) -> (i32, i32) {
    %c0_i32 = arith.constant 0 : i32
    %c0_i32_0 = arith.constant 0 : i32
    %c0_i32_1 = arith.constant 0 : i32
    return %c0_i32, %c0_i32_0 : i32, i32
  }
  func.func @transform_6(%arg0: i32) -> (i32, i32, i32) {
    %c0_i32 = arith.constant 0 : i32
    %c0_i32_0 = arith.constant 0 : i32
    %c0_i32_1 = arith.constant 0 : i32
    %c0_i32_2 = arith.constant 0 : i32
    return %c0_i32, %c0_i32_0, %c0_i32_1 : i32, i32, i32
  }
  func.func @transform_7(%arg0: i32) -> (i32, i32) {
    %c0_i32 = arith.constant 0 : i32
    %c0_i32_0 = arith.constant 0 : i32
    %c0_i32_1 = arith.constant 0 : i32
    return %c0_i32, %c0_i32_0 : i32, i32
  }
  func.func @transform_8(%arg0: i32) -> (i32, i32) {
    %c0_i32 = arith.constant 0 : i32
    %c0_i32_0 = arith.constant 0 : i32
    %c0_i32_1 = arith.constant 0 : i32
    return %c0_i32, %c0_i32_0 : i32, i32
  }
  func.func @transform_9(%arg0: i32) -> (i32, i32) {
    %c0_i32 = arith.constant 0 : i32
    %c0_i32_0 = arith.constant 0 : i32
    %c0_i32_1 = arith.constant 0 : i32
    return %c0_i32, %c0_i32_0 : i32, i32
  }
  func.func @transform_10(%arg0: i32) -> (i32, i32) {
    %c0_i32 = arith.constant 0 : i32
    %c0_i32_0 = arith.constant 0 : i32
    %c0_i32_1 = arith.constant 0 : i32
    return %c0_i32, %c0_i32_0 : i32, i32
  }
  func.func @transform_11(%arg0: i32) -> (i32, i32) {
    %c0_i32 = arith.constant 0 : i32
    %c0_i32_0 = arith.constant 0 : i32
    %c0_i32_1 = arith.constant 0 : i32
    return %c0_i32, %c0_i32_0 : i32, i32
  }
  func.func @transform_12(%arg0: i32) -> (i32, i32, i32) {
    %c0_i32 = arith.constant 0 : i32
    %c0_i32_0 = arith.constant 0 : i32
    %c0_i32_1 = arith.constant 0 : i32
    return %arg0, %c0_i32, %c0_i32_0 : i32, i32, i32
  }
}

module attributes {stable_mosaic.version = 11 : i64} {
  func.func @kernel(%arg0: i32, %arg1: memref<1x36x256xbf16, #tpu.memory_space<vmem>>, %arg2: memref<9x9x36xbf16, #tpu.memory_space<vmem>>, %arg3: memref<256x128xbf16, #tpu.memory_space<vmem>>, %arg4: memref<1x128xf32, #tpu.memory_space<vmem>>, %arg5: memref<9x128x128xbf16, #tpu.memory_space<vmem>>, %arg6: memref<1x128xf32, #tpu.memory_space<vmem>>, %arg7: memref<128x512xbf16, #tpu.memory_space<vmem>>, %arg8: memref<1x512xf32, #tpu.memory_space<vmem>>, %arg9: memref<256x512xbf16, #tpu.memory_space<vmem>>, %arg10: memref<1x512xf32, #tpu.memory_space<vmem>>, %arg11: memref<512x1024xf32, #tpu.memory_space<vmem>>, %arg12: memref<1x1024xf32, #tpu.memory_space<vmem>>, %arg13: memref<1024x128xf32, #tpu.memory_space<vmem>>, %arg14: memref<1x128xf32, #tpu.memory_space<vmem>>, %arg15: memref<1x1x128xf32, #tpu.memory_space<vmem>>) attributes {dimension_semantics = [#tpu.dimension_semantics<parallel>], iteration_bounds = array<i64: 2>, scalar_prefetch = 0 : i64, scratch_operands = 0 : i64, tpu.core_type = #tpu.core_type<tc>, window_params = [{transform_indices = @transform_0, window_bounds = array<i64: 1, 36, 256>}, {pipeline_mode = #tpu.pipeline_mode<synchronous>, transform_indices = @transform_1, window_bounds = array<i64: 9, 9, 36>}, {pipeline_mode = #tpu.pipeline_mode<synchronous>, transform_indices = @transform_2, window_bounds = array<i64: 256, 128>}, {pipeline_mode = #tpu.pipeline_mode<synchronous>, transform_indices = @transform_3, window_bounds = array<i64: 1, 128>}, {pipeline_mode = #tpu.pipeline_mode<synchronous>, transform_indices = @transform_4, window_bounds = array<i64: 9, 128, 128>}, {pipeline_mode = #tpu.pipeline_mode<synchronous>, transform_indices = @transform_5, window_bounds = array<i64: 1, 128>}, {pipeline_mode = #tpu.pipeline_mode<synchronous>, transform_indices = @transform_6, window_bounds = array<i64: 128, 512>}, {pipeline_mode = #tpu.pipeline_mode<synchronous>, transform_indices = @transform_7, window_bounds = array<i64: 1, 512>}, {pipeline_mode = #tpu.pipeline_mode<synchronous>, transform_indices = @transform_8, window_bounds = array<i64: 256, 512>}, {pipeline_mode = #tpu.pipeline_mode<synchronous>, transform_indices = @transform_9, window_bounds = array<i64: 1, 512>}, {pipeline_mode = #tpu.pipeline_mode<synchronous>, transform_indices = @transform_10, window_bounds = array<i64: 512, 1024>}, {pipeline_mode = #tpu.pipeline_mode<synchronous>, transform_indices = @transform_11, window_bounds = array<i64: 1, 1024>}, {pipeline_mode = #tpu.pipeline_mode<synchronous>, transform_indices = @transform_12, window_bounds = array<i64: 1024, 128>}, {pipeline_mode = #tpu.pipeline_mode<synchronous>, transform_indices = @transform_13, window_bounds = array<i64: 1, 128>}, {transform_indices = @transform_14, window_bounds = array<i64: 1, 1, 128>}]} {
    %c0 = arith.constant 0 : index
    %c0_0 = arith.constant 0 : index
    %c0_1 = arith.constant 0 : index
    %0 = vector.load %arg1[%c0, %c0_0, %c0_1] : memref<1x36x256xbf16, #tpu.memory_space<vmem>>, vector<1x36x256xbf16>
    %1 = vector.shape_cast %0 : vector<1x36x256xbf16> to vector<36x256xbf16>
    %c0_2 = arith.constant 0 : index
    %c0_3 = arith.constant 0 : index
    %2 = vector.load %arg3[%c0_2, %c0_3] : memref<256x128xbf16, #tpu.memory_space<vmem>>, vector<256x128xbf16>
    %cst = arith.constant dense<0.000000e+00> : vector<36x128xf32>
    %3 = tpu.matmul %1, %2, %cst {dimension_numbers = #tpu.dot_dimension_numbers<[1], [0], [0], [1], [0, 0, 1, 1], [], []>} : vector<36x256xbf16>, vector<256x128xbf16>, vector<36x128xf32> -> vector<36x128xf32>
    %c0_4 = arith.constant 0 : index
    %c0_5 = arith.constant 0 : index
    %4 = vector.load %arg4[%c0_4, %c0_5] : memref<1x128xf32, #tpu.memory_space<vmem>>, vector<1x128xf32>
    %5 = vector.broadcast %4 : vector<1x128xf32> to vector<36x128xf32>
    %6 = arith.addf %3, %5 : vector<36x128xf32>
    %cst_6 = arith.constant 0.000000e+00 : f32
    %7 = vector.broadcast %cst_6 : f32 to vector<36x128xf32>
    %8 = arith.maximumf %6, %7 : vector<36x128xf32>
    %9 = arith.truncf %8 : vector<36x128xf32> to vector<36x128xbf16>
    %cst_7 = arith.constant 0.000000e+00 : f32
    %10 = vector.broadcast %cst_7 : f32 to vector<9x128xf32>
    %c0_8 = arith.constant 0 : index
    %c0_9 = arith.constant 0 : index
    %c0_10 = arith.constant 0 : index
    %11 = vector.load %arg2[%c0_8, %c0_9, %c0_10] : memref<9x9x36xbf16, #tpu.memory_space<vmem>>, vector<1x9x36xbf16>
    %12 = vector.shape_cast %11 : vector<1x9x36xbf16> to vector<9x36xbf16>
    %cst_11 = arith.constant dense<0.000000e+00> : vector<9x128xf32>
    %13 = tpu.matmul %12, %9, %cst_11 {dimension_numbers = #tpu.dot_dimension_numbers<[1], [0], [0], [1], [0, 0, 1, 1], [], []>} : vector<9x36xbf16>, vector<36x128xbf16>, vector<9x128xf32> -> vector<9x128xf32>
    %14 = arith.truncf %13 : vector<9x128xf32> to vector<9x128xbf16>
    %c0_12 = arith.constant 0 : index
    %c0_13 = arith.constant 0 : index
    %c0_14 = arith.constant 0 : index
    %15 = vector.load %arg5[%c0_12, %c0_13, %c0_14] : memref<9x128x128xbf16, #tpu.memory_space<vmem>>, vector<1x128x128xbf16>
    %16 = vector.shape_cast %15 : vector<1x128x128xbf16> to vector<128x128xbf16>
    %cst_15 = arith.constant dense<0.000000e+00> : vector<9x128xf32>
    %17 = tpu.matmul %14, %16, %cst_15 {dimension_numbers = #tpu.dot_dimension_numbers<[1], [0], [0], [1], [0, 0, 1, 1], [], []>} : vector<9x128xbf16>, vector<128x128xbf16>, vector<9x128xf32> -> vector<9x128xf32>
    %18 = arith.addf %10, %17 : vector<9x128xf32>
    %c1 = arith.constant 1 : index
    %c0_16 = arith.constant 0 : index
    %c0_17 = arith.constant 0 : index
    %19 = vector.load %arg2[%c1, %c0_16, %c0_17] : memref<9x9x36xbf16, #tpu.memory_space<vmem>>, vector<1x9x36xbf16>
    %20 = vector.shape_cast %19 : vector<1x9x36xbf16> to vector<9x36xbf16>
    %cst_18 = arith.constant dense<0.000000e+00> : vector<9x128xf32>
    %21 = tpu.matmul %20, %9, %cst_18 {dimension_numbers = #tpu.dot_dimension_numbers<[1], [0], [0], [1], [0, 0, 1, 1], [], []>} : vector<9x36xbf16>, vector<36x128xbf16>, vector<9x128xf32> -> vector<9x128xf32>
    %22 = arith.truncf %21 : vector<9x128xf32> to vector<9x128xbf16>
    %c1_19 = arith.constant 1 : index
    %c0_20 = arith.constant 0 : index
    %c0_21 = arith.constant 0 : index
    %23 = vector.load %arg5[%c1_19, %c0_20, %c0_21] : memref<9x128x128xbf16, #tpu.memory_space<vmem>>, vector<1x128x128xbf16>
    %24 = vector.shape_cast %23 : vector<1x128x128xbf16> to vector<128x128xbf16>
    %cst_22 = arith.constant dense<0.000000e+00> : vector<9x128xf32>
    %25 = tpu.matmul %22, %24, %cst_22 {dimension_numbers = #tpu.dot_dimension_numbers<[1], [0], [0], [1], [0, 0, 1, 1], [], []>} : vector<9x128xbf16>, vector<128x128xbf16>, vector<9x128xf32> -> vector<9x128xf32>
    %26 = arith.addf %18, %25 : vector<9x128xf32>
    %c2 = arith.constant 2 : index
    %c0_23 = arith.constant 0 : index
    %c0_24 = arith.constant 0 : index
    %27 = vector.load %arg2[%c2, %c0_23, %c0_24] : memref<9x9x36xbf16, #tpu.memory_space<vmem>>, vector<1x9x36xbf16>
    %28 = vector.shape_cast %27 : vector<1x9x36xbf16> to vector<9x36xbf16>
    %cst_25 = arith.constant dense<0.000000e+00> : vector<9x128xf32>
    %29 = tpu.matmul %28, %9, %cst_25 {dimension_numbers = #tpu.dot_dimension_numbers<[1], [0], [0], [1], [0, 0, 1, 1], [], []>} : vector<9x36xbf16>, vector<36x128xbf16>, vector<9x128xf32> -> vector<9x128xf32>
    %30 = arith.truncf %29 : vector<9x128xf32> to vector<9x128xbf16>
    %c2_26 = arith.constant 2 : index
    %c0_27 = arith.constant 0 : index
    %c0_28 = arith.constant 0 : index
    %31 = vector.load %arg5[%c2_26, %c0_27, %c0_28] : memref<9x128x128xbf16, #tpu.memory_space<vmem>>, vector<1x128x128xbf16>
    %32 = vector.shape_cast %31 : vector<1x128x128xbf16> to vector<128x128xbf16>
    %cst_29 = arith.constant dense<0.000000e+00> : vector<9x128xf32>
    %33 = tpu.matmul %30, %32, %cst_29 {dimension_numbers = #tpu.dot_dimension_numbers<[1], [0], [0], [1], [0, 0, 1, 1], [], []>} : vector<9x128xbf16>, vector<128x128xbf16>, vector<9x128xf32> -> vector<9x128xf32>
    %34 = arith.addf %26, %33 : vector<9x128xf32>
    %c3 = arith.constant 3 : index
    %c0_30 = arith.constant 0 : index
    %c0_31 = arith.constant 0 : index
    %35 = vector.load %arg2[%c3, %c0_30, %c0_31] : memref<9x9x36xbf16, #tpu.memory_space<vmem>>, vector<1x9x36xbf16>
    %36 = vector.shape_cast %35 : vector<1x9x36xbf16> to vector<9x36xbf16>
    %cst_32 = arith.constant dense<0.000000e+00> : vector<9x128xf32>
    %37 = tpu.matmul %36, %9, %cst_32 {dimension_numbers = #tpu.dot_dimension_numbers<[1], [0], [0], [1], [0, 0, 1, 1], [], []>} : vector<9x36xbf16>, vector<36x128xbf16>, vector<9x128xf32> -> vector<9x128xf32>
    %38 = arith.truncf %37 : vector<9x128xf32> to vector<9x128xbf16>
    %c3_33 = arith.constant 3 : index
    %c0_34 = arith.constant 0 : index
    %c0_35 = arith.constant 0 : index
    %39 = vector.load %arg5[%c3_33, %c0_34, %c0_35] : memref<9x128x128xbf16, #tpu.memory_space<vmem>>, vector<1x128x128xbf16>
    %40 = vector.shape_cast %39 : vector<1x128x128xbf16> to vector<128x128xbf16>
    %cst_36 = arith.constant dense<0.000000e+00> : vector<9x128xf32>
    %41 = tpu.matmul %38, %40, %cst_36 {dimension_numbers = #tpu.dot_dimension_numbers<[1], [0], [0], [1], [0, 0, 1, 1], [], []>} : vector<9x128xbf16>, vector<128x128xbf16>, vector<9x128xf32> -> vector<9x128xf32>
    %42 = arith.addf %34, %41 : vector<9x128xf32>
    %c4 = arith.constant 4 : index
    %c0_37 = arith.constant 0 : index
    %c0_38 = arith.constant 0 : index
    %43 = vector.load %arg2[%c4, %c0_37, %c0_38] : memref<9x9x36xbf16, #tpu.memory_space<vmem>>, vector<1x9x36xbf16>
    %44 = vector.shape_cast %43 : vector<1x9x36xbf16> to vector<9x36xbf16>
    %cst_39 = arith.constant dense<0.000000e+00> : vector<9x128xf32>
    %45 = tpu.matmul %44, %9, %cst_39 {dimension_numbers = #tpu.dot_dimension_numbers<[1], [0], [0], [1], [0, 0, 1, 1], [], []>} : vector<9x36xbf16>, vector<36x128xbf16>, vector<9x128xf32> -> vector<9x128xf32>
    %46 = arith.truncf %45 : vector<9x128xf32> to vector<9x128xbf16>
    %c4_40 = arith.constant 4 : index
    %c0_41 = arith.constant 0 : index
    %c0_42 = arith.constant 0 : index
    %47 = vector.load %arg5[%c4_40, %c0_41, %c0_42] : memref<9x128x128xbf16, #tpu.memory_space<vmem>>, vector<1x128x128xbf16>
    %48 = vector.shape_cast %47 : vector<1x128x128xbf16> to vector<128x128xbf16>
    %cst_43 = arith.constant dense<0.000000e+00> : vector<9x128xf32>
    %49 = tpu.matmul %46, %48, %cst_43 {dimension_numbers = #tpu.dot_dimension_numbers<[1], [0], [0], [1], [0, 0, 1, 1], [], []>} : vector<9x128xbf16>, vector<128x128xbf16>, vector<9x128xf32> -> vector<9x128xf32>
    %50 = arith.addf %42, %49 : vector<9x128xf32>
    %c5 = arith.constant 5 : index
    %c0_44 = arith.constant 0 : index
    %c0_45 = arith.constant 0 : index
    %51 = vector.load %arg2[%c5, %c0_44, %c0_45] : memref<9x9x36xbf16, #tpu.memory_space<vmem>>, vector<1x9x36xbf16>
    %52 = vector.shape_cast %51 : vector<1x9x36xbf16> to vector<9x36xbf16>
    %cst_46 = arith.constant dense<0.000000e+00> : vector<9x128xf32>
    %53 = tpu.matmul %52, %9, %cst_46 {dimension_numbers = #tpu.dot_dimension_numbers<[1], [0], [0], [1], [0, 0, 1, 1], [], []>} : vector<9x36xbf16>, vector<36x128xbf16>, vector<9x128xf32> -> vector<9x128xf32>
    %54 = arith.truncf %53 : vector<9x128xf32> to vector<9x128xbf16>
    %c5_47 = arith.constant 5 : index
    %c0_48 = arith.constant 0 : index
    %c0_49 = arith.constant 0 : index
    %55 = vector.load %arg5[%c5_47, %c0_48, %c0_49] : memref<9x128x128xbf16, #tpu.memory_space<vmem>>, vector<1x128x128xbf16>
    %56 = vector.shape_cast %55 : vector<1x128x128xbf16> to vector<128x128xbf16>
    %cst_50 = arith.constant dense<0.000000e+00> : vector<9x128xf32>
    %57 = tpu.matmul %54, %56, %cst_50 {dimension_numbers = #tpu.dot_dimension_numbers<[1], [0], [0], [1], [0, 0, 1, 1], [], []>} : vector<9x128xbf16>, vector<128x128xbf16>, vector<9x128xf32> -> vector<9x128xf32>
    %58 = arith.addf %50, %57 : vector<9x128xf32>
    %c6 = arith.constant 6 : index
    %c0_51 = arith.constant 0 : index
    %c0_52 = arith.constant 0 : index
    %59 = vector.load %arg2[%c6, %c0_51, %c0_52] : memref<9x9x36xbf16, #tpu.memory_space<vmem>>, vector<1x9x36xbf16>
    %60 = vector.shape_cast %59 : vector<1x9x36xbf16> to vector<9x36xbf16>
    %cst_53 = arith.constant dense<0.000000e+00> : vector<9x128xf32>
    %61 = tpu.matmul %60, %9, %cst_53 {dimension_numbers = #tpu.dot_dimension_numbers<[1], [0], [0], [1], [0, 0, 1, 1], [], []>} : vector<9x36xbf16>, vector<36x128xbf16>, vector<9x128xf32> -> vector<9x128xf32>
    %62 = arith.truncf %61 : vector<9x128xf32> to vector<9x128xbf16>
    %c6_54 = arith.constant 6 : index
    %c0_55 = arith.constant 0 : index
    %c0_56 = arith.constant 0 : index
    %63 = vector.load %arg5[%c6_54, %c0_55, %c0_56] : memref<9x128x128xbf16, #tpu.memory_space<vmem>>, vector<1x128x128xbf16>
    %64 = vector.shape_cast %63 : vector<1x128x128xbf16> to vector<128x128xbf16>
    %cst_57 = arith.constant dense<0.000000e+00> : vector<9x128xf32>
    %65 = tpu.matmul %62, %64, %cst_57 {dimension_numbers = #tpu.dot_dimension_numbers<[1], [0], [0], [1], [0, 0, 1, 1], [], []>} : vector<9x128xbf16>, vector<128x128xbf16>, vector<9x128xf32> -> vector<9x128xf32>
    %66 = arith.addf %58, %65 : vector<9x128xf32>
    %c7 = arith.constant 7 : index
    %c0_58 = arith.constant 0 : index
    %c0_59 = arith.constant 0 : index
    %67 = vector.load %arg2[%c7, %c0_58, %c0_59] : memref<9x9x36xbf16, #tpu.memory_space<vmem>>, vector<1x9x36xbf16>
    %68 = vector.shape_cast %67 : vector<1x9x36xbf16> to vector<9x36xbf16>
    %cst_60 = arith.constant dense<0.000000e+00> : vector<9x128xf32>
    %69 = tpu.matmul %68, %9, %cst_60 {dimension_numbers = #tpu.dot_dimension_numbers<[1], [0], [0], [1], [0, 0, 1, 1], [], []>} : vector<9x36xbf16>, vector<36x128xbf16>, vector<9x128xf32> -> vector<9x128xf32>
    %70 = arith.truncf %69 : vector<9x128xf32> to vector<9x128xbf16>
    %c7_61 = arith.constant 7 : index
    %c0_62 = arith.constant 0 : index
    %c0_63 = arith.constant 0 : index
    %71 = vector.load %arg5[%c7_61, %c0_62, %c0_63] : memref<9x128x128xbf16, #tpu.memory_space<vmem>>, vector<1x128x128xbf16>
    %72 = vector.shape_cast %71 : vector<1x128x128xbf16> to vector<128x128xbf16>
    %cst_64 = arith.constant dense<0.000000e+00> : vector<9x128xf32>
    %73 = tpu.matmul %70, %72, %cst_64 {dimension_numbers = #tpu.dot_dimension_numbers<[1], [0], [0], [1], [0, 0, 1, 1], [], []>} : vector<9x128xbf16>, vector<128x128xbf16>, vector<9x128xf32> -> vector<9x128xf32>
    %74 = arith.addf %66, %73 : vector<9x128xf32>
    %c8 = arith.constant 8 : index
    %c0_65 = arith.constant 0 : index
    %c0_66 = arith.constant 0 : index
    %75 = vector.load %arg2[%c8, %c0_65, %c0_66] : memref<9x9x36xbf16, #tpu.memory_space<vmem>>, vector<1x9x36xbf16>
    %76 = vector.shape_cast %75 : vector<1x9x36xbf16> to vector<9x36xbf16>
    %cst_67 = arith.constant dense<0.000000e+00> : vector<9x128xf32>
    %77 = tpu.matmul %76, %9, %cst_67 {dimension_numbers = #tpu.dot_dimension_numbers<[1], [0], [0], [1], [0, 0, 1, 1], [], []>} : vector<9x36xbf16>, vector<36x128xbf16>, vector<9x128xf32> -> vector<9x128xf32>
    %78 = arith.truncf %77 : vector<9x128xf32> to vector<9x128xbf16>
    %c8_68 = arith.constant 8 : index
    %c0_69 = arith.constant 0 : index
    %c0_70 = arith.constant 0 : index
    %79 = vector.load %arg5[%c8_68, %c0_69, %c0_70] : memref<9x128x128xbf16, #tpu.memory_space<vmem>>, vector<1x128x128xbf16>
    %80 = vector.shape_cast %79 : vector<1x128x128xbf16> to vector<128x128xbf16>
    %cst_71 = arith.constant dense<0.000000e+00> : vector<9x128xf32>
    %81 = tpu.matmul %78, %80, %cst_71 {dimension_numbers = #tpu.dot_dimension_numbers<[1], [0], [0], [1], [0, 0, 1, 1], [], []>} : vector<9x128xbf16>, vector<128x128xbf16>, vector<9x128xf32> -> vector<9x128xf32>
    %82 = arith.addf %74, %81 : vector<9x128xf32>
    %c0_72 = arith.constant 0 : index
    %c0_73 = arith.constant 0 : index
    %83 = vector.load %arg6[%c0_72, %c0_73] : memref<1x128xf32, #tpu.memory_space<vmem>>, vector<1x128xf32>
    %84 = vector.broadcast %83 : vector<1x128xf32> to vector<9x128xf32>
    %85 = arith.addf %82, %84 : vector<9x128xf32>
    %cst_74 = arith.constant 0.000000e+00 : f32
    %86 = vector.broadcast %cst_74 : f32 to vector<9x128xf32>
    %87 = arith.maximumf %85, %86 : vector<9x128xf32>
    %88 = arith.truncf %87 : vector<9x128xf32> to vector<9x128xbf16>
    %c4_75 = arith.constant 4 : index
    %c0_76 = arith.constant 0 : index
    %c0_77 = arith.constant 0 : index
    %89 = vector.load %arg2[%c4_75, %c0_76, %c0_77] : memref<9x9x36xbf16, #tpu.memory_space<vmem>>, vector<1x9x36xbf16>
    %90 = vector.shape_cast %89 : vector<1x9x36xbf16> to vector<9x36xbf16>
    %cst_78 = arith.constant dense<0.000000e+00> : vector<9x256xf32>
    %91 = tpu.matmul %90, %1, %cst_78 {dimension_numbers = #tpu.dot_dimension_numbers<[1], [0], [0], [1], [0, 0, 1, 1], [], []>} : vector<9x36xbf16>, vector<36x256xbf16>, vector<9x256xf32> -> vector<9x256xf32>
    %92 = arith.truncf %91 : vector<9x256xf32> to vector<9x256xbf16>
    %c0_79 = arith.constant 0 : index
    %c0_80 = arith.constant 0 : index
    %93 = vector.load %arg7[%c0_79, %c0_80] : memref<128x512xbf16, #tpu.memory_space<vmem>>, vector<128x512xbf16>
    %cst_81 = arith.constant dense<0.000000e+00> : vector<9x512xf32>
    %94 = tpu.matmul %88, %93, %cst_81 {dimension_numbers = #tpu.dot_dimension_numbers<[1], [0], [0], [1], [0, 0, 1, 1], [], []>} : vector<9x128xbf16>, vector<128x512xbf16>, vector<9x512xf32> -> vector<9x512xf32>
    %c0_82 = arith.constant 0 : index
    %c0_83 = arith.constant 0 : index
    %95 = vector.load %arg8[%c0_82, %c0_83] : memref<1x512xf32, #tpu.memory_space<vmem>>, vector<1x512xf32>
    %96 = vector.broadcast %95 : vector<1x512xf32> to vector<9x512xf32>
    %97 = arith.addf %94, %96 : vector<9x512xf32>
    %cst_84 = arith.constant 0.000000e+00 : f32
    %98 = vector.broadcast %cst_84 : f32 to vector<9x512xf32>
    %99 = arith.maximumf %97, %98 : vector<9x512xf32>
    %c0_85 = arith.constant 0 : index
    %c0_86 = arith.constant 0 : index
    %100 = vector.load %arg9[%c0_85, %c0_86] : memref<256x512xbf16, #tpu.memory_space<vmem>>, vector<256x512xbf16>
    %cst_87 = arith.constant dense<0.000000e+00> : vector<9x512xf32>
    %101 = tpu.matmul %92, %100, %cst_87 {dimension_numbers = #tpu.dot_dimension_numbers<[1], [0], [0], [1], [0, 0, 1, 1], [], []>} : vector<9x256xbf16>, vector<256x512xbf16>, vector<9x512xf32> -> vector<9x512xf32>
    %c0_88 = arith.constant 0 : index
    %c0_89 = arith.constant 0 : index
    %102 = vector.load %arg10[%c0_88, %c0_89] : memref<1x512xf32, #tpu.memory_space<vmem>>, vector<1x512xf32>
    %103 = vector.broadcast %102 : vector<1x512xf32> to vector<9x512xf32>
    %104 = arith.addf %101, %103 : vector<9x512xf32>
    %105 = arith.addf %99, %104 : vector<9x512xf32>
    %cst_90 = arith.constant 0.000000e+00 : f32
    %106 = vector.broadcast %cst_90 : f32 to vector<9x512xf32>
    %107 = arith.maximumf %105, %106 : vector<9x512xf32>
    %cst_91 = arith.constant dense<0.000000e+00> : vector<512xf32>
    %108 = vector.multi_reduction <add>, %107, %cst_91 [0] : vector<9x512xf32> to vector<512xf32>
    %109 = vector.shape_cast %108 : vector<512xf32> to vector<1x512xf32>
    %cst_92 = arith.constant 9.000000e+00 : f32
    %110 = vector.broadcast %cst_92 : f32 to vector<1x512xf32>
    %111 = arith.divf %109, %110 : vector<1x512xf32>
    %c0_93 = arith.constant 0 : index
    %c0_94 = arith.constant 0 : index
    %112 = vector.load %arg11[%c0_93, %c0_94] : memref<512x1024xf32, #tpu.memory_space<vmem>>, vector<512x1024xf32>
    %cst_95 = arith.constant dense<0.000000e+00> : vector<1x1024xf32>
    %113 = tpu.matmul %111, %112, %cst_95 {dimension_numbers = #tpu.dot_dimension_numbers<[1], [0], [0], [1], [0, 0, 1, 1], [], []>} : vector<1x512xf32>, vector<512x1024xf32>, vector<1x1024xf32> -> vector<1x1024xf32>
    %c0_96 = arith.constant 0 : index
    %c0_97 = arith.constant 0 : index
    %114 = vector.load %arg12[%c0_96, %c0_97] : memref<1x1024xf32, #tpu.memory_space<vmem>>, vector<1x1024xf32>
    %115 = arith.addf %113, %114 : vector<1x1024xf32>
    %c0_98 = arith.constant 0 : index
    %c0_99 = arith.constant 0 : index
    %116 = vector.load %arg13[%c0_98, %c0_99] : memref<1024x128xf32, #tpu.memory_space<vmem>>, vector<1024x128xf32>
    %cst_100 = arith.constant dense<0.000000e+00> : vector<1x128xf32>
    %117 = tpu.matmul %115, %116, %cst_100 {dimension_numbers = #tpu.dot_dimension_numbers<[1], [0], [0], [1], [0, 0, 1, 1], [], []>} : vector<1x1024xf32>, vector<1024x128xf32>, vector<1x128xf32> -> vector<1x128xf32>
    %c0_101 = arith.constant 0 : index
    %c0_102 = arith.constant 0 : index
    %118 = vector.load %arg14[%c0_101, %c0_102] : memref<1x128xf32, #tpu.memory_space<vmem>>, vector<1x128xf32>
    %119 = arith.addf %117, %118 : vector<1x128xf32>
    %c0_103 = arith.constant 0 : index
    %c0_104 = arith.constant 0 : index
    %c0_105 = arith.constant 0 : index
    %120 = vector.load %arg15[%c0_103, %c0_104, %c0_105] : memref<1x1x128xf32, #tpu.memory_space<vmem>>, vector<1x1x128xf32>
    %121 = vector.shape_cast %120 : vector<1x1x128xf32> to vector<1x128xf32>
    %122 = vector.shape_cast %119 : vector<1x128xf32> to vector<1x1x128xf32>
    tpu.vector_store %arg15[%c0_103, %c0_104, %c0_105], %122 {strides = array<i32>} : memref<1x1x128xf32, #tpu.memory_space<vmem>>, vector<1x1x128xf32>,
    return
  }
  func.func @transform_0(%arg0: i32) -> (i32, i32, i32) {
    %c0_i32 = arith.constant 0 : i32
    %c0_i32_0 = arith.constant 0 : i32
    %c0_i32_1 = arith.constant 0 : i32
    return %arg0, %c0_i32, %c0_i32_0 : i32, i32, i32
  }
  func.func @transform_1(%arg0: i32) -> (i32, i32, i32) {
    %c0_i32 = arith.constant 0 : i32
    %c0_i32_0 = arith.constant 0 : i32
    %c0_i32_1 = arith.constant 0 : i32
    %c0_i32_2 = arith.constant 0 : i32
    return %c0_i32, %c0_i32_0, %c0_i32_1 : i32, i32, i32
  }
  func.func @transform_2(%arg0: i32) -> (i32, i32) {
    %c0_i32 = arith.constant 0 : i32
    %c0_i32_0 = arith.constant 0 : i32
    %c0_i32_1 = arith.constant 0 : i32
    return %c0_i32, %c0_i32_0 : i32, i32
  }
  func.func @transform_3(%arg0: i32) -> (i32, i32) {
    %c0_i32 = arith.constant 0 : i32
    %c0_i32_0 = arith.constant 0 : i32
    %c0_i32_1 = arith.constant 0 : i32
    return %c0_i32, %c0_i32_0 : i32, i32
  }
  func.func @transform_4(%arg0: i32) -> (i32, i32, i32) {
    %c0_i32 = arith.constant 0 : i32
    %c0_i32_0 = arith.constant 0 : i32
    %c0_i32_1 = arith.constant 0 : i32
    %c0_i32_2 = arith.constant 0 : i32
    return %c0_i32, %c0_i32_0, %c0_i32_1 : i32, i32, i32
  }
  func.func @transform_5(%arg0: i32) -> (i32, i32) {
    %c0_i32 = arith.constant 0 : i32
    %c0_i32_0 = arith.constant 0 : i32
    %c0_i32_1 = arith.constant 0 : i32
    return %c0_i32, %c0_i32_0 : i32, i32
  }
  func.func @transform_6(%arg0: i32) -> (i32, i32) {
    %c0_i32 = arith.constant 0 : i32
    %c0_i32_0 = arith.constant 0 : i32
    %c0_i32_1 = arith.constant 0 : i32
    return %c0_i32, %c0_i32_0 : i32, i32
  }
  func.func @transform_7(%arg0: i32) -> (i32, i32) {
    %c0_i32 = arith.constant 0 : i32
    %c0_i32_0 = arith.constant 0 : i32
    %c0_i32_1 = arith.constant 0 : i32
    return %c0_i32, %c0_i32_0 : i32, i32
  }
  func.func @transform_8(%arg0: i32) -> (i32, i32) {
    %c0_i32 = arith.constant 0 : i32
    %c0_i32_0 = arith.constant 0 : i32
    %c0_i32_1 = arith.constant 0 : i32
    return %c0_i32, %c0_i32_0 : i32, i32
  }
  func.func @transform_9(%arg0: i32) -> (i32, i32) {
    %c0_i32 = arith.constant 0 : i32
    %c0_i32_0 = arith.constant 0 : i32
    %c0_i32_1 = arith.constant 0 : i32
    return %c0_i32, %c0_i32_0 : i32, i32
  }
  func.func @transform_10(%arg0: i32) -> (i32, i32) {
    %c0_i32 = arith.constant 0 : i32
    %c0_i32_0 = arith.constant 0 : i32
    %c0_i32_1 = arith.constant 0 : i32
    return %c0_i32, %c0_i32_0 : i32, i32
  }
  func.func @transform_11(%arg0: i32) -> (i32, i32) {
    %c0_i32 = arith.constant 0 : i32
    %c0_i32_0 = arith.constant 0 : i32
    %c0_i32_1 = arith.constant 0 : i32
    return %c0_i32, %c0_i32_0 : i32, i32
  }
  func.func @transform_12(%arg0: i32) -> (i32, i32) {
    %c0_i32 = arith.constant 0 : i32
    %c0_i32_0 = arith.constant 0 : i32
    %c0_i32_1 = arith.constant 0 : i32
    return %c0_i32, %c0_i32_0 : i32, i32
  }
  func.func @transform_13(%arg0: i32) -> (i32, i32) {
    %c0_i32 = arith.constant 0 : i32
    %c0_i32_0 = arith.constant 0 : i32
    %c0_i32_1 = arith.constant 0 : i32
    return %c0_i32, %c0_i32_0 : i32, i32
  }
  func.func @transform_14(%arg0: i32) -> (i32, i32, i32) {
    %c0_i32 = arith.constant 0 : i32
    %c0_i32_0 = arith.constant 0 : i32
    %c0_i32_1 = arith.constant 0 : i32
    return %arg0, %c0_i32, %c0_i32_0 : i32, i32, i32
  }
}

</mosaic_0001>

<bundles_post_ra>
// kernel: _lambda_.4
= control target key start
LH: loop header
LB: loop body
LE: loop exit
PB: predicated region body
PF: predicated region fallthrough
CT: control target
= control target key end

     0   :  { %s3280_s13 = smov 0   ;;  %s4200_s0 = inlined_call_operand.vmem [shape: bf16[2,121,256], index: 0, kind: input, shape index: {}]   ;;  %s4201_s1 = inlined_call_operand.vmem [shape: bf16[9,36,121], index: 1, kind: input, shape index: {}]   ;;  %s4202_s2 = inlined_call_operand.vmem [shape: bf16[256,64], index: 2, kind: input, shape index: {}]   ;;  %s4203_s3 = inlined_call_operand.vmem [shape: f32[1,64], index: 3, kind: input, shape index: {}]   ;;  %s4204_s4 = inlined_call_operand.vmem [shape: bf16[9,64,64], index: 4, kind: input, shape index: {}]   ;;  %s4205_s5 = inlined_call_operand.vmem [shape: f32[1,64], index: 5, kind: input, shape index: {}]   ;;  %s4206_s6 = inlined_call_operand.vmem [shape: bf16[64,256], index: 6, kind: input, shape index: {}]   ;;  %s4207_s7 = inlined_call_operand.vmem [shape: f32[1,256], index: 7, kind: input, shape index: {}]   ;;  %s4208_s8 = inlined_call_operand.vmem [shape: bf16[256,256], index: 8, kind: input, shape index: {}]   ;;  %s4209_s9 = inlined_call_operand.vmem [shape: f32[1,256], index: 9, kind: input, shape index: {}]   ;;  %s4210_s10 = inlined_call_operand.vmem [shape: bf16[2,36,256], index: 10, kind: output, shape index: {}]  }
   0x1 LB: > { %s2393_s14 = sadd.s32 4294967295, %s3222_s13   ;;  %p2397_p0 = scmp.ge.s32.totalorder %s3222_s13, 1  ;;  %s3222_s13 = sphi %s3280_s13, %s20_s13  }
   0x2   : > { %p312_p1 = scmp.lt.s32.totalorder %s3222_s13, 3 }
   0x4   : > { %p313_p2 = pnand %p2397_p0, %p312_p1 }
   0x5   : > { %p350_p3 = scmp.lt.s32.totalorder (!%p313_p2), %s2393_s14, 1 }
   0x6   : > { %316 = sbr.rel (%p313_p2) target bundleno = 1177 (0x499), region = 60 }
   0xb   : > { %v3101_v0 = vld [vmem:[%s4202_s2 + $0x38] sm:$0xff]  ;;  %v3100_v2 = vld [vmem:[%s4202_s2 + $0x30] sm:$0xff]  ;;  %v3099_v4 = vld [vmem:[%s4202_s2 + $0x28] sm:$0xff]  ;;  %s4212_s14 = smov (!%p350_p3, %s2393_s14), 1  ;;  %vm739_vm0 = vcmask 1043456   ;;  %vm740_vm1 = vcmask 1044480  }
   0xc   : > { %v3109_v1 = vld [vmem:[%s4202_s2 + $0x78] sm:$0xff]  ;;  %589 = vmatpush.bf16.msra.mxu0 %v3101_v0  ;;  %v3108_v3 = vld [vmem:[%s4202_s2 + $0x70] sm:$0xff]  ;;  %v3107_v5 = vld [vmem:[%s4202_s2 + $0x68] sm:$0xff]  ;;  %s3077_s21 = sshll.u32 %s4212_s14, 7  ;;  %vm729_vm2 = vcmask 990208   ;;  %vm867_vm3 = vcmask 523264  }
   0xd   : > { %638 = vmatpush.bf16.msra.mxu1 %v3109_v1  ;;  %v3098_v6 = vld [vmem:[%s4202_s2 + $0x20] sm:$0xff]  ;;  %v3097_v8 = vld [vmem:[%s4202_s2 + $0x18] sm:$0xff]  ;;  %v3096_v10 = vld [vmem:[%s4202_s2 + $0x10] sm:$0xff]  ;;  %s3336_s28 = scalar_lea.vmem %s4200_s0, %s3077_s21  ;;  %s3204_s21 = smul.u32 40, %s4212_s14 }
   0xe   : > { %v3106_v7 = vld [vmem:[%s4202_s2 + $0x60] sm:$0xff]  ;;  %v3105_v9 = vld [vmem:[%s4202_s2 + $0x58] sm:$0xff]  ;;  %v3104_v11 = vld [vmem:[%s4202_s2 + $0x50] sm:$0xff] }
   0xf   : > { %v3095_v12 = vld [vmem:[%s4202_s2 + $0x8] sm:$0xff]  ;;  %v3094_v14 = vld [vmem:[%s4202_s2] sm:$0xff]  ;;  %v2411_v22 = vld [vmem:[%s3336_s28 + $0x10] sm:$0xf]  ;;  %s4186_s24 = scalar_lea.vmem %s4210_s10, %s3204_s21 }
  0x10   : > { %590 = vmatpush.bf16.msra.mxu0 %v3100_v2  ;;  %v3103_v13 = vld [vmem:[%s4202_s2 + $0x48] sm:$0xff]  ;;  %v3102_v15 = vld [vmem:[%s4202_s2 + $0x40] sm:$0xff]  ;;  %v3081_v23 = vld [vmem:[%s3336_s28 + $0x14] sm:$0xf0] }
  0x11   : > { %639 = vmatpush.bf16.msra.mxu1 %v3108_v3  ;;  %v2403_v16 = vld [vmem:[%s3336_s28] sm:$0xf]  ;;  %v3079_v17 = vld [vmem:[%s3336_s28 + $0x4] sm:$0xf0]  ;;  %v3078_v18 = vld [vmem:[%s3336_s28 + $0x4] sm:$0xf]  ;;  %v3358_v26 = vor.u32 %v3081_v23, %v2411_v22 }
  0x12   : > { %v2405_v19 = vld [vmem:[%s3336_s28 + $0x8] sm:$0xf0]  ;;  %v3348_v20 = vor.u32 %v3079_v17, %v2403_v16  ;;  %v3080_v24 = vld [vmem:[%s3336_s28 + $0x14] sm:$0xf]  ;;  %v2413_v25 = vld [vmem:[%s3336_s28 + $0x18] sm:$0xf0] }
  0x13   : > { %v3350_v21 = vor.u32 %v3078_v18, %v2405_v19  ;;  %v3360_v27 = vor.u32 %v3080_v24, %v2413_v25  ;;  %v2419_v28 = vld [vmem:[%s3336_s28 + $0x20] sm:$0xf]  ;;  %v3083_v29 = vld [vmem:[%s3336_s28 + $0x24] sm:$0xf0]  ;;  %v3082_v30 = vld [vmem:[%s3336_s28 + $0x24] sm:$0xf] }
  0x14   : > { %591 = vmatpush.bf16.msra.mxu0 %v3099_v4  ;;  %v2421_v31 = vld [vmem:[%s3336_s28 + $0x28] sm:$0xf0]  ;;  %v3368_v32 = vor.u32 %v3083_v29, %v2419_v28  ;;  %v2427_v34 = vld [vmem:[%s3336_s28 + $0x30] sm:$0xf]  ;;  %v3085_v35 = vld [vmem:[%s3336_s28 + $0x34] sm:$0xf0] }
  0x15   : > { %640 = vmatpush.bf16.msra.mxu1 %v3107_v5  ;;  %v3370_v33 = vor.u32 %v3082_v30, %v2421_v31  ;;  %v3084_v36 = vld [vmem:[%s3336_s28 + $0x34] sm:$0xf]  ;;  %v2429_v37 = vld [vmem:[%s3336_s28 + $0x38] sm:$0xf0]  ;;  %v3378_v38 = vor.u32 %v3085_v35, %v2427_v34  ;;  %v2435_v40 = vld [vmem:[%s3336_s28 + $0x40] sm:$0xf] }
  0x16   : > { %v3380_v39 = vor.u32 %v3084_v36, %v2429_v37  ;;  %v3087_v41 = vld [vmem:[%s3336_s28 + $0x44] sm:$0xf0]  ;;  %v3086_v42 = vld [vmem:[%s3336_s28 + $0x44] sm:$0xf]  ;;  %v2437_v43 = vld [vmem:[%s3336_s28 + $0x48] sm:$0xf0] }
  0x17   : > { %v3388_v44 = vor.u32 %v3087_v41, %v2435_v40  ;;  %v3390_v45 = vor.u32 %v3086_v42, %v2437_v43  ;;  %v2443_v46 = vld [vmem:[%s3336_s28 + $0x50] sm:$0xf]  ;;  %v3089_v47 = vld [vmem:[%s3336_s28 + $0x54] sm:$0xf0]  ;;  %v3088_v48 = vld [vmem:[%s3336_s28 + $0x54] sm:$0xf] }
  0x18   : > { %592 = vmatpush.bf16.msra.mxu0 %v3098_v6  ;;  %v2445_v49 = vld [vmem:[%s3336_s28 + $0x58] sm:$0xf0]  ;;  %v3398_v50 = vor.u32 %v3089_v47, %v2443_v46  ;;  %v2451_v52 = vld [vmem:[%s3336_s28 + $0x60] sm:$0xf]  ;;  %v3091_v53 = vld [vmem:[%s3336_s28 + $0x64] sm:$0xf0] }
  0x19   : > { %641 = vmatpush.bf16.msra.mxu1 %v3106_v7  ;;  %v3400_v51 = vor.u32 %v3088_v48, %v2445_v49  ;;  %v3090_v54 = vld [vmem:[%s3336_s28 + $0x64] sm:$0xf]  ;;  %v2453_v55 = vld [vmem:[%s3336_s28 + $0x68] sm:$0xf0]  ;;  %v3408_v56 = vor.u32 %v3091_v53, %v2451_v52  ;;  %v2459_v58 = vld [vmem:[%s3336_s28 + $0x70] sm:$0xf] }
  0x1a   : > { %v3410_v57 = vor.u32 %v3090_v54, %v2453_v55  ;;  %v3093_v59 = vld [vmem:[%s3336_s28 + $0x74] sm:$0x10]  ;;  %v3092_v60 = vld [vmem:[%s3336_s28 + $0x74] sm:$0xf]  ;;  %v2461_v61 = vld [vmem:[%s3336_s28 + $0x78] sm:$0x10] }
  0x1b   : > { %v3418_v62 = vor.u32 %v3093_v59, %v2459_v58  ;;  %v3420_v63 = vor.u32 %v3092_v60, %v2461_v61  ;;  %v3427_v0 = vld [vmem:[%s4203_s3] ss:$0 sm:$0xff]  ;;  %v3224_v61 = vmov 65535  }
  0x1c   : > { %593 = vmatpush.bf16.msra.mxu0 %v3097_v8 }
  0x1d   : > { %642 = vmatpush.bf16.msra.mxu1 %v3105_v9 }
  0x20   : > { %594 = vmatpush.bf16.msra.mxu0 %v3096_v10 }
  0x21   : > { %643 = vmatpush.bf16.msra.mxu1 %v3104_v11 }
  0x24   : > { %595 = vmatpush.bf16.msra.mxu0 %v3095_v12 }
  0x25   : > { %644 = vmatpush.bf16.msra.mxu1 %v3103_v13 }
  0x28   : > { %596 = vmatpush.bf16.msra.mxu0 %v3094_v14 }
  0x29   : > { %645 = vmatpush.bf16.msra.mxu1 %v3102_v15 }
  0x2b   : > { %597 = vmatmul.bf16.vlgmr.msra.gmra.mxu0 %v3348_v20 }
  0x2c   : > { %646 = vmatmul.bf16.vlgmr.msra.gmra.mxu1 %v3350_v21 }
  0x3b   : > { %602 = vmatmul.bf16.gmra.mxu0 %v3358_v26 }
  0x3c   : > { %651 = vmatmul.bf16.gmra.mxu1 %v3360_v27 }
  0x4b   : > { %607 = vmatmul.bf16.gmra.mxu0 %v3368_v32 }
  0x4c   : > { %656 = vmatmul.bf16.gmra.mxu1 %v3370_v33 }
  0x5b   : > { %612 = vmatmul.bf16.gmra.mxu0 %v3378_v38 }
  0x5c   : > { %661 = vmatmul.bf16.gmra.mxu1 %v3380_v39 }
  0x6b   : > { %617 = vmatmul.bf16.gmra.mxu0 %v3388_v44 }
  0x6c   : > { %666 = vmatmul.bf16.gmra.mxu1 %v3390_v45 }
  0x7b   : > { %622 = vmatmul.bf16.gmra.mxu0 %v3398_v50 }
  0x7c   : > { %671 = vmatmul.bf16.gmra.mxu1 %v3400_v51 }
  0x8b   : > { %627 = vmatmul.bf16.gmra.mxu0 %v3408_v56 }
  0x8c   : > { %676 = vmatmul.bf16.gmra.mxu1 %v3410_v57 }
  0x9b   : > { %632 = vmatmul.bf16.gmra.mxu0 %v3418_v62 }
  0x9c   : > { %681 = vmatmul.bf16.gmra.mxu1 %v3420_v63 }
  0xa8   : > { %v598_v1 = vpop.f32.mrf.mxu0 }
  0xa9   : > { %v647_v2 = vpop.f32.mrf.mxu1  ;;  %v599_v3 = vadd.f32 %v3427_v0, %v598_v1  ;;  %v741_v1 = vsel %vm739_vm0, 4294967295, %v3224_v61  ;;  %v3110_v61 = vld [vmem:[%s4201_s1] sm:$0xff] }
  0xab   : > { %v3430_v4 = vadd.f32 %v647_v2, %v599_v3 }
  0xb0   : > { %v3432_v5 = vpop.f32.mrf.mxu0 }
  0xb1   : > { %v3434_v6 = vpop.f32.mrf.mxu1 }
  0xb8   : > { %v603_v7 = vpop.f32.mrf.mxu0 }
  0xb9   : > { %v652_v8 = vpop.f32.mrf.mxu1  ;;  %v604_v9 = vadd.f32 %v3427_v0, %v603_v7 }
  0xbb   : > { %v3437_v10 = vadd.f32 %v652_v8, %v604_v9 }
  0xc0   : > { %v3439_v11 = vpop.f32.mrf.mxu0 }
  0xc1   : > { %v3441_v12 = vpop.f32.mrf.mxu1 }
  0xc8   : > { %v608_v13 = vpop.f32.mrf.mxu0 }
  0xc9   : > { %v657_v14 = vpop.f32.mrf.mxu1  ;;  %v609_v15 = vadd.f32 %v3427_v0, %v608_v13 }
  0xcb   : > { %v3444_v16 = vadd.f32 %v657_v14, %v609_v15  ;;  %v3457_v14 = vsel %vm740_vm1, %v741_v1, 0  ;;  %v3128_v1 = vld [vmem:[%s4201_s1 + $0x3c] sm:$0xff] }
  0xd0   : > { %v610_v17 = vpop.f32.mrf.mxu0 }
  0xd1   : > { %v3446_v18 = vpop.f32.mrf.mxu1 }
  0xd8   : > { %v613_v19 = vpop.f32.mrf.mxu0 }
  0xd9   : > { %v662_v22 = vpop.f32.mrf.mxu1  ;;  %v614_v23 = vadd.f32 %v3427_v0, %v613_v19 }
  0xdb   : > { %v3449_v24 = vadd.f32 %v662_v22, %v614_v23 }
  0xe0   : > { %v615_v25 = vpop.f32.mrf.mxu0 }
  0xe1   : > { %v664_v28 = vpop.f32.mrf.mxu1 }
  0xe8   : > { %v618_v29 = vpop.f32.mrf.mxu0 }
  0xe9   : > { %v667_v30 = vpop.f32.mrf.mxu1  ;;  %v619_v31 = vadd.f32 %v3427_v0, %v618_v29 }
  0xeb   : > { %v668_v34 = vadd.f32 %v667_v30, %v619_v31 }
  0xf0   : > { %v620_v35 = vpop.f32.mrf.mxu0 }
  0xf1   : > { %v669_v36 = vpop.f32.mrf.mxu1  ;;  %v621_v23 = vadd.f32 %v3427_v0, %v620_v35 }
  0xf8   : > { %v623_v37 = vpop.f32.mrf.mxu0 }
  0xf9   : > { %v672_v40 = vpop.f32.mrf.mxu1  ;;  %v624_v15 = vadd.f32 %v3427_v0, %v623_v37  ;;  %v670_v37 = vadd.f32 %v669_v36, %v621_v23 }
 0x100   : > { %v625_v41 = vpop.f32.mrf.mxu0 }
 0x101   : > { %v674_v42 = vpop.f32.mrf.mxu1  ;;  %v626_v7 = vadd.f32 %v3427_v0, %v625_v41  ;;  %v616_v41 = vadd.f32 %v3427_v0, %v615_v25  ;;  %v606_v25 = vadd.f32 %v3427_v0, %v3439_v11 }
 0x103   : > { %v675_v29 = vadd.f32 %v674_v42, %v626_v7  ;;  %v665_v42 = vadd.f32 %v664_v28, %v616_v41  ;;  %v601_v28 = vadd.f32 %v3427_v0, %v3432_v5  ;;  %v3118_v7 = vld [vmem:[%s4204_s4 + $0x20] sm:$0xff] }
 0x104   : > { %v3112_v41 = vld [vmem:[%s4204_s4] sm:$0xff] }
 0x108   : > { %v628_v43 = vpop.f32.mrf.mxu0 }
 0x109   : > { %v677_v46 = vpop.f32.mrf.mxu1  ;;  %v629_v2 = vadd.f32 %v3427_v0, %v628_v43  ;;  %v673_v43 = vadd.f32 %v672_v40, %v624_v15  ;;  %v611_v40 = vadd.f32 %v3427_v0, %v610_v17  ;;  %v693_v17 = vmax.f32 %v3449_v24, 0.0  ;;  %v715_v15 = vld [vmem:[%s4201_s1 + $0x10] sm:$0x3] }
 0x10a   : > { %v650_v24 = vadd.f32 %v3434_v6, %v601_v28  ;;  %v3121_v6 = vld [vmem:[%s4204_s4 + $0x38] sm:$0xff]  ;;  %v725_v23 = vunpack.c.l.b16 %v715_v15  ;;  %v3141_v15 = vld [vmem:[%s4201_s1 + $0x6c] sm:$0xff] }
 0x10b   : > { %v678_v19 = vadd.f32 %v677_v46, %v629_v2  ;;  %v698_v46 = vmax.f32 %v675_v29, 0.0  ;;  %v697_v35 = vmax.f32 %v673_v43, 0.0  ;;  %v660_v36 = vadd.f32 %v3446_v18, %v611_v40  ;;  %v3120_v2 = vld [vmem:[%s4204_s4 + $0x30] sm:$0xff] }
 0x10c   : > { %v691_v18 = vmax.f32 %v3444_v16, 0.0  ;;  %v688_v5 = vmax.f32 %v650_v24, 0.0  ;;  %v687_v16 = vmax.f32 %v3430_v4, 0.0  ;;  %v3116_v4 = vld [vmem:[%s4201_s1 + $0x14] sm:$0xff] }
 0x10d   : > { %v3114_v43 = vld [vmem:[%s4204_s4 + $0x10] sm:$0xff] }
 0x110   : > { %v630_v47 = vpop.f32.mrf.mxu0 }
 0x111   : > { %v679_v48 = vpop.f32.mrf.mxu1  ;;  %v631_v55 = vadd.f32 %v3427_v0, %v630_v47  ;;  %v699_v47 = vmax.f32 %v678_v19, 0.0 }
 0x113   : > { %v680_v8 = vadd.f32 %v679_v48, %v631_v55 }
 0x115   : > { %v700_v30 = vmax.f32 %v680_v8, 0.0  ;;  %v3111_v8 = vld [vmem:[%s4201_s1 + $0x8] sm:$0xff] }
 0x117   : > { %v3468_v48 = vpack.c.bf16 %v700_v30, %v699_v47  ;;  %v728_v30 = vpack.c.b16 %v725_v23, %v725_v23  ;;  %v3113_v47 = vld [vmem:[%s4204_s4 + $0x8] sm:$0xff] }
 0x118   : > { %v633_v49 = vpop.f32.mrf.mxu0 }
 0x119   : > { %v682_v52 = vpop.f32.mrf.mxu1  ;;  %v634_v53 = vadd.f32 %v3427_v0, %v633_v49  ;;  %v696_v49 = vmax.f32 %v670_v37, 0.0 }
 0x11b   : > { %v683_v58 = vadd.f32 %v682_v52, %v634_v53  ;;  %v3474_v52 = vpack.c.bf16 %v698_v46, %v697_v35  ;;  %v695_v53 = vmax.f32 %v668_v34, 0.0  ;;  %v655_v34 = vadd.f32 %v3441_v12, %v606_v25 }
 0x11d   : > { %v701_v9 = vmax.f32 %v683_v58, 0.0  ;;  %v3482_v55 = vpack.c.bf16 %v696_v49, %v695_v53  ;;  %v692_v58 = vmax.f32 %v660_v36, 0.0 }
 0x120   : > { %v635_v54 = vpop.f32.mrf.mxu0 }
 0x121   : > { %v636_v59 = vadd.f32 %v3427_v0, %v635_v54  ;;  %v684_v60 = vpop.f32.mrf.mxu1  ;;  %v694_v54 = vmax.f32 %v665_v42, 0.0  ;;  %v689_v0 = vmax.f32 %v3437_v10, 0.0  ;;  %v3513_v10 = vpack.c.bf16 %v688_v5, %v687_v16  ;;  %v3122_v5 = vld [vmem:[%s4201_s1 + $0x28] sm:$0xff] }
 0x122   : > { %v3129_v16 = vld [vmem:[%s4201_s1 + $0x44] sm:$0xff] }
 0x123   : > { %v685_v3 = vadd.f32 %v684_v60, %v636_v59  ;;  %v3491_v11 = vpack.c.bf16 %v694_v54, %v693_v17  ;;  %v690_v59 = vmax.f32 %v655_v34, 0.0  ;;  %v3498_v60 = vpack.c.bf16 %v692_v58, %v691_v18 }
 0x125   : > { %v702_v13 = vmax.f32 %v685_v3, 0.0  ;;  %v3504_v12 = vpack.c.bf16 %v690_v59, %v689_v0  ;;  %v3119_v3 = vld [vmem:[%s4204_s4 + $0x28] sm:$0xff] }
 0x127   : > { %v710_v22 = vpack.c.bf16 %v702_v13, %v701_v9  ;;  %v3117_v9 = vld [vmem:[%s4201_s1 + $0x1c] sm:$0xff]  ;;  %v2544_v13 = vld [vmem:[%s4201_s1 + $0x24] sm:$0x3] }
 0x128   : > { %v795_v19 = vunpack.c.l.b16 %v2544_v13  ;;  %v3133_v13 = vld [vmem:[%s4204_s4 + $0x78] sm:$0xff] }
 0x129   : > { %v3462_v31 = vand.u32 %v3457_v14, %v710_v22  ;;  %v3115_v22 = vld [vmem:[%s4204_s4 + $0x18] sm:$0xff]  ;;  %1180 = vmatpush.bf16.msrb.mxu1 %v3133_v13 }
 0x12a   : > { %v798_v29 = vpack.c.b16 %v795_v19, %v795_v19 }
 0x12b   : > { %746 = vmatpush.bf16.msra.mxu2 %v3462_v31  ;;  %808 = vmatpush.bf16.msra.mxu3 %v3462_v31 }
 0x12c   : > { %1108 = vmatpush.bf16.msrb.mxu0 %v3462_v31 }
 0x12f   : > { %747 = vmatpush.bf16.msra.mxu2 %v3468_v48  ;;  %809 = vmatpush.bf16.msra.mxu3 %v3468_v48 }
 0x130   : > { %1109 = vmatpush.bf16.msrb.mxu0 %v3468_v48 }
 0x133   : > { %748 = vmatpush.bf16.msra.mxu2 %v3474_v52  ;;  %810 = vmatpush.bf16.msra.mxu3 %v3474_v52 }
 0x134   : > { %1110 = vmatpush.bf16.msrb.mxu0 %v3474_v52 }
 0x137   : > { %749 = vmatpush.bf16.msra.mxu2 %v3482_v55  ;;  %811 = vmatpush.bf16.msra.mxu3 %v3482_v55 }
 0x138   : > { %1111 = vmatpush.bf16.msrb.mxu0 %v3482_v55 }
 0x13b   : > { %750 = vmatpush.bf16.msra.mxu2 %v3491_v11  ;;  %812 = vmatpush.bf16.msra.mxu3 %v3491_v11 }
 0x13c   : > { %1112 = vmatpush.bf16.msrb.mxu0 %v3491_v11 }
 0x13f   : > { %751 = vmatpush.bf16.msra.mxu2 %v3498_v60  ;;  %813 = vmatpush.bf16.msra.mxu3 %v3498_v60 }
 0x140   : > { %1113 = vmatpush.bf16.msrb.mxu0 %v3498_v60 }
 0x143   : > { %752 = vmatpush.bf16.msra.mxu2 %v3504_v12  ;;  %814 = vmatpush.bf16.msra.mxu3 %v3504_v12 }
 0x144   : > { %1114 = vmatpush.bf16.msrb.mxu0 %v3504_v12 }
 0x147   : > { %753 = vmatpush.bf16.msra.mxu2 %v3513_v10  ;;  %815 = vmatpush.bf16.msra.mxu3 %v3513_v10 }
 0x148   : > { %1115 = vmatpush.bf16.msrb.mxu0 %v3513_v10 }
 0x14a   : > { %2537 = vmatmul.msk.bf16.vlgmr.msra.gmra.mxu2 %vm729_vm2, %v3110_v61  ;;  %2553 = vmatmul.msk.bf16.vlgmr.msra.gmra.mxu3 %vm729_vm2, %v3116_v4 }
 0x14b   : > { %881 = vmatpush.bf16.msrb.mxu2 %v3121_v6  ;;  %2658 = vmatmul.msk.bf16.vlgmr.msrb.gmra.mxu0 %vm729_vm2, %v3128_v1  ;;  %v2649_v6 = vld [vmem:[%s4201_s1 + $0x4c] sm:$0x3]  ;;  %v3123_v1 = vld [vmem:[%s4201_s1 + $0x30] sm:$0xff] }
 0x14c   : > { %1356 = vmatpush.bf16.msra.mxu0 %v3462_v31  ;;  %937 = vmatpush.bf16.msrb.mxu3 %v3115_v22  ;;  %v1095_v61 = vunpack.c.l.b16 %v2649_v6 }
 0x14e   : > { %v1098_v4 = vpack.c.b16 %v1095_v61, %v1095_v61 }
 0x14f   : > { %882 = vmatpush.bf16.msrb.mxu2 %v3120_v2  ;;  %v2606_v2 = vld [vmem:[%s4201_s1 + $0x38] sm:$0x3] }
 0x150   : > { %1357 = vmatpush.bf16.msra.mxu0 %v3468_v48  ;;  %938 = vmatpush.bf16.msrb.mxu3 %v3114_v43  ;;  %v3131_v43 = vld [vmem:[%s4204_s4 + $0x68] sm:$0xff] }
 0x153   : > { %883 = vmatpush.bf16.msrb.mxu2 %v3119_v3  ;;  %v971_v3 = vunpack.c.l.b16 %v2606_v2  ;;  %v3137_v2 = vld [vmem:[%s4204_s4 + $0x88] sm:$0xff] }
 0x154   : > { %1358 = vmatpush.bf16.msra.mxu0 %v3474_v52  ;;  %939 = vmatpush.bf16.msrb.mxu3 %v3113_v47 }
 0x157   : > { %884 = vmatpush.bf16.msrb.mxu2 %v3118_v7  ;;  %v1842_v7 = vand.u32 %v3418_v62, %v3457_v14  ;;  %v3647_v62 = vld [vmem:[%s4201_s1 + $0x50] sm:$0xff] }
 0x158   : > { %1359 = vmatpush.bf16.msra.mxu0 %v3482_v55  ;;  %940 = vmatpush.bf16.msrb.mxu3 %v3112_v41 }
 0x15a   : > { %2538 = vmatmul.msk.bf16.gmra.mxu2 %vm729_vm2, %v3111_v8  ;;  %2554 = vmatmul.msk.bf16.gmra.mxu3 %vm729_vm2, %v3117_v9  ;;  %v974_v8 = vpack.c.b16 %v971_v3, %v971_v3  ;;  %v3140_v9 = vld [vmem:[%s4201_s1 + $0x64] sm:$0xff] }
 0x15b   : > { %984 = vmatpush.bf16.msra.mxu2 %v3462_v31  ;;  %2659 = vmatmul.msk.bf16.gmra.mxu0 %vm729_vm2, %v3129_v16 }
 0x15c   : > { %1360 = vmatpush.bf16.msra.mxu0 %v3491_v11 }
 0x15f   : > { %985 = vmatpush.bf16.msra.mxu2 %v3468_v48 }
 0x160   : > { %1361 = vmatpush.bf16.msra.mxu0 %v3498_v60 }
 0x163   : > { %986 = vmatpush.bf16.msra.mxu2 %v3474_v52 }
 0x164   : > { %1362 = vmatpush.bf16.msra.mxu0 %v3504_v12 }
 0x167   : > { %987 = vmatpush.bf16.msra.mxu2 %v3482_v55 }
 0x168   : > { %1363 = vmatpush.bf16.msra.mxu0 %v3513_v10 }
 0x16a   : > { %2555 = vmatmul.msk.bf16.gmra.mxu3 %vm729_vm2, %v798_v29  ;;  %2539 = vmatmul.msk.bf16.gmra.mxu2 %vm729_vm2, %v728_v30  ;;  %v3146_v29 = vld [vmem:[%s4201_s1 + $0x78] sm:$0xff]  ;;  %v3124_v30 = vld [vmem:[%s4204_s4 + $0x40] sm:$0xff] }
 0x16b   : > { %988 = vmatpush.bf16.msra.mxu2 %v3491_v11  ;;  %2660 = vmatmul.msk.bf16.gmra.mxu0 %vm729_vm2, %v1098_v4 }
 0x16c   : > { %1604 = vmatpush.bf16.msrb.mxu0 %v3462_v31 }
 0x16f   : > { %989 = vmatpush.bf16.msra.mxu2 %v3498_v60 }
 0x170   : > { %1605 = vmatpush.bf16.msrb.mxu0 %v3468_v48 }
 0x173   : > { %990 = vmatpush.bf16.msra.mxu2 %v3504_v12 }
 0x174   : > { %1606 = vmatpush.bf16.msrb.mxu0 %v3474_v52 }
 0x177   : > { %991 = vmatpush.bf16.msra.mxu2 %v3513_v10 }
 0x178   : > { %1607 = vmatpush.bf16.msrb.mxu0 %v3482_v55 }
 0x17b   : > { %2744 = vmatmul.msk.bf16.vlgmr.msra.gmra.mxu0 %vm729_vm2, %v3140_v9  ;;  %v3158_v9 = vld [vmem:[%s4201_s1 + $0xa0] sm:$0xff] }
 0x17c   : > { %1608 = vmatpush.bf16.msrb.mxu0 %v3491_v11 }
 0x180   : > { %1609 = vmatpush.bf16.msrb.mxu0 %v3498_v60 }
 0x184   : > { %1610 = vmatpush.bf16.msrb.mxu0 %v3504_v12 }
 0x188   : > { %1611 = vmatpush.bf16.msrb.mxu0 %v3513_v10 }
 0x18b   : > { %2745 = vmatmul.msk.bf16.gmra.mxu0 %vm729_vm2, %v3141_v15  ;;  %v3136_v15 = vld [vmem:[%s4204_s4 + $0x80] sm:$0xff] }
 0x18c   : > { %1847 = vmatpush.bf16.msra.mxu0 %v1842_v7 }
 0x190   : > { %1848 = vmatpush.bf16.msra.mxu0 %v3408_v56  ;;  %v3668_v56 = vld [vmem:[%s4201_s1 + $0x58] sm:$0xff] }
 0x194   : > { %1849 = vmatpush.bf16.msra.mxu0 %v3398_v50 }
 0x198   : > { %1850 = vmatpush.bf16.msra.mxu0 %v3388_v44  ;;  %v2735_v44 = vld [vmem:[%s4201_s1 + $0x74] sm:$0x3] }
 0x199   : > { %v1343_v50 = vunpack.c.l.b16 %v2735_v44 }
 0x19c   : > { %1851 = vmatpush.bf16.msra.mxu0 %v3378_v38  ;;  %v3132_v38 = vld [vmem:[%s4204_s4 + $0x70] sm:$0xff] }
 0x19d   : > { %1181 = vmatpush.bf16.msrb.mxu1 %v3132_v38  ;;  %v3144_v38 = vld [vmem:[%s4204_s4 + $0xb0] sm:$0xff] }
 0x1a0   : > { %1852 = vmatpush.bf16.msra.mxu0 %v3368_v32  ;;  %v3127_v32 = vld [vmem:[%s4204_s4 + $0x58] sm:$0xff] }
 0x1a1   : > { %1056 = vmatpush.bf16.msra.mxu3 %v3127_v32  ;;  %1182 = vmatpush.bf16.msrb.mxu1 %v3131_v43  ;;  %v3145_v32 = vld [vmem:[%s4204_s4 + $0xb8] sm:$0xff]  ;;  %v2864_v43 = vld [vmem:[%s4201_s1 + $0xb0] sm:$0x3] }
 0x1a4   : > { %1853 = vmatpush.bf16.msra.mxu0 %v3358_v26  ;;  %v1346_v26 = vpack.c.b16 %v1343_v50, %v1343_v50 }
 0x1a6   : > { %2746 = vmatmul.msk.bf16.gmra.mxu0 %vm729_vm2, %v1346_v26 }
 0x1a8   : > { %1854 = vmatpush.bf16.msra.mxu0 %v3348_v20  ;;  %v3126_v20 = vld [vmem:[%s4204_s4 + $0x50] sm:$0xff] }
 0x1a9   : > { %1057 = vmatpush.bf16.msra.mxu3 %v3126_v20 }
 0x1cd   : > { %v755_v37 = vpop.f32.mrf.mxu2  ;;  %v817_v46 = vpop.f32.mrf.mxu3 }
 0x1d5   : > { %v757_v35 = vpop.f32.mrf.mxu2  ;;  %v819_v40 = vpop.f32.mrf.mxu3 }
 0x1d6   : > { %v769_v42 = vpack.c.bf16 %v757_v35, %v755_v37  ;;  %v831_v49 = vpack.c.bf16 %v819_v40, %v817_v46  ;;  %v3147_v40 = vld [vmem:[%s4201_s1 + $0x80] sm:$0xff] }
 0x1d8   : > { %2580 = vmatmul.msk.bf16.vlgmr.msrb.gmra.mxu2 %vm867_vm3, %v831_v49  ;;  %2599 = vmatmul.msk.bf16.vlgmr.msrb.gmra.mxu3 %vm867_vm3, %v769_v42  ;;  %v1117_v42 = vpop.f32.mrf.mxu0  ;;  %v3139_v49 = vld [vmem:[%s4204_s4 + $0x98] sm:$0xff] }
 0x1d9   : > { %1232 = vmatpush.bf16.msrb.mxu2 %v3462_v31 }
 0x1dd   : > { %1233 = vmatpush.bf16.msrb.mxu2 %v3468_v48  ;;  %v760_v53 = vpop.f32.mrf.mxu2  ;;  %v822_v25 = vpop.f32.mrf.mxu3 }
 0x1e1   : > { %1234 = vmatpush.bf16.msrb.mxu2 %v3474_v52 }
 0x1e5   : > { %1235 = vmatpush.bf16.msrb.mxu2 %v3482_v55  ;;  %v762_v36 = vpop.f32.mrf.mxu2  ;;  %v824_v54 = vpop.f32.mrf.mxu3 }
 0x1e6   : > { %v770_v17 = vpack.c.bf16 %v762_v36, %v760_v53  ;;  %v832_v28 = vpack.c.bf16 %v824_v54, %v822_v25  ;;  %v3130_v53 = vld [vmem:[%s4204_s4 + $0x60] sm:$0xff]  ;;  %v2821_v25 = vld [vmem:[%s4201_s1 + $0x9c] sm:$0x3] }
 0x1e7   : > { %1183 = vmatpush.bf16.msrb.mxu1 %v3130_v53 }
 0x1e8   : > { %2581 = vmatmul.msk.bf16.gmra.mxu2 %vm867_vm3, %v832_v28  ;;  %2600 = vmatmul.msk.bf16.gmra.mxu3 %vm867_vm3, %v770_v17  ;;  %v1591_v17 = vunpack.c.l.b16 %v2821_v25  ;;  %v3138_v28 = vld [vmem:[%s4204_s4 + $0x90] sm:$0xff] }
 0x1e9   : > { %1236 = vmatpush.bf16.msrb.mxu2 %v3491_v11 }
 0x1eb   : > { %1428 = vmatpush.bf16.msra.mxu1 %v3145_v32 }
 0x1ed   : > { %1237 = vmatpush.bf16.msrb.mxu2 %v3498_v60  ;;  %v827_v34 = vpop.f32.mrf.mxu3  ;;  %v765_v58 = vpop.f32.mrf.mxu2 }
 0x1ee   : > { %v833_v18 = vpack.c.bf16 %v827_v34, %v827_v34  ;;  %v771_v24 = vpack.c.bf16 %v765_v58, %v765_v58  ;;  %v1119_v58 = vpop.f32.mrf.mxu0 }
 0x1ef   : > { %1429 = vmatpush.bf16.msra.mxu1 %v3144_v38  ;;  %v3161_v38 = vld [vmem:[%s4204_s4 + $0x108] sm:$0xff] }
 0x1f1   : > { %1238 = vmatpush.bf16.msrb.mxu2 %v3504_v12 }
 0x1f5   : > { %1239 = vmatpush.bf16.msrb.mxu2 %v3513_v10  ;;  %v829_v59 = vpop.f32.mrf.mxu3  ;;  %v767_v0 = vpop.f32.mrf.mxu2 }
 0x1f6   : > { %v1594_v59 = vpack.c.b16 %v1591_v17, %v1591_v17  ;;  %v1122_v61 = vpop.f32.mrf.mxu0 }
 0x1f8   : > { %2582 = vmatmul.msk.bf16.gmra.mxu2 %vm867_vm3, %v833_v18  ;;  %2601 = vmatmul.msk.bf16.gmra.mxu3 %vm867_vm3, %v771_v24  ;;  %v2778_v18 = vld [vmem:[%s4201_s1 + $0x88] sm:$0x3]  ;;  %v1131_v24 = vpack.c.bf16 %v1119_v58, %v1117_v42 }
 0x1f9   : > { %v1467_v0 = vunpack.c.l.b16 %v2778_v18 }
 0x1fa   : > { %2685 = vmatmul.msk.bf16.vlgmr.msrb.gmra.mxu1 %vm867_vm3, %v1131_v24  ;;  %v3148_v24 = vld [vmem:[%s4204_s4 + $0xc0] sm:$0xff] }
 0x1fb   : > { %v1470_v6 = vpack.c.b16 %v1467_v0, %v1467_v0  ;;  %v3157_v0 = vld [vmem:[%s4204_s4 + $0xf8] sm:$0xff] }
 0x208   : > { %2615 = vmatmul.msk.bf16.vlgmr.msra.gmra.mxu2 %vm729_vm2, %v3122_v5 }
 0x209   : > { %1480 = vmatpush.bf16.msra.mxu2 %v3462_v31 }
 0x20d   : > { %1481 = vmatpush.bf16.msra.mxu2 %v3468_v48 }
 0x211   : > { %1482 = vmatpush.bf16.msra.mxu2 %v3474_v52 }
 0x215   : > { %1483 = vmatpush.bf16.msra.mxu2 %v3482_v55 }
 0x218   : > { %2616 = vmatmul.msk.bf16.gmra.mxu2 %vm729_vm2, %v3123_v1  ;;  %v1124_v1 = vpop.f32.mrf.mxu0 }
 0x219   : > { %1484 = vmatpush.bf16.msra.mxu2 %v3491_v11  ;;  %v1132_v3 = vpack.c.bf16 %v1124_v1, %v1122_v61 }
 0x21b   : > { %2686 = vmatmul.msk.bf16.gmra.mxu1 %vm867_vm3, %v1132_v3  ;;  %v3155_v3 = vld [vmem:[%s4204_s4 + $0xe8] sm:$0xff] }
 0x21d   : > { %1485 = vmatpush.bf16.msra.mxu2 %v3498_v60 }
 0x220   : > { %v1127_v13 = vpop.f32.mrf.mxu0 }
 0x221   : > { %1486 = vmatpush.bf16.msra.mxu2 %v3504_v12  ;;  %v1133_v50 = vpack.c.bf16 %v1127_v13, %v1127_v13  ;;  %v3162_v13 = vld [vmem:[%s4204_s4 + $0x110] sm:$0xff] }
 0x225   : > { %1487 = vmatpush.bf16.msra.mxu2 %v3513_v10 }
 0x228   : > { %2617 = vmatmul.msk.bf16.gmra.mxu2 %vm729_vm2, %v974_v8  ;;  %v1129_v26 = vpop.f32.mrf.mxu0 }
 0x22b   : > { %2687 = vmatmul.msk.bf16.gmra.mxu1 %vm867_vm3, %v1133_v50 }
 0x238   : > { %2701 = vmatmul.msk.bf16.vlgmr.msrb.gmra.mxu2 %vm729_vm2, %v3647_v62 }
 0x239   : > { %1728 = vmatpush.bf16.msrb.mxu2 %v3462_v31  ;;  %v2692_v31 = vld [vmem:[%s4201_s1 + $0x60] sm:$0x3] }
 0x23d   : > { %1729 = vmatpush.bf16.msrb.mxu2 %v3468_v48  ;;  %v1219_v48 = vunpack.c.l.b16 %v2692_v31 }
 0x241   : > { %1730 = vmatpush.bf16.msrb.mxu2 %v3474_v52  ;;  %v3690_v52 = vpack.c.b16 %v1219_v48, %v1219_v48  ;;  %v3159_v48 = vld [vmem:[%s4201_s1 + $0xa8] sm:$0xff] }
 0x245   : > { %1731 = vmatpush.bf16.msrb.mxu2 %v3482_v55  ;;  %v3152_v55 = vld [vmem:[%s4201_s1 + $0x8c] sm:$0xff] }
 0x246   : > { %2830 = vmatmul.msk.bf16.vlgmr.msrb.gmra.mxu0 %vm729_vm2, %v3152_v55  ;;  %v1365_v55 = vpop.f32.mrf.mxu0 }
 0x248   : > { %2702 = vmatmul.msk.bf16.gmra.mxu2 %vm729_vm2, %v3668_v56 }
 0x249   : > { %1732 = vmatpush.bf16.msrb.mxu2 %v3491_v11 }
 0x24d   : > { %1733 = vmatpush.bf16.msrb.mxu2 %v3498_v60 }
 0x251   : > { %1734 = vmatpush.bf16.msrb.mxu2 %v3504_v12  ;;  %v3125_v12 = vld [vmem:[%s4204_s4 + $0x48] sm:$0xff] }
 0x252   : > { %1058 = vmatpush.bf16.msra.mxu3 %v3125_v12  ;;  %v3142_v12 = vld [vmem:[%s4204_s4 + $0xa0] sm:$0xff] }
 0x255   : > { %1735 = vmatpush.bf16.msrb.mxu2 %v3513_v10  ;;  %v3153_v10 = vld [vmem:[%s4201_s1 + $0x94] sm:$0xff] }
 0x256   : > { %2831 = vmatmul.msk.bf16.gmra.mxu0 %vm729_vm2, %v3153_v10  ;;  %1059 = vmatpush.bf16.msra.mxu3 %v3124_v30  ;;  %v1367_v30 = vpop.f32.mrf.mxu0 }
 0x258   : > { %2703 = vmatmul.msk.bf16.gmra.mxu2 %vm729_vm2, %v3690_v52 }
 0x25a   : > { %1304 = vmatpush.bf16.msrb.mxu3 %v3139_v49 }
 0x25b   : > { %v886_v11 = vpop.f32.mrf.mxu2  ;;  %v942_v60 = vpop.f32.mrf.mxu3 }
 0x25c   : > { %v3699_v19 = vadd.f32 %v942_v60, %v886_v11  ;;  %v3151_v11 = vld [vmem:[%s4204_s4 + $0xd8] sm:$0xff]  ;;  %v3143_v60 = vld [vmem:[%s4204_s4 + $0xa8] sm:$0xff] }
 0x25d   : > { %1430 = vmatpush.bf16.msra.mxu1 %v3143_v60 }
 0x25e   : > { %1305 = vmatpush.bf16.msrb.mxu3 %v3138_v28  ;;  %v1370_v53 = vpop.f32.mrf.mxu0 }
 0x261   : > { %1431 = vmatpush.bf16.msra.mxu1 %v3142_v12 }
 0x262   : > { %1306 = vmatpush.bf16.msrb.mxu3 %v3137_v2  ;;  %v3163_v2 = vld [vmem:[%s4204_s4 + $0x118] sm:$0xff] }
 0x263   : > { %v3704_v22 = vpop.f32.mrf.mxu2  ;;  %v3706_v23 = vpop.f32.mrf.mxu3 }
 0x265   : > { %1676 = vmatpush.bf16.msrb.mxu1 %v3157_v0 }
 0x266   : > { %2832 = vmatmul.msk.bf16.gmra.mxu0 %vm729_vm2, %v1594_v59  ;;  %1307 = vmatpush.bf16.msrb.mxu3 %v3136_v15 }
 0x268   : > { %2787 = vmatmul.msk.bf16.vlgmr.msra.gmra.mxu2 %vm729_vm2, %v3146_v29  ;;  %v3150_v29 = vld [vmem:[%s4204_s4 + $0xd0] sm:$0xff] }
 0x26b   : > { %v891_v47 = vpop.f32.mrf.mxu2  ;;  %v947_v41 = vpop.f32.mrf.mxu3 }
 0x26c   : > { %v3722_v37 = vadd.f32 %v947_v41, %v891_v47  ;;  %v1379_v47 = vpack.c.bf16 %v1367_v30, %v1365_v55  ;;  %v1715_v41 = vunpack.c.l.b16 %v2864_v43 }
 0x26e   : > { %2771 = vmatmul.msk.bf16.vlgmr.msra.gmra.mxu1 %vm867_vm3, %v1379_v47  ;;  %v1718_v49 = vpack.c.b16 %v1715_v41, %v1715_v41 }
 0x273   : > { %v3724_v46 = vpop.f32.mrf.mxu2  ;;  %v3726_v35 = vpop.f32.mrf.mxu3 }
 0x276   : > { %2903 = vmatmul.msk.bf16.vlgmr.msra.gmra.mxu0 %vm729_vm2, %v3647_v62 }
 0x278   : > { %2788 = vmatmul.msk.bf16.gmra.mxu2 %vm729_vm2, %v3147_v40 }
 0x27b   : > { %v896_v36 = vpop.f32.mrf.mxu2  ;;  %v952_v54 = vpop.f32.mrf.mxu3 }
 0x27c   : > { %v3744_v34 = vadd.f32 %v952_v54, %v896_v36  ;;  %v1372_v36 = vpop.f32.mrf.mxu0  ;;  %v3149_v54 = vld [vmem:[%s4204_s4 + $0xc8] sm:$0xff] }
 0x27d   : > { %v1380_v17 = vpack.c.bf16 %v1372_v36, %v1370_v53 }
 0x27f   : > { %2772 = vmatmul.msk.bf16.gmra.mxu1 %vm867_vm3, %v1380_v17 }
 0x283   : > { %v898_v5 = vpop.f32.mrf.mxu2  ;;  %v954_v16 = vpop.f32.mrf.mxu3 }
 0x284   : > { %v1375_v18 = vpop.f32.mrf.mxu0 }
 0x285   : > { %v1381_v5 = vpack.c.bf16 %v1375_v18, %v1375_v18 }
 0x286   : > { %2904 = vmatmul.msk.bf16.gmra.mxu0 %vm729_vm2, %v3668_v56 }
 0x288   : > { %2789 = vmatmul.msk.bf16.gmra.mxu2 %vm729_vm2, %v1470_v6  ;;  %v3156_v6 = vld [vmem:[%s4204_s4 + $0xf0] sm:$0xff] }
 0x289   : > { %1677 = vmatpush.bf16.msrb.mxu1 %v3156_v6 }
 0x28b   : > { %v993_v4 = vpop.f32.mrf.mxu2 }
 0x28c   : > { %v1377_v16 = vpop.f32.mrf.mxu0 }
 0x28d   : > { %1678 = vmatpush.bf16.msrb.mxu1 %v3155_v3 }
 0x28f   : > { %2773 = vmatmul.msk.bf16.gmra.mxu1 %vm867_vm3, %v1381_v5 }
 0x293   : > { %v995_v7 = vpop.f32.mrf.mxu2 }
 0x294   : > { %v1007_v8 = vpack.c.bf16 %v995_v7, %v993_v4  ;;  %v1845_v7 = vand.u32 %v3420_v63, %v3457_v14 }
 0x296   : > { %2642 = vmatmul.msk.bf16.vlgmr.msra.gmra.mxu3 %vm867_vm3, %v1007_v8  ;;  %2905 = vmatmul.msk.bf16.gmra.mxu0 %vm729_vm2, %v3690_v52  ;;  %v3154_v8 = vld [vmem:[%s4204_s4 + $0xe0] sm:$0xff] }
 0x297   : > { %1552 = vmatpush.bf16.msra.mxu3 %v3151_v11  ;;  %1679 = vmatpush.bf16.msrb.mxu1 %v3154_v8 }
 0x298   : > { %2873 = vmatmul.msk.bf16.vlgmr.msrb.gmra.mxu2 %vm729_vm2, %v3158_v9 }
 0x29b   : > { %v998_v44 = vpop.f32.mrf.mxu2  ;;  %1553 = vmatpush.bf16.msra.mxu3 %v3150_v29  ;;  %1870 = vmatpush.bf16.msra.mxu1 %v1845_v7 }
 0x29f   : > { %1554 = vmatpush.bf16.msra.mxu3 %v3149_v54  ;;  %1871 = vmatpush.bf16.msra.mxu1 %v3410_v57 }
 0x2a3   : > { %v1000_v20 = vpop.f32.mrf.mxu2  ;;  %1555 = vmatpush.bf16.msra.mxu3 %v3148_v24  ;;  %1872 = vmatpush.bf16.msra.mxu1 %v3400_v51 }
 0x2a4   : > { %v1008_v31 = vpack.c.bf16 %v1000_v20, %v998_v44 }
 0x2a6   : > { %2643 = vmatmul.msk.bf16.gmra.mxu3 %vm867_vm3, %v1008_v31 }
 0x2a7   : > { %1873 = vmatpush.bf16.msra.mxu1 %v3390_v45  ;;  %v3160_v45 = vld [vmem:[%s4204_s4 + $0x100] sm:$0xff] }
 0x2a8   : > { %2874 = vmatmul.msk.bf16.gmra.mxu2 %vm729_vm2, %v3159_v48 }
 0x2ab   : > { %v1003_v10 = vpop.f32.mrf.mxu2  ;;  %1874 = vmatpush.bf16.msra.mxu1 %v3380_v39  ;;  %v1185_v39 = vpop.f32.mrf.mxu1 }
 0x2ac   : > { %v1009_v42 = vpack.c.bf16 %v1003_v10, %v1003_v10 }
 0x2af   : > { %1875 = vmatpush.bf16.msra.mxu1 %v3370_v33 }
 0x2b3   : > { %v1005_v40 = vpop.f32.mrf.mxu2  ;;  %1876 = vmatpush.bf16.msra.mxu1 %v3360_v27  ;;  %v1187_v60 = vpop.f32.mrf.mxu1 }
 0x2b6   : > { %2644 = vmatmul.msk.bf16.gmra.mxu3 %vm867_vm3, %v1009_v42 }
 0x2b7   : > { %1877 = vmatpush.bf16.msra.mxu1 %v3350_v21 }
 0x2b8   : > { %2875 = vmatmul.msk.bf16.gmra.mxu2 %vm729_vm2, %v1718_v49 }
 0x2bb   : > { %v1241_v25 = vpop.f32.mrf.mxu2  ;;  %v1190_v10 = vpop.f32.mrf.mxu1 }
 0x2c3   : > { %v1243_v28 = vpop.f32.mrf.mxu2  ;;  %v1613_v1 = vpop.f32.mrf.mxu0 }
 0x2c4   : > { %v1255_v58 = vpack.c.bf16 %v1243_v28, %v1241_v25  ;;  %v1192_v30 = vpop.f32.mrf.mxu1 }
 0x2c6   : > { %2728 = vmatmul.msk.bf16.vlgmr.msrb.gmra.mxu3 %vm867_vm3, %v1255_v58 }
 0x2c7   : > { %1800 = vmatpush.bf16.msrb.mxu3 %v3163_v2 }
 0x2cb   : > { %v1246_v59 = vpop.f32.mrf.mxu2  ;;  %v1615_v15 = vpop.f32.mrf.mxu0  ;;  %1801 = vmatpush.bf16.msrb.mxu3 %v3162_v13 }
 0x2cc   : > { %v1627_v44 = vpack.c.bf16 %v1615_v15, %v1613_v1  ;;  %v1195_v42 = vpop.f32.mrf.mxu1 }
 0x2ce   : > { %2857 = vmatmul.msk.bf16.vlgmr.msrb.gmra.mxu1 %vm867_vm3, %v1627_v44 }
 0x2cf   : > { %1802 = vmatpush.bf16.msrb.mxu3 %v3161_v38 }
 0x2d3   : > { %v1248_v61 = vpop.f32.mrf.mxu2  ;;  %v1618_v14 = vpop.f32.mrf.mxu0  ;;  %1803 = vmatpush.bf16.msrb.mxu3 %v3160_v45 }
 0x2d4   : > { %v1256_v4 = vpack.c.bf16 %v1248_v61, %v1246_v59  ;;  %v1197_v36 = vpop.f32.mrf.mxu1 }
 0x2d5   : > { %v3187_v36 = vld [vmem:[%s4208_s8 + $0x74] sm:$0xf0] }
 0x2d6   : > { %2729 = vmatmul.msk.bf16.gmra.mxu3 %vm867_vm3, %v1256_v4 }
 0x2db   : > { %v1251_v9 = vpop.f32.mrf.mxu2  ;;  %v1620_v26 = vpop.f32.mrf.mxu0 }
 0x2dc   : > { %v1257_v63 = vpack.c.bf16 %v1251_v9, %v1251_v9  ;;  %v1628_v20 = vpack.c.bf16 %v1620_v26, %v1618_v14  ;;  %v950_v14 = vadd.f32 %v3726_v35, %v3724_v46  ;;  %v3171_v46 = vld [vmem:[%s4206_s6 + $0x34] sm:$0xf0] }
 0x2de   : > { %2858 = vmatmul.msk.bf16.gmra.mxu1 %vm867_vm3, %v1628_v20 }
 0x2e3   : > { %v1253_v50 = vpop.f32.mrf.mxu2  ;;  %v1623_v48 = vpop.f32.mrf.mxu0 }
 0x2e4   : > { %v1629_v55 = vpack.c.bf16 %v1623_v48, %v1623_v48  ;;  %v2935_v48 = vld [vmem:[%s4206_s6 + $0x30] sm:$0xf] }
 0x2e5   : > { %v2936_v35 = vor.u32 %v3171_v46, %v2935_v48  ;;  %v3179_v48 = vld [vmem:[%s4208_s8 + $0x34] sm:$0xf0] }
 0x2e6   : > { %2730 = vmatmul.msk.bf16.gmra.mxu3 %vm867_vm3, %v1257_v63 }
 0x2e7   : > { %1966 = vmatpush.bf16.msra.mxu2 %v2936_v35 }
 0x2eb   : > { %v1489_v32 = vpop.f32.mrf.mxu2  ;;  %v1625_v12 = vpop.f32.mrf.mxu0 }
 0x2ec   : > { %v1433_v58 = vpop.f32.mrf.mxu1 }
 0x2ee   : > { %2859 = vmatmul.msk.bf16.gmra.mxu1 %vm867_vm3, %v1629_v55 }
 0x2f3   : > { %v1491_v57 = vpop.f32.mrf.mxu2 }
 0x2f4   : > { %v1503_v51 = vpack.c.bf16 %v1491_v57, %v1489_v32  ;;  %v1435_v59 = vpop.f32.mrf.mxu1 }
 0x2f6   : > { %2814 = vmatmul.msk.bf16.vlgmr.msra.gmra.mxu3 %vm867_vm3, %v1503_v51 }
 0x2fb   : > { %v1494_v31 = vpop.f32.mrf.mxu2 }
 0x2fc   : > { %v1438_v6 = vpop.f32.mrf.mxu1 }
 0x2fe   : > { %2906 = vmatmul.msk.bf16.vlgmr.msra.gmra.mxu1 %vm729_vm2, %v3647_v62 }
 0x303   : > { %v1496_v33 = vpop.f32.mrf.mxu2 }
 0x304   : > { %v1504_v11 = vpack.c.bf16 %v1496_v33, %v1494_v31  ;;  %v1440_v1 = vpop.f32.mrf.mxu1  ;;  %v3170_v33 = vld [vmem:[%s4206_s6 + $0x34] sm:$0xf] }
 0x306   : > { %2815 = vmatmul.msk.bf16.gmra.mxu3 %vm867_vm3, %v1504_v11  ;;  %v2937_v11 = vld [vmem:[%s4206_s6 + $0x38] sm:$0xf0] }
 0x307   : > { %v2940_v12 = vor.u32 %v3170_v33, %v2937_v11  ;;  %v3037_v11 = vld [vmem:[%s4208_s8 + $0xb0] sm:$0xf] }
 0x309   : > { %1989 = vmatpush.bf16.msra.mxu3 %v2940_v12 }
 0x30b   : > { %v1499_v27 = vpop.f32.mrf.mxu2 }
 0x30c   : > { %v1505_v29 = vpack.c.bf16 %v1499_v27, %v1499_v27  ;;  %v1443_v9 = vpop.f32.mrf.mxu1 }
 0x30e   : > { %2907 = vmatmul.msk.bf16.gmra.mxu1 %vm729_vm2, %v3668_v56 }
 0x313   : > { %v1501_v21 = vpop.f32.mrf.mxu2 }
 0x314   : > { %v1445_v50 = vpop.f32.mrf.mxu1  ;;  %v3169_v21 = vld [vmem:[%s4206_s6 + $0x24] sm:$0xf0] }
 0x315   : > { %v2981_v50 = vld [vmem:[%s4208_s8 + $0x40] sm:$0xf] }
 0x316   : > { %2816 = vmatmul.msk.bf16.gmra.mxu3 %vm867_vm3, %v1505_v29  ;;  %v3168_v29 = vld [vmem:[%s4206_s6 + $0x24] sm:$0xf] }
 0x319   : > { %v1061_v43 = vpop.f32.mrf.mxu3 }
 0x31a   : > { %v1075_v47 = vadd.f32 %v1061_v43, %v3699_v19 }
 0x31b   : > { %v1737_v41 = vpop.f32.mrf.mxu2 }
 0x31c   : > { %v1199_v40 = vadd.f32 %v1185_v39, %v1075_v47  ;;  %v2929_v47 = vld [vmem:[%s4206_s6 + $0x28] sm:$0xf0] }
 0x31e   : > { %2908 = vmatmul.msk.bf16.gmra.mxu1 %vm729_vm2, %v3690_v52  ;;  %v945_v52 = vadd.f32 %v3706_v23, %v3704_v22 }
 0x321   : > { %v1063_v49 = vpop.f32.mrf.mxu3 }
 0x322   : > { %v1076_v7 = vadd.f32 %v1063_v49, %v945_v52 }
 0x323   : > { %v1739_v53 = vpop.f32.mrf.mxu2 }
 0x324   : > { %v1751_v25 = vpack.c.bf16 %v1739_v53, %v1737_v41  ;;  %v1200_v13 = vadd.f32 %v1187_v60, %v1076_v7  ;;  %v2932_v41 = vor.u32 %v3168_v29, %v2929_v47  ;;  %v3183_v7 = vld [vmem:[%s4208_s8 + $0x54] sm:$0xf0]  ;;  %v3193_v47 = vld [vmem:[%s4208_s8 + $0xa4] sm:$0xf0] }
 0x326   : > { %2900 = vmatmul.msk.bf16.vlgmr.msrb.gmra.mxu3 %vm867_vm3, %v1751_v25  ;;  %v3005_v25 = vld [vmem:[%s4208_s8 + $0x70] sm:$0xf] }
 0x327   : > { %1990 = vmatpush.bf16.msra.mxu3 %v2932_v41  ;;  %v1856_v41 = vpop.f32.mrf.mxu0 }
 0x329   : > { %v1066_v62 = vpop.f32.mrf.mxu3 }
 0x32a   : > { %v1077_v54 = vadd.f32 %v1066_v62, %v3722_v37  ;;  %v3006_v62 = vor.u32 %v3187_v36, %v3005_v25 }
 0x32b   : > { %v1742_v17 = vpop.f32.mrf.mxu2 }
 0x32c   : > { %v1201_v28 = vadd.f32 %v1190_v10, %v1077_v54  ;;  %v2927_v10 = vld [vmem:[%s4206_s6 + $0x20] sm:$0xf]  ;;  %2216 = vmatpush.bf16.msrb.mxu0 %v3006_v62 }
 0x32d   : > { %v2928_v43 = vor.u32 %v3169_v21, %v2927_v10  ;;  %v2965_v10 = vld [vmem:[%s4208_s8 + $0x20] sm:$0xf]  ;;  %v3177_v21 = vld [vmem:[%s4208_s8 + $0x24] sm:$0xf0] }
 0x32f   : > { %1967 = vmatpush.bf16.msra.mxu2 %v2928_v43  ;;  %v2966_v43 = vor.u32 %v3177_v21, %v2965_v10  ;;  %v3178_v10 = vld [vmem:[%s4208_s8 + $0x34] sm:$0xf]  ;;  %v2975_v21 = vld [vmem:[%s4208_s8 + $0x38] sm:$0xf0] }
 0x331   : > { %v1068_v19 = vpop.f32.mrf.mxu3 }
 0x332   : > { %v1078_v26 = vadd.f32 %v1068_v19, %v950_v14 }
 0x333   : > { %v1744_v18 = vpop.f32.mrf.mxu2 }
 0x334   : > { %v1752_v24 = vpack.c.bf16 %v1744_v18, %v1742_v17  ;;  %v1202_v57 = vadd.f32 %v1192_v30, %v1078_v26  ;;  %v2919_v17 = vld [vmem:[%s4206_s6 + $0x10] sm:$0xf]  ;;  %v3045_v26 = vld [vmem:[%s4208_s8 + $0xc0] sm:$0xf] }
 0x336   : > { %2901 = vmatmul.msk.bf16.gmra.mxu3 %vm867_vm3, %v1752_v24  ;;  %v3203_v24 = vld [vmem:[%s4208_s8 + $0xf4] sm:$0xf0] }
 0x339   : > { %v1071_v56 = vpop.f32.mrf.mxu3 }
 0x33a   : > { %v1079_v0 = vadd.f32 %v1071_v56, %v3744_v34  ;;  %v2921_v56 = vld [vmem:[%s4206_s6 + $0x18] sm:$0xf0] }
 0x33b   : > { %v1747_v5 = vpop.f32.mrf.mxu2 }
 0x33c   : > { %v1203_v16 = vadd.f32 %v1195_v42, %v1079_v0  ;;  %v1753_v37 = vpack.c.bf16 %v1747_v5, %v1747_v5 }
 0x341   : > { %v1073_v61 = vpop.f32.mrf.mxu3 }
 0x342   : > { %v3061_v61 = vld [vmem:[%s4208_s8 + $0xe0] sm:$0xf] }
 0x343   : > { %v1749_v4 = vpop.f32.mrf.mxu2 }
 0x346   : > { %2902 = vmatmul.msk.bf16.gmra.mxu3 %vm867_vm3, %v1753_v37 }
 0x349   : > { %v1309_v2 = vpop.f32.mrf.mxu3 }
 0x34a   : > { %v1323_v3 = vadd.f32 %v1309_v2, %v1199_v40 }
 0x34b   : > { %v1681_v20 = vpop.f32.mrf.mxu1 }
 0x34c   : > { %v1447_v8 = vadd.f32 %v1433_v58, %v1323_v3  ;;  %v3069_v58 = vld [vmem:[%s4208_s8 + $0xf0] sm:$0xf] }
 0x34d   : > { %v3070_v0 = vor.u32 %v3203_v24, %v3069_v58  ;;  %v2989_v3 = vld [vmem:[%s4208_s8 + $0x50] sm:$0xf] }
 0x34f   : > { %2239 = vmatpush.bf16.msrb.mxu1 %v3070_v0  ;;  %v3186_v0 = vld [vmem:[%s4208_s8 + $0x74] sm:$0xf] }
 0x351   : > { %v1311_v15 = vpop.f32.mrf.mxu3 }
 0x352   : > { %v1324_v34 = vadd.f32 %v1311_v15, %v1200_v13  ;;  %v3053_v13 = vld [vmem:[%s4208_s8 + $0xd0] sm:$0xf]  ;;  %v3199_v15 = vld [vmem:[%s4208_s8 + $0xd4] sm:$0xf0] }
 0x353   : > { %v1683_v45 = vpop.f32.mrf.mxu1 }
 0x354   : > { %v1448_v44 = vadd.f32 %v1435_v59, %v1324_v34  ;;  %v3166_v59 = vld [vmem:[%s4206_s6 + $0x14] sm:$0xf] }
 0x355   : > { %v2924_v5 = vor.u32 %v3166_v59, %v2921_v56  ;;  %v3013_v56 = vld [vmem:[%s4208_s8 + $0x80] sm:$0xf] }
 0x357   : > { %1991 = vmatpush.bf16.msra.mxu3 %v2924_v5  ;;  %v3007_v5 = vld [vmem:[%s4208_s8 + $0x78] sm:$0xf0] }
 0x359   : > { %v1314_v63 = vpop.f32.mrf.mxu3 }
 0x35a   : > { %v1325_v32 = vadd.f32 %v1314_v63, %v1201_v28  ;;  %v3167_v28 = vld [vmem:[%s4206_s6 + $0x14] sm:$0xf0]  ;;  %v3181_v63 = vld [vmem:[%s4208_s8 + $0x44] sm:$0xf0] }
 0x35b   : > { %v1686_v60 = vpop.f32.mrf.mxu1  ;;  %v2920_v18 = vor.u32 %v3167_v28, %v2919_v17  ;;  %v3191_v17 = vld [vmem:[%s4208_s8 + $0x94] sm:$0xf0] }
 0x35c   : > { %v3866_v38 = vadd.f32 %v1438_v6, %v1325_v32  ;;  %v3185_v6 = vld [vmem:[%s4208_s8 + $0x64] sm:$0xf0]  ;;  %v2982_v32 = vor.u32 %v3181_v63, %v2981_v50  ;;  %v3182_v50 = vld [vmem:[%s4208_s8 + $0x54] sm:$0xf] }
 0x35d   : > { %1968 = vmatpush.bf16.msra.mxu2 %v2920_v18  ;;  %v3173_v18 = vld [vmem:[%s4208_s8 + $0x4] sm:$0xf0] }
 0x361   : > { %v1316_v22 = vpop.f32.mrf.mxu3 }
 0x362   : > { %v1326_v23 = vadd.f32 %v1316_v22, %v1202_v57  ;;  %v3165_v57 = vld [vmem:[%s4206_s6 + $0x4] sm:$0xf0] }
 0x363   : > { %v3893_v30 = vpop.f32.mrf.mxu1 }
 0x364   : > { %v3868_v51 = vadd.f32 %v1440_v1, %v1326_v23  ;;  %v3201_v1 = vld [vmem:[%s4208_s8 + $0xe4] sm:$0xf0]  ;;  %v3164_v23 = vld [vmem:[%s4206_s6 + $0x4] sm:$0xf] }
 0x365   : > { %v3062_v2 = vor.u32 %v3201_v1, %v3061_v61  ;;  %v3010_v61 = vor.u32 %v3186_v0, %v3007_v5  ;;  %v2959_v5 = vld [vmem:[%s4208_s8 + $0x18] sm:$0xf0] }
 0x367   : > { %2240 = vmatpush.bf16.msrb.mxu1 %v3062_v2  ;;  %v3184_v2 = vld [vmem:[%s4208_s8 + $0x64] sm:$0xf] }
 0x369   : > { %v1319_v31 = vpop.f32.mrf.mxu3 }
 0x36a   : > { %v1327_v39 = vadd.f32 %v1319_v31, %v1203_v16  ;;  %v2997_v16 = vld [vmem:[%s4208_s8 + $0x60] sm:$0xf]  ;;  %v2913_v31 = vld [vmem:[%s4206_s6 + $0x8] sm:$0xf0] }
 0x36b   : > { %v3900_v53 = vpop.f32.mrf.mxu1  ;;  %v2998_v4 = vor.u32 %v3185_v6, %v2997_v16  ;;  %v2916_v46 = vor.u32 %v3164_v23, %v2913_v31  ;;  %v1858_v16 = vpop.f32.mrf.mxu0  ;;  %v4081_v31 = vld [vmem:[%s4205_s5] ss:$0 sm:$0xff] }
 0x36c   : > { %v3876_v55 = vadd.f32 %v1443_v9, %v1327_v39  ;;  %v2973_v39 = vld [vmem:[%s4208_s8 + $0x30] sm:$0xf]  ;;  %v4047_v1 = vpack.c.bf16 %v1858_v16, %v1856_v41  ;;  %v3194_v41 = vld [vmem:[%s4208_s8 + $0xb4] sm:$0xf]  ;;  %v3023_v16 = vld [vmem:[%s4208_s8 + $0x98] sm:$0xf0] }
 0x36d   : > { %2217 = vmatpush.bf16.msrb.mxu0 %v2998_v4  ;;  %v2974_v35 = vor.u32 %v3179_v48, %v2973_v39  ;;  %1992 = vmatpush.bf16.msra.mxu3 %v2916_v46  ;;  %v3071_v4 = vld [vmem:[%s4208_s8 + $0xf8] sm:$0xf0]  ;;  %v3180_v46 = vld [vmem:[%s4208_s8 + $0x44] sm:$0xf] }
 0x371   : > { %v1321_v27 = vpop.f32.mrf.mxu3 }
 0x373   : > { %v1693_v52 = vpop.f32.mrf.mxu1 }
 0x374   : > { %v2999_v52 = vld [vmem:[%s4208_s8 + $0x68] sm:$0xf0] }
 0x379   : > { %v1557_v40 = vpop.f32.mrf.mxu3 }
 0x37a   : > { %v1571_v42 = vadd.f32 %v1557_v40, %v1447_v8  ;;  %v2990_v8 = vor.u32 %v3183_v7, %v2989_v3 }
 0x37b   : > { %v1879_v25 = vpop.f32.mrf.mxu1 }
 0x37c   : > { %v3898_v49 = vadd.f32 %v1681_v20, %v1571_v42  ;;  %2218 = vmatpush.bf16.msrb.mxu0 %v2990_v8  ;;  %v2911_v20 = vld [vmem:[%s4206_s6] sm:$0xf]  ;;  %v2957_v42 = vld [vmem:[%s4208_s8 + $0x10] sm:$0xf] }
 0x380   : > { %2219 = vmatpush.bf16.msrb.mxu0 %v2982_v32 }
 0x381   : > { %v1559_v54 = vpop.f32.mrf.mxu3 }
 0x382   : > { %v1572_v19 = vadd.f32 %v1559_v54, %v1448_v44  ;;  %v3054_v44 = vor.u32 %v3199_v15, %v3053_v13  ;;  %v3021_v54 = vld [vmem:[%s4208_s8 + $0x90] sm:$0xf]  ;;  %v3002_v13 = vor.u32 %v3184_v2, %v2999_v52  ;;  %v1861_v15 = vpop.f32.mrf.mxu0 }
 0x383   : > { %v3022_v58 = vor.u32 %v3191_v17, %v3021_v54  ;;  %v1881_v7 = vpop.f32.mrf.mxu1 }
 0x384   : > { %v3935_v37 = vadd.f32 %v1683_v45, %v1572_v19  ;;  %2241 = vmatpush.bf16.msrb.mxu1 %v3054_v44  ;;  %v2912_v45 = vor.u32 %v3165_v57, %v2911_v20  ;;  %2220 = vmatpush.bf16.msrb.mxu0 %v2974_v35  ;;  %v2949_v19 = vld [vmem:[%s4208_s8] sm:$0xf]  ;;  %v3063_v44 = vld [vmem:[%s4208_s8 + $0xe8] sm:$0xf0]  ;;  %v3198_v20 = vld [vmem:[%s4208_s8 + $0xd4] sm:$0xf] }
 0x385   : > { %v2950_v59 = vor.u32 %v3173_v18, %v2949_v19  ;;  %v3055_v57 = vld [vmem:[%s4208_s8 + $0xd8] sm:$0xf0]  ;;  %v2983_v35 = vld [vmem:[%s4208_s8 + $0x48] sm:$0xf0]  ;;  %v3192_v19 = vld [vmem:[%s4208_s8 + $0xa4] sm:$0xf] }
 0x386   : > { %1969 = vmatpush.bf16.msra.mxu2 %v2912_v45  ;;  %v3058_v23 = vor.u32 %v3198_v20, %v3055_v57  ;;  %v3031_v18 = vld [vmem:[%s4208_s8 + $0xa8] sm:$0xf0] }
 0x387   : > { %v3034_v0 = vor.u32 %v3192_v19, %v3031_v18 }
 0x388   : > { %2221 = vmatpush.bf16.msrb.mxu0 %v2966_v43 }
 0x389   : > { %v1562_v9 = vpop.f32.mrf.mxu3 }
 0x38a   : > { %v1573_v34 = vadd.f32 %v1562_v9, %v3866_v38  ;;  %v3197_v38 = vld [vmem:[%s4208_s8 + $0xc4] sm:$0xf0]  ;;  %2262 = vmatpush.bf16.msrb.mxu2 %v3010_v61  ;;  %v4055_v9 = vpack.c.bf16 %v1881_v7, %v1879_v25  ;;  %v1863_v39 = vpop.f32.mrf.mxu0  ;;  %v3172_v61 = vld [vmem:[%s4208_s8 + $0x4] sm:$0xf] }
 0x38b   : > { %v3046_v22 = vor.u32 %v3197_v38, %v3045_v26  ;;  %v1884_v63 = vpop.f32.mrf.mxu1  ;;  %v2991_v38 = vld [vmem:[%s4208_s8 + $0x58] sm:$0xf0]  ;;  %v4083_v48 = vpack.c.bf16 %v1863_v39, %v1861_v15  ;;  %v3188_v7 = vld [vmem:[%s4208_s8 + $0x84] sm:$0xf] }
 0x38c   : > { %v3959_v14 = vadd.f32 %v1686_v60, %v1573_v34  ;;  %v3195_v60 = vld [vmem:[%s4208_s8 + $0xb4] sm:$0xf0]  ;;  %v3200_v34 = vld [vmem:[%s4208_s8 + $0xe4] sm:$0xf] }
 0x38d   : > { %2242 = vmatpush.bf16.msrb.mxu1 %v3046_v22  ;;  %v3038_v27 = vor.u32 %v3195_v60, %v3037_v11  ;;  %v3066_v26 = vor.u32 %v3200_v34, %v3063_v44  ;;  %v2994_v22 = vor.u32 %v3182_v50, %v2991_v38  ;;  %v2986_v60 = vor.u32 %v3180_v46, %v2983_v35 }
 0x38e   : > { %2263 = vmatpush.bf16.msrb.mxu2 %v3002_v13 }
 0x391   : > { %v1564_v33 = vpop.f32.mrf.mxu3  ;;  %2243 = vmatpush.bf16.msrb.mxu1 %v3038_v27 }
 0x392   : > { %v1574_v12 = vadd.f32 %v1564_v33, %v3868_v51  ;;  %v3029_v51 = vld [vmem:[%s4208_s8 + $0xa0] sm:$0xf]  ;;  %2264 = vmatpush.bf16.msrb.mxu2 %v2994_v22 }
 0x393   : > { %v3030_v40 = vor.u32 %v3193_v47, %v3029_v51  ;;  %v1886_v33 = vpop.f32.mrf.mxu1 }
 0x394   : > { %v3999_v29 = vadd.f32 %v3893_v30, %v1574_v12  ;;  %v3175_v30 = vld [vmem:[%s4208_s8 + $0x14] sm:$0xf0]  ;;  %v3047_v12 = vld [vmem:[%s4208_s8 + $0xc8] sm:$0xf0]  ;;  %v4097_v27 = vpack.c.bf16 %v1886_v33, %v1884_v63 }
 0x395   : > { %v2958_v36 = vor.u32 %v3175_v30, %v2957_v42  ;;  %2244 = vmatpush.bf16.msrb.mxu1 %v3030_v40  ;;  %v3039_v40 = vld [vmem:[%s4208_s8 + $0xb8] sm:$0xf0]  ;;  %v2978_v42 = vor.u32 %v3178_v10, %v2975_v21 }
 0x396   : > { %2265 = vmatpush.bf16.msrb.mxu2 %v2986_v60  ;;  %v3042_v25 = vor.u32 %v3194_v41, %v3039_v40 }
 0x397   : > { %2222 = vmatpush.bf16.msrb.mxu0 %v2958_v36  ;;  %v2967_v36 = vld [vmem:[%s4208_s8 + $0x28] sm:$0xf0] }
 0x399   : > { %v1567_v62 = vpop.f32.mrf.mxu3  ;;  %2245 = vmatpush.bf16.msrb.mxu1 %v3022_v58 }
 0x39a   : > { %v1575_v28 = vadd.f32 %v1567_v62, %v3876_v55  ;;  %v3189_v55 = vld [vmem:[%s4208_s8 + $0x84] sm:$0xf0]  ;;  %2266 = vmatpush.bf16.msrb.mxu2 %v2978_v42 }
 0x39b   : > { %2223 = vmatpush.bf16.msrb.mxu0 %v2950_v59  ;;  %v3014_v6 = vor.u32 %v3189_v55, %v3013_v56  ;;  %v1866_v59 = vpop.f32.mrf.mxu0  ;;  %v3174_v56 = vld [vmem:[%s4208_s8 + $0x14] sm:$0xf]  ;;  %v1889_v55 = vpop.f32.mrf.mxu1 }
 0x39c   : > { %v4027_v24 = vadd.f32 %v3900_v53, %v1575_v28  ;;  %v3202_v53 = vld [vmem:[%s4208_s8 + $0xf4] sm:$0xf]  ;;  %v1898_v15 = vpack.c.bf16 %v1889_v55, %v1889_v55 }
 0x39d   : > { %v3074_v3 = vor.u32 %v3202_v53, %v3071_v4  ;;  %2246 = vmatpush.bf16.msrb.mxu1 %v3014_v6  ;;  %v3190_v53 = vld [vmem:[%s4208_s8 + $0x94] sm:$0xf]  ;;  %v2962_v6 = vor.u32 %v3174_v56, %v2959_v5  ;;  %v2951_v4 = vld [vmem:[%s4208_s8 + $0x8] sm:$0xf0] }
 0x39e   : > { %2224 = vmatmul.bf16.vlgmr.msrb.gmra.mxu0 %v4047_v1  ;;  %v3026_v2 = vor.u32 %v3190_v53, %v3023_v16  ;;  %v2954_v13 = vor.u32 %v3172_v61, %v2951_v4 }
 0x39f   : > { %2285 = vmatpush.bf16.msrb.mxu3 %v3074_v3  ;;  %v1897_v3 = vpack.c.bf16 %v1866_v59, %v1866_v59 }
 0x3a0   : > { %2247 = vmatmul.bf16.vlgmr.msrb.gmra.mxu1 %v4055_v9 }
 0x3a1   : > { %v1569_v8 = vpop.f32.mrf.mxu3 }
 0x3a2   : > { %v3015_v8 = vld [vmem:[%s4208_s8 + $0x88] sm:$0xf0] }
 0x3a3   : > { %2286 = vmatpush.bf16.msrb.mxu3 %v3066_v26  ;;  %v3018_v44 = vor.u32 %v3188_v7, %v3015_v8 }
 0x3a7   : > { %2287 = vmatpush.bf16.msrb.mxu3 %v3058_v23 }
 0x3a9   : > { %v1805_v32 = vpop.f32.mrf.mxu3 }
 0x3aa   : > { %v1819_v45 = vadd.f32 %v1805_v32, %v3898_v49  ;;  %v3196_v49 = vld [vmem:[%s4208_s8 + $0xc4] sm:$0xf]  ;;  %v1891_v32 = vpop.f32.mrf.mxu1 }
 0x3ab   : > { %v3050_v47 = vor.u32 %v3196_v49, %v3047_v12 }
 0x3ac   : > { %v1828_v43 = vadd.f32 %v4081_v31, %v1819_v45 }
 0x3ad   : > { %2288 = vmatpush.bf16.msrb.mxu3 %v3050_v47 }
 0x3ae   : > { %2229 = vmatmul.bf16.gmra.mxu0 %v4083_v48  ;;  %v1833_v62 = vmax.f32 %v1828_v43, 0.0 }
 0x3b0   : > { %2252 = vmatmul.bf16.gmra.mxu1 %v4097_v27 }
 0x3b1   : > { %v1807_v11 = vpop.f32.mrf.mxu3  ;;  %2289 = vmatpush.bf16.msrb.mxu3 %v3042_v25 }
 0x3b2   : > { %v1820_v51 = vadd.f32 %v1807_v11, %v3935_v37  ;;  %v3176_v37 = vld [vmem:[%s4208_s8 + $0x24] sm:$0xf] }
 0x3b3   : > { %v2970_v17 = vor.u32 %v3176_v37, %v2967_v36 }
 0x3b4   : > { %v1829_v30 = vadd.f32 %v4081_v31, %v1820_v51 }
 0x3b5   : > { %2267 = vmatpush.bf16.msrb.mxu2 %v2970_v17  ;;  %2290 = vmatpush.bf16.msrb.mxu3 %v3034_v0  ;;  %v1907_v0 = vld [vmem:[%s4207_s7] sm:$0x3] }
 0x3b6   : > { %v1834_v54 = vmax.f32 %v1829_v30, 0.0  ;;  %v1909_v5 = vperm.slane %v1907_v0, 0  ;;  %v1910_v61 = vperm.slane %v1907_v0, 1 }
 0x3b8   : > { %v1838_v28 = vpack.c.bf16 %v1834_v54, %v1833_v62 }
 0x3b9   : > { %v1810_v58 = vpop.f32.mrf.mxu3  ;;  %2268 = vmatpush.bf16.msrb.mxu2 %v2962_v6  ;;  %2291 = vmatpush.bf16.msrb.mxu3 %v3026_v2 }
 0x3ba   : > { %2941 = vmatmul.msk.bf16.vlgmr.msra.gmra.mxu2 %vm867_vm3, %v1838_v28  ;;  %2944 = vmatmul.msk.bf16.vlgmr.msra.gmra.mxu3 %vm867_vm3, %v1838_v28  ;;  %v1821_v52 = vadd.f32 %v1810_v58, %v3959_v14  ;;  %v1868_v14 = vpop.f32.mrf.mxu0 }
 0x3bc   : > { %v1830_v50 = vadd.f32 %v4081_v31, %v1821_v52 }
 0x3bd   : > { %2269 = vmatpush.bf16.msrb.mxu2 %v2954_v13  ;;  %2292 = vmatpush.bf16.msrb.mxu3 %v3018_v44 }
 0x3be   : > { %2234 = vmatmul.bf16.gmra.mxu0 %v1897_v3  ;;  %v1835_v38 = vmax.f32 %v1830_v50, 0.0 }
 0x3c0   : > { %2257 = vmatmul.bf16.gmra.mxu1 %v1898_v15 }
 0x3c1   : > { %v1812_v34 = vpop.f32.mrf.mxu3 }
 0x3c2   : > { %v1822_v63 = vadd.f32 %v1812_v34, %v3999_v29 }
 0x3c4   : > { %v1831_v26 = vadd.f32 %v4081_v31, %v1822_v63 }
 0x3c6   : > { %v1836_v20 = vmax.f32 %v1831_v26, 0.0 }
 0x3c8   : > { %v1839_v57 = vpack.c.bf16 %v1836_v20, %v1835_v38 }
 0x3c9   : > { %v1815_v22 = vpop.f32.mrf.mxu3 }
 0x3ca   : > { %2942 = vmatmul.msk.bf16.gmra.mxu2 %vm867_vm3, %v1839_v57  ;;  %2945 = vmatmul.msk.bf16.gmra.mxu3 %vm867_vm3, %v1839_v57  ;;  %v1823_v23 = vadd.f32 %v1815_v22, %v4027_v24  ;;  %v2050_v24 = vld [vmem:[%s4209_s9] sm:$0x3] }
 0x3cb   : > { %v2053_v4 = vperm.slane %v2050_v24, 1 }
 0x3cc   : > { %v1832_v29 = vadd.f32 %v4081_v31, %v1823_v23  ;;  %v2052_v31 = vperm.slane %v2050_v24, 0 }
 0x3ce   : > { %v1837_v39 = vmax.f32 %v1832_v29, 0.0 }
 0x3d0   : > { %v1840_v46 = vpack.c.bf16 %v1837_v39, %v1837_v39 }
 0x3d1   : > { %v1817_v45 = vpop.f32.mrf.mxu3 }
 0x3da   : > { %2943 = vmatmul.msk.bf16.gmra.mxu2 %vm867_vm3, %v1840_v46  ;;  %2946 = vmatmul.msk.bf16.gmra.mxu3 %vm867_vm3, %v1840_v46 }
 0x3ea   : > { %2270 = vmatmul.bf16.vlgmr.msrb.gmra.mxu2 %v4047_v1  ;;  %2293 = vmatmul.bf16.vlgmr.msrb.gmra.mxu3 %v4055_v9 }
 0x3fa   : > { %2275 = vmatmul.bf16.gmra.mxu2 %v4083_v48  ;;  %2298 = vmatmul.bf16.gmra.mxu3 %v4097_v27 }
 0x40a   : > { %2280 = vmatmul.bf16.gmra.mxu2 %v1897_v3  ;;  %2303 = vmatmul.bf16.gmra.mxu3 %v1898_v15 }
 0x41b   : > { %v2225_v35 = vpop.f32.mrf.mxu0 }
 0x41c   : > { %v2226_v49 = vadd.f32 %v2225_v35, %v2052_v31 }
 0x41d   : > { %v2248_v33 = vpop.f32.mrf.mxu1 }
 0x41e   : > { %v2249_v11 = vadd.f32 %v2248_v33, %v2226_v49 }
 0x423   : > { %v2227_v60 = vpop.f32.mrf.mxu0 }
 0x424   : > { %v2228_v12 = vadd.f32 %v2227_v60, %v2052_v31 }
 0x425   : > { %v2250_v1 = vpop.f32.mrf.mxu1 }
 0x426   : > { %v2251_v10 = vadd.f32 %v2250_v1, %v2228_v12 }
 0x42b   : > { %v2230_v9 = vpop.f32.mrf.mxu0 }
 0x42c   : > { %v2231_v21 = vadd.f32 %v2230_v9, %v2052_v31 }
 0x42d   : > { %v2253_v48 = vpop.f32.mrf.mxu1 }
 0x42e   : > { %v4171_v43 = vadd.f32 %v2253_v48, %v2231_v21 }
 0x433   : > { %v2232_v27 = vpop.f32.mrf.mxu0 }
 0x434   : > { %v2233_v51 = vadd.f32 %v2232_v27, %v2052_v31 }
 0x435   : > { %v2255_v47 = vpop.f32.mrf.mxu1 }
 0x436   : > { %v4173_v41 = vadd.f32 %v2255_v47, %v2233_v51 }
 0x43b   : > { %v2235_v30 = vpop.f32.mrf.mxu0 }
 0x43c   : > { %v2236_v25 = vadd.f32 %v2235_v30, %v2052_v31 }
 0x43d   : > { %v1971_v40 = vpop.f32.mrf.mxu2  ;;  %v1994_v42 = vpop.f32.mrf.mxu3 }
 0x43e   : > { %v2258_v37 = vpop.f32.mrf.mxu1  ;;  %v1972_v6 = vadd.f32 %v1971_v40, %v1909_v5  ;;  %v1995_v52 = vadd.f32 %v1994_v42, %v1910_v61 }
 0x43f   : > { %v4175_v36 = vadd.f32 %v2258_v37, %v2236_v25 }
 0x440   : > { %v2008_v2 = vmax.f32 %v1972_v6, 0.0  ;;  %v2009_v13 = vmax.f32 %v1995_v52, 0.0 }
 0x442   : > { %v2308_v15 = vadd.f32 %v2249_v11, %v2008_v2 }
 0x443   : > { %v2237_v17 = vpop.f32.mrf.mxu0 }
 0x444   : > { %v2318_v63 = vmax.f32 %v2308_v15, 0.0 }
 0x445   : > { %v1973_v62 = vpop.f32.mrf.mxu2  ;;  %v1996_v54 = vpop.f32.mrf.mxu3 }
 0x446   : > { %v2260_v28 = vpop.f32.mrf.mxu1  ;;  %v1974_v34 = vadd.f32 %v1973_v62, %v1909_v5  ;;  %v1997_v32 = vadd.f32 %v1996_v54, %v1910_v61 }
 0x448   : > { %v2010_v14 = vmax.f32 %v1974_v34, 0.0  ;;  %v2011_v23 = vmax.f32 %v1997_v32, 0.0 }
 0x44a   : > { %v2310_v29 = vadd.f32 %v2251_v10, %v2010_v14 }
 0x44c   : > { %v2320_v24 = vmax.f32 %v2310_v29, 0.0 }
 0x44d   : > { %v1976_v58 = vpop.f32.mrf.mxu2  ;;  %v1999_v19 = vpop.f32.mrf.mxu3 }
 0x44e   : > { %v1977_v45 = vadd.f32 %v1976_v58, %v1909_v5  ;;  %v2000_v35 = vadd.f32 %v1999_v19, %v1910_v61 }
 0x450   : > { %v2012_v31 = vmax.f32 %v1977_v45, 0.0  ;;  %v2013_v1 = vmax.f32 %v2000_v35, 0.0 }
 0x452   : > { %v2312_v9 = vadd.f32 %v4171_v43, %v2012_v31 }
 0x454   : > { %v2322_v27 = vmax.f32 %v2312_v9, 0.0 }
 0x455   : > { %v1978_v18 = vpop.f32.mrf.mxu2  ;;  %v2001_v59 = vpop.f32.mrf.mxu3 }
 0x456   : > { %v1979_v21 = vadd.f32 %v1978_v18, %v1909_v5  ;;  %v2002_v47 = vadd.f32 %v2001_v59, %v1910_v61 }
 0x458   : > { %v2014_v51 = vmax.f32 %v1979_v21, 0.0  ;;  %v2015_v62 = vmax.f32 %v2002_v47, 0.0 }
 0x45a   : > { %v2314_v54 = vadd.f32 %v4173_v41, %v2014_v51 }
 0x45c   : > { %v2324_v58 = vmax.f32 %v2314_v54, 0.0 }
 0x45d   : > { %v1981_v56 = vpop.f32.mrf.mxu2  ;;  %v4177_v55 = vpop.f32.mrf.mxu3 }
 0x45e   : > { %v1982_v17 = vadd.f32 %v1981_v56, %v1909_v5  ;;  %v2005_v18 = vadd.f32 %v4177_v55, %v1910_v61 }
 0x460   : > { %v2016_v19 = vmax.f32 %v1982_v17, 0.0  ;;  %v2017_v2 = vmax.f32 %v2005_v18, 0.0 }
 0x462   : > { %v2316_v52 = vadd.f32 %v4175_v36, %v2016_v19 }
 0x464   : > { %v2326_v56 = vmax.f32 %v2316_v52, 0.0 }
 0x465   : > { %v1983_v53 = vpop.f32.mrf.mxu2  ;;  %v2006_v16 = vpop.f32.mrf.mxu3 }
 0x46d   : > { %v2271_v3 = vpop.f32.mrf.mxu2  ;;  %v2294_v7 = vpop.f32.mrf.mxu3 }
 0x46e   : > { %v2272_v8 = vadd.f32 %v2271_v3, %v2053_v4 }
 0x470   : > { %v2295_v44 = vadd.f32 %v2294_v7, %v2272_v8 }
 0x472   : > { %v2309_v50 = vadd.f32 %v2295_v44, %v2009_v13 }
 0x474   : > { %v2319_v26 = vmax.f32 %v2309_v50, 0.0 }
 0x475   : > { %v2273_v38 = vpop.f32.mrf.mxu2  ;;  %v2296_v20 = vpop.f32.mrf.mxu3 }
 0x476   : > { %v2328_v57 = vpack.c.bf16 %v2319_v26, %v2318_v63  ;;  %v2274_v22 = vadd.f32 %v2273_v38, %v2053_v4 }
 0x478   : > { %2333 = vst [vmem:[%s4186_s24] sm:$0xff] %v2328_v57  ;;  %v2297_v39 = vadd.f32 %v2296_v20, %v2274_v22 }
 0x47a   : > { %v2311_v46 = vadd.f32 %v2297_v39, %v2011_v23 }
 0x47c   : > { %v2321_v49 = vmax.f32 %v2311_v46, 0.0 }
 0x47d   : > { %v2276_v33 = vpop.f32.mrf.mxu2  ;;  %v2299_v11 = vpop.f32.mrf.mxu3 }
 0x47e   : > { %v2329_v60 = vpack.c.bf16 %v2321_v49, %v2320_v24  ;;  %v2277_v12 = vadd.f32 %v2276_v33, %v2053_v4 }
 0x480   : > { %2334 = vst [vmem:[%s4186_s24 + $0x8] sm:$0xff] %v2329_v60  ;;  %v2300_v10 = vadd.f32 %v2299_v11, %v2277_v12 }
 0x482   : > { %v2313_v48 = vadd.f32 %v2300_v10, %v2013_v1 }
 0x484   : > { %v2323_v40 = vmax.f32 %v2313_v48, 0.0 }
 0x485   : > { %v2278_v42 = vpop.f32.mrf.mxu2  ;;  %v2301_v30 = vpop.f32.mrf.mxu3 }
 0x486   : > { %v2330_v25 = vpack.c.bf16 %v2323_v40, %v2322_v27  ;;  %v2279_v37 = vadd.f32 %v2278_v42, %v2053_v4 }
 0x488   : > { %2335 = vst [vmem:[%s4186_s24 + $0x10] sm:$0xff] %v2330_v25  ;;  %v2302_v43 = vadd.f32 %v2301_v30, %v2279_v37 }
 0x48a   : > { %v2315_v28 = vadd.f32 %v2302_v43, %v2015_v62 }
 0x48c   : > { %v2325_v0 = vmax.f32 %v2315_v28, 0.0 }
 0x48d   : > { %v2281_v59 = vpop.f32.mrf.mxu2  ;;  %v2304_v53 = vpop.f32.mrf.mxu3 }
 0x48e   : > { %v2331_v16 = vpack.c.bf16 %v2325_v0, %v2324_v58  ;;  %v2282_v6 = vadd.f32 %v2281_v59, %v2053_v4 }
 0x490   : > { %2336 = vst [vmem:[%s4186_s24 + $0x18] sm:$0xff] %v2331_v16  ;;  %v2305_v3 = vadd.f32 %v2304_v53, %v2282_v6 }
 0x492   : > { %v2317_v41 = vadd.f32 %v2305_v3, %v2017_v2 }
 0x494   : > { %v2327_v5 = vmax.f32 %v2317_v41, 0.0 }
 0x495   : > { %v2283_v7 = vpop.f32.mrf.mxu2  ;;  %v2306_v8 = vpop.f32.mrf.mxu3 }
 0x496   : > { %v2332_v13 = vpack.c.bf16 %v2327_v5, %v2326_v56 }
 0x498   : > { %2337 = vst [vmem:[%s4186_s24 + $0x20] sm:$0x33] %v2332_v13 }
 0x499 PF: > { %s20_s13 = sadd.s32 1, %s3222_s13  }
 0x49a   : > { %p17_p4 = scmp.ge.s32.totalorder %s20_s13, 4  }
 0x49c   :  { %19 = sbr.rel (!%p17_p4) target bundleno = 1 (0x1), region = 106 }

// kernel: _lambda_.3
= control target key start
LH: loop header
LB: loop body
LE: loop exit
PB: predicated region body
PF: predicated region fallthrough
CT: control target
= control target key end

     0   :  { %s4616_s21 = smov 0   ;;  %s5791_s0 = inlined_call_operand.vmem [shape: bf16[2,121,64], index: 0, kind: input, shape index: {}]   ;;  %s5792_s1 = inlined_call_operand.vmem [shape: bf16[9,121,121], index: 1, kind: input, shape index: {}]   ;;  %s5793_s2 = inlined_call_operand.vmem [shape: bf16[64,64], index: 2, kind: input, shape index: {}]   ;;  %s5794_s3 = inlined_call_operand.vmem [shape: f32[1,64], index: 3, kind: input, shape index: {}]   ;;  %s5795_s4 = inlined_call_operand.vmem [shape: bf16[64,64], index: 4, kind: input, shape index: {}]   ;;  %s5796_s5 = inlined_call_operand.vmem [shape: f32[1,64], index: 5, kind: input, shape index: {}]   ;;  %s5797_s6 = inlined_call_operand.vmem [shape: bf16[9,64,64], index: 6, kind: input, shape index: {}]   ;;  %s5798_s7 = inlined_call_operand.vmem [shape: f32[1,64], index: 7, kind: input, shape index: {}]   ;;  %s5799_s8 = inlined_call_operand.vmem [shape: bf16[64,256], index: 8, kind: input, shape index: {}]   ;;  %s5800_s9 = inlined_call_operand.vmem [shape: f32[1,256], index: 9, kind: input, shape index: {}]   ;;  %s5801_s10 = inlined_call_operand.vmem [shape: bf16[64,256], index: 10, kind: input, shape index: {}]   ;;  %s5802_s11 = inlined_call_operand.vmem [shape: f32[1,256], index: 11, kind: input, shape index: {}]   ;;  %s5803_s12 = inlined_call_operand.vmem [shape: bf16[2,121,256], index: 12, kind: output, shape index: {}]  }
   0x1 LB: > { %s3477_s22 = sadd.s32 4294967295, %s4548_s21   ;;  %p3481_p0 = scmp.ge.s32.totalorder %s4548_s21, 1  ;;  %s4548_s21 = sphi %s4616_s21, %s22_s21  }
   0x2   : > { %p362_p1 = scmp.lt.s32.totalorder %s4548_s21, 3 }
   0x4   : > { %p363_p2 = pnand %p3481_p0, %p362_p1 }
   0x5   : > { %p404_p3 = scmp.lt.s32.totalorder (!%p363_p2), %s3477_s22, 1 }
   0x6   : > { %366 = sbr.rel (%p363_p2) target bundleno = 1742 (0x6ce), region = 68 }
   0xb   : > { %v4389_v0 = vld [vmem:[%s5793_s2 + $0x18] sm:$0xff]  ;;  %v4388_v1 = vld [vmem:[%s5793_s2 + $0x10] sm:$0xff]  ;;  %s5805_s22 = smov (!%p404_p3, %s3477_s22), 1  ;;  %v4387_v2 = vld [vmem:[%s5793_s2 + $0x8] sm:$0xff]  ;;  %vm507_vm0 = vcmask 523264   ;;  %vm819_vm1 = vcmask 1043456  }
   0xc   : > { %536 = vmatpush.bf16.msra.mxu0 %v4389_v0  ;;  %s4376_s29 = sshll.u32 %s5805_s22, 6  ;;  %v4386_v3 = vld [vmem:[%s5793_s2] sm:$0xff]  ;;  %v4393_v10 = vld [vmem:[%s5795_s4 + $0x18] sm:$0xff]  ;;  %v4392_v12 = vld [vmem:[%s5795_s4 + $0x10] sm:$0xff]  ;;  %vm820_vm2 = vcmask 1044480   ;;  %vm794_vm3 = vcmask 990208  }
   0xd   : > { %s408_s16 = scalar_lea.vmem %s5791_s0, %s4376_s29  ;;  %669 = vmatpush.bf16.msra.mxu1 %v4393_v10  ;;  %v4391_v13 = vld [vmem:[%s5795_s4 + $0x8] sm:$0xff]  ;;  %v4390_v14 = vld [vmem:[%s5795_s4] sm:$0xff]  ;;  %s4377_s29 = sshll.u32 %s5805_s22, 7  ;;  %vm3412_vm4 = vcmask 1040384   ;;  %vm3413_vm5 = vsmask.f32 256 }
   0xe   : > { %v4378_v4 = vld [vmem:[%s408_s16] sm:$0xff]  ;;  %v4379_v5 = vld [vmem:[%s408_s16 + $0x8] sm:$0xff]  ;;  %v4380_v6 = vld [vmem:[%s408_s16 + $0x10] sm:$0xff]  ;;  %s5710_s14 = scalar_lea.vmem %s5803_s12, %s4377_s29  ;;  %vm3415_vm6 = vcmask 1044484   ;;  %vm3416_vm7 = vsmask.f32 4352 }
   0xf   : > { %v4381_v7 = vld [vmem:[%s408_s16 + $0x18] sm:$0xff]  ;;  %v4382_v8 = vld [vmem:[%s408_s16 + $0x20] sm:$0xff]  ;;  %v4383_v9 = vld [vmem:[%s408_s16 + $0x28] sm:$0xff] }
  0x10   : > { %537 = vmatpush.bf16.msra.mxu0 %v4388_v1  ;;  %v4384_v11 = vld [vmem:[%s408_s16 + $0x30] sm:$0xff]  ;;  %v3516_v15 = vld [vmem:[%s408_s16 + $0x38] sm:$0xf]  ;;  %v4385_v16 = vld [vmem:[%s408_s16 + $0x38] sm:$0x10] }
  0x11   : > { %670 = vmatpush.bf16.msra.mxu1 %v4392_v12  ;;  %v3517_v17 = vor.u32 %v4385_v16, %v3516_v15  ;;  %v4539_v19 = vld [vmem:[%s5794_s3] ss:$0 sm:$0xff]  ;;  %vm3414_vm8 = vmand %vm3412_vm4, %vm3413_vm5 }
  0x12   : > { %vm3417_vm9 = vmand %vm3415_vm6, %vm3416_vm7 }
  0x13   : > { %vm3418_vm10 = vmor %vm3417_vm9, %vm3414_vm8 }
  0x14   : > { %538 = vmatpush.bf16.msra.mxu0 %v4387_v2 }
  0x15   : > { %671 = vmatpush.bf16.msra.mxu1 %v4391_v13 }
  0x18   : > { %539 = vmatpush.bf16.msra.mxu0 %v4386_v3 }
  0x19   : > { %672 = vmatpush.bf16.msra.mxu1 %v4390_v14 }
  0x1b   : > { %3534 = vmatmul.msk.bf16.vlgmr.msra.gmra.mxu0 %vm507_vm0, %v4378_v4 }
  0x2b   : > { %3535 = vmatmul.msk.bf16.gmra.mxu0 %vm507_vm0, %v4379_v5 }
  0x3b   : > { %3536 = vmatmul.msk.bf16.gmra.mxu0 %vm507_vm0, %v4380_v6 }
  0x4b   : > { %3537 = vmatmul.msk.bf16.gmra.mxu0 %vm507_vm0, %v4381_v7 }
  0x5b   : > { %3538 = vmatmul.msk.bf16.gmra.mxu0 %vm507_vm0, %v4382_v8 }
  0x6b   : > { %3539 = vmatmul.msk.bf16.gmra.mxu0 %vm507_vm0, %v4383_v9 }
  0x7b   : > { %3540 = vmatmul.msk.bf16.gmra.mxu0 %vm507_vm0, %v4384_v11 }
  0x8b   : > { %3541 = vmatmul.msk.bf16.gmra.mxu0 %vm507_vm0, %v3517_v17 }
  0x98   : > { %v541_v18 = vpop.f32.mrf.mxu0 }
  0x99   : > { %v542_v20 = vadd.f32 %v4539_v19, %v541_v18 }
  0x9b   : > { %v581_v23 = vmax.f32 %v542_v20, 0.0 }
  0xa0   : > { %v543_v21 = vpop.f32.mrf.mxu0 }
  0xa1   : > { %v544_v22 = vadd.f32 %v4539_v19, %v543_v21 }
  0xa3   : > { %v582_v24 = vmax.f32 %v544_v22, 0.0  ;;  %v4417_v22 = vld [vmem:[%s5797_s6 + $0x38] sm:$0xff] }
  0xa4   : > { %1090 = vmatpush.bf16.msrb.mxu0 %v4417_v22  ;;  %v4395_v22 = vld [vmem:[%s5792_s1 + $0x8] sm:$0xff] }
  0xa5   : > { %v4665_v25 = vpack.c.bf16 %v582_v24, %v581_v23  ;;  %v4416_v23 = vld [vmem:[%s5797_s6 + $0x30] sm:$0xff] }
  0xa7   : > { %3558 = vmatmul.msk.bf16.vlgmr.msra.gmra.mxu1 %vm507_vm0, %v4665_v25 }
  0xa8   : > { %v546_v26 = vpop.f32.mrf.mxu0  ;;  %1091 = vmatpush.bf16.msrb.mxu0 %v4416_v23  ;;  %v4397_v23 = vld [vmem:[%s5792_s1 + $0x18] sm:$0xff] }
  0xa9   : > { %v547_v27 = vadd.f32 %v4539_v19, %v546_v26  ;;  %v4415_v26 = vld [vmem:[%s5797_s6 + $0x28] sm:$0xff] }
  0xab   : > { %v583_v30 = vmax.f32 %v547_v27, 0.0  ;;  %v4414_v27 = vld [vmem:[%s5797_s6 + $0x20] sm:$0xff] }
  0xac   : > { %1092 = vmatpush.bf16.msrb.mxu0 %v4415_v26  ;;  %v4418_v26 = vld [vmem:[%s5792_s1 + $0x80] sm:$0xff] }
  0xb0   : > { %v548_v28 = vpop.f32.mrf.mxu0  ;;  %1093 = vmatpush.bf16.msrb.mxu0 %v4414_v27  ;;  %v4399_v27 = vld [vmem:[%s5792_s1 + $0x28] sm:$0xff] }
  0xb1   : > { %v549_v29 = vadd.f32 %v4539_v19, %v548_v28 }
  0xb3   : > { %v584_v31 = vmax.f32 %v549_v29, 0.0 }
  0xb5   : > { %v4669_v32 = vpack.c.bf16 %v584_v31, %v583_v30  ;;  %v4540_v31 = vld [vmem:[%s5796_s5] ss:$0 sm:$0xff] }
  0xb7   : > { %3559 = vmatmul.msk.bf16.gmra.mxu1 %vm507_vm0, %v4669_v32 }
  0xb8   : > { %v551_v33 = vpop.f32.mrf.mxu0 }
  0xb9   : > { %v552_v34 = vadd.f32 %v4539_v19, %v551_v33 }
  0xbb   : > { %v585_v37 = vmax.f32 %v552_v34, 0.0 }
  0xc0   : > { %v553_v35 = vpop.f32.mrf.mxu0 }
  0xc1   : > { %v554_v36 = vadd.f32 %v4539_v19, %v553_v35 }
  0xc3   : > { %v586_v38 = vmax.f32 %v554_v36, 0.0  ;;  %v4550_v36 = vmov 65535  }
  0xc5   : > { %v4673_v39 = vpack.c.bf16 %v586_v38, %v585_v37  ;;  %v821_v37 = vsel %vm819_vm1, 4294967295, %v4550_v36  ;;  %v3596_v36 = vld [vmem:[%s5792_s1 + $0x38] sm:$0xf] }
  0xc7   : > { %3560 = vmatmul.msk.bf16.gmra.mxu1 %vm507_vm0, %v4673_v39 }
  0xc8   : > { %v556_v40 = vpop.f32.mrf.mxu0 }
  0xc9   : > { %v557_v41 = vadd.f32 %v4539_v19, %v556_v40 }
  0xcb   : > { %v587_v44 = vmax.f32 %v557_v41, 0.0 }
  0xd0   : > { %v558_v42 = vpop.f32.mrf.mxu0 }
  0xd1   : > { %v559_v43 = vadd.f32 %v4539_v19, %v558_v42  ;;  %v822_v42 = vsel %vm820_vm2, %v821_v37, 0  ;;  %v4401_v37 = vld [vmem:[%s5792_s1 + $0x38] sm:$0x10] }
  0xd3   : > { %v588_v45 = vmax.f32 %v559_v43, 0.0 }
  0xd5   : > { %v4677_v46 = vpack.c.bf16 %v588_v45, %v587_v44 }
  0xd7   : > { %3561 = vmatmul.msk.bf16.gmra.mxu1 %vm507_vm0, %v4677_v46 }
  0xd8   : > { %v561_v47 = vpop.f32.mrf.mxu0 }
  0xd9   : > { %v562_v48 = vadd.f32 %v4539_v19, %v561_v47 }
  0xdb   : > { %v589_v51 = vmax.f32 %v562_v48, 0.0 }
  0xe0   : > { %v563_v49 = vpop.f32.mrf.mxu0 }
  0xe1   : > { %v564_v50 = vadd.f32 %v4539_v19, %v563_v49 }
  0xe3   : > { %v590_v52 = vmax.f32 %v564_v50, 0.0 }
  0xe5   : > { %v4681_v53 = vpack.c.bf16 %v590_v52, %v589_v51 }
  0xe7   : > { %3562 = vmatmul.msk.bf16.gmra.mxu1 %vm507_vm0, %v4681_v53 }
  0xe8   : > { %v566_v54 = vpop.f32.mrf.mxu0 }
  0xe9   : > { %v567_v55 = vadd.f32 %v4539_v19, %v566_v54 }
  0xeb   : > { %v591_v58 = vmax.f32 %v567_v55, 0.0 }
  0xf0   : > { %v568_v56 = vpop.f32.mrf.mxu0 }
  0xf1   : > { %v569_v57 = vadd.f32 %v4539_v19, %v568_v56 }
  0xf3   : > { %v592_v59 = vmax.f32 %v569_v57, 0.0 }
  0xf5   : > { %v4685_v60 = vpack.c.bf16 %v592_v59, %v591_v58 }
  0xf7   : > { %3563 = vmatmul.msk.bf16.gmra.mxu1 %vm507_vm0, %v4685_v60 }
  0xf8   : > { %v571_v61 = vpop.f32.mrf.mxu0 }
  0xf9   : > { %v572_v62 = vadd.f32 %v4539_v19, %v571_v61 }
  0xfb   : > { %v593_v1 = vmax.f32 %v572_v62, 0.0 }
 0x100   : > { %v573_v63 = vpop.f32.mrf.mxu0 }
 0x101   : > { %v574_v0 = vadd.f32 %v4539_v19, %v573_v63 }
 0x103   : > { %v594_v2 = vmax.f32 %v574_v0, 0.0 }
 0x105   : > { %v4689_v3 = vpack.c.bf16 %v594_v2, %v593_v1 }
 0x107   : > { %3564 = vmatmul.msk.bf16.gmra.mxu1 %vm507_vm0, %v4689_v3 }
 0x108   : > { %v576_v4 = vpop.f32.mrf.mxu0 }
 0x109   : > { %v577_v5 = vadd.f32 %v4539_v19, %v576_v4 }
 0x10b   : > { %v595_v8 = vmax.f32 %v577_v5, 0.0 }
 0x110   : > { %v578_v6 = vpop.f32.mrf.mxu0 }
 0x111   : > { %v579_v7 = vadd.f32 %v4539_v19, %v578_v6 }
 0x113   : > { %v596_v9 = vmax.f32 %v579_v7, 0.0 }
 0x115   : > { %v4693_v10 = vpack.c.bf16 %v596_v9, %v595_v8 }
 0x117   : > { %3565 = vmatmul.msk.bf16.gmra.mxu1 %vm507_vm0, %v4693_v10 }
 0x124   : > { %v4697_v11 = vpop.f32.mrf.mxu1 }
 0x12c   : > { %v4699_v12 = vpop.f32.mrf.mxu1 }
 0x134   : > { %v4701_v13 = vpop.f32.mrf.mxu1 }
 0x135   : > { %v680_v8 = vadd.f32 %v4540_v31, %v4701_v13 }
 0x13c   : > { %v4703_v14 = vpop.f32.mrf.mxu1 }
 0x13d   : > { %v682_v5 = vadd.f32 %v4540_v31, %v4703_v14  ;;  %v716_v14 = vmax.f32 %v680_v8, 0.0  ;;  %v4409_v8 = vld [vmem:[%s5792_s1 + $0x58] sm:$0xff] }
 0x144   : > { %v684_v15 = vpop.f32.mrf.mxu1 }
 0x145   : > { %v685_v2 = vadd.f32 %v4540_v31, %v684_v15  ;;  %v677_v15 = vadd.f32 %v4540_v31, %v4699_v12 }
 0x147   : > { %v718_v9 = vmax.f32 %v685_v2, 0.0  ;;  %v715_v13 = vmax.f32 %v677_v15, 0.0  ;;  %v4425_v2 = vld [vmem:[%s5792_s1 + $0xb8] sm:$0x10] }
 0x14c   : > { %v686_v16 = vpop.f32.mrf.mxu1 }
 0x14d   : > { %v687_v63 = vadd.f32 %v4540_v31, %v686_v16  ;;  %v717_v16 = vmax.f32 %v682_v5, 0.0 }
 0x14f   : > { %v719_v6 = vmax.f32 %v687_v63, 0.0 }
 0x154   : > { %v689_v17 = vpop.f32.mrf.mxu1 }
 0x155   : > { %v690_v61 = vadd.f32 %v4540_v31, %v689_v17  ;;  %v4751_v17 = vpack.c.bf16 %v719_v6, %v718_v9 }
 0x157   : > { %v720_v4 = vmax.f32 %v690_v61, 0.0  ;;  %v4424_v61 = vld [vmem:[%s5792_s1 + $0xb0] sm:$0xff] }
 0x15c   : > { %v691_v18 = vpop.f32.mrf.mxu1 }
 0x15d   : > { %v692_v57 = vadd.f32 %v4540_v31, %v691_v18  ;;  %v675_v18 = vadd.f32 %v4540_v31, %v4697_v11  ;;  %v4394_v11 = vld [vmem:[%s5792_s1] sm:$0xff] }
 0x15f   : > { %v721_v0 = vmax.f32 %v692_v57, 0.0  ;;  %v4423_v57 = vld [vmem:[%s5792_s1 + $0xa8] sm:$0xff] }
 0x161   : > { %v4744_v7 = vpack.c.bf16 %v721_v0, %v720_v4  ;;  %v3764_v0 = vld [vmem:[%s5792_s1 + $0xb8] sm:$0xf] }
 0x162   : > { %v3765_v9 = vor.u32 %v4425_v2, %v3764_v0 }
 0x164   : > { %v694_v19 = vpop.f32.mrf.mxu1 }
 0x165   : > { %v695_v55 = vadd.f32 %v4540_v31, %v694_v19  ;;  %v4757_v19 = vpack.c.bf16 %v717_v16, %v716_v14  ;;  %v4437_v14 = vld [vmem:[%s5792_s1 + $0xf8] sm:$0x10] }
 0x167   : > { %v722_v62 = vmax.f32 %v695_v55, 0.0  ;;  %v4407_v55 = vld [vmem:[%s5792_s1 + $0x48] sm:$0xff] }
 0x16c   : > { %v696_v20 = vpop.f32.mrf.mxu1 }
 0x16d   : > { %v697_v51 = vadd.f32 %v4540_v31, %v696_v20  ;;  %v714_v20 = vmax.f32 %v675_v18, 0.0  ;;  %v3852_v18 = vld [vmem:[%s5792_s1 + $0xf8] sm:$0xf] }
 0x16f   : > { %v723_v58 = vmax.f32 %v697_v51, 0.0  ;;  %v4762_v12 = vpack.c.bf16 %v715_v13, %v714_v20  ;;  %v4440_v51 = vld [vmem:[%s5797_s6 + $0x70] sm:$0xff] }
 0x171   : > { %v4738_v1 = vpack.c.bf16 %v723_v58, %v722_v62  ;;  %v4408_v58 = vld [vmem:[%s5792_s1 + $0x50] sm:$0xff] }
 0x174   : > { %v699_v21 = vpop.f32.mrf.mxu1 }
 0x175   : > { %v700_v49 = vadd.f32 %v4540_v31, %v699_v21  ;;  %v4396_v21 = vld [vmem:[%s5792_s1 + $0x10] sm:$0xff] }
 0x177   : > { %v724_v56 = vmax.f32 %v700_v49, 0.0  ;;  %v4402_v49 = vld [vmem:[%s5797_s6] sm:$0xff] }
 0x17c   : > { %v701_v24 = vpop.f32.mrf.mxu1 }
 0x17d   : > { %v702_v45 = vadd.f32 %v4540_v31, %v701_v24  ;;  %v4398_v24 = vld [vmem:[%s5792_s1 + $0x20] sm:$0xff] }
 0x17f   : > { %v725_v52 = vmax.f32 %v702_v45, 0.0  ;;  %v4406_v45 = vld [vmem:[%s5792_s1 + $0x40] sm:$0xff] }
 0x181   : > { %v4733_v59 = vpack.c.bf16 %v725_v52, %v724_v56  ;;  %v4439_v52 = vld [vmem:[%s5797_s6 + $0x68] sm:$0xff]  ;;  %v4438_v56 = vld [vmem:[%s5797_s6 + $0x60] sm:$0xff] }
 0x184   : > { %v704_v28 = vpop.f32.mrf.mxu1 }
 0x185   : > { %v705_v43 = vadd.f32 %v4540_v31, %v704_v28  ;;  %v4419_v28 = vld [vmem:[%s5792_s1 + $0x88] sm:$0xff] }
 0x187   : > { %v726_v50 = vmax.f32 %v705_v43, 0.0  ;;  %v4403_v43 = vld [vmem:[%s5797_s6 + $0x8] sm:$0xff] }
 0x18c   : > { %v706_v29 = vpop.f32.mrf.mxu1 }
 0x18d   : > { %v707_v38 = vadd.f32 %v4540_v31, %v706_v29  ;;  %v4429_v29 = vld [vmem:[%s5797_s6 + $0x58] sm:$0xff] }
 0x18f   : > { %v727_v47 = vmax.f32 %v707_v38, 0.0  ;;  %v3597_v38 = vor.u32 %v4401_v37, %v3596_v36  ;;  %v4412_v36 = vld [vmem:[%s5792_s1 + $0x70] sm:$0xff] }
 0x191   : > { %v4728_v54 = vpack.c.bf16 %v727_v47, %v726_v50  ;;  %v4422_v47 = vld [vmem:[%s5792_s1 + $0xa0] sm:$0xff]  ;;  %v4441_v50 = vld [vmem:[%s5797_s6 + $0x78] sm:$0xff] }
 0x194   : > { %v709_v30 = vpop.f32.mrf.mxu1 }
 0x195   : > { %v710_v33 = vadd.f32 %v4540_v31, %v709_v30  ;;  %v4428_v30 = vld [vmem:[%s5797_s6 + $0x50] sm:$0xff] }
 0x197   : > { %v728_v40 = vmax.f32 %v710_v33, 0.0  ;;  %v4426_v33 = vld [vmem:[%s5797_s6 + $0x40] sm:$0xff] }
 0x19c   : > { %v711_v34 = vpop.f32.mrf.mxu1 }
 0x19d   : > { %v712_v35 = vadd.f32 %v4540_v31, %v711_v34  ;;  %v4427_v31 = vld [vmem:[%s5797_s6 + $0x48] sm:$0xff]  ;;  %v4400_v34 = vld [vmem:[%s5792_s1 + $0x30] sm:$0xff] }
 0x19f   : > { %v729_v41 = vmax.f32 %v712_v35, 0.0  ;;  %v4420_v35 = vld [vmem:[%s5792_s1 + $0x90] sm:$0xff] }
 0x1a1   : > { %v4720_v44 = vpack.c.bf16 %v729_v41, %v728_v40  ;;  %v4421_v40 = vld [vmem:[%s5792_s1 + $0x98] sm:$0xff] }
 0x1a2   : > { %v4405_v41 = vld [vmem:[%s5797_s6 + $0x18] sm:$0xff] }
 0x1a3   : > { %v4723_v48 = vand.u32 %v822_v42, %v4720_v44  ;;  %1187 = vmatpush.bf16.msrb.mxu1 %v4405_v41  ;;  %v4404_v42 = vld [vmem:[%s5797_s6 + $0x10] sm:$0xff]  ;;  %v4413_v41 = vld [vmem:[%s5792_s1 + $0x78] sm:$0x10] }
 0x1a5   : > { %826 = vmatpush.bf16.msra.mxu2 %v4723_v48  ;;  %4510 = vmatpush.bf16.msra.mxu3 %v4723_v48 }
 0x1a6   : > { %1573 = vmatpush.bf16.msra.mxu0 %v4723_v48 }
 0x1a7   : > { %1188 = vmatpush.bf16.msrb.mxu1 %v4404_v42 }
 0x1a9   : > { %827 = vmatpush.bf16.msra.mxu2 %v4728_v54  ;;  %4511 = vmatpush.bf16.msra.mxu3 %v4728_v54 }
 0x1aa   : > { %1574 = vmatpush.bf16.msra.mxu0 %v4728_v54 }
 0x1ab   : > { %1189 = vmatpush.bf16.msrb.mxu1 %v4403_v43 }
 0x1ad   : > { %828 = vmatpush.bf16.msra.mxu2 %v4733_v59  ;;  %4512 = vmatpush.bf16.msra.mxu3 %v4733_v59 }
 0x1ae   : > { %1575 = vmatpush.bf16.msra.mxu0 %v4733_v59 }
 0x1af   : > { %1190 = vmatpush.bf16.msrb.mxu1 %v4402_v49 }
 0x1b1   : > { %829 = vmatpush.bf16.msra.mxu2 %v4738_v1  ;;  %4513 = vmatpush.bf16.msra.mxu3 %v4738_v1 }
 0x1b2   : > { %1576 = vmatpush.bf16.msra.mxu0 %v4738_v1 }
 0x1b3   : > { %1691 = vmatpush.bf16.msra.mxu1 %v4441_v50 }
 0x1b5   : > { %830 = vmatpush.bf16.msra.mxu2 %v4744_v7  ;;  %4514 = vmatpush.bf16.msra.mxu3 %v4744_v7 }
 0x1b6   : > { %1577 = vmatpush.bf16.msra.mxu0 %v4744_v7 }
 0x1b7   : > { %1692 = vmatpush.bf16.msra.mxu1 %v4440_v51 }
 0x1b9   : > { %831 = vmatpush.bf16.msra.mxu2 %v4751_v17  ;;  %4515 = vmatpush.bf16.msra.mxu3 %v4751_v17 }
 0x1ba   : > { %1578 = vmatpush.bf16.msra.mxu0 %v4751_v17 }
 0x1bb   : > { %1693 = vmatpush.bf16.msra.mxu1 %v4439_v52 }
 0x1bd   : > { %832 = vmatpush.bf16.msra.mxu2 %v4757_v19  ;;  %4516 = vmatpush.bf16.msra.mxu3 %v4757_v19 }
 0x1be   : > { %1579 = vmatpush.bf16.msra.mxu0 %v4757_v19 }
 0x1bf   : > { %1694 = vmatpush.bf16.msra.mxu1 %v4438_v56 }
 0x1c1   : > { %833 = vmatpush.bf16.msra.mxu2 %v4762_v12  ;;  %4517 = vmatpush.bf16.msra.mxu3 %v4762_v12 }
 0x1c2   : > { %1580 = vmatpush.bf16.msra.mxu0 %v4762_v12 }
 0x1c4   : > { %3598 = vmatmul.msk.bf16.vlgmr.msra.gmra.mxu2 %vm794_vm3, %v4394_v11  ;;  %3600 = vmatmul.msk.bf16.vlgmr.msra.gmra.mxu3 %vm794_vm3, %v4396_v21  ;;  %v4410_v21 = vld [vmem:[%s5792_s1 + $0x60] sm:$0xff] }
 0x1c5   : > { %972 = vmatpush.bf16.msrb.mxu3 %v4723_v48  ;;  %1313 = vmatpush.bf16.msrb.mxu2 %v4723_v48 }
 0x1c9   : > { %973 = vmatpush.bf16.msrb.mxu3 %v4728_v54  ;;  %1314 = vmatpush.bf16.msrb.mxu2 %v4728_v54 }
 0x1cd   : > { %974 = vmatpush.bf16.msrb.mxu3 %v4733_v59  ;;  %1315 = vmatpush.bf16.msrb.mxu2 %v4733_v59 }
 0x1d1   : > { %975 = vmatpush.bf16.msrb.mxu3 %v4738_v1  ;;  %1316 = vmatpush.bf16.msrb.mxu2 %v4738_v1 }
 0x1d4   : > { %3599 = vmatmul.msk.bf16.gmra.mxu2 %vm794_vm3, %v4395_v22  ;;  %3601 = vmatmul.msk.bf16.gmra.mxu3 %vm794_vm3, %v4397_v23  ;;  %v3853_v22 = vor.u32 %v4437_v14, %v3852_v18 }
 0x1d5   : > { %976 = vmatpush.bf16.msrb.mxu3 %v4744_v7  ;;  %1317 = vmatpush.bf16.msrb.mxu2 %v4744_v7 }
 0x1d9   : > { %977 = vmatpush.bf16.msrb.mxu3 %v4751_v17  ;;  %1318 = vmatpush.bf16.msrb.mxu2 %v4751_v17 }
 0x1dd   : > { %978 = vmatpush.bf16.msrb.mxu3 %v4757_v19  ;;  %1319 = vmatpush.bf16.msrb.mxu2 %v4757_v19 }
 0x1e1   : > { %979 = vmatpush.bf16.msrb.mxu3 %v4762_v12  ;;  %1320 = vmatpush.bf16.msrb.mxu2 %v4762_v12 }
 0x1e4   : > { %3602 = vmatmul.msk.bf16.gmra.mxu3 %vm794_vm3, %v4398_v24  ;;  %3766 = vmatmul.msk.bf16.vlgmr.msrb.gmra.mxu2 %vm794_vm3, %v4418_v26 }
 0x1e5   : > { %4518 = vmatpush.bf16.msra.mxu2 %v4723_v48  ;;  %1431 = vmatpush.bf16.msra.mxu3 %v4429_v29  ;;  %v4411_v29 = vld [vmem:[%s5792_s1 + $0x68] sm:$0xff] }
 0x1e9   : > { %4519 = vmatpush.bf16.msra.mxu2 %v4728_v54  ;;  %1432 = vmatpush.bf16.msra.mxu3 %v4428_v30 }
 0x1ed   : > { %4520 = vmatpush.bf16.msra.mxu2 %v4733_v59  ;;  %1433 = vmatpush.bf16.msra.mxu3 %v4427_v31 }
 0x1f1   : > { %4521 = vmatpush.bf16.msra.mxu2 %v4738_v1  ;;  %1434 = vmatpush.bf16.msra.mxu3 %v4426_v33 }
 0x1f4   : > { %3603 = vmatmul.msk.bf16.gmra.mxu3 %vm794_vm3, %v4399_v27  ;;  %3767 = vmatmul.msk.bf16.gmra.mxu2 %vm794_vm3, %v4419_v28 }
 0x1f5   : > { %4522 = vmatpush.bf16.msra.mxu2 %v4744_v7 }
 0x1f9   : > { %4523 = vmatpush.bf16.msra.mxu2 %v4751_v17 }
 0x1fd   : > { %4524 = vmatpush.bf16.msra.mxu2 %v4757_v19 }
 0x201   : > { %4525 = vmatpush.bf16.msra.mxu2 %v4762_v12 }
 0x204   : > { %3604 = vmatmul.msk.bf16.gmra.mxu3 %vm794_vm3, %v4400_v34  ;;  %3768 = vmatmul.msk.bf16.gmra.mxu2 %vm794_vm3, %v4420_v35 }
 0x205   : > { %4526 = vmatpush.bf16.msrb.mxu2 %v4441_v50 }
 0x209   : > { %4527 = vmatpush.bf16.msrb.mxu2 %v4440_v51 }
 0x20d   : > { %4528 = vmatpush.bf16.msrb.mxu2 %v4439_v52 }
 0x211   : > { %4529 = vmatpush.bf16.msrb.mxu2 %v4438_v56 }
 0x214   : > { %3605 = vmatmul.msk.bf16.gmra.mxu3 %vm794_vm3, %v3597_v38  ;;  %3769 = vmatmul.msk.bf16.gmra.mxu2 %vm794_vm3, %v4421_v40  ;;  %v3652_v40 = vld [vmem:[%s5792_s1 + $0x78] sm:$0xf] }
 0x224   : > { %3654 = vmatmul.msk.bf16.vlgmr.msrb.gmra.mxu3 %vm794_vm3, %v4406_v45  ;;  %3770 = vmatmul.msk.bf16.gmra.mxu2 %vm794_vm3, %v4422_v47  ;;  %v3653_v47 = vor.u32 %v4413_v41, %v3652_v40 }
 0x225   : > { %1954 = vmatpush.bf16.msrb.mxu3 %v4723_v48 }
 0x229   : > { %1955 = vmatpush.bf16.msrb.mxu3 %v4728_v54 }
 0x22d   : > { %1956 = vmatpush.bf16.msrb.mxu3 %v4733_v59 }
 0x231   : > { %1957 = vmatpush.bf16.msrb.mxu3 %v4738_v1 }
 0x234   : > { %3655 = vmatmul.msk.bf16.gmra.mxu3 %vm794_vm3, %v4407_v55  ;;  %3771 = vmatmul.msk.bf16.gmra.mxu2 %vm794_vm3, %v4423_v57 }
 0x235   : > { %1958 = vmatpush.bf16.msrb.mxu3 %v4744_v7 }
 0x239   : > { %1959 = vmatpush.bf16.msrb.mxu3 %v4751_v17 }
 0x23d   : > { %1960 = vmatpush.bf16.msrb.mxu3 %v4757_v19 }
 0x241   : > { %1961 = vmatpush.bf16.msrb.mxu3 %v4762_v12 }
 0x244   : > { %3656 = vmatmul.msk.bf16.gmra.mxu3 %vm794_vm3, %v4408_v58  ;;  %3772 = vmatmul.msk.bf16.gmra.mxu2 %vm794_vm3, %v4424_v61 }
 0x247   : > { %v835_v62 = vpop.f32.mrf.mxu2  ;;  %v845_v63 = vpop.f32.mrf.mxu3 }
 0x24f   : > { %v837_v4 = vpop.f32.mrf.mxu2  ;;  %v847_v5 = vpop.f32.mrf.mxu3 }
 0x250   : > { %v875_v6 = vpack.c.bf16 %v837_v4, %v835_v62  ;;  %v877_v27 = vpack.c.bf16 %v847_v5, %v845_v63 }
 0x252   : > { %3710 = vmatmul.msk.bf16.vlgmr.msrb.gmra.mxu1 %vm507_vm0, %v875_v6 }
 0x253   : > { %2214 = vmatpush.bf16.msrb.mxu1 %v4723_v48 }
 0x254   : > { %3657 = vmatmul.msk.bf16.gmra.mxu3 %vm794_vm3, %v4409_v8  ;;  %3773 = vmatmul.msk.bf16.gmra.mxu2 %vm794_vm3, %v3765_v9 }
 0x257   : > { %2215 = vmatpush.bf16.msrb.mxu1 %v4728_v54  ;;  %v840_v15 = vpop.f32.mrf.mxu2  ;;  %v850_v16 = vpop.f32.mrf.mxu3 }
 0x25b   : > { %2216 = vmatpush.bf16.msrb.mxu1 %v4733_v59 }
 0x25f   : > { %2217 = vmatpush.bf16.msrb.mxu1 %v4738_v1  ;;  %v842_v13 = vpop.f32.mrf.mxu2  ;;  %v852_v20 = vpop.f32.mrf.mxu3 }
 0x260   : > { %v876_v11 = vpack.c.bf16 %v842_v13, %v840_v15  ;;  %v878_v34 = vpack.c.bf16 %v852_v20, %v850_v16 }
 0x262   : > { %3711 = vmatmul.msk.bf16.gmra.mxu1 %vm507_vm0, %v876_v11 }
 0x263   : > { %2218 = vmatpush.bf16.msrb.mxu1 %v4744_v7 }
 0x264   : > { %3658 = vmatmul.msk.bf16.gmra.mxu3 %vm794_vm3, %v4410_v21  ;;  %3861 = vmatmul.msk.bf16.vlgmr.msra.gmra.mxu2 %vm794_vm3, %v3853_v22  ;;  %v4445_v22 = vld [vmem:[%s5797_s6 + $0x98] sm:$0xff] }
 0x265   : > { %1812 = vmatpush.bf16.msra.mxu2 %v4445_v22 }
 0x267   : > { %2219 = vmatpush.bf16.msrb.mxu1 %v4751_v17  ;;  %v855_v23 = vpop.f32.mrf.mxu3  ;;  %v1322_v24 = vpop.f32.mrf.mxu2 }
 0x26b   : > { %2220 = vmatpush.bf16.msrb.mxu1 %v4757_v19 }
 0x26f   : > { %2221 = vmatpush.bf16.msrb.mxu1 %v4762_v12  ;;  %v857_v26 = vpop.f32.mrf.mxu3  ;;  %v1324_v28 = vpop.f32.mrf.mxu2 }
 0x270   : > { %v879_v43 = vpack.c.bf16 %v857_v26, %v855_v23  ;;  %v1362_v52 = vpack.c.bf16 %v1324_v28, %v1322_v24  ;;  %v4444_v23 = vld [vmem:[%s5797_s6 + $0x90] sm:$0xff]  ;;  %v4442_v28 = vld [vmem:[%s5797_s6 + $0x80] sm:$0xff] }
 0x271   : > { %1813 = vmatpush.bf16.msra.mxu2 %v4444_v23 }
 0x272   : > { %3712 = vmatmul.msk.bf16.gmra.mxu1 %vm507_vm0, %v877_v27  ;;  %v4443_v27 = vld [vmem:[%s5797_s6 + $0x88] sm:$0xff] }
 0x274   : > { %3659 = vmatmul.msk.bf16.gmra.mxu3 %vm794_vm3, %v4411_v29 }
 0x275   : > { %1814 = vmatpush.bf16.msra.mxu2 %v4443_v27 }
 0x277   : > { %v860_v30 = vpop.f32.mrf.mxu3  ;;  %v1327_v31 = vpop.f32.mrf.mxu2 }
 0x279   : > { %1815 = vmatpush.bf16.msra.mxu2 %v4442_v28 }
 0x27f   : > { %v862_v33 = vpop.f32.mrf.mxu3  ;;  %v1329_v35 = vpop.f32.mrf.mxu2 }
 0x280   : > { %v880_v55 = vpack.c.bf16 %v862_v33, %v860_v30  ;;  %v1363_v62 = vpack.c.bf16 %v1329_v35, %v1327_v31 }
 0x282   : > { %3713 = vmatmul.msk.bf16.gmra.mxu1 %vm507_vm0, %v878_v34 }
 0x284   : > { %3660 = vmatmul.msk.bf16.gmra.mxu3 %vm794_vm3, %v4412_v36 }
 0x287   : > { %v865_v37 = vpop.f32.mrf.mxu3  ;;  %v1332_v38 = vpop.f32.mrf.mxu2 }
 0x28f   : > { %v867_v42 = vpop.f32.mrf.mxu3  ;;  %v1334_v45 = vpop.f32.mrf.mxu2 }
 0x290   : > { %v881_v63 = vpack.c.bf16 %v867_v42, %v865_v37  ;;  %v1364_v8 = vpack.c.bf16 %v1334_v45, %v1332_v38 }
 0x292   : > { %3714 = vmatmul.msk.bf16.gmra.mxu1 %vm507_vm0, %v879_v43 }
 0x294   : > { %3661 = vmatmul.msk.bf16.gmra.mxu3 %vm794_vm3, %v3653_v47 }
 0x297   : > { %v870_v49 = vpop.f32.mrf.mxu3  ;;  %v1337_v50 = vpop.f32.mrf.mxu2 }
 0x29f   : > { %v872_v51 = vpop.f32.mrf.mxu3  ;;  %v1339_v56 = vpop.f32.mrf.mxu2 }
 0x2a0   : > { %v882_v9 = vpack.c.bf16 %v872_v51, %v870_v49  ;;  %v1365_v20 = vpack.c.bf16 %v1339_v56, %v1337_v50 }
 0x2a2   : > { %3715 = vmatmul.msk.bf16.gmra.mxu1 %vm507_vm0, %v880_v55 }
 0x2a4   : > { %3798 = vmatmul.msk.bf16.vlgmr.msra.gmra.mxu3 %vm507_vm0, %v1362_v52 }
 0x2a5   : > { %2474 = vmatpush.bf16.msra.mxu3 %v4723_v48 }
 0x2a7   : > { %v981_v57 = vpop.f32.mrf.mxu3  ;;  %v1342_v58 = vpop.f32.mrf.mxu2 }
 0x2a9   : > { %2475 = vmatpush.bf16.msra.mxu3 %v4728_v54 }
 0x2ad   : > { %2476 = vmatpush.bf16.msra.mxu3 %v4733_v59 }
 0x2af   : > { %v983_v61 = vpop.f32.mrf.mxu3  ;;  %v1344_v2 = vpop.f32.mrf.mxu2 }
 0x2b0   : > { %v1021_v0 = vpack.c.bf16 %v983_v61, %v981_v57  ;;  %v1366_v30 = vpack.c.bf16 %v1344_v2, %v1342_v58  ;;  %v4430_v2 = vld [vmem:[%s5792_s1 + $0xc0] sm:$0xff] }
 0x2b1   : > { %2477 = vmatpush.bf16.msra.mxu3 %v4738_v1 }
 0x2b2   : > { %3686 = vmatmul.msk.bf16.vlgmr.msrb.gmra.mxu0 %vm507_vm0, %v1021_v0  ;;  %3716 = vmatmul.msk.bf16.gmra.mxu1 %vm507_vm0, %v881_v63 }
 0x2b4   : > { %3799 = vmatmul.msk.bf16.gmra.mxu3 %vm507_vm0, %v1363_v62  ;;  %v4446_v62 = vld [vmem:[%s5792_s1 + $0x140] sm:$0xff] }
 0x2b5   : > { %2478 = vmatpush.bf16.msra.mxu3 %v4744_v7 }
 0x2b7   : > { %v986_v4 = vpop.f32.mrf.mxu3  ;;  %v1347_v5 = vpop.f32.mrf.mxu2 }
 0x2b9   : > { %2479 = vmatpush.bf16.msra.mxu3 %v4751_v17 }
 0x2bd   : > { %2480 = vmatpush.bf16.msra.mxu3 %v4757_v19 }
 0x2bf   : > { %v988_v6 = vpop.f32.mrf.mxu3  ;;  %v1349_v16 = vpop.f32.mrf.mxu2 }
 0x2c0   : > { %v1022_v15 = vpack.c.bf16 %v988_v6, %v986_v4  ;;  %v1367_v37 = vpack.c.bf16 %v1349_v16, %v1347_v5 }
 0x2c1   : > { %2481 = vmatpush.bf16.msra.mxu3 %v4762_v12 }
 0x2c2   : > { %3687 = vmatmul.msk.bf16.gmra.mxu0 %vm507_vm0, %v1022_v15  ;;  %3717 = vmatmul.msk.bf16.gmra.mxu1 %vm507_vm0, %v882_v9 }
 0x2c4   : > { %3800 = vmatmul.msk.bf16.gmra.mxu3 %vm507_vm0, %v1364_v8  ;;  %v4447_v8 = vld [vmem:[%s5792_s1 + $0x148] sm:$0xff] }
 0x2c7   : > { %v991_v18 = vpop.f32.mrf.mxu3  ;;  %v1352_v14 = vpop.f32.mrf.mxu2 }
 0x2cf   : > { %v993_v13 = vpop.f32.mrf.mxu3  ;;  %v1354_v21 = vpop.f32.mrf.mxu2 }
 0x2d0   : > { %v1023_v11 = vpack.c.bf16 %v993_v13, %v991_v18  ;;  %v1368_v45 = vpack.c.bf16 %v1354_v21, %v1352_v14  ;;  %v1192_v55 = vpop.f32.mrf.mxu1 }
 0x2d2   : > { %3688 = vmatmul.msk.bf16.gmra.mxu0 %vm507_vm0, %v1023_v11  ;;  %v4431_v11 = vld [vmem:[%s5792_s1 + $0xc8] sm:$0xff] }
 0x2d4   : > { %3801 = vmatmul.msk.bf16.gmra.mxu3 %vm507_vm0, %v1365_v20 }
 0x2d7   : > { %v996_v24 = vpop.f32.mrf.mxu3  ;;  %v1357_v26 = vpop.f32.mrf.mxu2 }
 0x2d8   : > { %v1194_v57 = vpop.f32.mrf.mxu1 }
 0x2df   : > { %v998_v29 = vpop.f32.mrf.mxu3  ;;  %v1359_v33 = vpop.f32.mrf.mxu2 }
 0x2e0   : > { %v1024_v31 = vpack.c.bf16 %v998_v29, %v996_v24  ;;  %v1369_v51 = vpack.c.bf16 %v1359_v33, %v1357_v26  ;;  %v1197_v63 = vpop.f32.mrf.mxu1  ;;  %v4448_v24 = vld [vmem:[%s5792_s1 + $0x150] sm:$0xff] }
 0x2e1   : > { %v4432_v33 = vld [vmem:[%s5792_s1 + $0xd0] sm:$0xff] }
 0x2e2   : > { %3689 = vmatmul.msk.bf16.gmra.mxu0 %vm507_vm0, %v1024_v31 }
 0x2e4   : > { %3802 = vmatmul.msk.bf16.gmra.mxu3 %vm507_vm0, %v1366_v30 }
 0x2e7   : > { %v1001_v34 = vpop.f32.mrf.mxu3  ;;  %v1617_v35 = vpop.f32.mrf.mxu2 }
 0x2e8   : > { %v1199_v9 = vpop.f32.mrf.mxu1 }
 0x2ef   : > { %v1003_v36 = vpop.f32.mrf.mxu3  ;;  %v1619_v40 = vpop.f32.mrf.mxu2 }
 0x2f0   : > { %v1025_v38 = vpack.c.bf16 %v1003_v36, %v1001_v34  ;;  %v1629_v41 = vpack.c.bf16 %v1619_v40, %v1617_v35  ;;  %v1202_v20 = vpop.f32.mrf.mxu1 }
 0x2f2   : > { %3690 = vmatmul.msk.bf16.gmra.mxu0 %vm507_vm0, %v1025_v38  ;;  %3893 = vmatmul.msk.bf16.vlgmr.msrb.gmra.mxu2 %vm507_vm0, %v1629_v41  ;;  %v4449_v38 = vld [vmem:[%s5792_s1 + $0x158] sm:$0xff] }
 0x2f4   : > { %3803 = vmatmul.msk.bf16.gmra.mxu3 %vm507_vm0, %v1367_v37 }
 0x2f7   : > { %v1006_v42 = vpop.f32.mrf.mxu3 }
 0x2f8   : > { %v1204_v27 = vpop.f32.mrf.mxu1 }
 0x2ff   : > { %v1008_v43 = vpop.f32.mrf.mxu3 }
 0x300   : > { %v1026_v47 = vpack.c.bf16 %v1008_v43, %v1006_v42  ;;  %v1207_v34 = vpop.f32.mrf.mxu1 }
 0x302   : > { %3691 = vmatmul.msk.bf16.gmra.mxu0 %vm507_vm0, %v1026_v47  ;;  %3918 = vmatmul.msk.bf16.vlgmr.msra.gmra.mxu2 %vm507_vm0, %v4762_v12 }
 0x304   : > { %3804 = vmatmul.msk.bf16.gmra.mxu3 %vm507_vm0, %v1368_v45 }
 0x307   : > { %v1011_v49 = vpop.f32.mrf.mxu3 }
 0x308   : > { %v5050_v45 = vpop.f32.mrf.mxu1 }
 0x30f   : > { %v1013_v50 = vpop.f32.mrf.mxu3 }
 0x310   : > { %v1027_v52 = vpack.c.bf16 %v1013_v50, %v1011_v49  ;;  %v4433_v49 = vld [vmem:[%s5792_s1 + $0xd8] sm:$0xff] }
 0x312   : > { %3692 = vmatmul.msk.bf16.gmra.mxu0 %vm507_vm0, %v1027_v52  ;;  %3919 = vmatmul.msk.bf16.gmra.mxu2 %vm507_vm0, %v4757_v19 }
 0x314   : > { %3805 = vmatmul.msk.bf16.gmra.mxu3 %vm507_vm0, %v1369_v51 }
 0x317   : > { %v1016_v56 = vpop.f32.mrf.mxu3 }
 0x31f   : > { %v1018_v58 = vpop.f32.mrf.mxu3 }
 0x320   : > { %v1028_v61 = vpack.c.bf16 %v1018_v58, %v1016_v56 }
 0x322   : > { %3693 = vmatmul.msk.bf16.gmra.mxu0 %vm507_vm0, %v1028_v61  ;;  %3920 = vmatmul.msk.bf16.gmra.mxu2 %vm507_vm0, %v4751_v17 }
 0x324   : > { %3974 = vmatmul.msk.bf16.vlgmr.msrb.gmra.mxu3 %vm794_vm3, %v4446_v62 }
 0x327   : > { %v1436_v0 = vpop.f32.mrf.mxu3 }
 0x32f   : > { %v1095_v4 = vpop.f32.mrf.mxu0  ;;  %v1438_v6 = vpop.f32.mrf.mxu3 }
 0x330   : > { %v1193_v5 = vadd.f32 %v1192_v55, %v1095_v4  ;;  %v4450_v55 = vld [vmem:[%s5792_s1 + $0x160] sm:$0xff] }
 0x332   : > { %3854 = vmatmul.msk.bf16.vlgmr.msra.gmra.mxu0 %vm794_vm3, %v4430_v2  ;;  %v5017_v15 = vadd.f32 %v1436_v0, %v1193_v5  ;;  %3921 = vmatmul.msk.bf16.gmra.mxu2 %vm507_vm0, %v4744_v7  ;;  %v4451_v5 = vld [vmem:[%s5792_s1 + $0x168] sm:$0xff] }
 0x334   : > { %3975 = vmatmul.msk.bf16.gmra.mxu3 %vm794_vm3, %v4447_v8 }
 0x337   : > { %v1097_v16 = vpop.f32.mrf.mxu0  ;;  %v1441_v14 = vpop.f32.mrf.mxu3 }
 0x338   : > { %v1195_v18 = vadd.f32 %v1194_v57, %v1097_v16  ;;  %v1212_v57 = vpop.f32.mrf.mxu1 }
 0x33a   : > { %v5022_v13 = vadd.f32 %v1438_v6, %v1195_v18 }
 0x33f   : > { %v1100_v21 = vpop.f32.mrf.mxu0  ;;  %v1443_v23 = vpop.f32.mrf.mxu3 }
 0x340   : > { %v1198_v22 = vadd.f32 %v1197_v63, %v1100_v21  ;;  %v5070_v62 = vpop.f32.mrf.mxu1  ;;  %v4434_v63 = vld [vmem:[%s5792_s1 + $0xe0] sm:$0xff] }
 0x342   : > { %3855 = vmatmul.msk.bf16.gmra.mxu0 %vm794_vm3, %v4431_v11  ;;  %v5031_v26 = vadd.f32 %v1441_v14, %v1198_v22  ;;  %3922 = vmatmul.msk.bf16.gmra.mxu2 %vm507_vm0, %v4738_v1 }
 0x344   : > { %3976 = vmatmul.msk.bf16.gmra.mxu3 %vm794_vm3, %v4448_v24  ;;  %v4457_v24 = vld [vmem:[%s5797_s6 + $0xb8] sm:$0xff] }
 0x345   : > { %2072 = vmatpush.bf16.msrb.mxu0 %v4457_v24 }
 0x347   : > { %v1102_v28 = vpop.f32.mrf.mxu0  ;;  %v1446_v30 = vpop.f32.mrf.mxu3 }
 0x348   : > { %v1200_v29 = vadd.f32 %v1199_v9, %v1102_v28  ;;  %v1217_v9 = vpop.f32.mrf.mxu1 }
 0x34a   : > { %v5036_v31 = vadd.f32 %v1443_v23, %v1200_v29  ;;  %v4456_v29 = vld [vmem:[%s5797_s6 + $0xb0] sm:$0xff] }
 0x34b   : > { %2073 = vmatpush.bf16.msrb.mxu0 %v4456_v29 }
 0x34f   : > { %v1105_v35 = vpop.f32.mrf.mxu0  ;;  %v1448_v37 = vpop.f32.mrf.mxu3 }
 0x350   : > { %v1203_v36 = vadd.f32 %v1202_v20, %v1105_v35  ;;  %v4435_v20 = vld [vmem:[%s5792_s1 + $0xe8] sm:$0xff]  ;;  %v5098_v23 = vpop.f32.mrf.mxu1 }
 0x352   : > { %3856 = vmatmul.msk.bf16.gmra.mxu0 %vm794_vm3, %v4432_v33  ;;  %v5045_v40 = vadd.f32 %v1446_v30, %v1203_v36  ;;  %3923 = vmatmul.msk.bf16.gmra.mxu2 %vm507_vm0, %v4733_v59  ;;  %v3972_v36 = vld [vmem:[%s5792_s1 + $0x178] sm:$0xf] }
 0x354   : > { %3977 = vmatmul.msk.bf16.gmra.mxu3 %vm794_vm3, %v4449_v38 }
 0x357   : > { %v1107_v41 = vpop.f32.mrf.mxu0  ;;  %v1451_v43 = vpop.f32.mrf.mxu3 }
 0x358   : > { %v1205_v42 = vadd.f32 %v1204_v27, %v1107_v41  ;;  %v1222_v35 = vpop.f32.mrf.mxu1  ;;  %v4436_v41 = vld [vmem:[%s5792_s1 + $0xf0] sm:$0xff] }
 0x35a   : > { %v5052_v47 = vadd.f32 %v1448_v37, %v1205_v42  ;;  %v4453_v37 = vld [vmem:[%s5792_s1 + $0x178] sm:$0x10]  ;;  %v4454_v42 = vld [vmem:[%s5797_s6 + $0xa0] sm:$0xff] }
 0x35f   : > { %v1110_v50 = vpop.f32.mrf.mxu0  ;;  %v5057_v52 = vpop.f32.mrf.mxu3 }
 0x360   : > { %v1208_v51 = vadd.f32 %v1207_v34, %v1110_v50  ;;  %v4455_v34 = vld [vmem:[%s5797_s6 + $0xa8] sm:$0xff] }
 0x361   : > { %2074 = vmatpush.bf16.msrb.mxu0 %v4455_v34 }
 0x362   : > { %3857 = vmatmul.msk.bf16.gmra.mxu0 %vm794_vm3, %v4433_v49  ;;  %v5063_v56 = vadd.f32 %v1451_v43, %v1208_v51  ;;  %3924 = vmatmul.msk.bf16.gmra.mxu2 %vm507_vm0, %v4728_v54  ;;  %v3973_v51 = vor.u32 %v4453_v37, %v3972_v36 }
 0x364   : > { %3978 = vmatmul.msk.bf16.gmra.mxu3 %vm794_vm3, %v4450_v55 }
 0x365   : > { %2075 = vmatpush.bf16.msrb.mxu0 %v4454_v42 }
 0x367   : > { %v5068_v58 = vpop.f32.mrf.mxu0  ;;  %v1456_v61 = vpop.f32.mrf.mxu3 }
 0x36f   : > { %v1115_v0 = vpop.f32.mrf.mxu0  ;;  %v5075_v4 = vpop.f32.mrf.mxu3 }
 0x370   : > { %v1213_v2 = vadd.f32 %v1212_v57, %v1115_v0  ;;  %v5137_v57 = vpop.f32.mrf.mxu1 }
 0x372   : > { %3858 = vmatmul.msk.bf16.gmra.mxu0 %vm794_vm3, %v4434_v63  ;;  %v5081_v6 = vadd.f32 %v1456_v61, %v1213_v2  ;;  %3925 = vmatmul.msk.bf16.gmra.mxu2 %vm507_vm0, %v4720_v44  ;;  %v4452_v44 = vld [vmem:[%s5792_s1 + $0x170] sm:$0xff] }
 0x374   : > { %3979 = vmatmul.msk.bf16.gmra.mxu3 %vm794_vm3, %v4451_v5 }
 0x375   : > { %v1731_v8 = vpop.f32.mrf.mxu2 }
 0x377   : > { %v5086_v16 = vpop.f32.mrf.mxu0  ;;  %v1461_v18 = vpop.f32.mrf.mxu3 }
 0x378   : > { %v1227_v5 = vpop.f32.mrf.mxu1 }
 0x37d   : > { %v5088_v14 = vpop.f32.mrf.mxu2 }
 0x37f   : > { %v1120_v11 = vpop.f32.mrf.mxu0  ;;  %v5093_v22 = vpop.f32.mrf.mxu3 }
 0x380   : > { %v1218_v21 = vadd.f32 %v1217_v9, %v1120_v11 }
 0x382   : > { %3859 = vmatmul.msk.bf16.gmra.mxu0 %vm794_vm3, %v4435_v20  ;;  %v5104_v27 = vadd.f32 %v1461_v18, %v1218_v21 }
 0x384   : > { %3980 = vmatmul.msk.bf16.gmra.mxu3 %vm794_vm3, %v4452_v44 }
 0x385   : > { %v5107_v28 = vpop.f32.mrf.mxu2 }
 0x387   : > { %v5112_v30 = vpop.f32.mrf.mxu0  ;;  %v1466_v33 = vpop.f32.mrf.mxu3 }
 0x38d   : > { %v5123_v38 = vpop.f32.mrf.mxu2 }
 0x38f   : > { %v1125_v43 = vpop.f32.mrf.mxu0  ;;  %v5131_v50 = vpop.f32.mrf.mxu3 }
 0x390   : > { %v1223_v49 = vadd.f32 %v1222_v35, %v1125_v43 }
 0x392   : > { %3860 = vmatmul.msk.bf16.gmra.mxu0 %vm794_vm3, %v4436_v41  ;;  %v5134_v55 = vadd.f32 %v1466_v33, %v1223_v49 }
 0x394   : > { %3981 = vmatmul.msk.bf16.gmra.mxu3 %vm794_vm3, %v3973_v51 }
 0x395   : > { %v5139_v61 = vpop.f32.mrf.mxu2 }
 0x397   : > { %v5141_v63 = vpop.f32.mrf.mxu0  ;;  %v1471_v0 = vpop.f32.mrf.mxu3 }
 0x39d   : > { %v5143_v2 = vpop.f32.mrf.mxu2 }
 0x39f   : > { %v1130_v9 = vpop.f32.mrf.mxu0  ;;  %v5145_v20 = vpop.f32.mrf.mxu3 }
 0x3a0   : > { %v1228_v18 = vadd.f32 %v1227_v5, %v1130_v9 }
 0x3a2   : > { %v1490_v11 = vadd.f32 %v1471_v0, %v1228_v18 }
 0x3a4   : > { %v1750_v21 = vadd.f32 %v1731_v8, %v1490_v11 }
 0x3a5   : > { %v5147_v44 = vpop.f32.mrf.mxu2 }
 0x3a7   : > { %v5149_v24 = vpop.f32.mrf.mxu0  ;;  %v1963_v29 = vpop.f32.mrf.mxu3 }
 0x3ad   : > { %v5151_v33 = vpop.f32.mrf.mxu2 }
 0x3af   : > { %v1582_v34 = vpop.f32.mrf.mxu0  ;;  %v1965_v35 = vpop.f32.mrf.mxu3 }
 0x3b0   : > { %v2003_v36 = vpack.c.bf16 %v1965_v35, %v1963_v29 }
 0x3b2   : > { %4006 = vmatmul.msk.bf16.vlgmr.msrb.gmra.mxu0 %vm507_vm0, %v2003_v36 }
 0x3b5   : > { %v5154_v37 = vpop.f32.mrf.mxu2 }
 0x3b7   : > { %v1584_v41 = vpop.f32.mrf.mxu0  ;;  %v1968_v43 = vpop.f32.mrf.mxu3 }
 0x3b8   : > { %v1622_v42 = vpack.c.bf16 %v1584_v41, %v1582_v34 }
 0x3ba   : > { %3886 = vmatmul.msk.bf16.vlgmr.msra.gmra.mxu1 %vm507_vm0, %v1622_v42 }
 0x3bb   : > { %2734 = vmatpush.bf16.msra.mxu1 %v4723_v48 }
 0x3bd   : > { %v5158_v8 = vpop.f32.mrf.mxu2 }
 0x3bf   : > { %2735 = vmatpush.bf16.msra.mxu1 %v4728_v54  ;;  %v1587_v49 = vpop.f32.mrf.mxu0  ;;  %v1970_v51 = vpop.f32.mrf.mxu3 }
 0x3c0   : > { %v2004_v0 = vpack.c.bf16 %v1970_v51, %v1968_v43 }
 0x3c2   : > { %4007 = vmatmul.msk.bf16.gmra.mxu0 %vm507_vm0, %v2004_v0 }
 0x3c3   : > { %2736 = vmatpush.bf16.msra.mxu1 %v4733_v59 }
 0x3c5   : > { %v5163_v5 = vpop.f32.mrf.mxu2 }
 0x3c7   : > { %2737 = vmatpush.bf16.msra.mxu1 %v4738_v1  ;;  %v1589_v9 = vpop.f32.mrf.mxu0  ;;  %v1973_v11 = vpop.f32.mrf.mxu3 }
 0x3c8   : > { %v1623_v18 = vpack.c.bf16 %v1589_v9, %v1587_v49 }
 0x3ca   : > { %3887 = vmatmul.msk.bf16.gmra.mxu1 %vm507_vm0, %v1623_v18 }
 0x3cb   : > { %2738 = vmatpush.bf16.msra.mxu1 %v4744_v7 }
 0x3cd   : > { %v5168_v48 = vpop.f32.mrf.mxu2 }
 0x3cf   : > { %2739 = vmatpush.bf16.msra.mxu1 %v4751_v17  ;;  %v1592_v54 = vpop.f32.mrf.mxu0  ;;  %v1975_v29 = vpop.f32.mrf.mxu3 }
 0x3d0   : > { %v2005_v34 = vpack.c.bf16 %v1975_v29, %v1973_v11 }
 0x3d2   : > { %4008 = vmatmul.msk.bf16.gmra.mxu0 %vm507_vm0, %v2005_v34 }
 0x3d3   : > { %2740 = vmatpush.bf16.msra.mxu1 %v4757_v19 }
 0x3d5   : > { %v5173_v59 = vpop.f32.mrf.mxu2 }
 0x3d7   : > { %2741 = vmatpush.bf16.msra.mxu1 %v4762_v12  ;;  %v1594_v1 = vpop.f32.mrf.mxu0  ;;  %v1978_v36 = vpop.f32.mrf.mxu3 }
 0x3d8   : > { %v1624_v35 = vpack.c.bf16 %v1594_v1, %v1592_v54 }
 0x3da   : > { %3888 = vmatmul.msk.bf16.gmra.mxu1 %vm507_vm0, %v1624_v35 }
 0x3dd   : > { %v5177_v7 = vpop.f32.mrf.mxu2 }
 0x3df   : > { %v1597_v41 = vpop.f32.mrf.mxu0  ;;  %v1980_v17 = vpop.f32.mrf.mxu3 }
 0x3e0   : > { %v2006_v42 = vpack.c.bf16 %v1980_v17, %v1978_v36 }
 0x3e2   : > { %4009 = vmatmul.msk.bf16.gmra.mxu0 %vm507_vm0, %v2006_v42 }
 0x3e5   : > { %v5180_v43 = vpop.f32.mrf.mxu2 }
 0x3e7   : > { %v1599_v49 = vpop.f32.mrf.mxu0  ;;  %v1983_v51 = vpop.f32.mrf.mxu3 }
 0x3e8   : > { %v1625_v19 = vpack.c.bf16 %v1599_v49, %v1597_v41 }
 0x3ea   : > { %3889 = vmatmul.msk.bf16.gmra.mxu1 %vm507_vm0, %v1625_v19 }
 0x3ed   : > { %v5183_v12 = vpop.f32.mrf.mxu2 }
 0x3ef   : > { %v1602_v0 = vpop.f32.mrf.mxu0  ;;  %v1985_v9 = vpop.f32.mrf.mxu3 }
 0x3f0   : > { %v2007_v18 = vpack.c.bf16 %v1985_v9, %v1983_v51 }
 0x3f2   : > { %4010 = vmatmul.msk.bf16.gmra.mxu0 %vm507_vm0, %v2007_v18 }
 0x3f5   : > { %v1852_v11 = vpop.f32.mrf.mxu2 }
 0x3f6   : > { %v5186_v54 = vadd.f32 %v1852_v11, %v1750_v21  ;;  %v4470_v21 = vld [vmem:[%s5792_s1 + $0x1c0] sm:$0xff] }
 0x3f7   : > { %v1604_v29 = vpop.f32.mrf.mxu0  ;;  %v1988_v1 = vpop.f32.mrf.mxu3  ;;  %4150 = vmatmul.msk.bf16.vlgmr.msra.gmra.mxu3 %vm794_vm3, %v4470_v21  ;;  %v4459_v21 = vld [vmem:[%s5792_s1 + $0x188] sm:$0xff] }
 0x3f8   : > { %v1626_v34 = vpack.c.bf16 %v1604_v29, %v1602_v0  ;;  %v4469_v0 = vld [vmem:[%s5797_s6 + $0xd8] sm:$0xff] }
 0x3f9   : > { %2332 = vmatpush.bf16.msrb.mxu2 %v4469_v0 }
 0x3fa   : > { %3890 = vmatmul.msk.bf16.gmra.mxu1 %vm507_vm0, %v1626_v34  ;;  %v4471_v34 = vld [vmem:[%s5792_s1 + $0x1c8] sm:$0xff] }
 0x3ff   : > { %v1607_v35 = vpop.f32.mrf.mxu0  ;;  %v1990_v36 = vpop.f32.mrf.mxu3 }
 0x400   : > { %v2008_v41 = vpack.c.bf16 %v1990_v36, %v1988_v1  ;;  %v4458_v36 = vld [vmem:[%s5792_s1 + $0x180] sm:$0xff] }
 0x402   : > { %4011 = vmatmul.msk.bf16.gmra.mxu0 %vm507_vm0, %v2008_v41  ;;  %v4472_v41 = vld [vmem:[%s5792_s1 + $0x1d0] sm:$0xff] }
 0x407   : > { %v1609_v17 = vpop.f32.mrf.mxu0  ;;  %v1993_v49 = vpop.f32.mrf.mxu3  ;;  %4151 = vmatmul.msk.bf16.gmra.mxu3 %vm794_vm3, %v4471_v34 }
 0x408   : > { %v1627_v42 = vpack.c.bf16 %v1609_v17, %v1607_v35  ;;  %v5213_v17 = vpop.f32.mrf.mxu1 }
 0x40a   : > { %3891 = vmatmul.msk.bf16.gmra.mxu1 %vm507_vm0, %v1627_v42 }
 0x40f   : > { %v1612_v19 = vpop.f32.mrf.mxu0  ;;  %v1995_v51 = vpop.f32.mrf.mxu3 }
 0x410   : > { %v2009_v9 = vpack.c.bf16 %v1995_v51, %v1993_v49  ;;  %v4468_v49 = vld [vmem:[%s5797_s6 + $0xd0] sm:$0xff] }
 0x411   : > { %2333 = vmatpush.bf16.msrb.mxu2 %v4468_v49 }
 0x412   : > { %4012 = vmatmul.msk.bf16.gmra.mxu0 %vm507_vm0, %v2009_v9 }
 0x417   : > { %v1614_v18 = vpop.f32.mrf.mxu0  ;;  %v1998_v29 = vpop.f32.mrf.mxu3  ;;  %4152 = vmatmul.msk.bf16.gmra.mxu3 %vm794_vm3, %v4472_v41 }
 0x418   : > { %v1628_v11 = vpack.c.bf16 %v1614_v18, %v1612_v19  ;;  %v4473_v18 = vld [vmem:[%s5792_s1 + $0x1d8] sm:$0xff] }
 0x41a   : > { %3892 = vmatmul.msk.bf16.gmra.mxu1 %vm507_vm0, %v1628_v11 }
 0x41f   : > { %v2000_v1 = vpop.f32.mrf.mxu3 }
 0x420   : > { %v2010_v35 = vpack.c.bf16 %v2000_v1, %v1998_v29 }
 0x422   : > { %4013 = vmatmul.msk.bf16.gmra.mxu0 %vm507_vm0, %v2010_v35 }
 0x427   : > { %4153 = vmatmul.msk.bf16.gmra.mxu3 %vm794_vm3, %v4473_v18 }
 0x42a   : > { %4062 = vmatmul.msk.bf16.vlgmr.msrb.gmra.mxu1 %vm794_vm3, %v4458_v36 }
 0x42f   : > { %v2077_v42 = vpop.f32.mrf.mxu0 }
 0x437   : > { %v1696_v19 = vpop.f32.mrf.mxu1  ;;  %v5222_v0 = vpop.f32.mrf.mxu0 }
 0x438   : > { %v1736_v51 = vadd.f32 %v1696_v19, %v5017_v15  ;;  %v4460_v15 = vld [vmem:[%s5792_s1 + $0x190] sm:$0xff] }
 0x43a   : > { %v1857_v9 = vadd.f32 %v5107_v28, %v1736_v51  ;;  %4063 = vmatmul.msk.bf16.gmra.mxu1 %vm794_vm3, %v4459_v21 }
 0x43c   : > { %v5230_v11 = vadd.f32 %v2077_v42, %v1857_v9  ;;  %v4474_v42 = vld [vmem:[%s5792_s1 + $0x1e0] sm:$0xff] }
 0x43d   : > { %4154 = vmatmul.msk.bf16.gmra.mxu3 %vm794_vm3, %v4474_v42 }
 0x43f   : > { %v1698_v29 = vpop.f32.mrf.mxu1  ;;  %v2082_v1 = vpop.f32.mrf.mxu0 }
 0x440   : > { %v5233_v34 = vadd.f32 %v1698_v29, %v5022_v13 }
 0x447   : > { %v1701_v28 = vpop.f32.mrf.mxu1  ;;  %v5239_v36 = vpop.f32.mrf.mxu0 }
 0x448   : > { %v1738_v35 = vadd.f32 %v1701_v28, %v5031_v26  ;;  %v4467_v26 = vld [vmem:[%s5797_s6 + $0xc8] sm:$0xff] }
 0x449   : > { %2334 = vmatpush.bf16.msrb.mxu2 %v4467_v26 }
 0x44a   : > { %v1859_v41 = vadd.f32 %v5139_v61, %v1738_v35  ;;  %4064 = vmatmul.msk.bf16.gmra.mxu1 %vm794_vm3, %v4460_v15  ;;  %v4461_v61 = vld [vmem:[%s5792_s1 + $0x198] sm:$0xff] }
 0x44c   : > { %v5247_v13 = vadd.f32 %v2082_v1, %v1859_v41 }
 0x44f   : > { %v1703_v49 = vpop.f32.mrf.mxu1  ;;  %v2087_v19 = vpop.f32.mrf.mxu0 }
 0x450   : > { %v5250_v21 = vadd.f32 %v1703_v49, %v5036_v31  ;;  %v4475_v31 = vld [vmem:[%s5792_s1 + $0x1e8] sm:$0xff]  ;;  %v1210_v49 = vadd.f32 %v5050_v45, %v5068_v58  ;;  %v4466_v45 = vld [vmem:[%s5797_s6 + $0xc0] sm:$0xff] }
 0x451   : > { %4155 = vmatmul.msk.bf16.gmra.mxu3 %vm794_vm3, %v4475_v31  ;;  %2335 = vmatpush.bf16.msrb.mxu2 %v4466_v45  ;;  %v4463_v58 = vld [vmem:[%s5792_s1 + $0x1a8] sm:$0xff]  ;;  %v4480_v45 = vld [vmem:[%s5797_s6 + $0xf0] sm:$0xff] }
 0x457   : > { %v1706_v51 = vpop.f32.mrf.mxu1  ;;  %v5259_v18 = vpop.f32.mrf.mxu0 }
 0x458   : > { %v1740_v9 = vadd.f32 %v1706_v51, %v5045_v40  ;;  %v4462_v40 = vld [vmem:[%s5792_s1 + $0x1a0] sm:$0xff] }
 0x45a   : > { %v1861_v29 = vadd.f32 %v5147_v44, %v1740_v9  ;;  %4065 = vmatmul.msk.bf16.gmra.mxu1 %vm794_vm3, %v4461_v61  ;;  %v1483_v61 = vadd.f32 %v5057_v52, %v1210_v49 }
 0x45c   : > { %v5267_v1 = vadd.f32 %v2087_v19, %v1861_v29 }
 0x45f   : > { %v1708_v15 = vpop.f32.mrf.mxu1  ;;  %v2092_v35 = vpop.f32.mrf.mxu0 }
 0x460   : > { %v5270_v28 = vadd.f32 %v1708_v15, %v5052_v47  ;;  %v4476_v47 = vld [vmem:[%s5792_s1 + $0x1f0] sm:$0xff]  ;;  %v4148_v15 = vld [vmem:[%s5792_s1 + $0x1f8] sm:$0xf] }
 0x461   : > { %4156 = vmatmul.msk.bf16.gmra.mxu3 %vm794_vm3, %v4476_v47 }
 0x467   : > { %v1711_v44 = vpop.f32.mrf.mxu1  ;;  %v5276_v42 = vpop.f32.mrf.mxu0 }
 0x468   : > { %v1742_v41 = vadd.f32 %v1711_v44, %v5063_v56 }
 0x46a   : > { %v1863_v19 = vadd.f32 %v5154_v37, %v1742_v41  ;;  %4066 = vmatmul.msk.bf16.gmra.mxu1 %vm794_vm3, %v4462_v40 }
 0x46c   : > { %v5286_v26 = vadd.f32 %v2092_v35, %v1863_v19  ;;  %v4477_v35 = vld [vmem:[%s5792_s1 + $0x1f8] sm:$0x10] }
 0x46d   : > { %v4149_v40 = vor.u32 %v4477_v35, %v4148_v15  ;;  %v4465_v15 = vld [vmem:[%s5792_s1 + $0x1b8] sm:$0x10] }
 0x46f   : > { %v1713_v56 = vpop.f32.mrf.mxu1  ;;  %v2097_v9 = vpop.f32.mrf.mxu0 }
 0x470   : > { %v5289_v51 = vadd.f32 %v1713_v56, %v1483_v61  ;;  %v4481_v56 = vld [vmem:[%s5797_s6 + $0xf8] sm:$0xff] }
 0x471   : > { %4157 = vmatmul.msk.bf16.gmra.mxu3 %vm794_vm3, %v4149_v40  ;;  %2592 = vmatpush.bf16.msra.mxu0 %v4481_v56  ;;  %v4478_v40 = vld [vmem:[%s5797_s6 + $0xe0] sm:$0xff] }
 0x475   : > { %2593 = vmatpush.bf16.msra.mxu0 %v4480_v45 }
 0x477   : > { %v1716_v37 = vpop.f32.mrf.mxu1  ;;  %v5298_v31 = vpop.f32.mrf.mxu0 }
 0x478   : > { %v1744_v29 = vadd.f32 %v1716_v37, %v5081_v6 }
 0x47a   : > { %v1865_v52 = vadd.f32 %v5163_v5, %v1744_v29  ;;  %4067 = vmatmul.msk.bf16.gmra.mxu1 %vm794_vm3, %v4463_v58  ;;  %v4464_v5 = vld [vmem:[%s5792_s1 + $0x1b0] sm:$0xff]  ;;  %v2483_v37 = vpop.f32.mrf.mxu3  ;;  %v4479_v29 = vld [vmem:[%s5797_s6 + $0xe8] sm:$0xff] }
 0x47b   : > { %2594 = vmatpush.bf16.msra.mxu0 %v4479_v29 }
 0x47c   : > { %v5308_v44 = vadd.f32 %v2097_v9, %v1865_v52  ;;  %v4060_v52 = vld [vmem:[%s5792_s1 + $0x1b8] sm:$0xf] }
 0x47d   : > { %v4061_v35 = vor.u32 %v4465_v15, %v4060_v52 }
 0x47f   : > { %v5311_v6 = vpop.f32.mrf.mxu1  ;;  %v2102_v41 = vpop.f32.mrf.mxu0  ;;  %2595 = vmatpush.bf16.msra.mxu0 %v4478_v40 }
 0x487   : > { %v1721_v49 = vpop.f32.mrf.mxu1  ;;  %v5317_v47 = vpop.f32.mrf.mxu0 }
 0x488   : > { %v1746_v19 = vadd.f32 %v1721_v49, %v5104_v27 }
 0x48a   : > { %v1867_v61 = vadd.f32 %v5173_v59, %v1746_v19  ;;  %4068 = vmatmul.msk.bf16.gmra.mxu1 %vm794_vm3, %v4464_v5  ;;  %v4493_v59 = vld [vmem:[%s5797_s6 + $0x118] sm:$0xff]  ;;  %v2485_v19 = vpop.f32.mrf.mxu3 }
 0x48b   : > { %2852 = vmatpush.bf16.msra.mxu2 %v4493_v59 }
 0x48c   : > { %v5324_v9 = vadd.f32 %v2102_v41, %v1867_v61  ;;  %v2523_v61 = vpack.c.bf16 %v2485_v19, %v2483_v37 }
 0x48e   : > { %4182 = vmatmul.msk.bf16.vlgmr.msra.gmra.mxu0 %vm507_vm0, %v2523_v61 }
 0x48f   : > { %v5329_v58 = vpop.f32.mrf.mxu1  ;;  %v2107_v27 = vpop.f32.mrf.mxu0 }
 0x492   : > { %v2488_v52 = vpop.f32.mrf.mxu3 }
 0x497   : > { %v1726_v41 = vpop.f32.mrf.mxu1  ;;  %v5347_v49 = vpop.f32.mrf.mxu0 }
 0x498   : > { %v1748_v5 = vadd.f32 %v1726_v41, %v5134_v55  ;;  %v4482_v55 = vld [vmem:[%s5792_s1 + $0x200] sm:$0xff] }
 0x49a   : > { %v1869_v56 = vadd.f32 %v5180_v43, %v1748_v5  ;;  %4069 = vmatmul.msk.bf16.gmra.mxu1 %vm794_vm3, %v4061_v35  ;;  %v2490_v40 = vpop.f32.mrf.mxu3  ;;  %v4483_v5 = vld [vmem:[%s5792_s1 + $0x208] sm:$0xff] }
 0x49b   : > { %v2524_v43 = vpack.c.bf16 %v2490_v40, %v2488_v52 }
 0x49c   : > { %v5352_v45 = vadd.f32 %v2107_v27, %v1869_v56 }
 0x49e   : > { %4183 = vmatmul.msk.bf16.gmra.mxu0 %vm507_vm0, %v2524_v43 }
 0x49f   : > { %v5354_v59 = vpop.f32.mrf.mxu1  ;;  %v2112_v29 = vpop.f32.mrf.mxu0 }
 0x4a0   : > { %v5357_v15 = vadd.f32 %v2112_v29, %v5186_v54  ;;  %v4492_v54 = vld [vmem:[%s5797_s6 + $0x110] sm:$0xff] }
 0x4a1   : > { %2853 = vmatpush.bf16.msra.mxu2 %v4492_v54 }
 0x4a2   : > { %v2493_v41 = vpop.f32.mrf.mxu3 }
 0x4a7   : > { %v2223_v37 = vpop.f32.mrf.mxu1 }
 0x4aa   : > { %4238 = vmatmul.msk.bf16.vlgmr.msra.gmra.mxu1 %vm794_vm3, %v4482_v55  ;;  %v2495_v61 = vpop.f32.mrf.mxu3 }
 0x4ab   : > { %v2525_v56 = vpack.c.bf16 %v2495_v61, %v2493_v41 }
 0x4ae   : > { %4184 = vmatmul.msk.bf16.gmra.mxu0 %vm507_vm0, %v2525_v56 }
 0x4af   : > { %v2225_v27 = vpop.f32.mrf.mxu1 }
 0x4b0   : > { %v2263_v35 = vpack.c.bf16 %v2225_v27, %v2223_v37  ;;  %v4484_v37 = vld [vmem:[%s5792_s1 + $0x210] sm:$0xff] }
 0x4b2   : > { %4094 = vmatmul.msk.bf16.vlgmr.msrb.gmra.mxu2 %vm507_vm0, %v2263_v35  ;;  %v2498_v55 = vpop.f32.mrf.mxu3 }
 0x4b7   : > { %v2228_v19 = vpop.f32.mrf.mxu1 }
 0x4ba   : > { %4239 = vmatmul.msk.bf16.gmra.mxu1 %vm794_vm3, %v4483_v5  ;;  %v2500_v43 = vpop.f32.mrf.mxu3  ;;  %v4491_v5 = vld [vmem:[%s5797_s6 + $0x108] sm:$0xff] }
 0x4bb   : > { %v2526_v27 = vpack.c.bf16 %v2500_v43, %v2498_v55  ;;  %2854 = vmatpush.bf16.msra.mxu2 %v4491_v5 }
 0x4be   : > { %4185 = vmatmul.msk.bf16.gmra.mxu0 %vm507_vm0, %v2526_v27 }
 0x4bf   : > { %v2230_v29 = vpop.f32.mrf.mxu1 }
 0x4c0   : > { %v2264_v52 = vpack.c.bf16 %v2230_v29, %v2228_v19  ;;  %v4485_v19 = vld [vmem:[%s5792_s1 + $0x218] sm:$0xff] }
 0x4c2   : > { %4095 = vmatmul.msk.bf16.gmra.mxu2 %vm507_vm0, %v2264_v52  ;;  %v2503_v54 = vpop.f32.mrf.mxu3 }
 0x4c7   : > { %v2233_v40 = vpop.f32.mrf.mxu1 }
 0x4ca   : > { %4240 = vmatmul.msk.bf16.gmra.mxu1 %vm794_vm3, %v4484_v37  ;;  %v2505_v56 = vpop.f32.mrf.mxu3 }
 0x4cb   : > { %v2527_v29 = vpack.c.bf16 %v2505_v56, %v2503_v54 }
 0x4ce   : > { %4186 = vmatmul.msk.bf16.gmra.mxu0 %vm507_vm0, %v2527_v29 }
 0x4cf   : > { %v2235_v35 = vpop.f32.mrf.mxu1 }
 0x4d0   : > { %v2265_v41 = vpack.c.bf16 %v2235_v35, %v2233_v40  ;;  %v4486_v40 = vld [vmem:[%s5792_s1 + $0x220] sm:$0xff] }
 0x4d2   : > { %4096 = vmatmul.msk.bf16.gmra.mxu2 %vm507_vm0, %v2265_v41 }
 0x4d4   : > { %v2508_v37 = vpop.f32.mrf.mxu3 }
 0x4d7   : > { %v2238_v61 = vpop.f32.mrf.mxu1 }
 0x4da   : > { %4241 = vmatmul.msk.bf16.gmra.mxu1 %vm794_vm3, %v4485_v19  ;;  %v4490_v19 = vld [vmem:[%s5797_s6 + $0x100] sm:$0xff] }
 0x4db   : > { %2855 = vmatpush.bf16.msra.mxu2 %v4490_v19  ;;  %v4336_v19 = vld [vmem:[%s5801_s10 + $0x10] sm:$0xf] }
 0x4dc   : > { %v2510_v27 = vpop.f32.mrf.mxu3 }
 0x4dd   : > { %v2528_v35 = vpack.c.bf16 %v2510_v27, %v2508_v37  ;;  %v4509_v37 = vld [vmem:[%s5801_s10 + $0x34] sm:$0xf0]  ;;  %v4507_v27 = vld [vmem:[%s5801_s10 + $0x24] sm:$0xf0] }
 0x4df   : > { %v2240_v52 = vpop.f32.mrf.mxu1  ;;  %4187 = vmatmul.msk.bf16.gmra.mxu0 %vm507_vm0, %v2528_v35 }
 0x4e0   : > { %v2266_v55 = vpack.c.bf16 %v2240_v52, %v2238_v61  ;;  %v4487_v61 = vld [vmem:[%s5792_s1 + $0x228] sm:$0xff] }
 0x4e2   : > { %4097 = vmatmul.msk.bf16.gmra.mxu2 %vm507_vm0, %v2266_v55  ;;  %v4352_v55 = vld [vmem:[%s5801_s10 + $0x30] sm:$0xf] }
 0x4e4   : > { %v2513_v5 = vpop.f32.mrf.mxu3 }
 0x4e7   : > { %v2243_v43 = vpop.f32.mrf.mxu1 }
 0x4ea   : > { %4242 = vmatmul.msk.bf16.gmra.mxu1 %vm794_vm3, %v4486_v40  ;;  %v4353_v40 = vor.u32 %v4509_v37, %v4352_v55  ;;  %v4488_v55 = vld [vmem:[%s5792_s1 + $0x230] sm:$0xff] }
 0x4ec   : > { %v2515_v29 = vpop.f32.mrf.mxu3  ;;  %3223 = vmatpush.bf16.msrb.mxu1 %v4353_v40 }
 0x4ed   : > { %v2529_v52 = vpack.c.bf16 %v2515_v29, %v2513_v5 }
 0x4ef   : > { %v2245_v41 = vpop.f32.mrf.mxu1  ;;  %4188 = vmatmul.msk.bf16.gmra.mxu0 %vm507_vm0, %v2529_v52  ;;  %v4328_v52 = vld [vmem:[%s5801_s10] sm:$0xf] }
 0x4f0   : > { %v2267_v54 = vpack.c.bf16 %v2245_v41, %v2243_v43  ;;  %v4344_v43 = vld [vmem:[%s5801_s10 + $0x20] sm:$0xf] }
 0x4f1   : > { %v4345_v35 = vor.u32 %v4507_v27, %v4344_v43 }
 0x4f2   : > { %4098 = vmatmul.msk.bf16.gmra.mxu2 %vm507_vm0, %v2267_v54 }
 0x4f3   : > { %3224 = vmatpush.bf16.msrb.mxu1 %v4345_v35 }
 0x4f4   : > { %v2518_v5 = vpop.f32.mrf.mxu3 }
 0x4f7   : > { %v2248_v56 = vpop.f32.mrf.mxu1 }
 0x4fa   : > { %4243 = vmatmul.msk.bf16.gmra.mxu1 %vm794_vm3, %v4487_v61  ;;  %v4505_v61 = vld [vmem:[%s5801_s10 + $0x14] sm:$0xf0] }
 0x4fb   : > { %v4337_v29 = vor.u32 %v4505_v61, %v4336_v19  ;;  %v4489_v19 = vld [vmem:[%s5792_s1 + $0x238] sm:$0x10] }
 0x4fc   : > { %v2520_v43 = vpop.f32.mrf.mxu3 }
 0x4fd   : > { %3225 = vmatpush.bf16.msrb.mxu1 %v4337_v29  ;;  %v2530_v27 = vpack.c.bf16 %v2520_v43, %v2518_v5  ;;  %v4508_v43 = vld [vmem:[%s5801_s10 + $0x34] sm:$0xf] }
 0x4ff   : > { %v2250_v41 = vpop.f32.mrf.mxu1  ;;  %4189 = vmatmul.msk.bf16.gmra.mxu0 %vm507_vm0, %v2530_v27  ;;  %v4354_v27 = vld [vmem:[%s5801_s10 + $0x38] sm:$0xf0] }
 0x500   : > { %v2268_v54 = vpack.c.bf16 %v2250_v41, %v2248_v56  ;;  %v4503_v56 = vld [vmem:[%s5801_s10 + $0x4] sm:$0xf0] }
 0x501   : > { %v4329_v37 = vor.u32 %v4503_v56, %v4328_v52  ;;  %v4304_v56 = vld [vmem:[%s5799_s8 + $0x30] sm:$0xf] }
 0x502   : > { %4099 = vmatmul.msk.bf16.gmra.mxu2 %vm507_vm0, %v2268_v54  ;;  %v4236_v54 = vld [vmem:[%s5792_s1 + $0x238] sm:$0xf] }
 0x503   : > { %3226 = vmatpush.bf16.msrb.mxu1 %v4329_v37  ;;  %v4237_v61 = vor.u32 %v4489_v19, %v4236_v54  ;;  %v4306_v54 = vld [vmem:[%s5799_s8 + $0x38] sm:$0xf0] }
 0x507   : > { %v2253_v40 = vpop.f32.mrf.mxu1 }
 0x50a   : > { %4244 = vmatmul.msk.bf16.gmra.mxu1 %vm794_vm3, %v4488_v55  ;;  %v4501_v55 = vld [vmem:[%s5799_s8 + $0x34] sm:$0xf0] }
 0x50f   : > { %v2255_v35 = vpop.f32.mrf.mxu1 }
 0x510   : > { %v2269_v41 = vpack.c.bf16 %v2255_v35, %v2253_v40  ;;  %v4305_v40 = vor.u32 %v4501_v55, %v4304_v56  ;;  %v4357_v35 = vor.u32 %v4508_v43, %v4354_v27 }
 0x512   : > { %4100 = vmatmul.msk.bf16.gmra.mxu2 %vm507_vm0, %v2269_v41  ;;  %3039 = vmatpush.bf16.msrb.mxu3 %v4305_v40  ;;  %v4500_v41 = vld [vmem:[%s5799_s8 + $0x34] sm:$0xf]  ;;  %v1858_v40 = vadd.f32 %v5123_v38, %v5233_v34  ;;  %v4296_v38 = vld [vmem:[%s5799_s8 + $0x20] sm:$0xf]  ;;  %v4499_v34 = vld [vmem:[%s5799_s8 + $0x24] sm:$0xf0] }
 0x513   : > { %3272 = vmatpush.bf16.msrb.mxu2 %v4357_v35  ;;  %v4309_v19 = vor.u32 %v4500_v41, %v4306_v54 }
 0x514   : > { %v2118_v43 = vadd.f32 %v5222_v0, %v1858_v40 }
 0x515   : > { %3088 = vmatpush.bf16.msrb.mxu0 %v4309_v19  ;;  %v4297_v19 = vor.u32 %v4499_v34, %v4296_v38 }
 0x517   : > { %v2258_v29 = vpop.f32.mrf.mxu1  ;;  %3040 = vmatpush.bf16.msrb.mxu3 %v4297_v19  ;;  %v1862_v19 = vadd.f32 %v5151_v33, %v5270_v28  ;;  %v4288_v33 = vld [vmem:[%s5799_s8 + $0x10] sm:$0xf]  ;;  %v4497_v28 = vld [vmem:[%s5799_s8 + $0x14] sm:$0xf0] }
 0x51a   : > { %4245 = vmatmul.msk.bf16.gmra.mxu1 %vm794_vm3, %v4237_v61  ;;  %v5462_v61 = vpop.f32.mrf.mxu2 }
 0x51f   : > { %v2260_v5 = vpop.f32.mrf.mxu1 }
 0x520   : > { %v2270_v52 = vpack.c.bf16 %v2260_v5, %v2258_v29 }
 0x522   : > { %4101 = vmatmul.msk.bf16.gmra.mxu2 %vm507_vm0, %v2270_v52 }
 0x527   : > { %v2743_v37 = vpop.f32.mrf.mxu1 }
 0x52a   : > { %4358 = vmatmul.msk.bf16.vlgmr.msrb.gmra.mxu1 %vm507_vm0, %v4665_v25 }
 0x52f   : > { %v2745_v29 = vpop.f32.mrf.mxu1 }
 0x530   : > { %v2783_v5 = vpack.c.bf16 %v2745_v29, %v2743_v37  ;;  %v1860_v29 = vadd.f32 %v5143_v2, %v5250_v21  ;;  %v4298_v2 = vld [vmem:[%s5799_s8 + $0x28] sm:$0xf0] }
 0x532   : > { %4270 = vmatmul.msk.bf16.vlgmr.msra.gmra.mxu2 %vm507_vm0, %v2783_v5  ;;  %v4506_v5 = vld [vmem:[%s5801_s10 + $0x24] sm:$0xf]  ;;  %v2120_v40 = vadd.f32 %v5239_v36, %v1860_v29  ;;  %v2122_v36 = vadd.f32 %v5259_v18, %v1862_v19 }
 0x535   : > { %v2337_v52 = vpop.f32.mrf.mxu2 }
 0x536   : > { %v5466_v56 = vadd.f32 %v2337_v52, %v5230_v11 }
 0x537   : > { %v2748_v55 = vpop.f32.mrf.mxu1 }
 0x53a   : > { %4359 = vmatmul.msk.bf16.gmra.mxu1 %vm507_vm0, %v4669_v32 }
 0x53d   : > { %v2339_v27 = vpop.f32.mrf.mxu2 }
 0x53e   : > { %v5473_v35 = vadd.f32 %v2339_v27, %v2118_v43 }
 0x53f   : > { %v2750_v41 = vpop.f32.mrf.mxu1 }
 0x540   : > { %v2784_v37 = vpack.c.bf16 %v2750_v41, %v2748_v55  ;;  %v4498_v55 = vld [vmem:[%s5799_s8 + $0x24] sm:$0xf] }
 0x541   : > { %v4301_v21 = vor.u32 %v4498_v55, %v4298_v2  ;;  %v4289_v55 = vor.u32 %v4497_v28, %v4288_v33  ;;  %v1864_v2 = vadd.f32 %v5158_v8, %v5289_v51  ;;  %v4290_v8 = vld [vmem:[%s5799_s8 + $0x18] sm:$0xf0] }
 0x542   : > { %4271 = vmatmul.msk.bf16.gmra.mxu2 %vm507_vm0, %v2784_v37 }
 0x543   : > { %3089 = vmatpush.bf16.msrb.mxu0 %v4301_v21  ;;  %v4504_v21 = vld [vmem:[%s5801_s10 + $0x14] sm:$0xf]  ;;  %3041 = vmatpush.bf16.msrb.mxu3 %v4289_v55 }
 0x545   : > { %v2342_v54 = vpop.f32.mrf.mxu2 }
 0x546   : > { %v5477_v11 = vadd.f32 %v2342_v54, %v5247_v13  ;;  %v4346_v13 = vld [vmem:[%s5801_s10 + $0x28] sm:$0xf0] }
 0x547   : > { %v2753_v0 = vpop.f32.mrf.mxu1  ;;  %v4349_v52 = vor.u32 %v4506_v5, %v4346_v13 }
 0x549   : > { %3273 = vmatpush.bf16.msrb.mxu2 %v4349_v52 }
 0x54a   : > { %4360 = vmatmul.msk.bf16.gmra.mxu1 %vm507_vm0, %v4673_v39 }
 0x54d   : > { %v2344_v43 = vpop.f32.mrf.mxu2 }
 0x54e   : > { %v5502_v27 = vadd.f32 %v2344_v43, %v2120_v40  ;;  %v4496_v43 = vld [vmem:[%s5799_s8 + $0x14] sm:$0xf] }
 0x54f   : > { %v2755_v41 = vpop.f32.mrf.mxu1  ;;  %v4293_v51 = vor.u32 %v4496_v43, %v4290_v8  ;;  %v4282_v43 = vld [vmem:[%s5799_s8 + $0x8] sm:$0xf0]  ;;  %v5587_v8 = vpop.f32.mrf.mxu0 }
 0x550   : > { %v2785_v37 = vpack.c.bf16 %v2755_v41, %v2753_v0  ;;  %v2124_v41 = vadd.f32 %v5276_v42, %v1864_v2 }
 0x551   : > { %3090 = vmatpush.bf16.msrb.mxu0 %v4293_v51 }
 0x552   : > { %4272 = vmatmul.msk.bf16.gmra.mxu2 %vm507_vm0, %v2785_v37 }
 0x555   : > { %v2347_v54 = vpop.f32.mrf.mxu2 }
 0x556   : > { %v5506_v38 = vadd.f32 %v2347_v54, %v5267_v1  ;;  %v1215_v54 = vadd.f32 %v5070_v62, %v5086_v16 }
 0x557   : > { %v2758_v34 = vpop.f32.mrf.mxu1 }
 0x55a   : > { %4361 = vmatmul.msk.bf16.gmra.mxu1 %vm507_vm0, %v4677_v46 }
 0x55d   : > { %v2349_v29 = vpop.f32.mrf.mxu2 }
 0x55e   : > { %v5513_v5 = vadd.f32 %v2349_v29, %v2122_v36  ;;  %v1485_v29 = vadd.f32 %v5075_v4, %v1215_v54  ;;  %v1220_v4 = vadd.f32 %v5098_v23, %v5112_v30  ;;  %v4495_v23 = vld [vmem:[%s5799_s8 + $0x4] sm:$0xf0] }
 0x55f   : > { %v2760_v13 = vpop.f32.mrf.mxu1 }
 0x560   : > { %v2786_v0 = vpack.c.bf16 %v2760_v13, %v2758_v34  ;;  %v1745_v13 = vadd.f32 %v5311_v6, %v1485_v29  ;;  %v1487_v55 = vadd.f32 %v5093_v22, %v1220_v4 }
 0x562   : > { %4273 = vmatmul.msk.bf16.gmra.mxu2 %vm507_vm0, %v2786_v0  ;;  %v1866_v33 = vadd.f32 %v5168_v48, %v1745_v13  ;;  %v2597_v13 = vpop.f32.mrf.mxu0 }
 0x564   : > { %v2126_v62 = vadd.f32 %v5298_v31, %v1866_v33  ;;  %v4280_v31 = vld [vmem:[%s5799_s8] sm:$0xf] }
 0x565   : > { %v2352_v52 = vpop.f32.mrf.mxu2 }
 0x566   : > { %v5517_v1 = vadd.f32 %v2352_v52, %v5286_v26  ;;  %v4338_v26 = vld [vmem:[%s5801_s10 + $0x18] sm:$0xf0] }
 0x567   : > { %v2763_v18 = vpop.f32.mrf.mxu1  ;;  %v4341_v40 = vor.u32 %v4504_v21, %v4338_v26  ;;  %v4281_v21 = vor.u32 %v4495_v23, %v4280_v31  ;;  %v4494_v26 = vld [vmem:[%s5799_s8 + $0x4] sm:$0xf]  ;;  %v5618_v31 = vld [vmem:[%s5798_s7] ss:$0 sm:$0xff] }
 0x569   : > { %3274 = vmatpush.bf16.msrb.mxu2 %v4341_v40  ;;  %3042 = vmatpush.bf16.msrb.mxu3 %v4281_v21 }
 0x56a   : > { %4362 = vmatmul.msk.bf16.gmra.mxu1 %vm507_vm0, %v4681_v53 }
 0x56d   : > { %v2354_v37 = vpop.f32.mrf.mxu2 }
 0x56e   : > { %v5544_v34 = vadd.f32 %v2354_v37, %v2124_v41  ;;  %v1225_v37 = vadd.f32 %v5137_v57, %v5141_v63  ;;  %v2599_v63 = vpop.f32.mrf.mxu0 }
 0x56f   : > { %v2765_v19 = vpop.f32.mrf.mxu1 }
 0x570   : > { %v2787_v36 = vpack.c.bf16 %v2765_v19, %v2763_v18  ;;  %v1489_v29 = vadd.f32 %v5131_v50, %v1225_v37 }
 0x572   : > { %4274 = vmatmul.msk.bf16.gmra.mxu2 %vm507_vm0, %v2787_v36 }
 0x575   : > { %v2357_v0 = vpop.f32.mrf.mxu2 }
 0x576   : > { %v5550_v52 = vadd.f32 %v2357_v0, %v5308_v44  ;;  %v1747_v44 = vadd.f32 %v5329_v58, %v1487_v55  ;;  %v4502_v58 = vld [vmem:[%s5801_s10 + $0x4] sm:$0xf]  ;;  %v1749_v0 = vadd.f32 %v5354_v59, %v1489_v29 }
 0x577   : > { %v2768_v42 = vpop.f32.mrf.mxu1 }
 0x578   : > { %v1868_v22 = vadd.f32 %v5177_v7, %v1747_v44  ;;  %v4285_v7 = vor.u32 %v4494_v26, %v4282_v43  ;;  %v2637_v44 = vadd.f32 %v2597_v13, %v5466_v56 }
 0x57a   : > { %4363 = vmatmul.msk.bf16.gmra.mxu1 %vm507_vm0, %v4685_v60  ;;  %v2128_v51 = vadd.f32 %v5317_v47, %v1868_v22  ;;  %3091 = vmatpush.bf16.msrb.mxu0 %v4285_v7 }
 0x57d   : > { %v2359_v16 = vpop.f32.mrf.mxu2 }
 0x57e   : > { %v5558_v28 = vadd.f32 %v2359_v16, %v2126_v62  ;;  %v1870_v62 = vadd.f32 %v5183_v12, %v1749_v0 }
 0x57f   : > { %v2770_v18 = vpop.f32.mrf.mxu1 }
 0x580   : > { %v2788_v6 = vpack.c.bf16 %v2770_v18, %v2768_v42  ;;  %v2130_v57 = vadd.f32 %v5347_v49, %v1870_v62 }
 0x582   : > { %4275 = vmatmul.msk.bf16.gmra.mxu2 %vm507_vm0, %v2788_v6  ;;  %v2602_v6 = vpop.f32.mrf.mxu0 }
 0x585   : > { %v2362_v48 = vpop.f32.mrf.mxu2 }
 0x586   : > { %v5564_v2 = vadd.f32 %v2362_v48, %v5324_v9  ;;  %v4330_v9 = vld [vmem:[%s5801_s10 + $0x8] sm:$0xf0] }
 0x587   : > { %v2773_v30 = vpop.f32.mrf.mxu1  ;;  %v4333_v40 = vor.u32 %v4502_v58, %v4330_v9 }
 0x589   : > { %3275 = vmatpush.bf16.msrb.mxu2 %v4333_v40 }
 0x58a   : > { %4364 = vmatmul.msk.bf16.gmra.mxu1 %vm507_vm0, %v4689_v3  ;;  %v2604_v12 = vpop.f32.mrf.mxu0 }
 0x58b   : > { %v2640_v7 = vadd.f32 %v2604_v12, %v5502_v27 }
 0x58d   : > { %v2364_v41 = vpop.f32.mrf.mxu2 }
 0x58e   : > { %v5592_v54 = vadd.f32 %v2364_v41, %v2128_v51 }
 0x58f   : > { %v2775_v19 = vpop.f32.mrf.mxu1 }
 0x590   : > { %v2789_v36 = vpack.c.bf16 %v2775_v19, %v2773_v30 }
 0x592   : > { %4276 = vmatmul.msk.bf16.gmra.mxu2 %vm507_vm0, %v2789_v36  ;;  %v2607_v23 = vpop.f32.mrf.mxu0 }
 0x595   : > { %v2367_v42 = vpop.f32.mrf.mxu2 }
 0x596   : > { %v5598_v33 = vadd.f32 %v2367_v42, %v5352_v45 }
 0x597   : > { %v2778_v47 = vpop.f32.mrf.mxu1 }
 0x59a   : > { %4365 = vmatmul.msk.bf16.gmra.mxu1 %vm507_vm0, %v4693_v10  ;;  %v2609_v26 = vpop.f32.mrf.mxu0 }
 0x59d   : > { %v2369_v16 = vpop.f32.mrf.mxu2 }
 0x59e   : > { %v5604_v50 = vadd.f32 %v2369_v16, %v2130_v57 }
 0x59f   : > { %v2780_v4 = vpop.f32.mrf.mxu1 }
 0x5a0   : > { %v2790_v18 = vpack.c.bf16 %v2780_v4, %v2778_v47  ;;  %v2642_v47 = vadd.f32 %v2609_v26, %v5513_v5 }
 0x5a2   : > { %4277 = vmatmul.msk.bf16.gmra.mxu2 %vm507_vm0, %v2790_v18  ;;  %v2612_v19 = vpop.f32.mrf.mxu0 }
 0x5a5   : > { %v2372_v59 = vpop.f32.mrf.mxu2 }
 0x5a6   : > { %v5608_v45 = vadd.f32 %v2372_v59, %v5357_v15  ;;  %v2638_v15 = vadd.f32 %v2599_v63, %v5473_v35  ;;  %v2639_v35 = vadd.f32 %v2602_v6, %v5477_v11  ;;  %v2641_v11 = vadd.f32 %v2607_v23, %v5506_v38 }
 0x5a7   : > { %v2643_v38 = vadd.f32 %v2612_v19, %v5517_v1 }
 0x5aa   : > { %v2614_v27 = vpop.f32.mrf.mxu0 }
 0x5ab   : > { %v2644_v12 = vadd.f32 %v2614_v27, %v5544_v34 }
 0x5ad   : > { %v5610_v55 = vpop.f32.mrf.mxu2 }
 0x5b2   : > { %4366 = vmatmul.msk.bf16.vlgmr.msrb.gmra.mxu2 %vm507_vm0, %v4665_v25  ;;  %v2617_v18 = vpop.f32.mrf.mxu0 }
 0x5b3   : > { %v2645_v34 = vadd.f32 %v2617_v18, %v5550_v52 }
 0x5b5   : > { %v2857_v49 = vpop.f32.mrf.mxu2 }
 0x5b6   : > { %v2897_v48 = vadd.f32 %v2857_v49, %v2637_v44 }
 0x5b8   : > { %v2917_v21 = vadd.f32 %v5618_v31, %v2897_v48 }
 0x5ba   : > { %v2933_v9 = vmax.f32 %v2917_v21, 0.0  ;;  %v2619_v49 = vpop.f32.mrf.mxu0 }
 0x5bd   : > { %v2859_v30 = vpop.f32.mrf.mxu2 }
 0x5be   : > { %v2898_v22 = vadd.f32 %v2859_v30, %v2638_v15 }
 0x5c0   : > { %v2918_v58 = vadd.f32 %v5618_v31, %v2898_v22 }
 0x5c2   : > { %v2934_v25 = vmax.f32 %v2918_v58, 0.0  ;;  %4367 = vmatmul.msk.bf16.gmra.mxu2 %vm507_vm0, %v4669_v32  ;;  %v2622_v1 = vpop.f32.mrf.mxu0 }
 0x5c3   : > { %v2647_v52 = vadd.f32 %v2622_v1, %v5564_v2  ;;  %v3173_v1 = vld [vmem:[%s5802_s11] sm:$0x3] }
 0x5c4   : > { %v2949_v56 = vpack.c.bf16 %v2934_v25, %v2933_v9  ;;  %v2646_v9 = vadd.f32 %v2619_v49, %v5558_v28 }
 0x5c5   : > { %v2862_v40 = vpop.f32.mrf.mxu2 }
 0x5c6   : > { %4310 = vmatmul.msk.bf16.vlgmr.msrb.gmra.mxu3 %vm507_vm0, %v2949_v56  ;;  %4318 = vmatmul.msk.bf16.vlgmr.msrb.gmra.mxu0 %vm507_vm0, %v2949_v56  ;;  %v2899_v43 = vadd.f32 %v2862_v40, %v2639_v35 }
 0x5c8   : > { %v2919_v41 = vadd.f32 %v5618_v31, %v2899_v43 }
 0x5ca   : > { %v2935_v32 = vmax.f32 %v2919_v41, 0.0  ;;  %v2624_v35 = vpop.f32.mrf.mxu0 }
 0x5cd   : > { %v2864_v51 = vpop.f32.mrf.mxu2 }
 0x5ce   : > { %v2900_v37 = vadd.f32 %v2864_v51, %v2640_v7 }
 0x5d0   : > { %v2920_v36 = vadd.f32 %v5618_v31, %v2900_v37  ;;  %v2648_v37 = vadd.f32 %v2624_v35, %v5592_v54  ;;  %v1230_v54 = vadd.f32 %v5213_v17, %v5149_v24 }
 0x5d2   : > { %v2936_v29 = vmax.f32 %v2920_v36, 0.0  ;;  %4368 = vmatmul.msk.bf16.gmra.mxu2 %vm507_vm0, %v4673_v39  ;;  %v2627_v41 = vpop.f32.mrf.mxu0 }
 0x5d3   : > { %v2649_v2 = vadd.f32 %v2627_v41, %v5598_v33 }
 0x5d4   : > { %v2950_v13 = vpack.c.bf16 %v2936_v29, %v2935_v32 }
 0x5d5   : > { %v2867_v0 = vpop.f32.mrf.mxu2 }
 0x5d6   : > { %4311 = vmatmul.msk.bf16.gmra.mxu3 %vm507_vm0, %v2950_v13  ;;  %4319 = vmatmul.msk.bf16.gmra.mxu0 %vm507_vm0, %v2950_v13  ;;  %v2901_v42 = vadd.f32 %v2867_v0, %v2641_v11 }
 0x5d8   : > { %v2921_v57 = vadd.f32 %v5618_v31, %v2901_v42 }
 0x5da   : > { %v2937_v4 = vmax.f32 %v2921_v57, 0.0  ;;  %v2629_v11 = vpop.f32.mrf.mxu0  ;;  %v1491_v57 = vadd.f32 %v5145_v20, %v1230_v54 }
 0x5dd   : > { %v2869_v62 = vpop.f32.mrf.mxu2 }
 0x5de   : > { %v2902_v63 = vadd.f32 %v2869_v62, %v2642_v47  ;;  %v2650_v47 = vadd.f32 %v2629_v11, %v5604_v50 }
 0x5e0   : > { %v2922_v16 = vadd.f32 %v5618_v31, %v2902_v63 }
 0x5e2   : > { %v2938_v39 = vmax.f32 %v2922_v16, 0.0  ;;  %4369 = vmatmul.msk.bf16.gmra.mxu2 %vm507_vm0, %v4677_v46  ;;  %v2632_v16 = vpop.f32.mrf.mxu0 }
 0x5e3   : > { %v2651_v20 = vadd.f32 %v2632_v16, %v5608_v45 }
 0x5e4   : > { %v2951_v59 = vpack.c.bf16 %v2938_v39, %v2937_v4  ;;  %v1751_v39 = vadd.f32 %v5088_v14, %v1491_v57 }
 0x5e5   : > { %v2872_v6 = vpop.f32.mrf.mxu2 }
 0x5e6   : > { %4312 = vmatmul.msk.bf16.gmra.mxu3 %vm507_vm0, %v2951_v59  ;;  %4320 = vmatmul.msk.bf16.gmra.mxu0 %vm507_vm0, %v2951_v59  ;;  %v2903_v5 = vadd.f32 %v2872_v6, %v2643_v38  ;;  %v1872_v24 = vadd.f32 %v5462_v61, %v1751_v39 }
 0x5e8   : > { %v2923_v48 = vadd.f32 %v5618_v31, %v2903_v5  ;;  %v2132_v50 = vadd.f32 %v5587_v8, %v1872_v24  ;;  %v3228_v5 = vpop.f32.mrf.mxu1 }
 0x5ea   : > { %v2939_v46 = vmax.f32 %v2923_v48, 0.0  ;;  %v2392_v6 = vadd.f32 %v5610_v55, %v2132_v50  ;;  %v2634_v14 = vpop.f32.mrf.mxu0  ;;  %v2965_v55 = vld [vmem:[%s5800_s9] sm:$0x3] }
 0x5ed   : > { %v2874_v44 = vpop.f32.mrf.mxu2 }
 0x5ee   : > { %v2904_v23 = vadd.f32 %v2874_v44, %v2644_v12  ;;  %v2652_v12 = vadd.f32 %v2634_v14, %v2392_v6 }
 0x5f0   : > { %v2924_v15 = vadd.f32 %v5618_v31, %v2904_v23 }
 0x5f2   : > { %v2940_v30 = vmax.f32 %v2924_v15, 0.0  ;;  %4370 = vmatmul.msk.bf16.gmra.mxu2 %vm507_vm0, %v4681_v53  ;;  %v3230_v15 = vpop.f32.mrf.mxu1 }
 0x5f4   : > { %v2952_v21 = vpack.c.bf16 %v2940_v30, %v2939_v46 }
 0x5f5   : > { %v2877_v22 = vpop.f32.mrf.mxu2 }
 0x5f6   : > { %4313 = vmatmul.msk.bf16.gmra.mxu3 %vm507_vm0, %v2952_v21  ;;  %4321 = vmatmul.msk.bf16.gmra.mxu0 %vm507_vm0, %v2952_v21  ;;  %v2905_v58 = vadd.f32 %v2877_v22, %v2645_v34  ;;  %v5690_v21 = vperm.slane %v2965_v55, 1 }
 0x5f8   : > { %v2925_v56 = vadd.f32 %v5618_v31, %v2905_v58  ;;  %v5696_v58 = vperm.slane %v3173_v1, 1 }
 0x5fa   : > { %v2941_v53 = vmax.f32 %v2925_v56, 0.0  ;;  %v3233_v30 = vpop.f32.mrf.mxu1 }
 0x5fd   : > { %v2879_v25 = vpop.f32.mrf.mxu2 }
 0x5fe   : > { %v2906_v26 = vadd.f32 %v2879_v25, %v2646_v9  ;;  %v5698_v9 = vperm.slane %v2965_v55, 0  ;;  %v5700_v25 = vperm.slane %v3173_v1, 0 }
 0x600   : > { %v2926_v40 = vadd.f32 %v5618_v31, %v2906_v26 }
 0x602   : > { %v2942_v43 = vmax.f32 %v2926_v40, 0.0  ;;  %4371 = vmatmul.msk.bf16.gmra.mxu2 %vm507_vm0, %v4685_v60  ;;  %v3235_v26 = vpop.f32.mrf.mxu1 }
 0x604   : > { %v2953_v7 = vpack.c.bf16 %v2942_v43, %v2941_v53 }
 0x605   : > { %v2882_v51 = vpop.f32.mrf.mxu2 }
 0x606   : > { %4314 = vmatmul.msk.bf16.gmra.mxu3 %vm507_vm0, %v2953_v7  ;;  %4322 = vmatmul.msk.bf16.gmra.mxu0 %vm507_vm0, %v2953_v7  ;;  %v2907_v28 = vadd.f32 %v2882_v51, %v2647_v52  ;;  %v3229_v7 = vadd.f32 %v3228_v5, %v5700_v25 }
 0x608   : > { %v2927_v36 = vadd.f32 %v5618_v31, %v2907_v28 }
 0x60a   : > { %v2943_v13 = vmax.f32 %v2927_v36, 0.0  ;;  %v3238_v11 = vpop.f32.mrf.mxu1 }
 0x60d   : > { %v2884_v19 = vpop.f32.mrf.mxu2 }
 0x60e   : > { %v2908_v32 = vadd.f32 %v2884_v19, %v2648_v37 }
 0x610   : > { %v2928_v29 = vadd.f32 %v5618_v31, %v2908_v32 }
 0x612   : > { %v2944_v60 = vmax.f32 %v2928_v29, 0.0  ;;  %4372 = vmatmul.msk.bf16.gmra.mxu2 %vm507_vm0, %v4689_v3  ;;  %v3240_v6 = vpop.f32.mrf.mxu1 }
 0x614   : > { %v2954_v0 = vpack.c.bf16 %v2944_v60, %v2943_v13 }
 0x615   : > { %v2887_v27 = vpop.f32.mrf.mxu2 }
 0x616   : > { %4315 = vmatmul.msk.bf16.gmra.mxu3 %vm507_vm0, %v2954_v0  ;;  %4323 = vmatmul.msk.bf16.gmra.mxu0 %vm507_vm0, %v2954_v0  ;;  %v2909_v42 = vadd.f32 %v2887_v27, %v2649_v2  ;;  %v3231_v2 = vadd.f32 %v3230_v15, %v5700_v25 }
 0x618   : > { %v2929_v3 = vadd.f32 %v5618_v31, %v2909_v42 }
 0x61a   : > { %v2945_v18 = vmax.f32 %v2929_v3, 0.0 }
 0x61d   : > { %v2889_v62 = vpop.f32.mrf.mxu2 }
 0x61e   : > { %v2910_v63 = vadd.f32 %v2889_v62, %v2650_v47 }
 0x620   : > { %v2930_v4 = vadd.f32 %v5618_v31, %v2910_v63 }
 0x622   : > { %v2946_v59 = vmax.f32 %v2930_v4, 0.0  ;;  %4373 = vmatmul.msk.bf16.gmra.mxu2 %vm507_vm0, %v4693_v10 }
 0x624   : > { %v2955_v17 = vpack.c.bf16 %v2946_v59, %v2945_v18 }
 0x625   : > { %v2892_v33 = vpop.f32.mrf.mxu2 }
 0x626   : > { %4316 = vmatmul.msk.bf16.gmra.mxu3 %vm507_vm0, %v2955_v17  ;;  %4324 = vmatmul.msk.bf16.gmra.mxu0 %vm507_vm0, %v2955_v17  ;;  %v2911_v38 = vadd.f32 %v2892_v33, %v2651_v20  ;;  %v3234_v17 = vadd.f32 %v3233_v30, %v5700_v25 }
 0x628   : > { %v2931_v10 = vadd.f32 %v5618_v31, %v2911_v38 }
 0x62a   : > { %v2947_v48 = vmax.f32 %v2931_v10, 0.0 }
 0x62d   : > { %v2894_v49 = vpop.f32.mrf.mxu2 }
 0x62e   : > { %v2912_v61 = vadd.f32 %v2894_v49, %v2652_v12 }
 0x630   : > { %v2932_v44 = vadd.f32 %v5618_v31, %v2912_v61 }
 0x632   : > { %v2948_v8 = vmax.f32 %v2932_v44, 0.0 }
 0x634   : > { %v2956_v23 = vpack.c.bf16 %v2948_v8, %v2947_v48 }
 0x635   : > { %v3277_v46 = vpop.f32.mrf.mxu2 }
 0x636   : > { %4317 = vmatmul.msk.bf16.gmra.mxu3 %vm507_vm0, %v2956_v23  ;;  %4325 = vmatmul.msk.bf16.gmra.mxu0 %vm507_vm0, %v2956_v23  ;;  %v3278_v35 = vadd.f32 %v3277_v46, %v5696_v58  ;;  %v3236_v23 = vadd.f32 %v3235_v26, %v5700_v25  ;;  %v3239_v26 = vadd.f32 %v3238_v11, %v5700_v25 }
 0x637   : > { %v3241_v11 = vadd.f32 %v3240_v6, %v5700_v25 }
 0x63d   : > { %v3279_v45 = vpop.f32.mrf.mxu2 }
 0x63e   : > { %v3280_v13 = vadd.f32 %v3279_v45, %v5696_v58 }
 0x643   : > { %v3093_v22 = vpop.f32.mrf.mxu0 }
 0x644   : > { %v3094_v31 = vadd.f32 %v3093_v22, %v5690_v21  ;;  %v3243_v22 = vpop.f32.mrf.mxu1 }
 0x645   : > { %v3282_v34 = vpop.f32.mrf.mxu2 }
 0x646   : > { %v3134_v56 = vmax.f32 %v3094_v31, 0.0  ;;  %v3283_v39 = vadd.f32 %v3282_v34, %v5696_v58 }
 0x648   : > { %v3318_v51 = vadd.f32 %v3278_v35, %v3134_v56 }
 0x649   : > { %v3044_v40 = vpop.f32.mrf.mxu3 }
 0x64a   : > { %v3045_v53 = vadd.f32 %v3044_v40, %v5698_v9  ;;  %v3350_v19 = vmax.f32 %v3318_v51, 0.0 }
 0x64b   : > { %v3095_v43 = vpop.f32.mrf.mxu0 }
 0x64c   : > { %v3133_v52 = vmax.f32 %v3045_v53, 0.0  ;;  %v3096_v28 = vadd.f32 %v3095_v43, %v5690_v21 }
 0x64d   : > { %v3284_v41 = vpop.f32.mrf.mxu2 }
 0x64e   : > { %v3317_v37 = vadd.f32 %v3229_v7, %v3133_v52  ;;  %v3136_v32 = vmax.f32 %v3096_v28, 0.0  ;;  %v3285_v61 = vadd.f32 %v3284_v41, %v5696_v58 }
 0x650   : > { %v3349_v36 = vmax.f32 %v3317_v37, 0.0  ;;  %v3320_v54 = vadd.f32 %v3280_v13, %v3136_v32  ;;  %v3245_v32 = vpop.f32.mrf.mxu1 }
 0x651   : > { %v3046_v29 = vpop.f32.mrf.mxu3 }
 0x652   : > { %v3381_v60 = vpack.c.bf16 %v3350_v19, %v3349_v36  ;;  %v3047_v0 = vadd.f32 %v3046_v29, %v5698_v9  ;;  %v3352_v3 = vmax.f32 %v3320_v54, 0.0 }
 0x653   : > { %v3098_v27 = vpop.f32.mrf.mxu0 }
 0x654   : > { %3397 = vst [vmem:[%s5710_s14] sm:$0xff] %v3381_v60  ;;  %v3135_v42 = vmax.f32 %v3047_v0, 0.0  ;;  %v3099_v47 = vadd.f32 %v3098_v27, %v5690_v21 }
 0x655   : > { %v3287_v62 = vpop.f32.mrf.mxu2 }
 0x656   : > { %v3319_v57 = vadd.f32 %v3231_v2, %v3135_v42  ;;  %v3138_v16 = vmax.f32 %v3099_v47, 0.0  ;;  %v3288_v40 = vadd.f32 %v3287_v62, %v5696_v58 }
 0x658   : > { %v3351_v63 = vmax.f32 %v3319_v57, 0.0  ;;  %v3322_v33 = vadd.f32 %v3283_v39, %v3138_v16 }
 0x659   : > { %v3049_v4 = vpop.f32.mrf.mxu3 }
 0x65a   : > { %v3382_v18 = vpack.c.bf16 %v3352_v3, %v3351_v63  ;;  %v3050_v59 = vadd.f32 %v3049_v4, %v5698_v9  ;;  %v3354_v5 = vmax.f32 %v3322_v33, 0.0 }
 0x65b   : > { %v3100_v24 = vpop.f32.mrf.mxu0 }
 0x65c   : > { %3398 = vst [vmem:[%s5710_s14 + $0x8] sm:$0xff] %v3382_v18  ;;  %v3137_v50 = vmax.f32 %v3050_v59, 0.0  ;;  %v3101_v20 = vadd.f32 %v3100_v24, %v5690_v21  ;;  %v3248_v59 = vpop.f32.mrf.mxu1 }
 0x65d   : > { %v3289_v14 = vpop.f32.mrf.mxu2 }
 0x65e   : > { %v3321_v38 = vadd.f32 %v3234_v17, %v3137_v50  ;;  %v3140_v49 = vmax.f32 %v3101_v20, 0.0  ;;  %v3290_v13 = vadd.f32 %v3289_v14, %v5696_v58  ;;  %v3244_v17 = vadd.f32 %v3243_v22, %v5700_v25 }
 0x660   : > { %v3353_v12 = vmax.f32 %v3321_v38, 0.0  ;;  %v3324_v15 = vadd.f32 %v3285_v61, %v3140_v49 }
 0x661   : > { %v3051_v10 = vpop.f32.mrf.mxu3 }
 0x662   : > { %v3383_v44 = vpack.c.bf16 %v3354_v5, %v3353_v12  ;;  %v3052_v48 = vadd.f32 %v3051_v10, %v5698_v9  ;;  %v3356_v31 = vmax.f32 %v3324_v15, 0.0 }
 0x663   : > { %v3103_v8 = vpop.f32.mrf.mxu0 }
 0x664   : > { %3399 = vst [vmem:[%s5710_s14 + $0x10] sm:$0xff] %v3383_v44  ;;  %v3139_v46 = vmax.f32 %v3052_v48, 0.0  ;;  %v3104_v45 = vadd.f32 %v3103_v8, %v5690_v21  ;;  %v3246_v8 = vadd.f32 %v3245_v32, %v5700_v25 }
 0x665   : > { %v3292_v55 = vpop.f32.mrf.mxu2 }
 0x666   : > { %v3323_v30 = vadd.f32 %v3236_v23, %v3139_v46  ;;  %v3142_v34 = vmax.f32 %v3104_v45, 0.0  ;;  %v3293_v4 = vadd.f32 %v3292_v55, %v5696_v58  ;;  %v3250_v45 = vpop.f32.mrf.mxu1 }
 0x668   : > { %v3355_v1 = vmax.f32 %v3323_v30, 0.0  ;;  %v3326_v7 = vadd.f32 %v3288_v40, %v3142_v34 }
 0x669   : > { %v3054_v56 = vpop.f32.mrf.mxu3 }
 0x66a   : > { %v3384_v35 = vpack.c.bf16 %v3356_v31, %v3355_v1  ;;  %v3055_v53 = vadd.f32 %v3054_v56, %v5698_v9  ;;  %v3358_v37 = vmax.f32 %v3326_v7, 0.0 }
 0x66b   : > { %v3105_v43 = vpop.f32.mrf.mxu0 }
 0x66c   : > { %3400 = vst [vmem:[%s5710_s14 + $0x18] sm:$0xff] %v3384_v35  ;;  %v3141_v51 = vmax.f32 %v3055_v53, 0.0  ;;  %v3106_v52 = vadd.f32 %v3105_v43, %v5690_v21  ;;  %v3249_v53 = vadd.f32 %v3248_v59, %v5700_v25 }
 0x66d   : > { %v3294_v41 = vpop.f32.mrf.mxu2 }
 0x66e   : > { %v3325_v28 = vadd.f32 %v3239_v26, %v3141_v51  ;;  %v3144_v36 = vmax.f32 %v3106_v52, 0.0  ;;  %v3295_v49 = vadd.f32 %v3294_v41, %v5696_v58 }
 0x670   : > { %v3357_v19 = vmax.f32 %v3325_v28, 0.0  ;;  %v3328_v2 = vadd.f32 %v3290_v13, %v3144_v36  ;;  %v3253_v28 = vpop.f32.mrf.mxu1 }
 0x671   : > { %v3056_v29 = vpop.f32.mrf.mxu3  ;;  %v3254_v59 = vadd.f32 %v3253_v28, %v5700_v25 }
 0x672   : > { %v3385_v60 = vpack.c.bf16 %v3358_v37, %v3357_v19  ;;  %v3057_v0 = vadd.f32 %v3056_v29, %v5698_v9  ;;  %v3360_v62 = vmax.f32 %v3328_v2, 0.0 }
 0x673   : > { %v3108_v27 = vpop.f32.mrf.mxu0 }
 0x674   : > { %3401 = vst [vmem:[%s5710_s14 + $0x20] sm:$0xff] %v3385_v60  ;;  %v3143_v54 = vmax.f32 %v3057_v0, 0.0  ;;  %v3109_v42 = vadd.f32 %v3108_v27, %v5690_v21  ;;  %v3251_v0 = vadd.f32 %v3250_v45, %v5700_v25 }
 0x675   : > { %v3297_v63 = vpop.f32.mrf.mxu2 }
 0x676   : > { %v3327_v47 = vadd.f32 %v3241_v11, %v3143_v54  ;;  %v3146_v3 = vmax.f32 %v3109_v42, 0.0  ;;  %v3298_v34 = vadd.f32 %v3297_v63, %v5696_v58 }
 0x678   : > { %v3359_v57 = vmax.f32 %v3327_v47, 0.0  ;;  %v3330_v33 = vadd.f32 %v3293_v4, %v3146_v3  ;;  %v3255_v3 = vpop.f32.mrf.mxu1 }
 0x679   : > { %v3059_v16 = vpop.f32.mrf.mxu3 }
 0x67a   : > { %v3386_v39 = vpack.c.bf16 %v3360_v62, %v3359_v57  ;;  %v3060_v18 = vadd.f32 %v3059_v16, %v5698_v9  ;;  %v3362_v14 = vmax.f32 %v3330_v33, 0.0 }
 0x67b   : > { %v3110_v24 = vpop.f32.mrf.mxu0 }
 0x67c   : > { %3402 = vst [vmem:[%s5710_s14 + $0x28] sm:$0xff] %v3386_v39  ;;  %v3145_v50 = vmax.f32 %v3060_v18, 0.0  ;;  %v3111_v20 = vadd.f32 %v3110_v24, %v5690_v21 }
 0x67d   : > { %v3299_v44 = vpop.f32.mrf.mxu2 }
 0x67e   : > { %v3329_v6 = vadd.f32 %v3244_v17, %v3145_v50  ;;  %v3148_v5 = vmax.f32 %v3111_v20, 0.0  ;;  %v3300_v32 = vadd.f32 %v3299_v44, %v5696_v58 }
 0x680   : > { %v3361_v38 = vmax.f32 %v3329_v6, 0.0  ;;  %v3332_v23 = vadd.f32 %v3295_v49, %v3148_v5 }
 0x681   : > { %v3061_v12 = vpop.f32.mrf.mxu3 }
 0x682   : > { %v3387_v10 = vpack.c.bf16 %v3362_v14, %v3361_v38  ;;  %v3062_v61 = vadd.f32 %v3061_v12, %v5698_v9  ;;  %v3364_v30 = vmax.f32 %v3332_v23, 0.0 }
 0x683   : > { %v3113_v48 = vpop.f32.mrf.mxu0 }
 0x684   : > { %3403 = vst [vmem:[%s5710_s14 + $0x30] sm:$0xff] %v3387_v10  ;;  %v3147_v15 = vmax.f32 %v3062_v61, 0.0  ;;  %v3114_v46 = vadd.f32 %v3113_v48, %v5690_v21  ;;  %v3258_v61 = vpop.f32.mrf.mxu1  ;;  %v3256_v48 = vadd.f32 %v3255_v3, %v5700_v25 }
 0x685   : > { %v3302_v51 = vpop.f32.mrf.mxu2 }
 0x686   : > { %v3331_v55 = vadd.f32 %v3246_v8, %v3147_v15  ;;  %v3150_v31 = vmax.f32 %v3114_v46, 0.0  ;;  %v3303_v16 = vadd.f32 %v3302_v51, %v5696_v58 }
 0x688   : > { %v3363_v22 = vmax.f32 %v3331_v55, 0.0  ;;  %v3334_v43 = vadd.f32 %v3298_v34, %v3150_v31 }
 0x689   : > { %v3064_v1 = vpop.f32.mrf.mxu3 }
 0x68a   : > { %v3388_v56 = vpack.c.bf16 %v3364_v30, %v3363_v22  ;;  %v3065_v40 = vadd.f32 %v3064_v1, %v5698_v9  ;;  %v3366_v41 = vmax.f32 %v3334_v43, 0.0 }
 0x68b   : > { %v3115_v35 = vpop.f32.mrf.mxu0 }
 0x68c   : > { %3404 = vst [vmem:[%s5710_s14 + $0x38] sm:$0xff] %v3388_v56  ;;  %v3149_v26 = vmax.f32 %v3065_v40, 0.0  ;;  %v3116_v7 = vadd.f32 %v3115_v35, %v5690_v21  ;;  %v3259_v35 = vadd.f32 %v3258_v61, %v5700_v25 }
 0x68d   : > { %v3304_v42 = vpop.f32.mrf.mxu2 }
 0x68e   : > { %v3333_v52 = vadd.f32 %v3249_v53, %v3149_v26  ;;  %v3152_v19 = vmax.f32 %v3116_v7, 0.0  ;;  %v3305_v12 = vadd.f32 %v3304_v42, %v5696_v58  ;;  %v3260_v7 = vpop.f32.mrf.mxu1 }
 0x690   : > { %v3365_v37 = vmax.f32 %v3333_v52, 0.0  ;;  %v3336_v27 = vadd.f32 %v3300_v32, %v3152_v19 }
 0x691   : > { %v3066_v36 = vpop.f32.mrf.mxu3 }
 0x692   : > { %v3389_v29 = vpack.c.bf16 %v3366_v41, %v3365_v37  ;;  %v3067_v13 = vadd.f32 %v3066_v36, %v5698_v9  ;;  %v3368_v47 = vmax.f32 %v3336_v27, 0.0 }
 0x693   : > { %v3118_v60 = vpop.f32.mrf.mxu0 }
 0x694   : > { %3405 = vst [vmem:[%s5710_s14 + $0x40] sm:$0xff] %v3389_v29  ;;  %v3151_v11 = vmax.f32 %v3067_v13, 0.0  ;;  %v3119_v2 = vadd.f32 %v3118_v60, %v5690_v21  ;;  %v3261_v13 = vadd.f32 %v3260_v7, %v5700_v25 }
 0x695   : > { %v3307_v38 = vpop.f32.mrf.mxu2 }
 0x696   : > { %v3335_v54 = vadd.f32 %v3251_v0, %v3151_v11  ;;  %v3154_v57 = vmax.f32 %v3119_v2, 0.0  ;;  %v3308_v31 = vadd.f32 %v3307_v38, %v5696_v58 }
 0x698   : > { %v3367_v62 = vmax.f32 %v3335_v54, 0.0  ;;  %v3338_v24 = vadd.f32 %v3303_v16, %v3154_v57  ;;  %v3263_v54 = vpop.f32.mrf.mxu1 }
 0x699   : > { %v3069_v63 = vpop.f32.mrf.mxu3 }
 0x69a   : > { %v3390_v4 = vpack.c.bf16 %v3368_v47, %v3367_v62  ;;  %v3070_v39 = vadd.f32 %v3069_v63, %v5698_v9  ;;  %v3370_v20 = vmax.f32 %v3338_v24, 0.0 }
 0x69b   : > { %v3120_v18 = vpop.f32.mrf.mxu0 }
 0x69c   : > { %3406 = vst [vmem:[%s5710_s14 + $0x48] sm:$0xff] %v3390_v4  ;;  %v3153_v17 = vmax.f32 %v3070_v39, 0.0  ;;  %v3121_v33 = vadd.f32 %v3120_v18, %v5690_v21  ;;  %v3264_v39 = vadd.f32 %v3263_v54, %v5700_v25 }
 0x69d   : > { %v3309_v56 = vpop.f32.mrf.mxu2 }
 0x69e   : > { %v3337_v50 = vadd.f32 %v3254_v59, %v3153_v17  ;;  %v3156_v14 = vmax.f32 %v3121_v33, 0.0  ;;  %v3310_v19 = vadd.f32 %v3309_v56, %v5696_v58 }
 0x6a0   : > { %v3369_v6 = vmax.f32 %v3337_v50, 0.0  ;;  %v3340_v8 = vadd.f32 %v3305_v12, %v3156_v14  ;;  %v3265_v14 = vpop.f32.mrf.mxu1 }
 0x6a1   : > { %v3071_v5 = vpop.f32.mrf.mxu3 }
 0x6a2   : > { %v3391_v49 = vpack.c.bf16 %v3370_v20, %v3369_v6  ;;  %v3072_v10 = vadd.f32 %v3071_v5, %v5698_v9  ;;  %v3372_v45 = vmax.f32 %v3340_v8, 0.0 }
 0x6a3   : > { %v3123_v44 = vpop.f32.mrf.mxu0 }
 0x6a4   : > { %3407 = vst [vmem:[%s5710_s14 + $0x50] sm:$0xff] %v3391_v49  ;;  %v3155_v23 = vmax.f32 %v3072_v10, 0.0  ;;  %v3124_v15 = vadd.f32 %v3123_v44, %v5690_v21 }
 0x6a5   : > { %v3312_v11 = vpop.f32.mrf.mxu2 }
 0x6a6   : > { %v3339_v46 = vadd.f32 %v3256_v48, %v3155_v23  ;;  %v3158_v30 = vmax.f32 %v3124_v15, 0.0  ;;  %v3313_v3 = vadd.f32 %v3312_v11, %v5696_v58 }
 0x6a8   : > { %v3371_v55 = vmax.f32 %v3339_v46, 0.0  ;;  %v3342_v53 = vadd.f32 %v3308_v31, %v3158_v30 }
 0x6a9   : > { %v3074_v22 = vpop.f32.mrf.mxu3 }
 0x6aa   : > { %v3392_v1 = vpack.c.bf16 %v3372_v45, %v3371_v55  ;;  %v3075_v34 = vadd.f32 %v3074_v22, %v5698_v9  ;;  %v3374_v52 = vmax.f32 %v3342_v53, 0.0 }
 0x6ab   : > { %v3125_v40 = vpop.f32.mrf.mxu0 }
 0x6ac   : > { %3408 = vst [vmem:[%s5710_s14 + $0x58] sm:$0xff] %v3392_v1  ;;  %v3157_v43 = vmax.f32 %v3075_v34, 0.0  ;;  %v3126_v26 = vadd.f32 %v3125_v40, %v5690_v21 }
 0x6ad   : > { %v3314_v33 = vpop.f32.mrf.mxu2 }
 0x6ae   : > { %v3341_v51 = vadd.f32 %v3259_v35, %v3157_v43  ;;  %v3160_v41 = vmax.f32 %v3126_v26, 0.0  ;;  %v3315_v5 = vadd.f32 %v3314_v33, %v5696_v58  ;;  %v3419_v58 = vld [vmem:[%s5710_s14 + $0x78] sm:$0x11] }
 0x6b0   : > { %v3373_v28 = vmax.f32 %v3341_v51, 0.0  ;;  %v3344_v60 = vadd.f32 %v3310_v19, %v3160_v41 }
 0x6b1   : > { %v3076_v37 = vpop.f32.mrf.mxu3 }
 0x6b2   : > { %v3393_v36 = vpack.c.bf16 %v3374_v52, %v3373_v28  ;;  %v3077_v32 = vadd.f32 %v3076_v37, %v5698_v9  ;;  %v3376_v42 = vmax.f32 %v3344_v60, 0.0 }
 0x6b3   : > { %v3128_v29 = vpop.f32.mrf.mxu0 }
 0x6b4   : > { %3409 = vst [vmem:[%s5710_s14 + $0x60] sm:$0xff] %v3393_v36  ;;  %v3159_v0 = vmax.f32 %v3077_v32, 0.0  ;;  %v3129_v27 = vadd.f32 %v3128_v29, %v5690_v21 }
 0x6b6   : > { %v3343_v2 = vadd.f32 %v3261_v13, %v3159_v0  ;;  %v3162_v62 = vmax.f32 %v3129_v27, 0.0 }
 0x6b8   : > { %v3375_v47 = vmax.f32 %v3343_v2, 0.0  ;;  %v3346_v18 = vadd.f32 %v3313_v3, %v3162_v62 }
 0x6b9   : > { %v3079_v57 = vpop.f32.mrf.mxu3 }
 0x6ba   : > { %v3394_v63 = vpack.c.bf16 %v3376_v42, %v3375_v47  ;;  %v3080_v16 = vadd.f32 %v3079_v57, %v5698_v9  ;;  %v3378_v50 = vmax.f32 %v3346_v18, 0.0 }
 0x6bb   : > { %v3130_v4 = vpop.f32.mrf.mxu0 }
 0x6bc   : > { %3410 = vst [vmem:[%s5710_s14 + $0x68] sm:$0xff] %v3394_v63  ;;  %v3161_v59 = vmax.f32 %v3080_v16, 0.0  ;;  %v3131_v24 = vadd.f32 %v3130_v4, %v5690_v21  ;;  %v3266_v21 = vadd.f32 %v3265_v14, %v5700_v25 }
 0x6be   : > { %v3345_v17 = vadd.f32 %v3264_v39, %v3161_v59  ;;  %v3164_v6 = vmax.f32 %v3131_v24, 0.0 }
 0x6c0   : > { %v3377_v20 = vmax.f32 %v3345_v17, 0.0  ;;  %v3348_v10 = vadd.f32 %v3315_v5, %v3164_v6 }
 0x6c1   : > { %v3081_v38 = vpop.f32.mrf.mxu3 }
 0x6c2   : > { %v3395_v12 = vpack.c.bf16 %v3378_v50, %v3377_v20  ;;  %v3082_v49 = vadd.f32 %v3081_v38, %v5698_v9  ;;  %v3380_v48 = vmax.f32 %v3348_v10, 0.0 }
 0x6c4   : > { %3411 = vst [vmem:[%s5710_s14 + $0x70] sm:$0xff] %v3395_v12  ;;  %v3163_v61 = vmax.f32 %v3082_v49, 0.0 }
 0x6c6   : > { %v3347_v44 = vadd.f32 %v3266_v21, %v3163_v61 }
 0x6c8   : > { %v3379_v8 = vmax.f32 %v3347_v44, 0.0 }
 0x6ca   : > { %v3396_v23 = vpack.c.bf16 %v3380_v48, %v3379_v8 }
 0x6cc   : > { %v3420_v15 = vsel %vm3418_vm10, %v3396_v23, %v3419_v58 }
 0x6cd   : > { %3421 = vst [vmem:[%s5710_s14 + $0x78] sm:$0x11] %v3420_v15 }
 0x6ce PF: > { %s22_s21 = sadd.s32 1, %s4548_s21  }
 0x6cf   : > { %p19_p4 = scmp.ge.s32.totalorder %s22_s21, 4  }
 0x6d1   :  { %21 = sbr.rel (!%p19_p4) target bundleno = 1 (0x1), region = 113 }

// kernel: _lambda_.5
= control target key start
LH: loop header
LB: loop body
LE: loop exit
PB: predicated region body
PF: predicated region fallthrough
CT: control target
= control target key end

     0   :  { %19 = vsyncpa [#allocation3], 0  ;;  %s8524_s0 = inlined_call_operand.vmem [shape: bf16[2,36,256], index: 0, kind: input, shape index: {}]   ;;  %s8525_s1 = inlined_call_operand.vmem [shape: bf16[9,9,36], index: 1, kind: input, shape index: {}]   ;;  %s8526_s2 = inlined_call_operand.vmem [shape: bf16[256,128], index: 2, kind: input, shape index: {}]   ;;  %s8527_s3 = inlined_call_operand.vmem [shape: f32[1,128], index: 3, kind: input, shape index: {}]   ;;  %s8528_s4 = inlined_call_operand.vmem [shape: bf16[9,128,128], index: 4, kind: input, shape index: {}]   ;;  %s8529_s5 = inlined_call_operand.vmem [shape: f32[1,128], index: 5, kind: input, shape index: {}]   ;;  %s8530_s6 = inlined_call_operand.vmem [shape: bf16[128,512], index: 6, kind: input, shape index: {}]   ;;  %s8531_s7 = inlined_call_operand.vmem [shape: f32[1,512], index: 7, kind: input, shape index: {}]   ;;  %s8532_s8 = inlined_call_operand.vmem [shape: bf16[256,512], index: 8, kind: input, shape index: {}]   ;;  %s8533_s9 = inlined_call_operand.vmem [shape: f32[1,512], index: 9, kind: input, shape index: {}]   ;;  %s8534_s10 = inlined_call_operand.vmem [shape: f32[512,1024], index: 10, kind: input, shape index: {}]   ;;  %s8535_s11 = inlined_call_operand.vmem [shape: f32[1,1024], index: 11, kind: input, shape index: {}]   ;;  %s8536_s12 = inlined_call_operand.vmem [shape: f32[1024,128], index: 12, kind: input, shape index: {}]   ;;  %s8537_s13 = inlined_call_operand.vmem [shape: f32[1,128], index: 13, kind: input, shape index: {}]   ;;  %s8538_s14 = inlined_call_operand.hbm [shape: f32[2,1,128], index: 14, kind: output, shape index: {}]  }
   0x1   :  { %21 = vsyncpa [#allocation3 + $0x1], 0  ;;  %s5383_s29 = smov 0   ;;  %s5385_s30 = smov 0  }
   0x2   :  { %s5387_s15 = smov 0   ;;  %s5389_s16 = smov 0  }
   0x3 LB: > { %8545 = sst [smem:[#allocation5_spill]] %s5293_s29  ;;  %s5404_s17 = sadd.s32 4294967295, %s5305_s16   ;;  %s5305_s16 = sphi %s5389_s16, %s8556_s16   ;;  %s5301_s15 = sphi %s5387_s15, %s8558_s15   ;;  %s5297_s30 = sphi %s5385_s30, %s8560_s30   ;;  %s5293_s29 = sphi %s5383_s29, %s8559_s29  }
   0x4   : > { %8546 = sst [smem:[#allocation6_spill]] %s5301_s15  ;;  %s4051_s18 = sadd.s32 4294967294, %s5305_s16  }
   0x5   : > { %8547 = sst [smem:[#allocation7_spill]] %s5305_s16  ;;  %s5408_s19 = sadd.s32 1, %s5305_s16  }
   0x6   : > { %8548 = sst [smem:[#allocation8_spill]] %s5408_s19  ;;  %s333_s20 = sadd.s32 1, %s5301_s15 }
   0x7   : > { %s330_s21 = ssub.s32 %s5305_s16, %s5408_s19  ;;  %p343_p0 = scmp.ne.s32.totalorder %s5301_s15, %s5297_s30 }
   0x8   : > { %p331_p1 = scmp.eq.s32.totalorder %s330_s21, 0  ;;  %p344_p2 = scmp.eq.s32.totalorder %s5404_s17, 1 }
   0x9   : > { %p349_p3 = scmp.ne.s32.totalorder %s5297_s30, %s5293_s29  ;;  %p350_p4 = scmp.eq.s32.totalorder %s4051_s18, 1 }
   0xa   : > { %s5419_s22 = scalar_select %p331_p1, %s5301_s15, %s333_s20  }
   0xb   : > { %p5421_p5 = por %p344_p2, %p343_p0  ;;  %p5425_p6 = por %p350_p4, %p349_p3 }
   0xc   : > { %8549 = sst [smem:[#allocation9_spill]] %s5419_s22  ;;  %p4054_p7 = scmp.ge.s32.totalorder %s5305_s16, 1 }
   0xd   : > { %s8551_s24 = scalar_select %p5425_p6, 1, 0 }
   0xe   : > { %p415_p8 = scmp.lt.s32.totalorder %s5305_s16, 3 }
   0xf   : > { %8552 = sst [smem:[#allocation10_spill]] %s8551_s24 }
  0x10   : > { %p416_p9 = pnand %p4054_p7, %p415_p8 }
  0x11   : > { %p460_p10 = scmp.lt.s32.totalorder (!%p416_p9), %s5404_s17, 1  ;;  %s458_s28 = sand.u32 (!%p416_p9), 1, %s5297_s30  }
  0x12   : > { %419 = sbr.rel (%p416_p9) target bundleno = 1650 (0x672), region = 76  ;;  %s3992_s29 = scalar_lea.hbm (!%p416_p9), %s8538_s14, %s5404_s17 }
  0x13   : > { %s459_s16 = scalar_lea.vmem (!%p416_p9), [#allocation2], %s458_s28  ;;  %s3996_s18 = sshll.u32 (!%p416_p9), %s3992_s29, 4  ;;  %s3997_s18 = int_to_ptr.hbm [resolvable:$true] %s3996_s18 }
  0x14   : > { %s3994_s24 = sshll.u32 (!%p416_p9), %s459_s16, 4  ;;  %s5257_s22 = sshra.s32 (!%p416_p9), %s3997_s18, 4  ;;  %s3995_s24 = int_to_ptr.vmem [resolvable:$true] %s3994_s24  ;;  %s5258_s22 = int_to_ptr.hbm [resolvable:$true] %s5257_s22 }
  0x15   : > { %s5259_s21 = scalar_lea.hbm (!%p416_p9), %s5258_s22, 1  ;;  %s5263_s15 = scalar_lea.hbm (!%p416_p9), %s8538_s14, 2 }
  0x16   : > { %p5260_p11 = scmp.ne.s32.totalorder (!%p416_p9), %s5258_s22, %s5259_s21  ;;  %p5264_p0 = scmp.lt.s32.totalorder (!%p416_p9), %s5258_s22, %s8538_s14 }
  0x17   : > { %v5012_v0 = vld [vmem:[%s8526_s2 + $0x38] sm:$0xff]  ;;  %v5011_v2 = vld [vmem:[%s8526_s2 + $0x30] sm:$0xff]  ;;  %v5010_v4 = vld [vmem:[%s8526_s2 + $0x28] sm:$0xff]  ;;  %s461_s26 = scalar_select %p460_p10, %s5404_s17, 1  ;;  %vm695_vm0 = vcmask 1041408   ;;  %vm691_vm1 = vcmask 293888  }
  0x18   : > { %v5020_v1 = vld [vmem:[%s8526_s2 + $0x78] sm:$0xff]  ;;  %630 = vmatpush.bf16.msra.mxu0 %v5012_v0  ;;  %v5019_v3 = vld [vmem:[%s8526_s2 + $0x70] sm:$0xff]  ;;  %v5018_v5 = vld [vmem:[%s8526_s2 + $0x68] sm:$0xff]  ;;  %vm2479_vm2 = vcmask 1040384   ;;  %p5261_p12 = pnand %p5260_p11, %p5421_p5  ;;  %p5265_p1 = scmp.lt.s32.totalorder %s5263_s15, %s5259_s21 }
  0x19   : > { %653 = vmatpush.bf16.msra.mxu1 %v5020_v1  ;;  %v5009_v6 = vld [vmem:[%s8526_s2 + $0x20] sm:$0xff]  ;;  %v5008_v8 = vld [vmem:[%s8526_s2 + $0x18] sm:$0xff]  ;;  %v5007_v10 = vld [vmem:[%s8526_s2 + $0x10] sm:$0xff]  ;;  %s5198_s20 = smul.u32 40, %s461_s26 }
  0x1a   : > { %v5017_v7 = vld [vmem:[%s8526_s2 + $0x60] sm:$0xff]  ;;  %v5016_v9 = vld [vmem:[%s8526_s2 + $0x58] sm:$0xff]  ;;  %v5015_v11 = vld [vmem:[%s8526_s2 + $0x50] sm:$0xff]  ;;  %p5262_p13 = pneg %p5261_p12  ;;  %p5266_p2 = por %p5265_p1, %p5264_p0 }
  0x1b   : > { %v5006_v12 = vld [vmem:[%s8526_s2 + $0x8] sm:$0xff]  ;;  %s464_s27 = scalar_lea.vmem %s8524_s0, %s5198_s20  ;;  %v5005_v14 = vld [vmem:[%s8526_s2] sm:$0xff]  ;;  %s3984_s20 = scalar_lea.sflag [#allocation3], %s458_s28 }
  0x1c   : > { %631 = vmatpush.bf16.msra.mxu0 %v5011_v2  ;;  %v5014_v13 = vld [vmem:[%s8526_s2 + $0x48] sm:$0xff]  ;;  %v5013_v15 = vld [vmem:[%s8526_s2 + $0x40] sm:$0xff]  ;;  %v4066_v22 = vld [vmem:[%s464_s27 + $0x10] sm:$0xf]  ;;  %p5267_p3 = pnand %p5266_p2, %p5262_p13 }
  0x1d   : > { %654 = vmatpush.bf16.msra.mxu1 %v5019_v3  ;;  %v4058_v16 = vld [vmem:[%s464_s27] sm:$0xf]  ;;  %v5002_v17 = vld [vmem:[%s464_s27 + $0x4] sm:$0xf0]  ;;  %v5001_v18 = vld [vmem:[%s464_s27 + $0x4] sm:$0xf] }
  0x1e   : > { %v4060_v19 = vld [vmem:[%s464_s27 + $0x8] sm:$0xf0]  ;;  %v5484_v20 = vor.u32 %v5002_v17, %v4058_v16  ;;  %v5004_v23 = vld [vmem:[%s464_s27 + $0x14] sm:$0xf0]  ;;  %v5003_v24 = vld [vmem:[%s464_s27 + $0x14] sm:$0xf] }
  0x1f   : > { %v5486_v21 = vor.u32 %v5001_v18, %v4060_v19  ;;  %v4068_v25 = vld [vmem:[%s464_s27 + $0x18] sm:$0xf0]  ;;  %v5490_v26 = vor.u32 %v5004_v23, %v4066_v22  ;;  %v470_v28 = vld [vmem:[%s464_s27 + $0x20] sm:$0x33]  ;;  %v4145_v2 = vld [vmem:[%s8525_s1 + $0x8] sm:$0xf] }
  0x20   : > { %632 = vmatpush.bf16.msra.mxu0 %v5010_v4  ;;  %v5492_v27 = vor.u32 %v5003_v24, %v4068_v25  ;;  %v520_v29 = vunpack.c.l.b16 %v470_v28  ;;  %v521_v30 = vunpack.c.h.b16 %v470_v28  ;;  %v5239_v41 = vld [vmem:[%s8527_s3] ss:$0 sm:$0xff]  ;;  %v5021_v1 = vld [vmem:[%s8525_s1] sm:$0x10]  ;;  %v5030_v3 = vld [vmem:[%s8525_s1 + $0x8] sm:$0x10] }
  0x21   : > { %655 = vmatpush.bf16.msra.mxu1 %v5018_v5  ;;  %v4138_v0 = vld [vmem:[%s8525_s1] sm:$0xf]  ;;  %v5038_v4 = vld [vmem:[%s8528_s4 + $0x78] sm:$0xff]  ;;  %v5027_v16 = vld [vmem:[%s8528_s4 + $0x28] sm:$0xff] }
  0x22   : > { %v5496_v31 = vpack.c.b16 %v520_v29, %v520_v29  ;;  %v5498_v32 = vpack.c.b16 %v521_v30, %v521_v30  ;;  %v4342_v5 = vld [vmem:[%s8525_s1 + $0x20] sm:$0xf]  ;;  %v5034_v17 = vld [vmem:[%s8528_s4 + $0x58] sm:$0xff]  ;;  %v5033_v19 = vld [vmem:[%s8528_s4 + $0x50] sm:$0xff] }
  0x23   : > { %v5026_v18 = vld [vmem:[%s8528_s4 + $0x20] sm:$0xff]  ;;  %v5025_v22 = vld [vmem:[%s8528_s4 + $0x18] sm:$0xff]  ;;  %v5032_v23 = vld [vmem:[%s8528_s4 + $0x48] sm:$0xff] }
  0x24   : > { %633 = vmatpush.bf16.msra.mxu0 %v5009_v6  ;;  %v5057_v6 = vld [vmem:[%s8525_s1 + $0x20] sm:$0x10]  ;;  %v5024_v24 = vld [vmem:[%s8528_s4 + $0x10] sm:$0xff]  ;;  %v5023_v28 = vld [vmem:[%s8528_s4 + $0x8] sm:$0xff] }
  0x25   : > { %656 = vmatpush.bf16.msra.mxu1 %v5017_v7  ;;  %v5031_v25 = vld [vmem:[%s8528_s4 + $0x40] sm:$0xff]  ;;  %v5047_v30 = vld [vmem:[%s8528_s4 + $0xb8] sm:$0xff] }
  0x26   : > { %v5022_v29 = vld [vmem:[%s8528_s4] sm:$0xff] }
  0x28   : > { %634 = vmatpush.bf16.msra.mxu0 %v5008_v8  ;;  %v4139_v8 = vor.u32 %v5021_v1, %v4138_v0  ;;  %v5074_v0 = vld [vmem:[%s8528_s4 + $0x178] sm:$0xff]  ;;  %v5063_v1 = vld [vmem:[%s8528_s4 + $0x128] sm:$0xff] }
  0x29   : > { %657 = vmatpush.bf16.msra.mxu1 %v5016_v9  ;;  %v4146_v9 = vor.u32 %v5030_v3, %v4145_v2  ;;  %v5073_v2 = vld [vmem:[%s8528_s4 + $0x170] sm:$0xff]  ;;  %v5062_v3 = vld [vmem:[%s8528_s4 + $0x120] sm:$0xff] }
  0x2c   : > { %635 = vmatpush.bf16.msra.mxu0 %v5007_v10  ;;  %v5541_v10 = vor.u32 %v5057_v6, %v4342_v5  ;;  %v5061_v5 = vld [vmem:[%s8528_s4 + $0x118] sm:$0xff]  ;;  %v5071_v6 = vld [vmem:[%s8528_s4 + $0x160] sm:$0xff] }
  0x2d   : > { %658 = vmatpush.bf16.msra.mxu1 %v5015_v11  ;;  %v5037_v11 = vld [vmem:[%s8528_s4 + $0x70] sm:$0xff] }
  0x30   : > { %636 = vmatpush.bf16.msra.mxu0 %v5006_v12  ;;  %v5036_v12 = vld [vmem:[%s8528_s4 + $0x68] sm:$0xff] }
  0x31   : > { %659 = vmatpush.bf16.msra.mxu1 %v5014_v13  ;;  %v5029_v13 = vld [vmem:[%s8528_s4 + $0x38] sm:$0xff] }
  0x34   : > { %637 = vmatpush.bf16.msra.mxu0 %v5005_v14  ;;  %v5028_v14 = vld [vmem:[%s8528_s4 + $0x30] sm:$0xff] }
  0x35   : > { %660 = vmatpush.bf16.msra.mxu1 %v5013_v15  ;;  %v5035_v15 = vld [vmem:[%s8528_s4 + $0x60] sm:$0xff] }
  0x37   : > { %638 = vmatmul.bf16.vlgmr.msra.gmra.mxu0 %v5484_v20 }
  0x38   : > { %661 = vmatmul.bf16.vlgmr.msra.gmra.mxu1 %v5486_v21 }
  0x47   : > { %643 = vmatmul.bf16.gmra.mxu0 %v5490_v26 }
  0x48   : > { %666 = vmatmul.bf16.gmra.mxu1 %v5492_v27 }
  0x57   : > { %648 = vmatmul.bf16.gmra.mxu0 %v5496_v31 }
  0x58   : > { %671 = vmatmul.bf16.gmra.mxu1 %v5498_v32 }
  0xb4   : > { %v639_v33 = vpop.f32.mrf.mxu0 }
  0xb5   : > { %v662_v34 = vpop.f32.mrf.mxu1  ;;  %v640_v50 = vadd.f32 %v5239_v41, %v639_v33  ;;  %v5046_v33 = vld [vmem:[%s8528_s4 + $0xb0] sm:$0xff] }
  0xb7   : > { %v663_v58 = vadd.f32 %v662_v34, %v640_v50  ;;  %v5045_v34 = vld [vmem:[%s8528_s4 + $0xa8] sm:$0xff]  ;;  %v5039_v50 = vld [vmem:[%s8525_s1 + $0x10] sm:$0x10] }
  0xb9   : > { %v676_v63 = vmax.f32 %v663_v58, 0.0  ;;  %v5065_v58 = vld [vmem:[%s8528_s4 + $0x138] sm:$0xff] }
  0xbc   : > { %v641_v35 = vpop.f32.mrf.mxu0 }
  0xbd   : > { %v664_v36 = vpop.f32.mrf.mxu1  ;;  %v642_v48 = vadd.f32 %v5239_v41, %v641_v35  ;;  %v5044_v35 = vld [vmem:[%s8528_s4 + $0xa0] sm:$0xff] }
  0xbf   : > { %v665_v54 = vadd.f32 %v664_v36, %v642_v48  ;;  %v5043_v36 = vld [vmem:[%s8528_s4 + $0x98] sm:$0xff]  ;;  %v5054_v48 = vld [vmem:[%s8528_s4 + $0xe8] sm:$0xff] }
  0xc1   : > { %v677_v61 = vmax.f32 %v665_v54, 0.0  ;;  %v5048_v54 = vld [vmem:[%s8525_s1 + $0x18] sm:$0x10] }
  0xc3   : > { %v5537_v7 = vpack.c.bf16 %v677_v61, %v676_v63  ;;  %v5064_v61 = vld [vmem:[%s8528_s4 + $0x130] sm:$0xff]  ;;  %v5049_v63 = vld [vmem:[%s8528_s4 + $0xc0] sm:$0xff] }
  0xc4   : > { %v644_v37 = vpop.f32.mrf.mxu0 }
  0xc5   : > { %v667_v38 = vpop.f32.mrf.mxu1  ;;  %v645_v46 = vadd.f32 %v5239_v41, %v644_v37  ;;  %v5042_v37 = vld [vmem:[%s8528_s4 + $0x90] sm:$0xff] }
  0xc7   : > { %v668_v52 = vadd.f32 %v667_v38, %v645_v46  ;;  %v5041_v38 = vld [vmem:[%s8528_s4 + $0x88] sm:$0xff]  ;;  %v5056_v46 = vld [vmem:[%s8528_s4 + $0xf8] sm:$0xff] }
  0xc8   : > { %1095 = vmatpush.bf16.msrb.mxu0 %v5056_v46 }
  0xc9   : > { %v678_v60 = vmax.f32 %v668_v52, 0.0 }
  0xcc   : > { %v646_v39 = vpop.f32.mrf.mxu0 }
  0xcd   : > { %v669_v40 = vpop.f32.mrf.mxu1  ;;  %v647_v42 = vadd.f32 %v5239_v41, %v646_v39  ;;  %v5040_v39 = vld [vmem:[%s8528_s4 + $0x80] sm:$0xff] }
  0xcf   : > { %v670_v49 = vadd.f32 %v669_v40, %v647_v42 }
  0xd1   : > { %v679_v55 = vmax.f32 %v670_v49, 0.0  ;;  %v4232_v49 = vld [vmem:[%s8525_s1 + $0x10] sm:$0xf] }
  0xd2   : > { %v4233_v52 = vor.u32 %v5039_v50, %v4232_v49  ;;  %v5079_v49 = vld [vmem:[%s8528_s4 + $0x198] sm:$0xff] }
  0xd3   : > { %v5511_v62 = vpack.c.bf16 %v679_v55, %v678_v60  ;;  %v5050_v60 = vld [vmem:[%s8528_s4 + $0xc8] sm:$0xff]  ;;  %v5088_v50 = vld [vmem:[%s8528_s4 + $0x1d8] sm:$0xff] }
  0xd4   : > { %v649_v43 = vpop.f32.mrf.mxu0 }
  0xd5   : > { %v672_v44 = vpop.f32.mrf.mxu1  ;;  %v650_v45 = vadd.f32 %v5239_v41, %v649_v43 }
  0xd7   : > { %v673_v47 = vadd.f32 %v672_v44, %v650_v45 }
  0xd9   : > { %v680_v51 = vmax.f32 %v673_v47, 0.0  ;;  %v5055_v47 = vld [vmem:[%s8528_s4 + $0xf0] sm:$0xff] }
  0xda   : > { %1096 = vmatpush.bf16.msrb.mxu0 %v5055_v47  ;;  %v5081_v47 = vld [vmem:[%s8528_s4 + $0x1a8] sm:$0xff] }
  0xdb   : > { %v683_v53 = vpack.c.bf16 %v680_v51, %v680_v51  ;;  %v5053_v51 = vld [vmem:[%s8528_s4 + $0xe0] sm:$0xff] }
  0xdc   : > { %v651_v56 = vpop.f32.mrf.mxu0 }
  0xdd   : > { %v674_v57 = vpop.f32.mrf.mxu1  ;;  %v5506_v59 = vsel %vm695_vm0, %v683_v53, 0  ;;  %v4287_v53 = vld [vmem:[%s8525_s1 + $0x18] sm:$0xf] }
  0xde   : > { %704 = vmatpush.bf16.msra.mxu2 %v5506_v59  ;;  %746 = vmatpush.bf16.msra.mxu3 %v5506_v59  ;;  %v4288_v55 = vor.u32 %v5048_v54, %v4287_v53  ;;  %v5052_v56 = vld [vmem:[%s8528_s4 + $0xd8] sm:$0xff]  ;;  %v5051_v57 = vld [vmem:[%s8528_s4 + $0xd0] sm:$0xff] }
  0xdf   : > { %1127 = vmatpush.bf16.msrb.mxu1 %v5506_v59  ;;  %1097 = vmatpush.bf16.msrb.mxu0 %v5054_v48  ;;  %v5090_v48 = vld [vmem:[%s8528_s4 + $0x1e8] sm:$0xff] }
  0xe2   : > { %705 = vmatpush.bf16.msra.mxu2 %v5511_v62  ;;  %747 = vmatpush.bf16.msra.mxu3 %v5511_v62 }
  0xe3   : > { %1128 = vmatpush.bf16.msrb.mxu1 %v5511_v62  ;;  %1098 = vmatpush.bf16.msrb.mxu0 %v5053_v51  ;;  %v5078_v51 = vld [vmem:[%s8528_s4 + $0x190] sm:$0xff] }
  0xe6   : > { %706 = vmatpush.bf16.msra.mxu2 %v5537_v7  ;;  %748 = vmatpush.bf16.msra.mxu3 %v5537_v7 }
  0xe7   : > { %1129 = vmatpush.bf16.msrb.mxu1 %v5537_v7  ;;  %1099 = vmatpush.bf16.msrb.mxu0 %v5052_v56  ;;  %v5086_v56 = vld [vmem:[%s8528_s4 + $0x1c8] sm:$0xff] }
  0xe9   : > { %4140 = vmatmul.msk.bf16.vlgmr.msra.gmra.mxu2 %vm691_vm1, %v4139_v8  ;;  %4147 = vmatmul.msk.bf16.vlgmr.msra.gmra.mxu3 %vm691_vm1, %v4146_v9  ;;  %v5060_v9 = vld [vmem:[%s8528_s4 + $0x110] sm:$0xff] }
  0xea   : > { %821 = vmatpush.bf16.msrb.mxu2 %v5038_v4  ;;  %4344 = vmatmul.msk.bf16.vlgmr.msrb.gmra.mxu1 %vm691_vm1, %v5541_v10  ;;  %v5072_v4 = vld [vmem:[%s8528_s4 + $0x168] sm:$0xff] }
  0xeb   : > { %1341 = vmatpush.bf16.msra.mxu1 %v5506_v59  ;;  %883 = vmatpush.bf16.msrb.mxu3 %v5029_v13  ;;  %v5075_v13 = vld [vmem:[%s8525_s1 + $0x30] sm:$0x10] }
  0xec   : > { %1100 = vmatpush.bf16.msrb.mxu0 %v5051_v57  ;;  %v5076_v57 = vld [vmem:[%s8528_s4 + $0x180] sm:$0xff] }
  0xee   : > { %822 = vmatpush.bf16.msrb.mxu2 %v5037_v11  ;;  %v5070_v11 = vld [vmem:[%s8528_s4 + $0x158] sm:$0xff] }
  0xef   : > { %1342 = vmatpush.bf16.msra.mxu1 %v5511_v62  ;;  %884 = vmatpush.bf16.msrb.mxu3 %v5028_v14 }
  0xf0   : > { %1101 = vmatpush.bf16.msrb.mxu0 %v5050_v60  ;;  %v5085_v60 = vld [vmem:[%s8528_s4 + $0x1c0] sm:$0xff] }
  0xf2   : > { %823 = vmatpush.bf16.msrb.mxu2 %v5036_v12  ;;  %v4452_v12 = vld [vmem:[%s8525_s1 + $0x30] sm:$0xf] }
  0xf3   : > { %1343 = vmatpush.bf16.msra.mxu1 %v5537_v7  ;;  %885 = vmatpush.bf16.msrb.mxu3 %v5027_v16  ;;  %v4453_v14 = vor.u32 %v5075_v13, %v4452_v12  ;;  %v4562_v13 = vld [vmem:[%s8525_s1 + $0x40] sm:$0xf] }
  0xf4   : > { %1102 = vmatpush.bf16.msrb.mxu0 %v5049_v63 }
  0xf6   : > { %824 = vmatpush.bf16.msrb.mxu2 %v5035_v15  ;;  %v5059_v15 = vld [vmem:[%s8528_s4 + $0x108] sm:$0xff] }
  0xf7   : > { %1448 = vmatpush.bf16.msrb.mxu1 %v5506_v59  ;;  %886 = vmatpush.bf16.msrb.mxu3 %v5026_v18  ;;  %v5058_v18 = vld [vmem:[%s8528_s4 + $0x100] sm:$0xff] }
  0xf8   : > { %1309 = vmatpush.bf16.msra.mxu0 %v5074_v0 }
  0xfa   : > { %825 = vmatpush.bf16.msrb.mxu2 %v5034_v17  ;;  %4454 = vmatmul.msk.bf16.vlgmr.msra.gmra.mxu1 %vm691_vm1, %v4453_v14  ;;  %v5069_v17 = vld [vmem:[%s8528_s4 + $0x150] sm:$0xff]  ;;  %v5093_v14 = vld [vmem:[%s8525_s1 + $0x40] sm:$0x10] }
  0xfb   : > { %1449 = vmatpush.bf16.msrb.mxu1 %v5511_v62  ;;  %887 = vmatpush.bf16.msrb.mxu3 %v5025_v22  ;;  %v5068_v22 = vld [vmem:[%s8528_s4 + $0x148] sm:$0xff] }
  0xfc   : > { %1310 = vmatpush.bf16.msra.mxu0 %v5073_v2 }
  0xfe   : > { %826 = vmatpush.bf16.msrb.mxu2 %v5033_v19 }
  0xff   : > { %1450 = vmatpush.bf16.msrb.mxu1 %v5537_v7  ;;  %888 = vmatpush.bf16.msrb.mxu3 %v5024_v24 }
 0x100   : > { %1311 = vmatpush.bf16.msra.mxu0 %v5072_v4 }
 0x102   : > { %827 = vmatpush.bf16.msrb.mxu2 %v5032_v23 }
 0x103   : > { %889 = vmatpush.bf16.msrb.mxu3 %v5023_v28  ;;  %v4507_v28 = vld [vmem:[%s8525_s1 + $0x38] sm:$0xf] }
 0x104   : > { %1312 = vmatpush.bf16.msra.mxu0 %v5071_v6 }
 0x106   : > { %828 = vmatpush.bf16.msrb.mxu2 %v5031_v25  ;;  %v5067_v25 = vld [vmem:[%s8528_s4 + $0x140] sm:$0xff] }
 0x107   : > { %890 = vmatpush.bf16.msrb.mxu3 %v5022_v29  ;;  %v5084_v29 = vld [vmem:[%s8525_s1 + $0x38] sm:$0x10] }
 0x108   : > { %1313 = vmatpush.bf16.msra.mxu0 %v5070_v11 }
 0x10a   : > { %913 = vmatpush.bf16.msra.mxu2 %v5506_v59 }
 0x10b   : > { %988 = vmatpush.bf16.msra.mxu3 %v5047_v30  ;;  %v4508_v30 = vor.u32 %v5084_v29, %v4507_v28  ;;  %v1656_v29 = vsel %vm695_vm0, %v5496_v31, 0  ;;  %v5130_v31 = vld [vmem:[%s8530_s6 + $0xe4] sm:$0xf] }
 0x10c   : > { %1314 = vmatpush.bf16.msra.mxu0 %v5069_v17  ;;  %v5099_v17 = vld [vmem:[%s8528_s4 + $0x228] sm:$0xff] }
 0x10d   : > { %4509 = vmatmul.msk.bf16.vlgmr.msrb.gmra.mxu1 %vm691_vm1, %v4508_v30 }
 0x10e   : > { %914 = vmatpush.bf16.msra.mxu2 %v5511_v62 }
 0x10f   : > { %989 = vmatpush.bf16.msra.mxu3 %v5046_v33 }
 0x110   : > { %1315 = vmatpush.bf16.msra.mxu0 %v5068_v22  ;;  %v5096_v22 = vld [vmem:[%s8528_s4 + $0x210] sm:$0xff] }
 0x112   : > { %915 = vmatpush.bf16.msra.mxu2 %v5537_v7 }
 0x113   : > { %990 = vmatpush.bf16.msra.mxu3 %v5045_v34  ;;  %v5092_v34 = vld [vmem:[%s8528_s4 + $0x1f8] sm:$0xff] }
 0x114   : > { %1316 = vmatpush.bf16.msra.mxu0 %v5067_v25  ;;  %v5094_v25 = vld [vmem:[%s8528_s4 + $0x200] sm:$0xff] }
 0x117   : > { %991 = vmatpush.bf16.msra.mxu3 %v5044_v35 }
 0x11b   : > { %992 = vmatpush.bf16.msra.mxu3 %v5043_v36  ;;  %v5083_v36 = vld [vmem:[%s8528_s4 + $0x1b8] sm:$0xff] }
 0x11f   : > { %993 = vmatpush.bf16.msra.mxu3 %v5042_v37 }
 0x123   : > { %994 = vmatpush.bf16.msra.mxu3 %v5041_v38  ;;  %v5082_v38 = vld [vmem:[%s8528_s4 + $0x1b0] sm:$0xff] }
 0x127   : > { %995 = vmatpush.bf16.msra.mxu3 %v5040_v39 }
 0x167   : > { %v1131_v8 = vpop.f32.mrf.mxu1 }
 0x16c   : > { %v708_v40 = vpop.f32.mrf.mxu2  ;;  %v750_v41 = vpop.f32.mrf.mxu3 }
 0x16f   : > { %v1133_v19 = vpop.f32.mrf.mxu1 }
 0x170   : > { %v1136_v23 = vpack.c.bf16 %v1133_v19, %v1131_v8  ;;  %v5101_v8 = vld [vmem:[%s8528_s4 + $0x238] sm:$0xff] }
 0x171   : > { %1630 = vmatpush.bf16.msra.mxu1 %v5101_v8  ;;  %v5097_v19 = vld [vmem:[%s8528_s4 + $0x218] sm:$0xff] }
 0x174   : > { %v710_v42 = vpop.f32.mrf.mxu2  ;;  %v752_v43 = vpop.f32.mrf.mxu3 }
 0x175   : > { %v713_v44 = vpack.c.bf16 %v710_v42, %v708_v40  ;;  %v755_v45 = vpack.c.bf16 %v752_v43, %v750_v41  ;;  %v4397_v40 = vld [vmem:[%s8525_s1 + $0x28] sm:$0xf]  ;;  %v5066_v41 = vld [vmem:[%s8525_s1 + $0x28] sm:$0x10] }
 0x176   : > { %v4398_v42 = vor.u32 %v5066_v41, %v4397_v40  ;;  %v5133_v41 = vld [vmem:[%s8530_s6 + $0xf4] sm:$0xf0] }
 0x177   : > { %829 = vmatmul.bf16.vlgmr.msrb.gmra.mxu2 %v755_v45  ;;  %891 = vmatmul.bf16.vlgmr.msrb.gmra.mxu3 %v713_v44  ;;  %v5091_v45 = vld [vmem:[%s8528_s4 + $0x1f0] sm:$0xff]  ;;  %v1345_v46 = vpop.f32.mrf.mxu1 }
 0x178   : > { %1020 = vmatpush.bf16.msrb.mxu2 %v5506_v59  ;;  %1234 = vmatpush.bf16.msrb.mxu3 %v5506_v59 }
 0x17c   : > { %1021 = vmatpush.bf16.msrb.mxu2 %v5511_v62  ;;  %1235 = vmatpush.bf16.msrb.mxu3 %v5511_v62 }
 0x180   : > { %1022 = vmatpush.bf16.msrb.mxu2 %v5537_v7  ;;  %1236 = vmatpush.bf16.msrb.mxu3 %v5537_v7 }
 0x187   : > { %4234 = vmatmul.msk.bf16.vlgmr.msra.gmra.mxu2 %vm691_vm1, %v4233_v52  ;;  %v5087_v52 = vld [vmem:[%s8528_s4 + $0x1d0] sm:$0xff] }
 0x188   : > { %1202 = vmatpush.bf16.msra.mxu2 %v5065_v58 }
 0x18c   : > { %1203 = vmatpush.bf16.msra.mxu2 %v5064_v61 }
 0x190   : > { %1204 = vmatpush.bf16.msra.mxu2 %v5063_v1 }
 0x194   : > { %1205 = vmatpush.bf16.msra.mxu2 %v5062_v3 }
 0x197   : > { %4289 = vmatmul.msk.bf16.vlgmr.msrb.gmra.mxu2 %vm691_vm1, %v4288_v55  ;;  %v5077_v55 = vld [vmem:[%s8528_s4 + $0x188] sm:$0xff] }
 0x198   : > { %1206 = vmatpush.bf16.msra.mxu2 %v5061_v5 }
 0x19c   : > { %1207 = vmatpush.bf16.msra.mxu2 %v5060_v9 }
 0x1a0   : > { %1208 = vmatpush.bf16.msra.mxu2 %v5059_v15  ;;  %v4563_v15 = vor.u32 %v5093_v14, %v4562_v13  ;;  %v4683_v13 = vld [vmem:[%s8530_s6 + $0x90] sm:$0xf0]  ;;  %v4665_v14 = vld [vmem:[%s8530_s6 + $0x60] sm:$0xf] }
 0x1a4   : > { %1209 = vmatpush.bf16.msra.mxu2 %v5058_v18  ;;  %v5098_v18 = vld [vmem:[%s8528_s4 + $0x220] sm:$0xff] }
 0x1a7   : > { %1210 = vmatmul.bf16.vlgmr.msra.gmra.mxu2 %v1136_v23  ;;  %v5095_v23 = vld [vmem:[%s8528_s4 + $0x208] sm:$0xff] }
 0x1a8   : > { %1523 = vmatpush.bf16.msrb.mxu2 %v5092_v34  ;;  %v4729_v34 = vld [vmem:[%s8530_s6 + $0xe0] sm:$0xf] }
 0x1ac   : > { %1524 = vmatpush.bf16.msrb.mxu2 %v5091_v45 }
 0x1b0   : > { %1525 = vmatpush.bf16.msrb.mxu2 %v5090_v48  ;;  %v4715_v48 = vld [vmem:[%s8530_s6 + $0xd0] sm:$0xf0] }
 0x1fa   : > { %v5713_v16 = vpop.f32.mrf.mxu2  ;;  %v892_v53 = vpop.f32.mrf.mxu3 }
 0x1fb   : > { %v893_v2 = vadd.f32 %v892_v53, %v5713_v16  ;;  %v5100_v16 = vld [vmem:[%s8528_s4 + $0x230] sm:$0xff] }
 0x1fc   : > { %1631 = vmatpush.bf16.msra.mxu1 %v5100_v16 }
 0x200   : > { %1632 = vmatpush.bf16.msra.mxu1 %v5099_v17 }
 0x202   : > { %v5724_v24 = vpop.f32.mrf.mxu2  ;;  %v894_v0 = vpop.f32.mrf.mxu3 }
 0x204   : > { %1633 = vmatpush.bf16.msra.mxu1 %v5098_v18 }
 0x208   : > { %1634 = vmatpush.bf16.msra.mxu1 %v5097_v19  ;;  %v5121_v19 = vld [vmem:[%s8530_s6 + $0x94] sm:$0xf0] }
 0x20a   : > { %v917_v33 = vpop.f32.mrf.mxu2 }
 0x20c   : > { %1635 = vmatpush.bf16.msra.mxu1 %v5096_v22 }
 0x210   : > { %1636 = vmatpush.bf16.msra.mxu1 %v5095_v23 }
 0x212   : > { %v919_v35 = vpop.f32.mrf.mxu2 }
 0x213   : > { %v922_v37 = vpack.c.bf16 %v919_v35, %v917_v33  ;;  %v1659_v33 = vsel %vm695_vm0, %v5498_v32, 0  ;;  %v5132_v35 = vld [vmem:[%s8530_s6 + $0xec] sm:$0xf0]  ;;  %v4737_v32 = vld [vmem:[%s8530_s6 + $0xe8] sm:$0xf] }
 0x214   : > { %1637 = vmatpush.bf16.msra.mxu1 %v5094_v25 }
 0x215   : > { %996 = vmatmul.bf16.vlgmr.msra.gmra.mxu3 %v922_v37  ;;  %v4731_v37 = vld [vmem:[%s8530_s6 + $0xf0] sm:$0xf0] }
 0x216   : > { %1416 = vmatpush.bf16.msra.mxu3 %v5083_v36  ;;  %v4730_v36 = vor.u32 %v5132_v35, %v4729_v34  ;;  %v4734_v40 = vor.u32 %v5130_v31, %v4731_v37  ;;  %v4649_v34 = vld [vmem:[%s8530_s6 + $0x40] sm:$0xf]  ;;  %v5112_v35 = vld [vmem:[%s8530_s6 + $0x4c] sm:$0xf0]  ;;  %v4673_v31 = vld [vmem:[%s8530_s6 + $0x68] sm:$0xf] }
 0x217   : > { %v5117_v37 = vld [vmem:[%s8530_s6 + $0x74] sm:$0xf0] }
 0x21a   : > { %v1024_v39 = vpop.f32.mrf.mxu2  ;;  %1417 = vmatpush.bf16.msra.mxu3 %v5082_v38  ;;  %v5131_v38 = vld [vmem:[%s8530_s6 + $0xec] sm:$0xf] }
 0x21e   : > { %1418 = vmatpush.bf16.msra.mxu3 %v5081_v47  ;;  %v5126_v47 = vld [vmem:[%s8530_s6 + $0xc4] sm:$0xf] }
 0x222   : > { %v1026_v43 = vpop.f32.mrf.mxu2 }
 0x223   : > { %v1029_v44 = vpack.c.bf16 %v1026_v43, %v1024_v39  ;;  %v4739_v39 = vld [vmem:[%s8530_s6 + $0xf8] sm:$0xf0]  ;;  %v5128_v43 = vld [vmem:[%s8530_s6 + $0xcc] sm:$0xf0] }
 0x225   : > { %1103 = vmatmul.bf16.vlgmr.msrb.gmra.mxu0 %v1029_v44  ;;  %4399 = vmatmul.msk.bf16.vlgmr.msrb.gmra.mxu3 %vm691_vm1, %v4398_v42  ;;  %v4742_v42 = vor.u32 %v5131_v38, %v4739_v39  ;;  %v895_v44 = vadd.f32 %v894_v0, %v5724_v24  ;;  %v4723_v24 = vld [vmem:[%s8530_s6 + $0xd8] sm:$0xf0]  ;;  %v5120_v0 = vld [vmem:[%s8530_s6 + $0x8c] sm:$0xf0]  ;;  %v4650_v39 = vor.u32 %v5112_v35, %v4649_v34  ;;  %v4825_v34 = vld [vmem:[%s8532_s8 + $0xa0] sm:$0xf] }
 0x226   : > { %1555 = vmatpush.bf16.msrb.mxu0 %v5506_v59  ;;  %v5080_v59 = vld [vmem:[%s8528_s4 + $0x1a0] sm:$0xff]  ;;  %v5156_v35 = vld [vmem:[%s8532_s8 + $0xac] sm:$0xf0] }
 0x227   : > { %1419 = vmatpush.bf16.msra.mxu3 %v5080_v59  ;;  %1935 = vmatpush.bf16.msrb.mxu1 %v4742_v42  ;;  %v4659_v42 = vld [vmem:[%s8530_s6 + $0x58] sm:$0xf0] }
 0x22a   : > { %1556 = vmatpush.bf16.msrb.mxu0 %v5511_v62  ;;  %v5089_v62 = vld [vmem:[%s8528_s4 + $0x1e0] sm:$0xff]  ;;  %v1211_v30 = vpop.f32.mrf.mxu2 }
 0x22b   : > { %1526 = vmatpush.bf16.msrb.mxu2 %v5089_v62  ;;  %1420 = vmatpush.bf16.msra.mxu3 %v5079_v49  ;;  %v5127_v62 = vld [vmem:[%s8530_s6 + $0xcc] sm:$0xf] }
 0x22c   : > { %v4726_v53 = vor.u32 %v5127_v62, %v4723_v24 }
 0x22e   : > { %1557 = vmatpush.bf16.msrb.mxu0 %v5537_v7  ;;  %v1347_v7 = vpop.f32.mrf.mxu1  ;;  %1936 = vmatpush.bf16.msrb.mxu1 %v4726_v53  ;;  %v5104_v53 = vld [vmem:[%s8530_s6 + $0xc] sm:$0xf0] }
 0x22f   : > { %1527 = vmatpush.bf16.msrb.mxu2 %v5088_v50  ;;  %1421 = vmatpush.bf16.msra.mxu3 %v5078_v51  ;;  %v1350_v58 = vpack.c.bf16 %v1347_v7, %v1345_v46  ;;  %v4697_v7 = vld [vmem:[%s8530_s6 + $0xa0] sm:$0xf]  ;;  %v4738_v51 = vor.u32 %v5133_v41, %v4737_v32  ;;  %v5111_v41 = vld [vmem:[%s8530_s6 + $0x4c] sm:$0xf] }
 0x233   : > { %1528 = vmatpush.bf16.msrb.mxu2 %v5087_v52  ;;  %1422 = vmatpush.bf16.msra.mxu3 %v5077_v55  ;;  %v5129_v52 = vld [vmem:[%s8530_s6 + $0xd4] sm:$0xf0]  ;;  %v4718_v55 = vor.u32 %v5126_v47, %v4715_v48  ;;  %v4657_v47 = vld [vmem:[%s8530_s6 + $0x48] sm:$0xf] }
 0x234   : > { %v5113_v48 = vld [vmem:[%s8530_s6 + $0x54] sm:$0xf0] }
 0x236   : > { %v1452_v54 = vpop.f32.mrf.mxu1 }
 0x237   : > { %1529 = vmatpush.bf16.msrb.mxu2 %v5086_v56  ;;  %1423 = vmatpush.bf16.msra.mxu3 %v5076_v57  ;;  %v4699_v57 = vld [vmem:[%s8530_s6 + $0xb0] sm:$0xf0] }
 0x23a   : > { %1424 = vmatmul.bf16.vlgmr.msra.gmra.mxu3 %v1350_v58  ;;  %v5123_v58 = vld [vmem:[%s8530_s6 + $0xac] sm:$0xf] }
 0x23b   : > { %1530 = vmatpush.bf16.msrb.mxu2 %v5085_v60  ;;  %1666 = vmatpush.bf16.msrb.mxu3 %v1656_v29  ;;  %v5115_v29 = vld [vmem:[%s8530_s6 + $0x6c] sm:$0xf] }
 0x23e   : > { %v1454_v61 = vpop.f32.mrf.mxu1 }
 0x23f   : > { %v1457_v63 = vpack.c.bf16 %v1454_v61, %v1452_v54  ;;  %1667 = vmatpush.bf16.msrb.mxu3 %v5490_v26  ;;  %1893 = vmatpush.bf16.msra.mxu2 %v4730_v36  ;;  %v4713_v26 = vld [vmem:[%s8530_s6 + $0xc0] sm:$0xf]  ;;  %v5124_v54 = vld [vmem:[%s8530_s6 + $0xac] sm:$0xf0]  ;;  %v4707_v61 = vld [vmem:[%s8530_s6 + $0xb8] sm:$0xf0] }
 0x240   : > { %v4714_v46 = vor.u32 %v5128_v43, %v4713_v26  ;;  %v4698_v56 = vor.u32 %v5124_v54, %v4697_v7  ;;  %v4651_v26 = vld [vmem:[%s8530_s6 + $0x50] sm:$0xf0]  ;;  %v4633_v43 = vld [vmem:[%s8530_s6 + $0x20] sm:$0xf]  ;;  %v5106_v7 = vld [vmem:[%s8530_s6 + $0x24] sm:$0xf] }
 0x241   : > { %1531 = vmatmul.bf16.vlgmr.msrb.gmra.mxu2 %v1457_v63  ;;  %v4681_v63 = vld [vmem:[%s8530_s6 + $0x80] sm:$0xf] }
 0x242   : > { %v4682_v8 = vor.u32 %v5120_v0, %v4681_v63  ;;  %v4857_v54 = vld [vmem:[%s8532_s8 + $0xe0] sm:$0xf]  ;;  %v4619_v0 = vld [vmem:[%s8530_s6 + $0x10] sm:$0xf0] }
 0x243   : > { %1668 = vmatpush.bf16.msrb.mxu3 %v5484_v20  ;;  %1894 = vmatpush.bf16.msra.mxu2 %v4714_v46  ;;  %v5122_v20 = vld [vmem:[%s8530_s6 + $0xa4] sm:$0xf]  ;;  %v4674_v46 = vor.u32 %v5117_v37, %v4673_v31 }
 0x244   : > { %v5158_v37 = vld [vmem:[%s8532_s8 + $0xc4] sm:$0xf] }
 0x247   : > { %1907 = vmatpush.bf16.msra.mxu3 %v4734_v40  ;;  %1895 = vmatpush.bf16.msra.mxu2 %v4698_v56  ;;  %v5110_v40 = vld [vmem:[%s8530_s6 + $0x44] sm:$0xf]  ;;  %v4658_v56 = vor.u32 %v5113_v48, %v4657_v47  ;;  %v4827_v48 = vld [vmem:[%s8532_s8 + $0xb0] sm:$0xf0] }
 0x248   : > { %v4654_v62 = vor.u32 %v5110_v40, %v4651_v26  ;;  %v4826_v40 = vor.u32 %v5156_v35, %v4825_v34  ;;  %v4953_v26 = vld [vmem:[%s8532_s8 + $0x1a0] sm:$0xf]  ;;  %v5154_v47 = vld [vmem:[%s8532_s8 + $0xa4] sm:$0xf] }
 0x24a   : > { %4613 = vmatmul.msk.bf16.vlgmr.msrb.gmra.mxu3 %vm691_vm1, %v5541_v10 }
 0x24b   : > { %1908 = vmatpush.bf16.msra.mxu3 %v4718_v55  ;;  %1896 = vmatpush.bf16.msra.mxu2 %v4682_v8  ;;  %v5164_v55 = vld [vmem:[%s8532_s8 + $0xec] sm:$0xf0] }
 0x298   : > { %v997_v1 = vpop.f32.mrf.mxu3 }
 0x299   : > { %v1002_v4 = vadd.f32 %v997_v1, %v893_v2  ;;  %v1213_v1 = vpop.f32.mrf.mxu2 }
 0x2a0   : > { %v999_v3 = vpop.f32.mrf.mxu3 }
 0x2a1   : > { %v1003_v49 = vadd.f32 %v999_v3, %v895_v44  ;;  %v4705_v3 = vld [vmem:[%s8530_s6 + $0xa8] sm:$0xf]  ;;  %v5108_v44 = vld [vmem:[%s8530_s6 + $0x2c] sm:$0xf0] }
 0x2a2   : > { %v1104_v5 = vpop.f32.mrf.mxu0  ;;  %v4634_v24 = vor.u32 %v5108_v44, %v4633_v43  ;;  %v5188_v43 = vld [vmem:[%s8532_s8 + $0x1ac] sm:$0xf0] }
 0x2a3   : > { %v1109_v6 = vadd.f32 %v1104_v5, %v1002_v4  ;;  %v5125_v4 = vld [vmem:[%s8530_s6 + $0xb4] sm:$0xf0]  ;;  %v4710_v5 = vor.u32 %v5123_v58, %v4707_v61 }
 0x2a4   : > { %v4706_v18 = vor.u32 %v5125_v4, %v4705_v3  ;;  %v4858_v3 = vor.u32 %v5164_v55, %v4857_v54  ;;  %v4985_v4 = vld [vmem:[%s8532_s8 + $0x1e0] sm:$0xf]  ;;  %v5182_v55 = vld [vmem:[%s8532_s8 + $0x184] sm:$0xf] }
 0x2a5   : > { %v1216_v45 = vadd.f32 %v1211_v30, %v1109_v6  ;;  %v4702_v6 = vor.u32 %v5122_v20, %v4699_v57  ;;  %1937 = vmatpush.bf16.msrb.mxu1 %v4710_v5  ;;  %v4675_v30 = vld [vmem:[%s8530_s6 + $0x78] sm:$0xf0]  ;;  %v4641_v20 = vld [vmem:[%s8530_s6 + $0x28] sm:$0xf]  ;;  %v5109_v57 = vld [vmem:[%s8530_s6 + $0x34] sm:$0xf0] }
 0x2a6   : > { %v4678_v32 = vor.u32 %v5115_v29, %v4675_v30  ;;  %v5194_v5 = vld [vmem:[%s8532_s8 + $0x1e4] sm:$0xf]  ;;  %v4971_v30 = vld [vmem:[%s8532_s8 + $0x1d0] sm:$0xf0] }
 0x2a7   : > { %1909 = vmatpush.bf16.msra.mxu3 %v4702_v6  ;;  %v4987_v6 = vld [vmem:[%s8532_s8 + $0x1f0] sm:$0xf0]  ;;  %v5190_v29 = vld [vmem:[%s8532_s8 + $0x1c4] sm:$0xf] }
 0x2a8   : > { %v1238_v9 = vpop.f32.mrf.mxu3 }
 0x2aa   : > { %v1106_v28 = vpop.f32.mrf.mxu0 }
 0x2ab   : > { %v1110_v60 = vadd.f32 %v1106_v28, %v1003_v49  ;;  %v5114_v28 = vld [vmem:[%s8530_s6 + $0x64] sm:$0xf]  ;;  %v5107_v49 = vld [vmem:[%s8530_s6 + $0x2c] sm:$0xf] }
 0x2b0   : > { %v1240_v11 = vpop.f32.mrf.mxu3 }
 0x2b1   : > { %v1243_v12 = vpack.c.bf16 %v1240_v11, %v1238_v9  ;;  %v5119_v9 = vld [vmem:[%s8530_s6 + $0x8c] sm:$0xf]  ;;  %v4691_v11 = vld [vmem:[%s8530_s6 + $0x98] sm:$0xf0] }
 0x2b2   : > { %v4694_v22 = vor.u32 %v5119_v9, %v4691_v11  ;;  %v4841_v9 = vld [vmem:[%s8532_s8 + $0xc0] sm:$0xf]  ;;  %v5160_v11 = vld [vmem:[%s8532_s8 + $0xcc] sm:$0xf0] }
 0x2b3   : > { %1317 = vmatmul.bf16.vlgmr.msra.gmra.mxu0 %v1243_v12  ;;  %v1217_v12 = vadd.f32 %v1213_v1, %v1110_v60  ;;  %v5102_v60 = vld [vmem:[%s8530_s6 + $0x4] sm:$0xf]  ;;  %v5103_v1 = vld [vmem:[%s8530_s6 + $0xc] sm:$0xf] }
 0x2b4   : > { %1680 = vmatpush.bf16.msra.mxu0 %v1659_v33  ;;  %v4667_v33 = vld [vmem:[%s8530_s6 + $0x70] sm:$0xf0]  ;;  %1938 = vmatpush.bf16.msrb.mxu1 %v4694_v22  ;;  %v4990_v22 = vor.u32 %v5194_v5, %v4987_v6 }
 0x2b5   : > { %v4670_v38 = vor.u32 %v5114_v28, %v4667_v33  ;;  %v4969_v28 = vld [vmem:[%s8532_s8 + $0x1c0] sm:$0xf]  ;;  %v5192_v33 = vld [vmem:[%s8532_s8 + $0x1cc] sm:$0xf0]  ;;  %v4923_v5 = vld [vmem:[%s8532_s8 + $0x170] sm:$0xf0] }
 0x2b8   : > { %1681 = vmatpush.bf16.msra.mxu0 %v5492_v27  ;;  %v4721_v27 = vld [vmem:[%s8530_s6 + $0xc8] sm:$0xf]  ;;  %1939 = vmatpush.bf16.msrb.mxu1 %v4678_v32  ;;  %v4974_v32 = vor.u32 %v5190_v29, %v4971_v30  ;;  %v5172_v29 = vld [vmem:[%s8532_s8 + $0x12c] sm:$0xf0]  ;;  %v5138_v30 = vld [vmem:[%s8532_s8 + $0x24] sm:$0xf] }
 0x2b9   : > { %v4722_v2 = vor.u32 %v5129_v52, %v4721_v27  ;;  %v4635_v27 = vld [vmem:[%s8530_s6 + $0x30] sm:$0xf0]  ;;  %v4617_v52 = vld [vmem:[%s8530_s6] sm:$0xf] }
 0x2ba   : > { %v4638_v61 = vor.u32 %v5106_v7, %v4635_v27  ;;  %v4618_v63 = vor.u32 %v5104_v53, %v4617_v52  ;;  %v4937_v7 = vld [vmem:[%s8532_s8 + $0x180] sm:$0xf]  ;;  %v5150_v27 = vld [vmem:[%s8532_s8 + $0x84] sm:$0xf]  ;;  %v4811_v52 = vld [vmem:[%s8532_s8 + $0x90] sm:$0xf0] }
 0x2bb   : > { %v4814_v54 = vor.u32 %v5150_v27, %v4811_v52 }
 0x2bc   : > { %1682 = vmatpush.bf16.msra.mxu0 %v5486_v21  ;;  %v5118_v21 = vld [vmem:[%s8530_s6 + $0x84] sm:$0xf] }
 0x2bd   : > { %v4686_v23 = vor.u32 %v5118_v21, %v4683_v13  ;;  %v5196_v21 = vld [vmem:[%s8532_s8 + $0x1ec] sm:$0xf0]  ;;  %v4642_v13 = vor.u32 %v5109_v57, %v4641_v20  ;;  %v4793_v57 = vld [vmem:[%s8532_s8 + $0x60] sm:$0xf] }
 0x2bf   : > { %1910 = vmatpush.bf16.msra.mxu3 %v4686_v23  ;;  %v4986_v23 = vor.u32 %v5196_v21, %v4985_v4  ;;  %v5178_v4 = vld [vmem:[%s8532_s8 + $0x164] sm:$0xf]  ;;  %v5144_v21 = vld [vmem:[%s8532_s8 + $0x4c] sm:$0xf0] }
 0x2c0   : > { %v4926_v6 = vor.u32 %v5178_v4, %v4923_v5 }
 0x2c3   : > { %4564 = vmatmul.msk.bf16.vlgmr.msrb.gmra.mxu0 %vm691_vm1, %v4563_v15  ;;  %v5116_v15 = vld [vmem:[%s8530_s6 + $0x6c] sm:$0xf0]  ;;  %1911 = vmatpush.bf16.msra.mxu3 %v4670_v38  ;;  %v4970_v38 = vor.u32 %v5192_v33, %v4969_v28  ;;  %v4763_v33 = vld [vmem:[%s8532_s8 + $0x30] sm:$0xf0] }
 0x2c4   : > { %1921 = vmatpush.bf16.msrb.mxu0 %v4738_v51  ;;  %v4666_v25 = vor.u32 %v5116_v15, %v4665_v14  ;;  %v4643_v51 = vld [vmem:[%s8530_s6 + $0x38] sm:$0xf0]  ;;  %v4625_v14 = vld [vmem:[%s8530_s6 + $0x8] sm:$0xf]  ;;  %v4766_v35 = vor.u32 %v5138_v30, %v4763_v33 }
 0x2c5   : > { %v4646_v58 = vor.u32 %v5107_v49, %v4643_v51  ;;  %v5184_v51 = vld [vmem:[%s8532_s8 + $0x18c] sm:$0xf0]  ;;  %v4961_v33 = vld [vmem:[%s8532_s8 + $0x1a8] sm:$0xf] }
 0x2c6   : > { %1897 = vmatpush.bf16.msra.mxu2 %v4666_v25  ;;  %v4842_v25 = vor.u32 %v5160_v11, %v4841_v9  ;;  %v4938_v53 = vor.u32 %v5184_v51, %v4937_v7  ;;  %v4905_v9 = vld [vmem:[%s8532_s8 + $0x140] sm:$0xf] }
 0x2c7   : > { %1912 = vmatpush.bf16.msra.mxu3 %v4654_v62  ;;  %v4809_v62 = vld [vmem:[%s8532_s8 + $0x80] sm:$0xf] }
 0x2c8   : > { %1922 = vmatpush.bf16.msrb.mxu0 %v4722_v2  ;;  %v4627_v2 = vld [vmem:[%s8530_s6 + $0x18] sm:$0xf0] }
 0x2c9   : > { %v4630_v15 = vor.u32 %v5103_v1, %v4627_v2  ;;  %v4795_v1 = vld [vmem:[%s8532_s8 + $0x70] sm:$0xf0] }
 0x2ca   : > { %1898 = vmatpush.bf16.msra.mxu2 %v4650_v39  ;;  %v4843_v39 = vld [vmem:[%s8532_s8 + $0xd0] sm:$0xf0] }
 0x2cb   : > { %1913 = vmatpush.bf16.msra.mxu3 %v4638_v61  ;;  %v4846_v44 = vor.u32 %v5158_v37, %v4843_v39  ;;  %v4873_v39 = vld [vmem:[%s8532_s8 + $0x100] sm:$0xf] }
 0x2cc   : > { %1923 = vmatpush.bf16.msrb.mxu0 %v4706_v18  ;;  %v5105_v18 = vld [vmem:[%s8530_s6 + $0x14] sm:$0xf0] }
 0x2ce   : > { %1899 = vmatpush.bf16.msra.mxu2 %v4634_v24  ;;  %v5152_v24 = vld [vmem:[%s8532_s8 + $0x8c] sm:$0xf0] }
 0x2cf   : > { %v4810_v49 = vor.u32 %v5152_v24, %v4809_v62 }
 0x2d2   : > { %1900 = vmatpush.bf16.msra.mxu2 %v4618_v63  ;;  %v5180_v63 = vld [vmem:[%s8532_s8 + $0x16c] sm:$0xf0] }
 0x2d3   : > { %4614 = vmatmul.msk.bf16.vlgmr.msra.gmra.mxu0 %vm691_vm1, %v5541_v10  ;;  %v4689_v10 = vld [vmem:[%s8530_s6 + $0x88] sm:$0xf] }
 0x2d4   : > { %v4690_v36 = vor.u32 %v5121_v19, %v4689_v10  ;;  %v5162_v10 = vld [vmem:[%s8532_s8 + $0xe4] sm:$0xf]  ;;  %v4859_v19 = vld [vmem:[%s8532_s8 + $0xf0] sm:$0xf0] }
 0x2d5   : > { %v4862_v31 = vor.u32 %v5162_v10, %v4859_v19  ;;  %v4907_v10 = vld [vmem:[%s8532_s8 + $0x150] sm:$0xf0] }
 0x2d6   : > { %1924 = vmatpush.bf16.msrb.mxu0 %v4690_v36  ;;  %2351 = vmatpush.bf16.msrb.mxu2 %v4858_v3  ;;  %v4626_v36 = vor.u32 %v5105_v18, %v4625_v14  ;;  %v4779_v14 = vld [vmem:[%s8532_s8 + $0x50] sm:$0xf0]  ;;  %v5174_v18 = vld [vmem:[%s8532_s8 + $0x144] sm:$0xf] }
 0x2d7   : > { %v4910_v19 = vor.u32 %v5174_v18, %v4907_v10  ;;  %v5191_v18 = vld [vmem:[%s8532_s8 + $0x1cc] sm:$0xf]  ;;  %v4979_v10 = vld [vmem:[%s8532_s8 + $0x1d8] sm:$0xf0] }
 0x2d8   : > { %v4982_v30 = vor.u32 %v5191_v18, %v4979_v10  ;;  %v4771_v18 = vld [vmem:[%s8532_s8 + $0x38] sm:$0xf0]  ;;  %v5171_v10 = vld [vmem:[%s8532_s8 + $0x12c] sm:$0xf] }
 0x2da   : > { %1925 = vmatpush.bf16.msrb.mxu0 %v4674_v46  ;;  %2352 = vmatpush.bf16.msrb.mxu2 %v4842_v25  ;;  %v4954_v46 = vor.u32 %v5188_v43, %v4953_v26  ;;  %v4889_v25 = vld [vmem:[%s8532_s8 + $0x120] sm:$0xf]  ;;  %v4747_v26 = vld [vmem:[%s8532_s8 + $0x10] sm:$0xf0] }
 0x2db   : > { %v4890_v34 = vor.u32 %v5172_v29, %v4889_v25  ;;  %v4833_v25 = vld [vmem:[%s8532_s8 + $0xa8] sm:$0xf] }
 0x2de   : > { %1926 = vmatpush.bf16.msrb.mxu0 %v4658_v56  ;;  %2353 = vmatpush.bf16.msrb.mxu2 %v4826_v40  ;;  %v4939_v56 = vld [vmem:[%s8532_s8 + $0x190] sm:$0xf0] }
 0x2df   : > { %v4942_v20 = vor.u32 %v5182_v55, %v4939_v56 }
 0x2e2   : > { %1927 = vmatpush.bf16.msrb.mxu0 %v4642_v13  ;;  %2354 = vmatpush.bf16.msrb.mxu2 %v4810_v49  ;;  %v5142_v13 = vld [vmem:[%s8532_s8 + $0x44] sm:$0xf] }
 0x2e6   : > { %1928 = vmatpush.bf16.msrb.mxu0 %v4626_v36  ;;  %v5170_v36 = vld [vmem:[%s8532_s8 + $0x124] sm:$0xf] }
 0x2ea   : > { %2379 = vmatpush.bf16.msra.mxu0 %v4862_v31  ;;  %v4891_v31 = vld [vmem:[%s8532_s8 + $0x130] sm:$0xf0] }
 0x2eb   : > { %v4894_v37 = vor.u32 %v5170_v36, %v4891_v31  ;;  %v4835_v36 = vld [vmem:[%s8532_s8 + $0xb8] sm:$0xf0]  ;;  %v5187_v31 = vld [vmem:[%s8532_s8 + $0x1ac] sm:$0xf] }
 0x2ee   : > { %2380 = vmatpush.bf16.msra.mxu0 %v4846_v44 }
 0x330   : > { %v1318_v59 = vpop.f32.mrf.mxu0 }
 0x331   : > { %v5878_v50 = vadd.f32 %v1318_v59, %v1216_v45  ;;  %v4662_v59 = vor.u32 %v5111_v41, %v4659_v42  ;;  %v5186_v41 = vld [vmem:[%s8532_s8 + $0x1a4] sm:$0xf]  ;;  %v4955_v42 = vld [vmem:[%s8532_s8 + $0x1b0] sm:$0xf0] }
 0x333   : > { %1940 = vmatpush.bf16.msrb.mxu1 %v4662_v59  ;;  %v4830_v59 = vor.u32 %v5154_v47, %v4827_v48  ;;  %v1425_v48 = vpop.f32.mrf.mxu3 }
 0x334   : > { %v1430_v62 = vadd.f32 %v1425_v48, %v5878_v50  ;;  %v4865_v50 = vld [vmem:[%s8532_s8 + $0xe8] sm:$0xf] }
 0x335   : > { %2381 = vmatpush.bf16.msra.mxu0 %v4830_v59  ;;  %v1532_v59 = vpop.f32.mrf.mxu2 }
 0x336   : > { %v1537_v49 = vadd.f32 %v1532_v59, %v1430_v62 }
 0x337   : > { %1941 = vmatpush.bf16.msrb.mxu1 %v4646_v58  ;;  %v5148_v58 = vld [vmem:[%s8532_s8 + $0x6c] sm:$0xf0] }
 0x338   : > { %v1320_v16 = vpop.f32.mrf.mxu0  ;;  %v4794_v61 = vor.u32 %v5148_v58, %v4793_v57  ;;  %v5165_v58 = vld [vmem:[%s8532_s8 + $0xf4] sm:$0xf0] }
 0x339   : > { %v5937_v17 = vadd.f32 %v1320_v16, %v1217_v12  ;;  %v4622_v16 = vor.u32 %v5102_v60, %v4619_v0  ;;  %2382 = vmatpush.bf16.msra.mxu0 %v4814_v54  ;;  %v4921_v60 = vld [vmem:[%s8532_s8 + $0x160] sm:$0xf]  ;;  %v5146_v0 = vld [vmem:[%s8532_s8 + $0x64] sm:$0xf]  ;;  %v4866_v5 = vor.u32 %v5165_v58, %v4865_v50 }
 0x33a   : > { %v4922_v2 = vor.u32 %v5180_v63, %v4921_v60  ;;  %v4798_v3 = vor.u32 %v5146_v0, %v4795_v1  ;;  %2355 = vmatpush.bf16.msrb.mxu2 %v4794_v61  ;;  %v5197_v60 = vld [vmem:[%s8532_s8 + $0x1f4] sm:$0xf0]  ;;  %v5163_v61 = vld [vmem:[%s8532_s8 + $0xec] sm:$0xf]  ;;  %v4867_v63 = vld [vmem:[%s8532_s8 + $0xf8] sm:$0xf0] }
 0x33b   : > { %1942 = vmatpush.bf16.msrb.mxu1 %v4630_v15  ;;  %1914 = vmatpush.bf16.msra.mxu3 %v4622_v16  ;;  %v4782_v16 = vor.u32 %v5142_v13, %v4779_v14  ;;  %v1427_v24 = vpop.f32.mrf.mxu3  ;;  %v5193_v13 = vld [vmem:[%s8532_s8 + $0x1d4] sm:$0xf0]  ;;  %v5159_v14 = vld [vmem:[%s8532_s8 + $0xcc] sm:$0xf] }
 0x33c   : > { %v1431_v51 = vadd.f32 %v1427_v24, %v5937_v17  ;;  %v4993_v17 = vld [vmem:[%s8532_s8 + $0x1e8] sm:$0xf] }
 0x33d   : > { %2383 = vmatpush.bf16.msra.mxu0 %v4798_v3  ;;  %v1534_v27 = vpop.f32.mrf.mxu2  ;;  %v4995_v3 = vld [vmem:[%s8532_s8 + $0x1f8] sm:$0xf0]  ;;  %v4801_v24 = vld [vmem:[%s8532_s8 + $0x68] sm:$0xf] }
 0x33e   : > { %v1538_v54 = vadd.f32 %v1534_v27, %v1431_v51 }
 0x33f   : > { %2365 = vmatpush.bf16.msrb.mxu3 %v4986_v23  ;;  %v5140_v23 = vld [vmem:[%s8532_s8 + $0x2c] sm:$0xf0] }
 0x340   : > { %v1559_v45 = vpop.f32.mrf.mxu0 }
 0x341   : > { %2384 = vmatpush.bf16.msra.mxu0 %v4782_v16  ;;  %v4851_v16 = vld [vmem:[%s8532_s8 + $0xd8] sm:$0xf0] }
 0x342   : > { %v4854_v29 = vor.u32 %v5159_v14, %v4851_v16  ;;  %v4897_v14 = vld [vmem:[%s8532_s8 + $0x128] sm:$0xf]  ;;  %v5139_v16 = vld [vmem:[%s8532_s8 + $0x2c] sm:$0xf] }
 0x343   : > { %2366 = vmatpush.bf16.msrb.mxu3 %v4970_v38  ;;  %v5136_v38 = vld [vmem:[%s8532_s8 + $0xc] sm:$0xf0] }
 0x345   : > { %2385 = vmatpush.bf16.msra.mxu0 %v4766_v35  ;;  %v5155_v35 = vld [vmem:[%s8532_s8 + $0xac] sm:$0xf] }
 0x347   : > { %2367 = vmatpush.bf16.msrb.mxu3 %v4954_v46  ;;  %v4875_v46 = vld [vmem:[%s8532_s8 + $0x110] sm:$0xf0] }
 0x348   : > { %v1561_v8 = vpop.f32.mrf.mxu0 }
 0x349   : > { %v1564_v12 = vpack.c.bf16 %v1561_v8, %v1559_v45  ;;  %v4958_v45 = vor.u32 %v5186_v41, %v4955_v42  ;;  %v4777_v8 = vld [vmem:[%s8532_s8 + $0x40] sm:$0xf]  ;;  %v5168_v41 = vld [vmem:[%s8532_s8 + $0x10c] sm:$0xf0]  ;;  %v5134_v42 = vld [vmem:[%s8532_s8 + $0x4] sm:$0xf] }
 0x34a   : > { %v4778_v11 = vor.u32 %v5144_v21, %v4777_v8  ;;  %v4874_v43 = vor.u32 %v5168_v41, %v4873_v39  ;;  %v4750_v44 = vor.u32 %v5134_v42, %v4747_v26  ;;  %v4849_v8 = vld [vmem:[%s8532_s8 + $0xc8] sm:$0xf]  ;;  %v5161_v21 = vld [vmem:[%s8532_s8 + $0xd4] sm:$0xf0]  ;;  %v4838_v41 = vor.u32 %v5155_v35, %v4835_v36  ;;  %v5135_v35 = vld [vmem:[%s8532_s8 + $0xc] sm:$0xf] }
 0x34b   : > { %1638 = vmatmul.bf16.vlgmr.msra.gmra.mxu1 %v1564_v12  ;;  %2368 = vmatpush.bf16.msrb.mxu3 %v4938_v53  ;;  %v5176_v12 = vld [vmem:[%s8532_s8 + $0x14c] sm:$0xf0]  ;;  %v5240_v53 = vld [vmem:[%s8529_s5] ss:$0 sm:$0xff]  ;;  %v4817_v39 = vld [vmem:[%s8532_s8 + $0x88] sm:$0xf] }
 0x34c   : > { %2393 = vmatpush.bf16.msra.mxu1 %v4990_v22  ;;  %v4906_v15 = vor.u32 %v5176_v12, %v4905_v9  ;;  %2356 = vmatpush.bf16.msrb.mxu2 %v4778_v11  ;;  %v4761_v22 = vld [vmem:[%s8532_s8 + $0x20] sm:$0xf]  ;;  %v4870_v9 = vor.u32 %v5163_v61, %v4867_v63  ;;  %v4977_v12 = vld [vmem:[%s8532_s8 + $0x1c8] sm:$0xf]  ;;  %v5145_v61 = vld [vmem:[%s8532_s8 + $0x54] sm:$0xf0] }
 0x34d   : > { %v4762_v28 = vor.u32 %v5140_v23, %v4761_v22  ;;  %2386 = vmatpush.bf16.msra.mxu0 %v4750_v44  ;;  %v4850_v22 = vor.u32 %v5161_v21, %v4849_v8  ;;  %v4978_v23 = vor.u32 %v5193_v13, %v4977_v12  ;;  %v4945_v26 = vld [vmem:[%s8532_s8 + $0x188] sm:$0xf]  ;;  %v5151_v44 = vld [vmem:[%s8532_s8 + $0x8c] sm:$0xf]  ;;  %v4755_v36 = vld [vmem:[%s8532_s8 + $0x18] sm:$0xf0] }
 0x34f   : > { %2369 = vmatpush.bf16.msrb.mxu3 %v4922_v2  ;;  %v5195_v2 = vld [vmem:[%s8532_s8 + $0x1ec] sm:$0xf] }
 0x350   : > { %2394 = vmatpush.bf16.msra.mxu1 %v4974_v32  ;;  %2357 = vmatpush.bf16.msrb.mxu2 %v4762_v28  ;;  %v4745_v32 = vld [vmem:[%s8532_s8] sm:$0xf]  ;;  %v4998_v11 = vor.u32 %v5195_v2, %v4995_v3  ;;  %v5157_v28 = vld [vmem:[%s8532_s8 + $0xb4] sm:$0xf0]  ;;  %v5143_v3 = vld [vmem:[%s8532_s8 + $0x4c] sm:$0xf] }
 0x351   : > { %v4746_v40 = vor.u32 %v5136_v38, %v4745_v32  ;;  %v4834_v32 = vor.u32 %v5157_v28, %v4833_v25  ;;  %v5177_v2 = vld [vmem:[%s8532_s8 + $0x154] sm:$0xf0]  ;;  %v4753_v25 = vld [vmem:[%s8532_s8 + $0x8] sm:$0xf] }
 0x352   : > { %v5137_v28 = vld [vmem:[%s8532_s8 + $0x14] sm:$0xf0] }
 0x353   : > { %2370 = vmatpush.bf16.msrb.mxu3 %v4906_v15  ;;  %v1670_v15 = vpop.f32.mrf.mxu3 }
 0x354   : > { %2395 = vmatpush.bf16.msra.mxu1 %v4958_v45  ;;  %v5166_v45 = vld [vmem:[%s8532_s8 + $0x104] sm:$0xf]  ;;  %2358 = vmatpush.bf16.msrb.mxu2 %v4746_v40  ;;  %v5153_v40 = vld [vmem:[%s8532_s8 + $0x94] sm:$0xf0] }
 0x355   : > { %v4878_v47 = vor.u32 %v5166_v45, %v4875_v46  ;;  %v4819_v45 = vld [vmem:[%s8532_s8 + $0x98] sm:$0xf0]  ;;  %v5183_v46 = vld [vmem:[%s8532_s8 + $0x18c] sm:$0xf]  ;;  %v4818_v59 = vor.u32 %v5153_v40, %v4817_v39  ;;  %v4758_v39 = vor.u32 %v5135_v35, %v4755_v36  ;;  %v2835_v35 = vld [vmem:[%s8534_s10 + $0x9c0] sm:$0xff] }
 0x356   : > { %v4822_v51 = vor.u32 %v5151_v44, %v4819_v45  ;;  %v2755_v44 = vld [vmem:[%s8534_s10 + $0x740] sm:$0xff] }
 0x357   : > { %2371 = vmatpush.bf16.msrb.mxu3 %v4890_v34  ;;  %v5189_v34 = vld [vmem:[%s8532_s8 + $0x1b4] sm:$0xf0]  ;;  %v2627_v45 = vld [vmem:[%s8534_s10 + $0x340] sm:$0xff] }
 0x358   : > { %2396 = vmatpush.bf16.msra.mxu1 %v4942_v20  ;;  %v4962_v38 = vor.u32 %v5189_v34, %v4961_v33  ;;  %v4881_v33 = vld [vmem:[%s8532_s8 + $0x108] sm:$0xf]  ;;  %v5169_v34 = vld [vmem:[%s8532_s8 + $0x114] sm:$0xf0]  ;;  %v2939_v36 = vld [vmem:[%s8534_s10 + $0xd00] sm:$0xff] }
 0x35b   : > { %2372 = vmatpush.bf16.msrb.mxu3 %v4874_v43  ;;  %v5185_v43 = vld [vmem:[%s8532_s8 + $0x194] sm:$0xf0]  ;;  %v1672_v48 = vpop.f32.mrf.mxu3 }
 0x35c   : > { %2397 = vmatpush.bf16.msra.mxu1 %v4926_v6  ;;  %v4994_v6 = vor.u32 %v5197_v60, %v4993_v17  ;;  %v4946_v62 = vor.u32 %v5185_v43, %v4945_v26  ;;  %v4785_v60 = vld [vmem:[%s8532_s8 + $0x48] sm:$0xf]  ;;  %v2763_v26 = vld [vmem:[%s8534_s10 + $0x780] sm:$0xff] }
 0x35d   : > { %v4786_v8 = vor.u32 %v5145_v61, %v4785_v60  ;;  %v2635_v43 = vld [vmem:[%s8534_s10 + $0x380] sm:$0xff] }
 0x35e   : > { %v2571_v60 = vld [vmem:[%s8534_s10 + $0x180] sm:$0xff] }
 0x35f   : > { %v2675_v61 = vld [vmem:[%s8534_s10 + $0x4c0] sm:$0xff] }
 0x360   : > { %2398 = vmatpush.bf16.msra.mxu1 %v4910_v19  ;;  %v1684_v19 = vpop.f32.mrf.mxu0 }
 0x364   : > { %2399 = vmatpush.bf16.msra.mxu1 %v4894_v37  ;;  %v4963_v37 = vld [vmem:[%s8532_s8 + $0x1b8] sm:$0xf0] }
 0x365   : > { %v4966_v42 = vor.u32 %v5187_v31, %v4963_v37  ;;  %v5167_v31 = vld [vmem:[%s8532_s8 + $0x10c] sm:$0xf]  ;;  %v4883_v37 = vld [vmem:[%s8532_s8 + $0x118] sm:$0xf0] }
 0x366   : > { %v4886_v40 = vor.u32 %v5167_v31, %v4883_v37  ;;  %v2636_v31 = vld [vmem:[%s8534_s10 + $0x388] sm:$0xff] }
 0x367   : > { %v2740_v37 = vld [vmem:[%s8534_s10 + $0x6c8] sm:$0xff] }
 0x368   : > { %2400 = vmatpush.bf16.msra.mxu1 %v4878_v47  ;;  %v4947_v47 = vld [vmem:[%s8532_s8 + $0x198] sm:$0xf0] }
 0x369   : > { %v4950_v27 = vor.u32 %v5183_v46, %v4947_v47  ;;  %v2747_v46 = vld [vmem:[%s8534_s10 + $0x700] sm:$0xff] }
 0x36a   : > { %v2739_v47 = vld [vmem:[%s8534_s10 + $0x6c0] sm:$0xff] }
 0x3c8   : > { %v1639_v7 = vpop.f32.mrf.mxu1 }
 0x3c9   : > { %v1644_v52 = vadd.f32 %v1639_v7, %v1537_v49  ;;  %v5149_v7 = vld [vmem:[%s8532_s8 + $0x74] sm:$0xf0]  ;;  %v1686_v49 = vpop.f32.mrf.mxu0 }
 0x3ca   : > { %v6354_v50 = vpack.c.bf16 %v1686_v49, %v1684_v19  ;;  %v4802_v58 = vor.u32 %v5149_v7, %v4801_v24  ;;  %v4899_v19 = vld [vmem:[%s8532_s8 + $0x138] sm:$0xf0]  ;;  %v2611_v24 = vld [vmem:[%s8534_s10 + $0x2c0] sm:$0xff] }
 0x3cb   : > { %v1650_v56 = vadd.f32 %v5240_v53, %v1644_v52  ;;  %v4929_v52 = vld [vmem:[%s8532_s8 + $0x168] sm:$0xf]  ;;  %v2715_v7 = vld [vmem:[%s8534_s10 + $0x600] sm:$0xff] }
 0x3cc   : > { %v2603_v49 = vld [vmem:[%s8534_s10 + $0x280] sm:$0xff] }
 0x3cd   : > { %v1652_v0 = vmax.f32 %v1650_v56, 0.0  ;;  %v5179_v56 = vld [vmem:[%s8532_s8 + $0x16c] sm:$0xf] }
 0x3d0   : > { %v1641_v55 = vpop.f32.mrf.mxu1 }
 0x3d1   : > { %v1645_v20 = vadd.f32 %v1641_v55, %v1538_v54  ;;  %v5147_v54 = vld [vmem:[%s8532_s8 + $0x6c] sm:$0xf]  ;;  %v4803_v55 = vld [vmem:[%s8532_s8 + $0x78] sm:$0xf0] }
 0x3d2   : > { %v4806_v63 = vor.u32 %v5147_v54, %v4803_v55  ;;  %v3019_v54 = vld [vmem:[%s8534_s10 + $0xf80] sm:$0xff] }
 0x3d3   : > { %v1651_v57 = vadd.f32 %v5240_v53, %v1645_v20  ;;  %v5181_v53 = vld [vmem:[%s8532_s8 + $0x174] sm:$0xf0]  ;;  %v4931_v20 = vld [vmem:[%s8532_s8 + $0x178] sm:$0xf0]  ;;  %v2587_v55 = vld [vmem:[%s8534_s10 + $0x200] sm:$0xff] }
 0x3d4   : > { %v4930_v17 = vor.u32 %v5181_v53, %v4929_v52  ;;  %v2595_v52 = vld [vmem:[%s8534_s10 + $0x240] sm:$0xff] }
 0x3d5   : > { %v1653_v1 = vmax.f32 %v1651_v57, 0.0  ;;  %v6352_v57 = vpack.c.bf16 %v1672_v48, %v1670_v15  ;;  %v5173_v15 = vld [vmem:[%s8532_s8 + $0x134] sm:$0xf0]  ;;  %v2731_v48 = vld [vmem:[%s8534_s10 + $0x680] sm:$0xff] }
 0x3d6   : > { %v2699_v53 = vld [vmem:[%s8534_s10 + $0x580] sm:$0xff] }
 0x3d7   : > { %v1654_v4 = vpack.c.bf16 %v1653_v1, %v1652_v0  ;;  %v4934_v0 = vor.u32 %v5179_v56, %v4931_v20  ;;  %v4913_v1 = vld [vmem:[%s8532_s8 + $0x148] sm:$0xf]  ;;  %v2691_v56 = vld [vmem:[%s8534_s10 + $0x540] sm:$0xff] }
 0x3d8   : > { %v4914_v21 = vor.u32 %v5177_v2, %v4913_v1  ;;  %v3011_v20 = vld [vmem:[%s8534_s10 + $0xf40] sm:$0xff] }
 0x3d9   : > { %1901 = vmatmul.bf16.vlgmr.msra.gmra.mxu2 %v1654_v4  ;;  %1915 = vmatmul.bf16.vlgmr.msra.gmra.mxu3 %v1654_v4  ;;  %v2563_v1 = vld [vmem:[%s8534_s10 + $0x140] sm:$0xff] }
 0x3da   : > { %1929 = vmatmul.bf16.vlgmr.msrb.gmra.mxu0 %v1654_v4  ;;  %1943 = vmatmul.bf16.vlgmr.msrb.gmra.mxu1 %v1654_v4  ;;  %v4787_v4 = vld [vmem:[%s8532_s8 + $0x58] sm:$0xf0]  ;;  %v2667_v2 = vld [vmem:[%s8534_s10 + $0x480] sm:$0xff] }
 0x3db   : > { %2407 = vmatpush.bf16.msra.mxu2 %v4866_v5  ;;  %2421 = vmatpush.bf16.msra.mxu3 %v4994_v6  ;;  %v5175_v5 = vld [vmem:[%s8532_s8 + $0x14c] sm:$0xf]  ;;  %v4915_v6 = vld [vmem:[%s8532_s8 + $0x158] sm:$0xf0]  ;;  %v4790_v12 = vor.u32 %v5143_v3, %v4787_v4  ;;  %v2883_v3 = vld [vmem:[%s8534_s10 + $0xb40] sm:$0xff] }
 0x3dc   : > { %2435 = vmatpush.bf16.msrb.mxu0 %v4870_v9  ;;  %2449 = vmatpush.bf16.msrb.mxu1 %v4998_v11  ;;  %v4769_v9 = vld [vmem:[%s8532_s8 + $0x28] sm:$0xf]  ;;  %v5141_v11 = vld [vmem:[%s8532_s8 + $0x34] sm:$0xf0]  ;;  %v4918_v13 = vor.u32 %v5175_v5, %v4915_v6  ;;  %v2987_v4 = vld [vmem:[%s8534_s10 + $0xe80] sm:$0xff] }
 0x3dd   : > { %v2555_v5 = vld [vmem:[%s8534_s10 + $0x100] sm:$0xff] }
 0x3de   : > { %v2659_v6 = vld [vmem:[%s8534_s10 + $0x440] sm:$0xff] }
 0x3df   : > { %2408 = vmatpush.bf16.msra.mxu2 %v4850_v22  ;;  %2422 = vmatpush.bf16.msra.mxu3 %v4978_v23  ;;  %v4770_v22 = vor.u32 %v5141_v11, %v4769_v9  ;;  %v4898_v23 = vor.u32 %v5173_v15, %v4897_v14  ;;  %v2547_v9 = vld [vmem:[%s8534_s10 + $0xc0] sm:$0xff]  ;;  %v2772_v14 = vld [vmem:[%s8534_s10 + $0x7c8] sm:$0xff] }
 0x3e0   : > { %2436 = vmatpush.bf16.msrb.mxu0 %v4854_v29  ;;  %2450 = vmatpush.bf16.msrb.mxu1 %v4982_v30  ;;  %v4774_v29 = vor.u32 %v5139_v16, %v4771_v18  ;;  %v4902_v30 = vor.u32 %v5171_v10, %v4899_v19  ;;  %v2651_v11 = vld [vmem:[%s8534_s10 + $0x400] sm:$0xff]  ;;  %v2764_v10 = vld [vmem:[%s8534_s10 + $0x788] sm:$0xff] }
 0x3e1   : > { %v2539_v15 = vld [vmem:[%s8534_s10 + $0x80] sm:$0xff] }
 0x3e2   : > { %v2859_v16 = vld [vmem:[%s8534_s10 + $0xa80] sm:$0xff] }
 0x3e3   : > { %2409 = vmatpush.bf16.msra.mxu2 %v4834_v32  ;;  %2423 = vmatpush.bf16.msra.mxu3 %v4962_v38  ;;  %v4754_v32 = vor.u32 %v5137_v28, %v4753_v25  ;;  %v4882_v38 = vor.u32 %v5169_v34, %v4881_v33  ;;  %v2963_v18 = vld [vmem:[%s8534_s10 + $0xdc0] sm:$0xff]  ;;  %v2756_v25 = vld [vmem:[%s8534_s10 + $0x748] sm:$0xff] }
 0x3e4   : > { %2437 = vmatpush.bf16.msrb.mxu0 %v4838_v41  ;;  %2451 = vmatpush.bf16.msrb.mxu1 %v4966_v42  ;;  %v2771_v41 = vld [vmem:[%s8534_s10 + $0x7c0] sm:$0xff]  ;;  %v2644_v33 = vld [vmem:[%s8534_s10 + $0x3c8] sm:$0xff] }
 0x3e5   : > { %v2643_v42 = vld [vmem:[%s8534_s10 + $0x3c0] sm:$0xff]  ;;  %v2748_v34 = vld [vmem:[%s8534_s10 + $0x708] sm:$0xff] }
 0x3e6   : > { %v2531_v19 = vld [vmem:[%s8534_s10 + $0x40] sm:$0xff] }
 0x3e7   : > { %2410 = vmatpush.bf16.msra.mxu2 %v4818_v59  ;;  %2424 = vmatpush.bf16.msra.mxu3 %v4946_v62  ;;  %v2619_v59 = vld [vmem:[%s8534_s10 + $0x300] sm:$0xff] }
 0x3e8   : > { %2438 = vmatpush.bf16.msrb.mxu0 %v4822_v51  ;;  %2452 = vmatpush.bf16.msrb.mxu1 %v4950_v27  ;;  %v2723_v62 = vld [vmem:[%s8534_s10 + $0x640] sm:$0xff] }
 0x3e9   : > { %2359 = vmatmul.bf16.vlgmr.msrb.gmra.mxu2 %v6352_v57  ;;  %2373 = vmatmul.bf16.vlgmr.msrb.gmra.mxu3 %v6354_v50  ;;  %v2707_v51 = vld [vmem:[%s8534_s10 + $0x5c0] sm:$0xff] }
 0x3ea   : > { %2387 = vmatmul.bf16.vlgmr.msra.gmra.mxu0 %v6352_v57  ;;  %2401 = vmatmul.bf16.vlgmr.msra.gmra.mxu1 %v6354_v50  ;;  %v3027_v27 = vld [vmem:[%s8534_s10 + $0xfc0] sm:$0xff] }
 0x3eb   : > { %2411 = vmatpush.bf16.msra.mxu2 %v4802_v58  ;;  %2425 = vmatpush.bf16.msra.mxu3 %v4930_v17  ;;  %v2899_v58 = vld [vmem:[%s8534_s10 + $0xbc0] sm:$0xff] }
 0x3ec   : > { %2439 = vmatpush.bf16.msrb.mxu0 %v4806_v63  ;;  %2453 = vmatpush.bf16.msrb.mxu1 %v4934_v0  ;;  %v3003_v17 = vld [vmem:[%s8534_s10 + $0xf00] sm:$0xff] }
 0x3ed   : > { %v2891_v63 = vld [vmem:[%s8534_s10 + $0xb80] sm:$0xff] }
 0x3ee   : > { %v2995_v0 = vld [vmem:[%s8534_s10 + $0xec0] sm:$0xff] }
 0x3ef   : > { %2412 = vmatpush.bf16.msra.mxu2 %v4786_v8  ;;  %2426 = vmatpush.bf16.msra.mxu3 %v4914_v21  ;;  %v2875_v8 = vld [vmem:[%s8534_s10 + $0xb00] sm:$0xff] }
 0x3f0   : > { %2440 = vmatpush.bf16.msrb.mxu0 %v4790_v12  ;;  %2454 = vmatpush.bf16.msrb.mxu1 %v4918_v13  ;;  %v2979_v21 = vld [vmem:[%s8534_s10 + $0xe40] sm:$0xff] }
 0x3f1   : > { %v2867_v12 = vld [vmem:[%s8534_s10 + $0xac0] sm:$0xff] }
 0x3f2   : > { %v2971_v13 = vld [vmem:[%s8534_s10 + $0xe00] sm:$0xff] }
 0x3f3   : > { %2413 = vmatpush.bf16.msra.mxu2 %v4770_v22  ;;  %2427 = vmatpush.bf16.msra.mxu3 %v4898_v23  ;;  %v2851_v22 = vld [vmem:[%s8534_s10 + $0xa40] sm:$0xff] }
 0x3f4   : > { %2441 = vmatpush.bf16.msrb.mxu0 %v4774_v29  ;;  %2455 = vmatpush.bf16.msrb.mxu1 %v4902_v30  ;;  %v2955_v23 = vld [vmem:[%s8534_s10 + $0xd80] sm:$0xff] }
 0x3f5   : > { %v2523_v28 = vld [vmem:[%s8534_s10] sm:$0xff] }
 0x3f6   : > { %v2843_v29 = vld [vmem:[%s8534_s10 + $0xa00] sm:$0xff] }
 0x3f7   : > { %2414 = vmatpush.bf16.msra.mxu2 %v4754_v32  ;;  %2428 = vmatpush.bf16.msra.mxu3 %v4882_v38  ;;  %v2947_v30 = vld [vmem:[%s8534_s10 + $0xd40] sm:$0xff] }
 0x3f8   : > { %2442 = vmatpush.bf16.msrb.mxu0 %v4758_v39  ;;  %2456 = vmatpush.bf16.msrb.mxu1 %v4886_v40  ;;  %v2827_v32 = vld [vmem:[%s8534_s10 + $0x980] sm:$0xff]  ;;  %v2628_v39 = vld [vmem:[%s8534_s10 + $0x348] sm:$0xff] }
 0x3f9   : > { %v2931_v38 = vld [vmem:[%s8534_s10 + $0xcc0] sm:$0xff]  ;;  %v2732_v40 = vld [vmem:[%s8534_s10 + $0x688] sm:$0xff] }
 0x3fa   : > { %2415 = vmatmul.bf16.vlgmr.msra.gmra.mxu2 %v6352_v57  ;;  %2429 = vmatmul.bf16.vlgmr.msra.gmra.mxu3 %v6354_v50 }
 0x3fb   : > { %3073 = vmatpush.msrb.mxu3 %v2771_v41  ;;  %3053 = vmatpush.msrb.mxu2 %v2643_v42  ;;  %v2819_v41 = vld [vmem:[%s8534_s10 + $0x940] sm:$0xff] }
 0x3fc   : > { %2443 = vmatmul.bf16.vlgmr.msrb.gmra.mxu0 %v6352_v57  ;;  %2457 = vmatmul.bf16.vlgmr.msrb.gmra.mxu1 %v6354_v50  ;;  %v2579_v57 = vld [vmem:[%s8534_s10 + $0x1c0] sm:$0xff] }
 0x3fd   : > { %3074 = vmatpush.msrb.mxu3 %v2763_v26  ;;  %3054 = vmatpush.msrb.mxu2 %v2635_v43  ;;  %v2683_v50 = vld [vmem:[%s8534_s10 + $0x500] sm:$0xff]  ;;  %v2620_v26 = vld [vmem:[%s8534_s10 + $0x308] sm:$0xff] }
 0x3fe   : > { %3113 = vmatpush.msra.mxu1 %v3027_v27  ;;  %3093 = vmatpush.msra.mxu0 %v2899_v58  ;;  %v2923_v42 = vld [vmem:[%s8534_s10 + $0xc80] sm:$0xff]  ;;  %v2724_v43 = vld [vmem:[%s8534_s10 + $0x648] sm:$0xff] }
 0x3ff   : > { %3075 = vmatpush.msrb.mxu3 %v2755_v44  ;;  %3055 = vmatpush.msrb.mxu2 %v2627_v45  ;;  %v2795_v27 = vld [vmem:[%s8534_s10 + $0x880] sm:$0xff]  ;;  %v3012_v58 = vld [vmem:[%s8534_s10 + $0xf48] sm:$0xff] }
 0x400   : > { %3114 = vmatpush.msra.mxu1 %v3019_v54  ;;  %3094 = vmatpush.msra.mxu0 %v2891_v63  ;;  %v2596_v54 = vld [vmem:[%s8534_s10 + $0x248] sm:$0xff] }
 0x401   : > { %3076 = vmatpush.msrb.mxu3 %v2747_v46  ;;  %3056 = vmatpush.msrb.mxu2 %v2619_v59  ;;  %v2811_v46 = vld [vmem:[%s8534_s10 + $0x900] sm:$0xff]  ;;  %v2716_v59 = vld [vmem:[%s8534_s10 + $0x608] sm:$0xff] }
 0x402   : > { %3115 = vmatpush.msra.mxu1 %v3011_v20  ;;  %3095 = vmatpush.msra.mxu0 %v2883_v3  ;;  %v2787_v20 = vld [vmem:[%s8534_s10 + $0x840] sm:$0xff]  ;;  %v2580_v63 = vld [vmem:[%s8534_s10 + $0x1c8] sm:$0xff] }
 0x403   : > { %3077 = vmatpush.msrb.mxu3 %v2739_v47  ;;  %3057 = vmatpush.msrb.mxu2 %v2611_v24  ;;  %v2915_v47 = vld [vmem:[%s8534_s10 + $0xc40] sm:$0xff]  ;;  %v2572_v3 = vld [vmem:[%s8534_s10 + $0x188] sm:$0xff] }
 0x404   : > { %3116 = vmatpush.msra.mxu1 %v3003_v17  ;;  %3096 = vmatpush.msra.mxu0 %v2875_v8  ;;  %v2907_v24 = vld [vmem:[%s8534_s10 + $0xc00] sm:$0xff]  ;;  %v2996_v8 = vld [vmem:[%s8534_s10 + $0xec8] sm:$0xff] }
 0x405   : > { %3078 = vmatpush.msrb.mxu3 %v2731_v48  ;;  %3058 = vmatpush.msrb.mxu2 %v2603_v49  ;;  %v2612_v48 = vld [vmem:[%s8534_s10 + $0x2c8] sm:$0xff] }
 0x406   : > { %3117 = vmatpush.msra.mxu1 %v2995_v0  ;;  %3097 = vmatpush.msra.mxu0 %v2867_v12  ;;  %v2708_v49 = vld [vmem:[%s8534_s10 + $0x5c8] sm:$0xff] }
 0x407   : > { %3079 = vmatpush.msrb.mxu3 %v2723_v62  ;;  %3059 = vmatpush.msrb.mxu2 %v2595_v52  ;;  %v2803_v62 = vld [vmem:[%s8534_s10 + $0x8c0] sm:$0xff]  ;;  %v2684_v0 = vld [vmem:[%s8534_s10 + $0x508] sm:$0xff] }
 0x408   : > { %3118 = vmatpush.msra.mxu1 %v2987_v4  ;;  %3098 = vmatpush.msra.mxu0 %v2859_v16  ;;  %v2676_v4 = vld [vmem:[%s8534_s10 + $0x4c8] sm:$0xff] }
 0x409   : > { %3080 = vmatpush.msrb.mxu3 %v2715_v7  ;;  %3060 = vmatpush.msrb.mxu2 %v2587_v55  ;;  %v2604_v7 = vld [vmem:[%s8534_s10 + $0x288] sm:$0xff] }
 0x40a   : > { %3119 = vmatpush.msra.mxu1 %v2979_v21  ;;  %3099 = vmatpush.msra.mxu0 %v2851_v22  ;;  %v2700_v55 = vld [vmem:[%s8534_s10 + $0x588] sm:$0xff] }
 0x40b   : > { %3081 = vmatpush.msrb.mxu3 %v2707_v51  ;;  %3061 = vmatpush.msrb.mxu2 %v2579_v57  ;;  %v3028_v51 = vld [vmem:[%s8534_s10 + $0xfc8] sm:$0xff] }
 0x40c   : > { %3120 = vmatpush.msra.mxu1 %v2971_v13  ;;  %3100 = vmatpush.msra.mxu0 %v2843_v29  ;;  %v2588_v57 = vld [vmem:[%s8534_s10 + $0x208] sm:$0xff] }
 0x40d   : > { %3082 = vmatpush.msrb.mxu3 %v2699_v53  ;;  %3062 = vmatpush.msrb.mxu2 %v2571_v60  ;;  %v2668_v12 = vld [vmem:[%s8534_s10 + $0x488] sm:$0xff] }
 0x40e   : > { %3121 = vmatpush.msra.mxu1 %v2963_v18  ;;  %3101 = vmatpush.msra.mxu0 %v2835_v35  ;;  %v2884_v13 = vld [vmem:[%s8534_s10 + $0xb48] sm:$0xff] }
 0x40f   : > { %3083 = vmatpush.msrb.mxu3 %v2691_v56  ;;  %3063 = vmatpush.msrb.mxu2 %v2563_v1  ;;  %v3020_v56 = vld [vmem:[%s8534_s10 + $0xf88] sm:$0xff] }
 0x410   : > { %3122 = vmatpush.msra.mxu1 %v2955_v23  ;;  %3102 = vmatpush.msra.mxu0 %v2827_v32  ;;  %v2900_v1 = vld [vmem:[%s8534_s10 + $0xbc8] sm:$0xff]  ;;  %v5307_v32 = vmov 9.0  }
 0x411   : > { %3084 = vmatpush.msrb.mxu3 %v2683_v50  ;;  %3064 = vmatpush.msrb.mxu2 %v2555_v5  ;;  %v2692_v50 = vld [vmem:[%s8534_s10 + $0x548] sm:$0xff]  ;;  %5241 = vrcp.f32 %v5307_v32 }
 0x412   : > { %3123 = vmatpush.msra.mxu1 %v2947_v30  ;;  %3103 = vmatpush.msra.mxu0 %v2819_v41  ;;  %v2892_v5 = vld [vmem:[%s8534_s10 + $0xb88] sm:$0xff] }
 0x413   : > { %3085 = vmatpush.msrb.mxu3 %v2675_v61  ;;  %3065 = vmatpush.msrb.mxu2 %v2547_v9  ;;  %v2779_v61 = vld [vmem:[%s8534_s10 + $0x800] sm:$0xff]  ;;  %v2660_v16 = vld [vmem:[%s8534_s10 + $0x448] sm:$0xff] }
 0x414   : > { %3124 = vmatpush.msra.mxu1 %v2939_v36  ;;  %3104 = vmatpush.msra.mxu0 %v2811_v46  ;;  %v2876_v18 = vld [vmem:[%s8534_s10 + $0xb08] sm:$0xff] }
 0x415   : > { %3086 = vmatpush.msrb.mxu3 %v2667_v2  ;;  %3066 = vmatpush.msrb.mxu2 %v2539_v15  ;;  %v3004_v2 = vld [vmem:[%s8534_s10 + $0xf08] sm:$0xff] }
 0x416   : > { %3125 = vmatpush.msra.mxu1 %v2931_v38  ;;  %3105 = vmatpush.msra.mxu0 %v2803_v62  ;;  %v2556_v15 = vld [vmem:[%s8534_s10 + $0x108] sm:$0xff] }
 0x417   : > { %3087 = vmatpush.msrb.mxu3 %v2659_v6  ;;  %3067 = vmatpush.msrb.mxu2 %v2531_v19  ;;  %v6730_v6 = vld [vmem:[%s8533_s9] sm:$0xf]  ;;  %v2652_v29 = vld [vmem:[%s8534_s10 + $0x408] sm:$0xff] }
 0x418   : > { %3126 = vmatpush.msra.mxu1 %v2923_v42  ;;  %3106 = vmatpush.msra.mxu0 %v2795_v27  ;;  %v2024_v19 = vperm.slane %v6730_v6, 1  ;;  %v2868_v30 = vld [vmem:[%s8534_s10 + $0xac8] sm:$0xff]  ;;  %v2023_v38 = vperm.slane %v6730_v6, 0 }
 0x419   : > { %3088 = vmatpush.msrb.mxu3 %v2651_v11  ;;  %3068 = vmatpush.msrb.mxu2 %v2523_v28  ;;  %v2564_v11 = vld [vmem:[%s8534_s10 + $0x148] sm:$0xff] }
 0x41a   : > { %3127 = vmatpush.msra.mxu1 %v2915_v47  ;;  %3107 = vmatpush.msra.mxu0 %v2787_v20  ;;  %v2548_v28 = vld [vmem:[%s8534_s10 + $0xc8] sm:$0xff] }
 0x41b   : > { %3153 = vmatpush.msra.mxu3 %v2772_v14  ;;  %3133 = vmatpush.msra.mxu2 %v2644_v33  ;;  %v2988_v14 = vld [vmem:[%s8534_s10 + $0xe88] sm:$0xff] }
 0x41c   : > { %3128 = vmatpush.msra.mxu1 %v2907_v24  ;;  %3108 = vmatpush.msra.mxu0 %v2779_v61  ;;  %v2540_v35 = vld [vmem:[%s8534_s10 + $0x88] sm:$0xff] }
 0x41d   : > { %3154 = vmatpush.msra.mxu3 %v2764_v10  ;;  %3134 = vmatpush.msra.mxu2 %v2636_v31  ;;  %v6761_v10 = vld [vmem:[%s8531_s7] sm:$0xf]  ;;  %v2860_v36 = vld [vmem:[%s8534_s10 + $0xa88] sm:$0xff] }
 0x41e   : > { %3193 = vmatpush.msrb.mxu1 %v3028_v51  ;;  %3173 = vmatpush.msrb.mxu0 %v2900_v1  ;;  %v1726_v33 = vperm.slane %v6761_v10, 1  ;;  %v2964_v31 = vld [vmem:[%s8534_s10 + $0xdc8] sm:$0xff]  ;;  %v1725_v46 = vperm.slane %v6761_v10, 0 }
 0x41f   : > { %3155 = vmatpush.msra.mxu3 %v2756_v25  ;;  %3135 = vmatpush.msra.mxu2 %v2628_v39  ;;  %v2980_v25 = vld [vmem:[%s8534_s10 + $0xe48] sm:$0xff] }
 0x420   : > { %3194 = vmatpush.msrb.mxu1 %v3020_v56  ;;  %3174 = vmatpush.msrb.mxu0 %v2892_v5  ;;  %v2532_v41 = vld [vmem:[%s8534_s10 + $0x48] sm:$0xff] }
 0x421   : > { %3156 = vmatpush.msra.mxu3 %v2748_v34  ;;  %3136 = vmatpush.msra.mxu2 %v2620_v26  ;;  %v2972_v34 = vld [vmem:[%s8534_s10 + $0xe08] sm:$0xff] }
 0x422   : > { %3195 = vmatpush.msrb.mxu1 %v3012_v58  ;;  %3175 = vmatpush.msrb.mxu0 %v2884_v13  ;;  %v2852_v42 = vld [vmem:[%s8534_s10 + $0xa48] sm:$0xff] }
 0x423   : > { %3157 = vmatpush.msra.mxu3 %v2740_v37  ;;  %3137 = vmatpush.msra.mxu2 %v2612_v48  ;;  %v2956_v26 = vld [vmem:[%s8534_s10 + $0xd88] sm:$0xff] }
 0x424   : > { %3196 = vmatpush.msrb.mxu1 %v3004_v2  ;;  %3176 = vmatpush.msrb.mxu0 %v2876_v18  ;;  %v2524_v48 = vld [vmem:[%s8534_s10 + $0x8] sm:$0xff] }
 0x425   : > { %3158 = vmatpush.msra.mxu3 %v2732_v40  ;;  %3138 = vmatpush.msra.mxu2 %v2604_v7  ;;  %v2948_v62 = vld [vmem:[%s8534_s10 + $0xd48] sm:$0xff] }
 0x426   : > { %3197 = vmatpush.msrb.mxu1 %v2996_v8  ;;  %3177 = vmatpush.msrb.mxu0 %v2868_v30  ;;  %v2828_v58 = vld [vmem:[%s8534_s10 + $0x988] sm:$0xff] }
 0x427   : > { %3159 = vmatpush.msra.mxu3 %v2724_v43  ;;  %3139 = vmatpush.msra.mxu2 %v2596_v54  ;;  %v2940_v54 = vld [vmem:[%s8534_s10 + $0xd08] sm:$0xff] }
 0x428   : > { %3198 = vmatpush.msrb.mxu1 %v2988_v14  ;;  %3178 = vmatpush.msrb.mxu0 %v2860_v36  ;;  %v2932_v61 = vld [vmem:[%s8534_s10 + $0xcc8] sm:$0xff] }
 0x429   : > { %3160 = vmatpush.msra.mxu3 %v2716_v59  ;;  %3140 = vmatpush.msra.mxu2 %v2588_v57  ;;  %v2844_v59 = vld [vmem:[%s8534_s10 + $0xa08] sm:$0xff] }
 0x42a   : > { %3199 = vmatpush.msrb.mxu1 %v2980_v25  ;;  %3179 = vmatpush.msrb.mxu0 %v2852_v42  ;;  %v2820_v5 = vld [vmem:[%s8534_s10 + $0x948] sm:$0xff]  ;;  %v2025_v42 = vperm.slane %v6730_v6, 2 }
 0x42b   : > { %3161 = vmatpush.msra.mxu3 %v2708_v49  ;;  %3141 = vmatpush.msra.mxu2 %v2580_v63  ;;  %v2924_v8 = vld [vmem:[%s8534_s10 + $0xc88] sm:$0xff] }
 0x42c   : > { %3200 = vmatpush.msrb.mxu1 %v2972_v34  ;;  %3180 = vmatpush.msrb.mxu0 %v2844_v59  ;;  %v2916_v13 = vld [vmem:[%s8534_s10 + $0xc48] sm:$0xff]  ;;  %v1727_v59 = vperm.slane %v6761_v10, 2 }
 0x42d   : > { %3162 = vmatpush.msra.mxu3 %v2700_v55  ;;  %3142 = vmatpush.msra.mxu2 %v2572_v3  ;;  %v6816_v55 = vpop.eup %5241  ;;  %v2908_v30 = vld [vmem:[%s8534_s10 + $0xc08] sm:$0xff] }
 0x42e   : > { %3201 = vmatpush.msrb.mxu1 %v2964_v31  ;;  %v2513_v3 = vmul.f32 9.0, %v6816_v55  ;;  %vm2517_vm3 = vweird.f32 %v6816_v55 }
 0x42f   : > { %3163 = vmatpush.msra.mxu3 %v2692_v50  ;;  %3143 = vmatpush.msra.mxu2 %v2564_v11 }
 0x430   : > { %3202 = vmatpush.msrb.mxu1 %v2956_v26 }
 0x431   : > { %3164 = vmatpush.msra.mxu3 %v2684_v0  ;;  %3144 = vmatpush.msra.mxu2 %v2556_v15 }
 0x432   : > { %3203 = vmatpush.msrb.mxu1 %v2948_v62 }
 0x433   : > { %3165 = vmatpush.msra.mxu3 %v2676_v4  ;;  %3145 = vmatpush.msra.mxu2 %v2548_v28 }
 0x434   : > { %3204 = vmatpush.msrb.mxu1 %v2940_v54 }
 0x435   : > { %3166 = vmatpush.msra.mxu3 %v2668_v12  ;;  %3146 = vmatpush.msra.mxu2 %v2540_v35  ;;  %v2812_v12 = vld [vmem:[%s8534_s10 + $0x908] sm:$0xff]  ;;  %v1728_v35 = vperm.slane %v6761_v10, 3 }
 0x436   : > { %3205 = vmatpush.msrb.mxu1 %v2932_v61 }
 0x437   : > { %3167 = vmatpush.msra.mxu3 %v2660_v16  ;;  %3147 = vmatpush.msra.mxu2 %v2532_v41 }
 0x438   : > { %3206 = vmatpush.msrb.mxu1 %v2924_v8 }
 0x439   : > { %3168 = vmatpush.msra.mxu3 %v2652_v29  ;;  %3148 = vmatpush.msra.mxu2 %v2524_v48  ;;  %v2804_v29 = vld [vmem:[%s8534_s10 + $0x8c8] sm:$0xff] }
 0x43a   : > { %3207 = vmatpush.msrb.mxu1 %v2916_v13 }
 0x43c   : > { %3208 = vmatpush.msrb.mxu1 %v2908_v30 }
 0x457   : > { %v6640_v44 = vpop.f32.mrf.mxu0  ;;  %v6642_v45 = vpop.f32.mrf.mxu1 }
 0x45c   : > { %v6674_v52 = vpop.f32.mrf.mxu2  ;;  %v6676_v53 = vpop.f32.mrf.mxu3 }
 0x45d   : > { %v1917_v43 = vadd.f32 %v6676_v53, %v1726_v33  ;;  %v2836_v53 = vld [vmem:[%s8534_s10 + $0x9c8] sm:$0xff]  ;;  %v1903_v20 = vadd.f32 %v6674_v52, %v1725_v46 }
 0x45e   : > { %3181 = vmatpush.msrb.mxu0 %v2836_v53 }
 0x45f   : > { %v6699_v17 = vpop.f32.mrf.mxu0  ;;  %v6701_v60 = vpop.f32.mrf.mxu1  ;;  %v1950_v56 = vmax.f32 %v1917_v43, 0.0 }
 0x460   : > { %3182 = vmatpush.msrb.mxu0 %v2828_v58  ;;  %v1947_v62 = vadd.f32 %v6701_v60, %v1728_v35  ;;  %v1933_v61 = vadd.f32 %v6699_v17, %v1727_v59  ;;  %v2773_v17 = vld [vmem:[%s8534_s10 + $0x7d0] sm:$0xff] }
 0x462   : > { %3183 = vmatpush.msrb.mxu0 %v2820_v5 }
 0x464   : > { %v6735_v21 = vpop.f32.mrf.mxu2  ;;  %v1918_v9 = vpop.f32.mrf.mxu3  ;;  %3184 = vmatpush.msrb.mxu0 %v2812_v12 }
 0x465   : > { %v1919_v47 = vadd.f32 %v1918_v9, %v1726_v33  ;;  %v1905_v63 = vadd.f32 %v6735_v21, %v1725_v46  ;;  %v1949_v21 = vmax.f32 %v1903_v20, 0.0  ;;  %v2788_v46 = vld [vmem:[%s8534_s10 + $0x848] sm:$0xff]  ;;  %v1931_v20 = vadd.f32 %v6640_v44, %v1727_v59  ;;  %v2613_v59 = vld [vmem:[%s8534_s10 + $0x2d0] sm:$0xff] }
 0x466   : > { %3185 = vmatpush.msrb.mxu0 %v2804_v29 }
 0x467   : > { %v2388_v22 = vpop.f32.mrf.mxu0  ;;  %v2402_v23 = vpop.f32.mrf.mxu1  ;;  %v1954_v57 = vmax.f32 %v1919_v47, 0.0  ;;  %v1953_v14 = vmax.f32 %v1905_v63, 0.0  ;;  %v1945_v47 = vadd.f32 %v6642_v45, %v1728_v35  ;;  %v2749_v35 = vld [vmem:[%s8534_s10 + $0x710] sm:$0xff] }
 0x468   : > { %v2389_v37 = vadd.f32 %v2388_v22, %v2024_v19  ;;  %v2514_v22 = vsub.f32 1.0, %v2513_v3 }
 0x469   : > { %v1952_v10 = vmax.f32 %v1945_v47, 0.0  ;;  %v2725_v47 = vld [vmem:[%s8534_s10 + $0x650] sm:$0xff] }
 0x46a   : > { %v2403_v24 = vadd.f32 %v2402_v23, %v2389_v37  ;;  %v2026_v23 = vperm.slane %v6730_v6, 3  ;;  %v2796_v37 = vld [vmem:[%s8534_s10 + $0x888] sm:$0xff] }
 0x46b   : > { %3186 = vmatpush.msrb.mxu0 %v2796_v37  ;;  %v2780_v6 = vld [vmem:[%s8534_s10 + $0x808] sm:$0xff]  ;;  %v2637_v37 = vld [vmem:[%s8534_s10 + $0x390] sm:$0xff] }
 0x46c   : > { %v2360_v39 = vpop.f32.mrf.mxu2  ;;  %v2374_v40 = vpop.f32.mrf.mxu3  ;;  %v2464_v0 = vadd.f32 %v2403_v24, %v1950_v56 }
 0x46d   : > { %v2361_v51 = vadd.f32 %v2360_v39, %v2023_v38  ;;  %3187 = vmatpush.msrb.mxu0 %v2788_v46 }
 0x46e   : > { %v2472_v15 = vmax.f32 %v2464_v0, 0.0 }
 0x46f   : > { %v2390_v7 = vpop.f32.mrf.mxu0  ;;  %v2404_v49 = vpop.f32.mrf.mxu1  ;;  %v2375_v1 = vadd.f32 %v2374_v40, %v2361_v51  ;;  %3188 = vmatpush.msrb.mxu0 %v2780_v6 }
 0x470   : > { %v2391_v27 = vadd.f32 %v2390_v7, %v2024_v19 }
 0x471   : > { %v2463_v18 = vadd.f32 %v2375_v1, %v1949_v21 }
 0x472   : > { %v2405_v50 = vadd.f32 %v2404_v49, %v2391_v27 }
 0x473   : > { %v2471_v32 = vmax.f32 %v2463_v18, 0.0  ;;  %v2765_v18 = vld [vmem:[%s8534_s10 + $0x790] sm:$0xff] }
 0x474   : > { %v2468_v2 = vadd.f32 %v2405_v50, %v1954_v57  ;;  %v2362_v52 = vpop.f32.mrf.mxu2  ;;  %v2376_v4 = vpop.f32.mrf.mxu3  ;;  %v1956_v57 = vmax.f32 %v1947_v62, 0.0 }
 0x475   : > { %v2363_v9 = vadd.f32 %v2362_v52, %v2023_v38  ;;  %v2515_v38 = vmul.f32 %v6816_v55, %v2514_v22 }
 0x476   : > { %v2476_v11 = vmax.f32 %v2468_v2, 0.0 }
 0x477   : > { %v2377_v16 = vadd.f32 %v2376_v4, %v2363_v9  ;;  %v2516_v7 = vadd.f32 %v6816_v55, %v2515_v38  ;;  %v1951_v9 = vmax.f32 %v1931_v20, 0.0  ;;  %v2741_v38 = vld [vmem:[%s8534_s10 + $0x6d0] sm:$0xff] }
 0x478   : > { %v2488_v19 = vsel %vm2479_vm2, %v2476_v11, 0.0 }
 0x479   : > { %v2444_v25 = vpop.f32.mrf.mxu0  ;;  %v2458_v28 = vpop.f32.mrf.mxu1  ;;  %v2489_v33 = vadd.f32 %v2488_v19, %v2472_v15  ;;  %v2467_v34 = vadd.f32 %v2377_v16, %v1953_v14  ;;  %v6868_v63 = vsel %vm2517_vm3, %v6816_v55, %v2516_v7  ;;  %v1955_v55 = vmax.f32 %v1933_v61, 0.0  ;;  %v2605_v7 = vld [vmem:[%s8534_s10 + $0x290] sm:$0xff] }
 0x47a   : > { %v2445_v39 = vadd.f32 %v2444_v25, %v2026_v23  ;;  %v2757_v25 = vld [vmem:[%s8534_s10 + $0x750] sm:$0xff] }
 0x47b   : > { %v2490_v36 = vrot.slane %v2489_v33, 4  ;;  %v2475_v31 = vmax.f32 %v2467_v34, 0.0  ;;  %v2581_v61 = vld [vmem:[%s8534_s10 + $0x1d0] sm:$0xff] }
 0x47c   : > { %v2459_v51 = vadd.f32 %v2458_v28, %v2445_v39 }
 0x47d   : > { %v2491_v40 = vadd.f32 %v2490_v36, %v2489_v33  ;;  %v2480_v41 = vsel %vm2479_vm2, %v2475_v31, 0.0  ;;  %v2416_v26 = vpop.f32.mrf.mxu2  ;;  %v2430_v43 = vpop.f32.mrf.mxu3  ;;  %v2645_v33 = vld [vmem:[%s8534_s10 + $0x3d0] sm:$0xff] }
 0x47e   : > { %v2481_v48 = vadd.f32 %v2480_v41, %v2471_v32  ;;  %v2417_v45 = vadd.f32 %v2416_v26, %v2025_v42  ;;  %v2466_v1 = vadd.f32 %v2459_v51, %v1952_v10  ;;  %v2709_v51 = vld [vmem:[%s8534_s10 + $0x5d0] sm:$0xff] }
 0x47f   : > { %v2492_v24 = vrot.slane %v2491_v40, 2  ;;  %v2701_v10 = vld [vmem:[%s8534_s10 + $0x590] sm:$0xff] }
 0x480   : > { %v2482_v49 = vrot.slane %v2481_v48, 4  ;;  %v2431_v3 = vadd.f32 %v2430_v43, %v2417_v45  ;;  %v2474_v13 = vmax.f32 %v2466_v1, 0.0  ;;  %v2621_v43 = vld [vmem:[%s8534_s10 + $0x310] sm:$0xff] }
 0x481   : > { %v2446_v27 = vpop.f32.mrf.mxu0  ;;  %v2493_v53 = vadd.f32 %v2492_v24, %v2491_v40  ;;  %v2460_v60 = vpop.f32.mrf.mxu1  ;;  %v2629_v40 = vld [vmem:[%s8534_s10 + $0x350] sm:$0xff] }
 0x482   : > { %v2447_v54 = vadd.f32 %v2446_v27, %v2026_v23  ;;  %v2483_v56 = vadd.f32 %v2482_v49, %v2481_v48  ;;  %v2465_v15 = vadd.f32 %v2431_v3, %v1951_v9  ;;  %v2717_v24 = vld [vmem:[%s8534_s10 + $0x610] sm:$0xff] }
 0x483   : > { %v2494_v50 = vrot.slane %v2493_v53, 1  ;;  %v2597_v45 = vld [vmem:[%s8534_s10 + $0x250] sm:$0xff] }
 0x484   : > { %v2461_v58 = vadd.f32 %v2460_v60, %v2447_v54  ;;  %v2484_v0 = vrot.slane %v2483_v56, 2  ;;  %v2473_v34 = vmax.f32 %v2465_v15, 0.0  ;;  %v2589_v60 = vld [vmem:[%s8534_s10 + $0x210] sm:$0xff] }
 0x485   : > { %v2495_v2 = vadd.f32 %v2494_v50, %v2493_v53  ;;  %v2418_v4 = vpop.f32.mrf.mxu2  ;;  %v2432_v11 = vpop.f32.mrf.mxu3  ;;  %v3029_v53 = vld [vmem:[%s8534_s10 + $0xfd0] sm:$0xff] }
 0x486   : > { %v2470_v52 = vadd.f32 %v2461_v58, %v1956_v57  ;;  %v2485_v5 = vadd.f32 %v2484_v0, %v2483_v56  ;;  %v2419_v8 = vadd.f32 %v2418_v4, %v2025_v42  ;;  %v2733_v42 = vld [vmem:[%s8534_s10 + $0x690] sm:$0xff] }
 0x487   : > { %v6871_v21 = vmul.f32 %v6868_v63, %v2495_v2  ;;  %v3021_v56 = vld [vmem:[%s8534_s10 + $0xf90] sm:$0xff] }
 0x488   : > { %v2478_v44 = vmax.f32 %v2470_v52, 0.0  ;;  %v2486_v12 = vrot.slane %v2485_v5, 1  ;;  %v2433_v14 = vadd.f32 %v2432_v11, %v2419_v8  ;;  %v2693_v57 = vld [vmem:[%s8534_s10 + $0x550] sm:$0xff] }
 0x489   : > { %3089 = vmatmul.f32.vlgmr.msrb.gmra.mxu3 %v6871_v21  ;;  %v3013_v50 = vld [vmem:[%s8534_s10 + $0xf50] sm:$0xff] }
 0x48a   : > { %v2504_v16 = vsel %vm2479_vm2, %v2478_v44, 0.0  ;;  %v2487_v19 = vadd.f32 %v2486_v12, %v2485_v5  ;;  %v2469_v23 = vadd.f32 %v2433_v14, %v1955_v55  ;;  %3233 = vmatpush.msrb.mxu3 %v2773_v17  ;;  %v2685_v0 = vld [vmem:[%s8534_s10 + $0x510] sm:$0xff] }
 0x48b   : > { %v2505_v22 = vadd.f32 %v2504_v16, %v2474_v13  ;;  %v2901_v1 = vld [vmem:[%s8534_s10 + $0xbd0] sm:$0xff] }
 0x48c   : > { %v6885_v28 = vmul.f32 %v6868_v63, %v2487_v19  ;;  %v2477_v30 = vmax.f32 %v2469_v23, 0.0  ;;  %3234 = vmatpush.msrb.mxu3 %v2765_v18  ;;  %v2573_v2 = vld [vmem:[%s8534_s10 + $0x190] sm:$0xff]  ;;  %v2774_v19 = vld [vmem:[%s8534_s10 + $0x7d8] sm:$0xff] }
 0x48d   : > { %v2506_v29 = vrot.slane %v2505_v22, 4  ;;  %v2677_v3 = vld [vmem:[%s8534_s10 + $0x4d0] sm:$0xff] }
 0x48e   : > { %v2496_v31 = vsel %vm2479_vm2, %v2477_v30, 0.0  ;;  %3235 = vmatpush.msrb.mxu3 %v2757_v25  ;;  %3069 = vmatmul.f32.vlgmr.msrb.gmra.mxu2 %v6885_v28  ;;  %v2893_v52 = vld [vmem:[%s8534_s10 + $0xb90] sm:$0xff] }
 0x48f   : > { %v2507_v36 = vadd.f32 %v2506_v29, %v2505_v22  ;;  %v2497_v32 = vadd.f32 %v2496_v31, %v2473_v34  ;;  %3213 = vmatpush.msrb.mxu2 %v2645_v33  ;;  %v2997_v4 = vld [vmem:[%s8534_s10 + $0xed0] sm:$0xff]  ;;  %v2766_v29 = vld [vmem:[%s8534_s10 + $0x798] sm:$0xff] }
 0x490   : > { %3236 = vmatpush.msrb.mxu3 %v2749_v35  ;;  %v2565_v5 = vld [vmem:[%s8534_s10 + $0x150] sm:$0xff]  ;;  %v2758_v35 = vld [vmem:[%s8534_s10 + $0x758] sm:$0xff] }
 0x491   : > { %v2508_v39 = vrot.slane %v2507_v36, 2  ;;  %v2498_v41 = vrot.slane %v2497_v32, 4  ;;  %3169 = vmatmul.f32.vlgmr.msra.gmra.mxu3 %v6871_v21  ;;  %3214 = vmatpush.msrb.mxu2 %v2637_v37  ;;  %v2669_v8 = vld [vmem:[%s8534_s10 + $0x490] sm:$0xff]  ;;  %v2646_v37 = vld [vmem:[%s8534_s10 + $0x3d8] sm:$0xff] }
 0x492   : > { %3237 = vmatpush.msrb.mxu3 %v2741_v38  ;;  %v2885_v9 = vld [vmem:[%s8534_s10 + $0xb50] sm:$0xff] }
 0x493   : > { %v2509_v26 = vadd.f32 %v2508_v39, %v2507_v36  ;;  %v2499_v46 = vadd.f32 %v2498_v41, %v2497_v32  ;;  %3215 = vmatpush.msrb.mxu2 %v2629_v40  ;;  %v2989_v44 = vld [vmem:[%s8534_s10 + $0xe90] sm:$0xff]  ;;  %v2750_v32 = vld [vmem:[%s8534_s10 + $0x718] sm:$0xff] }
 0x494   : > { %3238 = vmatpush.msrb.mxu3 %v2733_v42  ;;  %v2557_v11 = vld [vmem:[%s8534_s10 + $0x110] sm:$0xff]  ;;  %v2638_v40 = vld [vmem:[%s8534_s10 + $0x398] sm:$0xff] }
 0x495   : > { %v2510_v48 = vrot.slane %v2509_v26, 1  ;;  %v2500_v62 = vrot.slane %v2499_v46, 2  ;;  %3216 = vmatpush.msrb.mxu2 %v2621_v43  ;;  %v2661_v17 = vld [vmem:[%s8534_s10 + $0x450] sm:$0xff]  ;;  %v2742_v41 = vld [vmem:[%s8534_s10 + $0x6d8] sm:$0xff] }
 0x496   : > { %3239 = vmatpush.msrb.mxu3 %v2725_v47  ;;  %3149 = vmatmul.f32.vlgmr.msra.gmra.mxu2 %v6885_v28  ;;  %v2877_v55 = vld [vmem:[%s8534_s10 + $0xb10] sm:$0xff]  ;;  %v2630_v43 = vld [vmem:[%s8534_s10 + $0x358] sm:$0xff] }
 0x497   : > { %v2511_v6 = vadd.f32 %v2510_v48, %v2509_v26  ;;  %v2501_v49 = vadd.f32 %v2500_v62, %v2499_v46  ;;  %3217 = vmatpush.msrb.mxu2 %v2613_v59  ;;  %v2981_v12 = vld [vmem:[%s8534_s10 + $0xe50] sm:$0xff]  ;;  %v2734_v46 = vld [vmem:[%s8534_s10 + $0x698] sm:$0xff] }
 0x498   : > { %3240 = vmatpush.msrb.mxu3 %v2717_v24  ;;  %v2549_v13 = vld [vmem:[%s8534_s10 + $0xd0] sm:$0xff]  ;;  %v2622_v59 = vld [vmem:[%s8534_s10 + $0x318] sm:$0xff] }
 0x499   : > { %v6928_v27 = vmul.f32 %v6868_v63, %v2511_v6  ;;  %v2502_v54 = vrot.slane %v2501_v49, 1  ;;  %3218 = vmatpush.msrb.mxu2 %v2605_v7  ;;  %v2653_v14 = vld [vmem:[%s8534_s10 + $0x410] sm:$0xff]  ;;  %v2726_v62 = vld [vmem:[%s8534_s10 + $0x658] sm:$0xff] }
 0x49a   : > { %3241 = vmatpush.msrb.mxu3 %v2709_v51  ;;  %v2869_v15 = vld [vmem:[%s8534_s10 + $0xad0] sm:$0xff]  ;;  %v2614_v7 = vld [vmem:[%s8534_s10 + $0x2d8] sm:$0xff] }
 0x49b   : > { %3129 = vmatmul.f32.vlgmr.msra.gmra.mxu1 %v6928_v27  ;;  %v2503_v20 = vadd.f32 %v2502_v54, %v2501_v49  ;;  %3219 = vmatpush.msrb.mxu2 %v2597_v45  ;;  %v2973_v16 = vld [vmem:[%s8534_s10 + $0xe10] sm:$0xff]  ;;  %v2718_v49 = vld [vmem:[%s8534_s10 + $0x618] sm:$0xff] }
 0x49c   : > { %3273 = vmatpush.msra.mxu1 %v3029_v53  ;;  %3242 = vmatpush.msrb.mxu3 %v2701_v10  ;;  %v2541_v18 = vld [vmem:[%s8534_s10 + $0x90] sm:$0xff]  ;;  %v2606_v45 = vld [vmem:[%s8534_s10 + $0x298] sm:$0xff] }
 0x49d   : > { %v6953_v58 = vmul.f32 %v6868_v63, %v2503_v20  ;;  %3220 = vmatpush.msrb.mxu2 %v2589_v60  ;;  %v3005_v63 = vld [vmem:[%s8534_s10 + $0xf10] sm:$0xff]  ;;  %v2710_v54 = vld [vmem:[%s8534_s10 + $0x5d8] sm:$0xff] }
 0x49e   : > { %3274 = vmatpush.msra.mxu1 %v3021_v56  ;;  %3243 = vmatpush.msrb.mxu3 %v2693_v57  ;;  %v2861_v22 = vld [vmem:[%s8534_s10 + $0xa90] sm:$0xff]  ;;  %v3030_v10 = vld [vmem:[%s8534_s10 + $0xfd8] sm:$0xff] }
 0x49f   : > { %3109 = vmatmul.f32.vlgmr.msra.gmra.mxu0 %v6953_v58  ;;  %3221 = vmatpush.msrb.mxu2 %v2581_v61  ;;  %v2965_v23 = vld [vmem:[%s8534_s10 + $0xdd0] sm:$0xff]  ;;  %v2598_v60 = vld [vmem:[%s8534_s10 + $0x258] sm:$0xff] }
 0x4a0   : > { %3275 = vmatpush.msra.mxu1 %v3013_v50  ;;  %3244 = vmatpush.msrb.mxu3 %v2685_v0  ;;  %v2533_v25 = vld [vmem:[%s8534_s10 + $0x50] sm:$0xff]  ;;  %v2702_v20 = vld [vmem:[%s8534_s10 + $0x598] sm:$0xff] }
 0x4a1   : > { %3253 = vmatpush.msra.mxu0 %v2901_v1  ;;  %3222 = vmatpush.msrb.mxu2 %v2573_v2  ;;  %v2853_v30 = vld [vmem:[%s8534_s10 + $0xa50] sm:$0xff]  ;;  %v3022_v57 = vld [vmem:[%s8534_s10 + $0xf98] sm:$0xff] }
 0x4a2   : > { %3276 = vmatpush.msra.mxu1 %v3005_v63  ;;  %3245 = vmatpush.msrb.mxu3 %v2677_v3  ;;  %v2957_v33 = vld [vmem:[%s8534_s10 + $0xd90] sm:$0xff]  ;;  %v2590_v61 = vld [vmem:[%s8534_s10 + $0x218] sm:$0xff] }
 0x4a3   : > { %3209 = vmatmul.f32.vlgmr.msrb.gmra.mxu1 %v6928_v27  ;;  %3254 = vmatpush.msra.mxu0 %v2893_v52  ;;  %v2525_v34 = vld [vmem:[%s8534_s10 + $0x10] sm:$0xff]  ;;  %v2694_v0 = vld [vmem:[%s8534_s10 + $0x558] sm:$0xff] }
 0x4a4   : > { %3277 = vmatpush.msra.mxu1 %v2997_v4  ;;  %3223 = vmatpush.msrb.mxu2 %v2565_v5  ;;  %v2845_v36 = vld [vmem:[%s8534_s10 + $0xa10] sm:$0xff]  ;;  %v3014_v1 = vld [vmem:[%s8534_s10 + $0xf58] sm:$0xff] }
 0x4a5   : > { %3246 = vmatpush.msrb.mxu3 %v2669_v8  ;;  %3255 = vmatpush.msra.mxu0 %v2885_v9  ;;  %v2949_v31 = vld [vmem:[%s8534_s10 + $0xd50] sm:$0xff]  ;;  %v2582_v2 = vld [vmem:[%s8534_s10 + $0x1d8] sm:$0xff] }
 0x4a6   : > { %3278 = vmatpush.msra.mxu1 %v2989_v44  ;;  %3224 = vmatpush.msrb.mxu2 %v2557_v11  ;;  %v2837_v38 = vld [vmem:[%s8534_s10 + $0x9d0] sm:$0xff]  ;;  %v2686_v3 = vld [vmem:[%s8534_s10 + $0x518] sm:$0xff] }
 0x4a7   : > { %3247 = vmatpush.msrb.mxu3 %v2661_v17  ;;  %3256 = vmatpush.msra.mxu0 %v2877_v55  ;;  %v2941_v39 = vld [vmem:[%s8534_s10 + $0xd10] sm:$0xff]  ;;  %v2902_v52 = vld [vmem:[%s8534_s10 + $0xbd8] sm:$0xff] }
 0x4a8   : > { %3279 = vmatpush.msra.mxu1 %v2981_v12  ;;  %3189 = vmatmul.f32.vlgmr.msrb.gmra.mxu0 %v6953_v58  ;;  %v2829_v42 = vld [vmem:[%s8534_s10 + $0x990] sm:$0xff]  ;;  %v3006_v4 = vld [vmem:[%s8534_s10 + $0xf18] sm:$0xff] }
 0x4a9   : > { %3225 = vmatpush.msrb.mxu2 %v2549_v13  ;;  %3248 = vmatpush.msrb.mxu3 %v2653_v14  ;;  %v2933_v26 = vld [vmem:[%s8534_s10 + $0xcd0] sm:$0xff]  ;;  %v2574_v5 = vld [vmem:[%s8534_s10 + $0x198] sm:$0xff] }
 0x4aa   : > { %3257 = vmatpush.msra.mxu0 %v2869_v15  ;;  %3280 = vmatpush.msra.mxu1 %v2973_v16  ;;  %v2821_v47 = vld [vmem:[%s8534_s10 + $0x950] sm:$0xff]  ;;  %v2678_v8 = vld [vmem:[%s8534_s10 + $0x4d8] sm:$0xff] }
 0x4ab   : > { %3249 = vmatmul.f32.vlgmr.msrb.gmra.mxu3 %v6871_v21  ;;  %3226 = vmatpush.msrb.mxu2 %v2541_v18  ;;  %v2925_v48 = vld [vmem:[%s8534_s10 + $0xc90] sm:$0xff]  ;;  %v2894_v9 = vld [vmem:[%s8534_s10 + $0xb98] sm:$0xff] }
 0x4ac   : > { %3313 = vmatpush.msra.mxu3 %v2774_v19  ;;  %3258 = vmatpush.msra.mxu0 %v2861_v22  ;;  %v2813_v24 = vld [vmem:[%s8534_s10 + $0x910] sm:$0xff]  ;;  %v2998_v44 = vld [vmem:[%s8534_s10 + $0xed8] sm:$0xff] }
 0x4ad   : > { %3281 = vmatpush.msra.mxu1 %v2965_v23  ;;  %3227 = vmatpush.msrb.mxu2 %v2533_v25  ;;  %v2917_v6 = vld [vmem:[%s8534_s10 + $0xc50] sm:$0xff]  ;;  %v2566_v11 = vld [vmem:[%s8534_s10 + $0x158] sm:$0xff] }
 0x4ae   : > { %3314 = vmatpush.msra.mxu3 %v2766_v29  ;;  %3259 = vmatpush.msra.mxu0 %v2853_v30  ;;  %v2805_v51 = vld [vmem:[%s8534_s10 + $0x8d0] sm:$0xff]  ;;  %v2670_v17 = vld [vmem:[%s8534_s10 + $0x498] sm:$0xff]  ;;  %v2775_v29 = vld [vmem:[%s8534_s10 + $0x7e0] sm:$0xff] }
 0x4af   : > { %3282 = vmatpush.msra.mxu1 %v2957_v33  ;;  %3228 = vmatpush.msrb.mxu2 %v2525_v34  ;;  %v2909_v53 = vld [vmem:[%s8534_s10 + $0xc10] sm:$0xff]  ;;  %v2886_v55 = vld [vmem:[%s8534_s10 + $0xb58] sm:$0xff] }
 0x4b0   : > { %3315 = vmatpush.msra.mxu3 %v2758_v35  ;;  %3260 = vmatpush.msra.mxu0 %v2845_v36  ;;  %v2797_v56 = vld [vmem:[%s8534_s10 + $0x890] sm:$0xff]  ;;  %v2990_v12 = vld [vmem:[%s8534_s10 + $0xe98] sm:$0xff]  ;;  %v2767_v35 = vld [vmem:[%s8534_s10 + $0x7a0] sm:$0xff] }
 0x4b1   : > { %3283 = vmatpush.msra.mxu1 %v2949_v31  ;;  %3229 = vmatmul.f32.vlgmr.msrb.gmra.mxu2 %v6885_v28  ;;  %v2789_v50 = vld [vmem:[%s8534_s10 + $0x850] sm:$0xff]  ;;  %v2558_v13 = vld [vmem:[%s8534_s10 + $0x118] sm:$0xff] }
 0x4b2   : > { %3293 = vmatpush.msra.mxu2 %v2646_v37  ;;  %3316 = vmatpush.msra.mxu3 %v2750_v32  ;;  %v2781_v63 = vld [vmem:[%s8534_s10 + $0x810] sm:$0xff]  ;;  %v2662_v14 = vld [vmem:[%s8534_s10 + $0x458] sm:$0xff]  ;;  %v2759_v32 = vld [vmem:[%s8534_s10 + $0x760] sm:$0xff] }
 0x4b3   : > { %3261 = vmatpush.msra.mxu0 %v2837_v38  ;;  %3284 = vmatpush.msra.mxu1 %v2941_v39  ;;  %v2878_v15 = vld [vmem:[%s8534_s10 + $0xb18] sm:$0xff] }
 0x4b4   : > { %3294 = vmatpush.msra.mxu2 %v2638_v40  ;;  %3317 = vmatpush.msra.mxu3 %v2742_v41  ;;  %v2982_v16 = vld [vmem:[%s8534_s10 + $0xe58] sm:$0xff]  ;;  %v2647_v40 = vld [vmem:[%s8534_s10 + $0x3e0] sm:$0xff] }
 0x4b5   : > { %3262 = vmatpush.msra.mxu0 %v2829_v42  ;;  %3285 = vmatpush.msra.mxu1 %v2933_v26  ;;  %v2550_v18 = vld [vmem:[%s8534_s10 + $0xd8] sm:$0xff]  ;;  %v2751_v41 = vld [vmem:[%s8534_s10 + $0x720] sm:$0xff] }
 0x4b6   : > { %3295 = vmatpush.msra.mxu2 %v2630_v43  ;;  %3318 = vmatpush.msra.mxu3 %v2734_v46  ;;  %v2654_v19 = vld [vmem:[%s8534_s10 + $0x418] sm:$0xff]  ;;  %v2639_v43 = vld [vmem:[%s8534_s10 + $0x3a0] sm:$0xff] }
 0x4b7   : > { %3263 = vmatpush.msra.mxu0 %v2821_v47  ;;  %3286 = vmatpush.msra.mxu1 %v2925_v48  ;;  %v2870_v22 = vld [vmem:[%s8534_s10 + $0xad8] sm:$0xff]  ;;  %v2743_v46 = vld [vmem:[%s8534_s10 + $0x6e0] sm:$0xff] }
 0x4b8   : > { %3296 = vmatpush.msra.mxu2 %v2622_v59  ;;  %3319 = vmatpush.msra.mxu3 %v2726_v62  ;;  %v2974_v23 = vld [vmem:[%s8534_s10 + $0xe18] sm:$0xff]  ;;  %v2631_v59 = vld [vmem:[%s8534_s10 + $0x360] sm:$0xff] }
 0x4b9   : > { %3264 = vmatpush.msra.mxu0 %v2813_v24  ;;  %3287 = vmatpush.msra.mxu1 %v2917_v6  ;;  %v2542_v25 = vld [vmem:[%s8534_s10 + $0x98] sm:$0xff]  ;;  %v2735_v62 = vld [vmem:[%s8534_s10 + $0x6a0] sm:$0xff] }
 0x4ba   : > { %3297 = vmatpush.msra.mxu2 %v2614_v7  ;;  %3320 = vmatpush.msra.mxu3 %v2718_v49  ;;  %v2862_v30 = vld [vmem:[%s8534_s10 + $0xa98] sm:$0xff]  ;;  %v2623_v7 = vld [vmem:[%s8534_s10 + $0x320] sm:$0xff] }
 0x4bb   : > { %3265 = vmatpush.msra.mxu0 %v2805_v51  ;;  %3288 = vmatpush.msra.mxu1 %v2909_v53  ;;  %v2966_v33 = vld [vmem:[%s8534_s10 + $0xdd8] sm:$0xff]  ;;  %v2727_v49 = vld [vmem:[%s8534_s10 + $0x660] sm:$0xff] }
 0x4bc   : > { %3289 = vmatmul.f32.vlgmr.msra.gmra.mxu1 %v6928_v27  ;;  %3298 = vmatpush.msra.mxu2 %v2606_v45  ;;  %v2534_v34 = vld [vmem:[%s8534_s10 + $0x58] sm:$0xff]  ;;  %v2615_v45 = vld [vmem:[%s8534_s10 + $0x2e0] sm:$0xff] }
 0x4bd   : > { %3321 = vmatpush.msra.mxu3 %v2710_v54  ;;  %3353 = vmatpush.msrb.mxu1 %v3030_v10  ;;  %v2854_v36 = vld [vmem:[%s8534_s10 + $0xa58] sm:$0xff]  ;;  %v2719_v54 = vld [vmem:[%s8534_s10 + $0x620] sm:$0xff] }
 0x4be   : > { %3266 = vmatpush.msra.mxu0 %v2797_v56  ;;  %3299 = vmatpush.msra.mxu2 %v2598_v60  ;;  %v2958_v31 = vld [vmem:[%s8534_s10 + $0xd98] sm:$0xff]  ;;  %v2607_v60 = vld [vmem:[%s8534_s10 + $0x2a0] sm:$0xff] }
 0x4bf   : > { %3322 = vmatpush.msra.mxu3 %v2702_v20  ;;  %3354 = vmatpush.msrb.mxu1 %v3022_v57  ;;  %v2526_v37 = vld [vmem:[%s8534_s10 + $0x18] sm:$0xff]  ;;  %v2711_v20 = vld [vmem:[%s8534_s10 + $0x5e0] sm:$0xff] }
 0x4c0   : > { %3267 = vmatpush.msra.mxu0 %v2789_v50  ;;  %3300 = vmatpush.msra.mxu2 %v2590_v61  ;;  %v2846_v38 = vld [vmem:[%s8534_s10 + $0xa18] sm:$0xff]  ;;  %v3031_v57 = vld [vmem:[%s8534_s10 + $0xfe0] sm:$0xff] }
 0x4c1   : > { %3323 = vmatpush.msra.mxu3 %v2694_v0  ;;  %3355 = vmatpush.msrb.mxu1 %v3014_v1  ;;  %v2950_v39 = vld [vmem:[%s8534_s10 + $0xd58] sm:$0xff]  ;;  %v2599_v61 = vld [vmem:[%s8534_s10 + $0x260] sm:$0xff] }
 0x4c2   : > { %3268 = vmatpush.msra.mxu0 %v2781_v63  ;;  %3301 = vmatpush.msra.mxu2 %v2582_v2  ;;  %v2838_v42 = vld [vmem:[%s8534_s10 + $0x9d8] sm:$0xff]  ;;  %v2703_v0 = vld [vmem:[%s8534_s10 + $0x5a0] sm:$0xff] }
 0x4c3   : > { %3269 = vmatmul.f32.vlgmr.msra.gmra.mxu0 %v6953_v58  ;;  %3324 = vmatpush.msra.mxu3 %v2686_v3  ;;  %v2942_v26 = vld [vmem:[%s8534_s10 + $0xd18] sm:$0xff]  ;;  %v3023_v1 = vld [vmem:[%s8534_s10 + $0xfa0] sm:$0xff] }
 0x4c4   : > { %3333 = vmatpush.msrb.mxu0 %v2902_v52  ;;  %3356 = vmatpush.msrb.mxu1 %v3006_v4  ;;  %v2830_v47 = vld [vmem:[%s8534_s10 + $0x998] sm:$0xff]  ;;  %v2591_v2 = vld [vmem:[%s8534_s10 + $0x220] sm:$0xff] }
 0x4c5   : > { %3302 = vmatpush.msra.mxu2 %v2574_v5  ;;  %3325 = vmatpush.msra.mxu3 %v2678_v8  ;;  %v2934_v48 = vld [vmem:[%s8534_s10 + $0xcd8] sm:$0xff]  ;;  %v2695_v3 = vld [vmem:[%s8534_s10 + $0x560] sm:$0xff] }
 0x4c6   : > { %3334 = vmatpush.msrb.mxu0 %v2894_v9  ;;  %3357 = vmatpush.msrb.mxu1 %v2998_v44  ;;  %v2822_v24 = vld [vmem:[%s8534_s10 + $0x958] sm:$0xff]  ;;  %v3015_v52 = vld [vmem:[%s8534_s10 + $0xf60] sm:$0xff] }
 0x4c7   : > { %3303 = vmatpush.msra.mxu2 %v2566_v11  ;;  %3326 = vmatpush.msra.mxu3 %v2670_v17  ;;  %v2926_v6 = vld [vmem:[%s8534_s10 + $0xc98] sm:$0xff]  ;;  %v2583_v5 = vld [vmem:[%s8534_s10 + $0x1e0] sm:$0xff] }
 0x4c8   : > { %3335 = vmatpush.msrb.mxu0 %v2886_v55  ;;  %3358 = vmatpush.msrb.mxu1 %v2990_v12  ;;  %v2814_v51 = vld [vmem:[%s8534_s10 + $0x918] sm:$0xff]  ;;  %v2687_v8 = vld [vmem:[%s8534_s10 + $0x520] sm:$0xff] }
 0x4c9   : > { %3304 = vmatpush.msra.mxu2 %v2558_v13  ;;  %3327 = vmatpush.msra.mxu3 %v2662_v14  ;;  %v2918_v53 = vld [vmem:[%s8534_s10 + $0xc58] sm:$0xff]  ;;  %v2903_v9 = vld [vmem:[%s8534_s10 + $0xbe0] sm:$0xff] }
 0x4ca   : > { %3336 = vmatpush.msrb.mxu0 %v2878_v15  ;;  %3359 = vmatpush.msrb.mxu1 %v2982_v16  ;;  %v2806_v10 = vld [vmem:[%s8534_s10 + $0x8d8] sm:$0xff]  ;;  %v3007_v44 = vld [vmem:[%s8534_s10 + $0xf20] sm:$0xff] }
 0x4cb   : > { %3305 = vmatpush.msra.mxu2 %v2550_v18  ;;  %3328 = vmatpush.msra.mxu3 %v2654_v19  ;;  %v2910_v56 = vld [vmem:[%s8534_s10 + $0xc18] sm:$0xff]  ;;  %v2575_v11 = vld [vmem:[%s8534_s10 + $0x1a0] sm:$0xff] }
 0x4cc   : > { %3337 = vmatpush.msrb.mxu0 %v2870_v22  ;;  %3360 = vmatpush.msrb.mxu1 %v2974_v23  ;;  %v2798_v50 = vld [vmem:[%s8534_s10 + $0x898] sm:$0xff]  ;;  %v2679_v17 = vld [vmem:[%s8534_s10 + $0x4e0] sm:$0xff] }
 0x4cd   : > { %3329 = vmatmul.f32.vlgmr.msra.gmra.mxu3 %v6871_v21  ;;  %3306 = vmatpush.msra.mxu2 %v2542_v25  ;;  %v2790_v63 = vld [vmem:[%s8534_s10 + $0x858] sm:$0xff]  ;;  %v2895_v55 = vld [vmem:[%s8534_s10 + $0xba0] sm:$0xff] }
 0x4ce   : > { %3393 = vmatpush.msrb.mxu3 %v2775_v29  ;;  %3338 = vmatpush.msrb.mxu0 %v2862_v30  ;;  %v2782_v4 = vld [vmem:[%s8534_s10 + $0x818] sm:$0xff]  ;;  %v2999_v12 = vld [vmem:[%s8534_s10 + $0xee0] sm:$0xff] }
 0x4cf   : > { %3361 = vmatpush.msrb.mxu1 %v2966_v33  ;;  %3307 = vmatpush.msra.mxu2 %v2534_v34  ;;  %v2567_v13 = vld [vmem:[%s8534_s10 + $0x160] sm:$0xff] }
 0x4d0   : > { %3394 = vmatpush.msrb.mxu3 %v2767_v35  ;;  %3339 = vmatpush.msrb.mxu0 %v2854_v36  ;;  %v2671_v14 = vld [vmem:[%s8534_s10 + $0x4a0] sm:$0xff]  ;;  %v2776_v35 = vld [vmem:[%s8534_s10 + $0x7e8] sm:$0xff] }
 0x4d1   : > { %3362 = vmatpush.msrb.mxu1 %v2958_v31  ;;  %3308 = vmatpush.msra.mxu2 %v2526_v37  ;;  %v2887_v15 = vld [vmem:[%s8534_s10 + $0xb60] sm:$0xff] }
 0x4d2   : > { %3395 = vmatpush.msrb.mxu3 %v2759_v32  ;;  %3340 = vmatpush.msrb.mxu0 %v2846_v38  ;;  %v2991_v16 = vld [vmem:[%s8534_s10 + $0xea0] sm:$0xff]  ;;  %v2768_v32 = vld [vmem:[%s8534_s10 + $0x7a8] sm:$0xff] }
 0x4d3   : > { %3363 = vmatpush.msrb.mxu1 %v2950_v39  ;;  %3309 = vmatmul.f32.vlgmr.msra.gmra.mxu2 %v6885_v28  ;;  %v2559_v18 = vld [vmem:[%s8534_s10 + $0x120] sm:$0xff] }
 0x4d4   : > { %3373 = vmatpush.msrb.mxu2 %v2647_v40  ;;  %3396 = vmatpush.msrb.mxu3 %v2751_v41  ;;  %v2663_v19 = vld [vmem:[%s8534_s10 + $0x460] sm:$0xff]  ;;  %v2760_v41 = vld [vmem:[%s8534_s10 + $0x768] sm:$0xff] }
 0x4d5   : > { %3341 = vmatpush.msrb.mxu0 %v2838_v42  ;;  %3364 = vmatpush.msrb.mxu1 %v2942_v26  ;;  %v2879_v22 = vld [vmem:[%s8534_s10 + $0xb20] sm:$0xff] }
 0x4d6   : > { %3374 = vmatpush.msrb.mxu2 %v2639_v43  ;;  %3397 = vmatpush.msrb.mxu3 %v2743_v46  ;;  %v2983_v23 = vld [vmem:[%s8534_s10 + $0xe60] sm:$0xff]  ;;  %v2648_v43 = vld [vmem:[%s8534_s10 + $0x3e8] sm:$0xff] }
 0x4d7   : > { %3342 = vmatpush.msrb.mxu0 %v2830_v47  ;;  %3365 = vmatpush.msrb.mxu1 %v2934_v48  ;;  %v2551_v25 = vld [vmem:[%s8534_s10 + $0xe0] sm:$0xff]  ;;  %v2752_v46 = vld [vmem:[%s8534_s10 + $0x728] sm:$0xff] }
 0x4d8   : > { %3375 = vmatpush.msrb.mxu2 %v2631_v59  ;;  %3398 = vmatpush.msrb.mxu3 %v2735_v62  ;;  %v2655_v29 = vld [vmem:[%s8534_s10 + $0x420] sm:$0xff]  ;;  %v2640_v59 = vld [vmem:[%s8534_s10 + $0x3a8] sm:$0xff] }
 0x4d9   : > { %3343 = vmatpush.msrb.mxu0 %v2822_v24  ;;  %3366 = vmatpush.msrb.mxu1 %v2926_v6  ;;  %v2871_v30 = vld [vmem:[%s8534_s10 + $0xae0] sm:$0xff]  ;;  %v2744_v62 = vld [vmem:[%s8534_s10 + $0x6e8] sm:$0xff] }
 0x4da   : > { %3376 = vmatpush.msrb.mxu2 %v2623_v7  ;;  %3399 = vmatpush.msrb.mxu3 %v2727_v49  ;;  %v2975_v33 = vld [vmem:[%s8534_s10 + $0xe20] sm:$0xff]  ;;  %v2632_v7 = vld [vmem:[%s8534_s10 + $0x368] sm:$0xff] }
 0x4db   : > { %3344 = vmatpush.msrb.mxu0 %v2814_v51  ;;  %3367 = vmatpush.msrb.mxu1 %v2918_v53  ;;  %v2543_v34 = vld [vmem:[%s8534_s10 + $0xa0] sm:$0xff]  ;;  %v2736_v49 = vld [vmem:[%s8534_s10 + $0x6a8] sm:$0xff] }
 0x4dc   : > { %3377 = vmatpush.msrb.mxu2 %v2615_v45  ;;  %3400 = vmatpush.msrb.mxu3 %v2719_v54  ;;  %v2863_v36 = vld [vmem:[%s8534_s10 + $0xaa0] sm:$0xff]  ;;  %v2624_v45 = vld [vmem:[%s8534_s10 + $0x328] sm:$0xff] }
 0x4dd   : > { %3345 = vmatpush.msrb.mxu0 %v2806_v10  ;;  %3368 = vmatpush.msrb.mxu1 %v2910_v56  ;;  %v2967_v31 = vld [vmem:[%s8534_s10 + $0xde0] sm:$0xff]  ;;  %v2728_v54 = vld [vmem:[%s8534_s10 + $0x668] sm:$0xff] }
 0x4de   : > { %3369 = vmatmul.f32.vlgmr.msrb.gmra.mxu1 %v6928_v27  ;;  %3378 = vmatpush.msrb.mxu2 %v2607_v60  ;;  %v2535_v37 = vld [vmem:[%s8534_s10 + $0x60] sm:$0xff]  ;;  %v2616_v60 = vld [vmem:[%s8534_s10 + $0x2e8] sm:$0xff] }
 0x4df   : > { %3401 = vmatpush.msrb.mxu3 %v2711_v20  ;;  %3433 = vmatpush.msra.mxu1 %v3031_v57  ;;  %v2855_v38 = vld [vmem:[%s8534_s10 + $0xa60] sm:$0xff]  ;;  %v2720_v20 = vld [vmem:[%s8534_s10 + $0x628] sm:$0xff] }
 0x4e0   : > { %3346 = vmatpush.msrb.mxu0 %v2798_v50  ;;  %3379 = vmatpush.msrb.mxu2 %v2599_v61  ;;  %v2959_v39 = vld [vmem:[%s8534_s10 + $0xda0] sm:$0xff]  ;;  %v2608_v61 = vld [vmem:[%s8534_s10 + $0x2a8] sm:$0xff] }
 0x4e1   : > { %3402 = vmatpush.msrb.mxu3 %v2703_v0  ;;  %3434 = vmatpush.msra.mxu1 %v3023_v1  ;;  %v2527_v40 = vld [vmem:[%s8534_s10 + $0x20] sm:$0xff]  ;;  %v2712_v0 = vld [vmem:[%s8534_s10 + $0x5e8] sm:$0xff] }
 0x4e2   : > { %3347 = vmatpush.msrb.mxu0 %v2790_v63  ;;  %3380 = vmatpush.msrb.mxu2 %v2591_v2  ;;  %v2847_v42 = vld [vmem:[%s8534_s10 + $0xa20] sm:$0xff]  ;;  %v3032_v1 = vld [vmem:[%s8534_s10 + $0xfe8] sm:$0xff] }
 0x4e3   : > { %3403 = vmatpush.msrb.mxu3 %v2695_v3  ;;  %3435 = vmatpush.msra.mxu1 %v3015_v52  ;;  %v2951_v26 = vld [vmem:[%s8534_s10 + $0xd60] sm:$0xff]  ;;  %v2600_v2 = vld [vmem:[%s8534_s10 + $0x268] sm:$0xff] }
 0x4e4   : > { %3348 = vmatpush.msrb.mxu0 %v2782_v4  ;;  %3381 = vmatpush.msrb.mxu2 %v2583_v5  ;;  %v2839_v47 = vld [vmem:[%s8534_s10 + $0x9e0] sm:$0xff]  ;;  %v2704_v3 = vld [vmem:[%s8534_s10 + $0x5a8] sm:$0xff] }
 0x4e5   : > { %3349 = vmatmul.f32.vlgmr.msrb.gmra.mxu0 %v6953_v58  ;;  %3404 = vmatpush.msrb.mxu3 %v2687_v8  ;;  %v2943_v48 = vld [vmem:[%s8534_s10 + $0xd20] sm:$0xff]  ;;  %v3024_v52 = vld [vmem:[%s8534_s10 + $0xfa8] sm:$0xff] }
 0x4e6   : > { %3413 = vmatpush.msra.mxu0 %v2903_v9  ;;  %3436 = vmatpush.msra.mxu1 %v3007_v44  ;;  %v2831_v24 = vld [vmem:[%s8534_s10 + $0x9a0] sm:$0xff]  ;;  %v2592_v5 = vld [vmem:[%s8534_s10 + $0x228] sm:$0xff] }
 0x4e7   : > { %3382 = vmatpush.msrb.mxu2 %v2575_v11  ;;  %3405 = vmatpush.msrb.mxu3 %v2679_v17  ;;  %v2935_v6 = vld [vmem:[%s8534_s10 + $0xce0] sm:$0xff]  ;;  %v2696_v8 = vld [vmem:[%s8534_s10 + $0x568] sm:$0xff] }
 0x4e8   : > { %3414 = vmatpush.msra.mxu0 %v2895_v55  ;;  %3437 = vmatpush.msra.mxu1 %v2999_v12  ;;  %v2823_v51 = vld [vmem:[%s8534_s10 + $0x960] sm:$0xff]  ;;  %v3016_v9 = vld [vmem:[%s8534_s10 + $0xf68] sm:$0xff] }
 0x4e9   : > { %3383 = vmatpush.msrb.mxu2 %v2567_v13  ;;  %3406 = vmatpush.msrb.mxu3 %v2671_v14  ;;  %v2927_v53 = vld [vmem:[%s8534_s10 + $0xca0] sm:$0xff]  ;;  %v2584_v11 = vld [vmem:[%s8534_s10 + $0x1e8] sm:$0xff] }
 0x4ea   : > { %3415 = vmatpush.msra.mxu0 %v2887_v15  ;;  %3438 = vmatpush.msra.mxu1 %v2991_v16  ;;  %v2815_v10 = vld [vmem:[%s8534_s10 + $0x920] sm:$0xff]  ;;  %v2688_v17 = vld [vmem:[%s8534_s10 + $0x528] sm:$0xff] }
 0x4eb   : > { %3384 = vmatpush.msrb.mxu2 %v2559_v18  ;;  %3407 = vmatpush.msrb.mxu3 %v2663_v19  ;;  %v2919_v56 = vld [vmem:[%s8534_s10 + $0xc60] sm:$0xff]  ;;  %v2904_v55 = vld [vmem:[%s8534_s10 + $0xbe8] sm:$0xff] }
 0x4ec   : > { %3416 = vmatpush.msra.mxu0 %v2879_v22  ;;  %3439 = vmatpush.msra.mxu1 %v2983_v23  ;;  %v2807_v57 = vld [vmem:[%s8534_s10 + $0x8e0] sm:$0xff]  ;;  %v3008_v12 = vld [vmem:[%s8534_s10 + $0xf28] sm:$0xff] }
 0x4ed   : > { %3385 = vmatpush.msrb.mxu2 %v2551_v25  ;;  %3408 = vmatpush.msrb.mxu3 %v2655_v29  ;;  %v2911_v50 = vld [vmem:[%s8534_s10 + $0xc20] sm:$0xff]  ;;  %v2576_v13 = vld [vmem:[%s8534_s10 + $0x1a8] sm:$0xff] }
 0x4ee   : > { %3417 = vmatpush.msra.mxu0 %v2871_v30  ;;  %3440 = vmatpush.msra.mxu1 %v2975_v33  ;;  %v2799_v63 = vld [vmem:[%s8534_s10 + $0x8a0] sm:$0xff]  ;;  %v2680_v14 = vld [vmem:[%s8534_s10 + $0x4e8] sm:$0xff] }
 0x4ef   : > { %3409 = vmatmul.f32.vlgmr.msrb.gmra.mxu3 %v6871_v21  ;;  %3386 = vmatpush.msrb.mxu2 %v2543_v34  ;;  %v2791_v4 = vld [vmem:[%s8534_s10 + $0x860] sm:$0xff]  ;;  %v2896_v15 = vld [vmem:[%s8534_s10 + $0xba8] sm:$0xff] }
 0x4f0   : > { %3473 = vmatpush.msra.mxu3 %v2776_v35  ;;  %3418 = vmatpush.msra.mxu0 %v2863_v36  ;;  %v2783_v44 = vld [vmem:[%s8534_s10 + $0x820] sm:$0xff]  ;;  %v3000_v16 = vld [vmem:[%s8534_s10 + $0xee8] sm:$0xff] }
 0x4f1   : > { %3441 = vmatpush.msra.mxu1 %v2967_v31  ;;  %3387 = vmatpush.msrb.mxu2 %v2535_v37  ;;  %v2568_v18 = vld [vmem:[%s8534_s10 + $0x168] sm:$0xff] }
 0x4f2   : > { %3474 = vmatpush.msra.mxu3 %v2768_v32  ;;  %3419 = vmatpush.msra.mxu0 %v2855_v38  ;;  %v2672_v19 = vld [vmem:[%s8534_s10 + $0x4a8] sm:$0xff]  ;;  %v2777_v32 = vld [vmem:[%s8534_s10 + $0x7f0] sm:$0xff] }
 0x4f3   : > { %3442 = vmatpush.msra.mxu1 %v2959_v39  ;;  %3388 = vmatpush.msrb.mxu2 %v2527_v40  ;;  %v2888_v22 = vld [vmem:[%s8534_s10 + $0xb68] sm:$0xff] }
 0x4f4   : > { %3475 = vmatpush.msra.mxu3 %v2760_v41  ;;  %3420 = vmatpush.msra.mxu0 %v2847_v42  ;;  %v2992_v23 = vld [vmem:[%s8534_s10 + $0xea8] sm:$0xff]  ;;  %v2769_v41 = vld [vmem:[%s8534_s10 + $0x7b0] sm:$0xff] }
 0x4f5   : > { %3443 = vmatpush.msra.mxu1 %v2951_v26  ;;  %3389 = vmatmul.f32.vlgmr.msrb.gmra.mxu2 %v6885_v28  ;;  %v2560_v25 = vld [vmem:[%s8534_s10 + $0x128] sm:$0xff] }
 0x4f6   : > { %3453 = vmatpush.msra.mxu2 %v2648_v43  ;;  %3476 = vmatpush.msra.mxu3 %v2752_v46  ;;  %v2664_v29 = vld [vmem:[%s8534_s10 + $0x468] sm:$0xff]  ;;  %v2761_v46 = vld [vmem:[%s8534_s10 + $0x770] sm:$0xff] }
 0x4f7   : > { %3421 = vmatpush.msra.mxu0 %v2839_v47  ;;  %3444 = vmatpush.msra.mxu1 %v2943_v48  ;;  %v2880_v30 = vld [vmem:[%s8534_s10 + $0xb28] sm:$0xff] }
 0x4f8   : > { %3454 = vmatpush.msra.mxu2 %v2640_v59  ;;  %3477 = vmatpush.msra.mxu3 %v2744_v62  ;;  %v2984_v33 = vld [vmem:[%s8534_s10 + $0xe68] sm:$0xff]  ;;  %v2649_v59 = vld [vmem:[%s8534_s10 + $0x3f0] sm:$0xff] }
 0x4f9   : > { %3422 = vmatpush.msra.mxu0 %v2831_v24  ;;  %3445 = vmatpush.msra.mxu1 %v2935_v6  ;;  %v2552_v34 = vld [vmem:[%s8534_s10 + $0xe8] sm:$0xff]  ;;  %v2753_v62 = vld [vmem:[%s8534_s10 + $0x730] sm:$0xff] }
 0x4fa   : > { %3455 = vmatpush.msra.mxu2 %v2632_v7  ;;  %3478 = vmatpush.msra.mxu3 %v2736_v49  ;;  %v2656_v35 = vld [vmem:[%s8534_s10 + $0x428] sm:$0xff]  ;;  %v2641_v7 = vld [vmem:[%s8534_s10 + $0x3b0] sm:$0xff] }
 0x4fb   : > { %3423 = vmatpush.msra.mxu0 %v2823_v51  ;;  %3446 = vmatpush.msra.mxu1 %v2927_v53  ;;  %v2872_v36 = vld [vmem:[%s8534_s10 + $0xae8] sm:$0xff]  ;;  %v2745_v49 = vld [vmem:[%s8534_s10 + $0x6f0] sm:$0xff] }
 0x4fc   : > { %3456 = vmatpush.msra.mxu2 %v2624_v45  ;;  %3479 = vmatpush.msra.mxu3 %v2728_v54  ;;  %v2976_v31 = vld [vmem:[%s8534_s10 + $0xe28] sm:$0xff]  ;;  %v2633_v45 = vld [vmem:[%s8534_s10 + $0x370] sm:$0xff] }
 0x4fd   : > { %3424 = vmatpush.msra.mxu0 %v2815_v10  ;;  %3447 = vmatpush.msra.mxu1 %v2919_v56  ;;  %v2544_v37 = vld [vmem:[%s8534_s10 + $0xa8] sm:$0xff]  ;;  %v2737_v54 = vld [vmem:[%s8534_s10 + $0x6b0] sm:$0xff] }
 0x4fe   : > { %3457 = vmatpush.msra.mxu2 %v2616_v60  ;;  %3480 = vmatpush.msra.mxu3 %v2720_v20  ;;  %v2864_v38 = vld [vmem:[%s8534_s10 + $0xaa8] sm:$0xff]  ;;  %v2625_v60 = vld [vmem:[%s8534_s10 + $0x330] sm:$0xff] }
 0x4ff   : > { %3425 = vmatpush.msra.mxu0 %v2807_v57  ;;  %3448 = vmatpush.msra.mxu1 %v2911_v50  ;;  %v2968_v39 = vld [vmem:[%s8534_s10 + $0xde8] sm:$0xff]  ;;  %v2729_v20 = vld [vmem:[%s8534_s10 + $0x670] sm:$0xff] }
 0x500   : > { %3449 = vmatmul.f32.vlgmr.msra.gmra.mxu1 %v6928_v27  ;;  %3458 = vmatpush.msra.mxu2 %v2608_v61  ;;  %v2536_v40 = vld [vmem:[%s8534_s10 + $0x68] sm:$0xff]  ;;  %v2617_v61 = vld [vmem:[%s8534_s10 + $0x2f0] sm:$0xff] }
 0x501   : > { %3481 = vmatpush.msra.mxu3 %v2712_v0  ;;  %3513 = vmatpush.msrb.mxu1 %v3032_v1  ;;  %v2856_v42 = vld [vmem:[%s8534_s10 + $0xa68] sm:$0xff]  ;;  %v2721_v0 = vld [vmem:[%s8534_s10 + $0x630] sm:$0xff] }
 0x502   : > { %3426 = vmatpush.msra.mxu0 %v2799_v63  ;;  %3459 = vmatpush.msra.mxu2 %v2600_v2  ;;  %v2960_v26 = vld [vmem:[%s8534_s10 + $0xda8] sm:$0xff]  ;;  %v2609_v2 = vld [vmem:[%s8534_s10 + $0x2b0] sm:$0xff] }
 0x503   : > { %3482 = vmatpush.msra.mxu3 %v2704_v3  ;;  %3514 = vmatpush.msrb.mxu1 %v3024_v52  ;;  %v2528_v43 = vld [vmem:[%s8534_s10 + $0x28] sm:$0xff]  ;;  %v2713_v3 = vld [vmem:[%s8534_s10 + $0x5f0] sm:$0xff] }
 0x504   : > { %3427 = vmatpush.msra.mxu0 %v2791_v4  ;;  %3460 = vmatpush.msra.mxu2 %v2592_v5  ;;  %v2848_v47 = vld [vmem:[%s8534_s10 + $0xa28] sm:$0xff]  ;;  %v3033_v52 = vld [vmem:[%s8534_s10 + $0xff0] sm:$0xff] }
 0x505   : > { %3483 = vmatpush.msra.mxu3 %v2696_v8  ;;  %3515 = vmatpush.msrb.mxu1 %v3016_v9  ;;  %v2952_v48 = vld [vmem:[%s8534_s10 + $0xd68] sm:$0xff]  ;;  %v2601_v5 = vld [vmem:[%s8534_s10 + $0x270] sm:$0xff] }
 0x506   : > { %3428 = vmatpush.msra.mxu0 %v2783_v44  ;;  %3461 = vmatpush.msra.mxu2 %v2584_v11  ;;  %v2840_v24 = vld [vmem:[%s8534_s10 + $0x9e8] sm:$0xff]  ;;  %v2705_v8 = vld [vmem:[%s8534_s10 + $0x5b0] sm:$0xff] }
 0x507   : > { %3429 = vmatmul.f32.vlgmr.msra.gmra.mxu0 %v6953_v58  ;;  %3484 = vmatpush.msra.mxu3 %v2688_v17  ;;  %v2944_v6 = vld [vmem:[%s8534_s10 + $0xd28] sm:$0xff]  ;;  %v3025_v9 = vld [vmem:[%s8534_s10 + $0xfb0] sm:$0xff] }
 0x508   : > { %3493 = vmatpush.msrb.mxu0 %v2904_v55  ;;  %3516 = vmatpush.msrb.mxu1 %v3008_v12  ;;  %v2832_v51 = vld [vmem:[%s8534_s10 + $0x9a8] sm:$0xff]  ;;  %v2593_v11 = vld [vmem:[%s8534_s10 + $0x230] sm:$0xff] }
 0x509   : > { %3462 = vmatpush.msra.mxu2 %v2576_v13  ;;  %3485 = vmatpush.msra.mxu3 %v2680_v14  ;;  %v2936_v53 = vld [vmem:[%s8534_s10 + $0xce8] sm:$0xff]  ;;  %v2697_v17 = vld [vmem:[%s8534_s10 + $0x570] sm:$0xff] }
 0x50a   : > { %3494 = vmatpush.msrb.mxu0 %v2896_v15  ;;  %3517 = vmatpush.msrb.mxu1 %v3000_v16  ;;  %v2824_v10 = vld [vmem:[%s8534_s10 + $0x968] sm:$0xff]  ;;  %v3017_v55 = vld [vmem:[%s8534_s10 + $0xf70] sm:$0xff] }
 0x50b   : > { %3463 = vmatpush.msra.mxu2 %v2568_v18  ;;  %3486 = vmatpush.msra.mxu3 %v2672_v19  ;;  %v2928_v56 = vld [vmem:[%s8534_s10 + $0xca8] sm:$0xff]  ;;  %v2585_v13 = vld [vmem:[%s8534_s10 + $0x1f0] sm:$0xff] }
 0x50c   : > { %3495 = vmatpush.msrb.mxu0 %v2888_v22  ;;  %3518 = vmatpush.msrb.mxu1 %v2992_v23  ;;  %v2816_v57 = vld [vmem:[%s8534_s10 + $0x928] sm:$0xff]  ;;  %v2689_v14 = vld [vmem:[%s8534_s10 + $0x530] sm:$0xff] }
 0x50d   : > { %3464 = vmatpush.msra.mxu2 %v2560_v25  ;;  %3487 = vmatpush.msra.mxu3 %v2664_v29  ;;  %v2920_v50 = vld [vmem:[%s8534_s10 + $0xc68] sm:$0xff]  ;;  %v2905_v15 = vld [vmem:[%s8534_s10 + $0xbf0] sm:$0xff] }
 0x50e   : > { %3496 = vmatpush.msrb.mxu0 %v2880_v30  ;;  %3519 = vmatpush.msrb.mxu1 %v2984_v33  ;;  %v2808_v1 = vld [vmem:[%s8534_s10 + $0x8e8] sm:$0xff]  ;;  %v3009_v16 = vld [vmem:[%s8534_s10 + $0xf30] sm:$0xff] }
 0x50f   : > { %3465 = vmatpush.msra.mxu2 %v2552_v34  ;;  %3488 = vmatpush.msra.mxu3 %v2656_v35  ;;  %v2912_v63 = vld [vmem:[%s8534_s10 + $0xc28] sm:$0xff]  ;;  %v2577_v18 = vld [vmem:[%s8534_s10 + $0x1b0] sm:$0xff] }
 0x510   : > { %3497 = vmatpush.msrb.mxu0 %v2872_v36  ;;  %3520 = vmatpush.msrb.mxu1 %v2976_v31  ;;  %v2800_v4 = vld [vmem:[%s8534_s10 + $0x8a8] sm:$0xff]  ;;  %v2681_v19 = vld [vmem:[%s8534_s10 + $0x4f0] sm:$0xff] }
 0x511   : > { %3489 = vmatmul.f32.vlgmr.msra.gmra.mxu3 %v6871_v21  ;;  %3466 = vmatpush.msra.mxu2 %v2544_v37  ;;  %v2792_v44 = vld [vmem:[%s8534_s10 + $0x868] sm:$0xff]  ;;  %v2897_v22 = vld [vmem:[%s8534_s10 + $0xbb0] sm:$0xff] }
 0x512   : > { %3553 = vmatpush.msrb.mxu3 %v2777_v32  ;;  %3498 = vmatpush.msrb.mxu0 %v2864_v38  ;;  %v2784_v12 = vld [vmem:[%s8534_s10 + $0x828] sm:$0xff]  ;;  %v3001_v23 = vld [vmem:[%s8534_s10 + $0xef0] sm:$0xff] }
 0x513   : > { %3521 = vmatpush.msrb.mxu1 %v2968_v39  ;;  %3467 = vmatpush.msra.mxu2 %v2536_v40  ;;  %v2569_v25 = vld [vmem:[%s8534_s10 + $0x170] sm:$0xff] }
 0x514   : > { %3554 = vmatpush.msrb.mxu3 %v2769_v41  ;;  %3499 = vmatpush.msrb.mxu0 %v2856_v42  ;;  %v2673_v29 = vld [vmem:[%s8534_s10 + $0x4b0] sm:$0xff]  ;;  %v2778_v41 = vld [vmem:[%s8534_s10 + $0x7f8] sm:$0xff] }
 0x515   : > { %3522 = vmatpush.msrb.mxu1 %v2960_v26  ;;  %3468 = vmatpush.msra.mxu2 %v2528_v43  ;;  %v2889_v30 = vld [vmem:[%s8534_s10 + $0xb70] sm:$0xff] }
 0x516   : > { %3555 = vmatpush.msrb.mxu3 %v2761_v46  ;;  %3500 = vmatpush.msrb.mxu0 %v2848_v47  ;;  %v2993_v33 = vld [vmem:[%s8534_s10 + $0xeb0] sm:$0xff]  ;;  %v2770_v46 = vld [vmem:[%s8534_s10 + $0x7b8] sm:$0xff] }
 0x517   : > { %3523 = vmatpush.msrb.mxu1 %v2952_v48  ;;  %3469 = vmatmul.f32.vlgmr.msra.gmra.mxu2 %v6885_v28  ;;  %v2561_v34 = vld [vmem:[%s8534_s10 + $0x130] sm:$0xff] }
 0x518   : > { %3533 = vmatpush.msrb.mxu2 %v2649_v59  ;;  %3556 = vmatpush.msrb.mxu3 %v2753_v62  ;;  %v2665_v35 = vld [vmem:[%s8534_s10 + $0x470] sm:$0xff]  ;;  %v2762_v62 = vld [vmem:[%s8534_s10 + $0x778] sm:$0xff] }
 0x519   : > { %3501 = vmatpush.msrb.mxu0 %v2840_v24  ;;  %3524 = vmatpush.msrb.mxu1 %v2944_v6  ;;  %v2881_v36 = vld [vmem:[%s8534_s10 + $0xb30] sm:$0xff] }
 0x51a   : > { %3534 = vmatpush.msrb.mxu2 %v2641_v7  ;;  %3557 = vmatpush.msrb.mxu3 %v2745_v49  ;;  %v2985_v31 = vld [vmem:[%s8534_s10 + $0xe70] sm:$0xff]  ;;  %v2650_v7 = vld [vmem:[%s8534_s10 + $0x3f8] sm:$0xff] }
 0x51b   : > { %3502 = vmatpush.msrb.mxu0 %v2832_v51  ;;  %3525 = vmatpush.msrb.mxu1 %v2936_v53  ;;  %v2553_v37 = vld [vmem:[%s8534_s10 + $0xf0] sm:$0xff]  ;;  %v2754_v49 = vld [vmem:[%s8534_s10 + $0x738] sm:$0xff] }
 0x51c   : > { %3535 = vmatpush.msrb.mxu2 %v2633_v45  ;;  %3558 = vmatpush.msrb.mxu3 %v2737_v54  ;;  %v2657_v32 = vld [vmem:[%s8534_s10 + $0x430] sm:$0xff]  ;;  %v2642_v45 = vld [vmem:[%s8534_s10 + $0x3b8] sm:$0xff] }
 0x51d   : > { %3503 = vmatpush.msrb.mxu0 %v2824_v10  ;;  %3526 = vmatpush.msrb.mxu1 %v2928_v56  ;;  %v2873_v38 = vld [vmem:[%s8534_s10 + $0xaf0] sm:$0xff]  ;;  %v2746_v54 = vld [vmem:[%s8534_s10 + $0x6f8] sm:$0xff] }
 0x51e   : > { %3536 = vmatpush.msrb.mxu2 %v2625_v60  ;;  %3559 = vmatpush.msrb.mxu3 %v2729_v20  ;;  %v2977_v39 = vld [vmem:[%s8534_s10 + $0xe30] sm:$0xff]  ;;  %v2634_v60 = vld [vmem:[%s8534_s10 + $0x378] sm:$0xff] }
 0x51f   : > { %3504 = vmatpush.msrb.mxu0 %v2816_v57  ;;  %3527 = vmatpush.msrb.mxu1 %v2920_v50  ;;  %v2545_v40 = vld [vmem:[%s8534_s10 + $0xb0] sm:$0xff]  ;;  %v2738_v20 = vld [vmem:[%s8534_s10 + $0x6b8] sm:$0xff] }
 0x520   : > { %3537 = vmatpush.msrb.mxu2 %v2617_v61  ;;  %3560 = vmatpush.msrb.mxu3 %v2721_v0  ;;  %v2865_v42 = vld [vmem:[%s8534_s10 + $0xab0] sm:$0xff]  ;;  %v2626_v61 = vld [vmem:[%s8534_s10 + $0x338] sm:$0xff] }
 0x521   : > { %3505 = vmatpush.msrb.mxu0 %v2808_v1  ;;  %3528 = vmatpush.msrb.mxu1 %v2912_v63  ;;  %v2969_v26 = vld [vmem:[%s8534_s10 + $0xdf0] sm:$0xff]  ;;  %v2730_v0 = vld [vmem:[%s8534_s10 + $0x678] sm:$0xff] }
 0x522   : > { %3529 = vmatmul.f32.vlgmr.msrb.gmra.mxu1 %v6928_v27  ;;  %3538 = vmatpush.msrb.mxu2 %v2609_v2  ;;  %v2537_v43 = vld [vmem:[%s8534_s10 + $0x70] sm:$0xff]  ;;  %v2618_v2 = vld [vmem:[%s8534_s10 + $0x2f8] sm:$0xff] }
 0x523   : > { %3561 = vmatpush.msrb.mxu3 %v2713_v3  ;;  %3593 = vmatpush.msra.mxu1 %v3033_v52  ;;  %v2857_v47 = vld [vmem:[%s8534_s10 + $0xa70] sm:$0xff]  ;;  %v2722_v3 = vld [vmem:[%s8534_s10 + $0x638] sm:$0xff] }
 0x524   : > { %3506 = vmatpush.msrb.mxu0 %v2800_v4  ;;  %3539 = vmatpush.msrb.mxu2 %v2601_v5  ;;  %v2961_v48 = vld [vmem:[%s8534_s10 + $0xdb0] sm:$0xff]  ;;  %v2610_v5 = vld [vmem:[%s8534_s10 + $0x2b8] sm:$0xff] }
 0x525   : > { %3562 = vmatpush.msrb.mxu3 %v2705_v8  ;;  %3594 = vmatpush.msra.mxu1 %v3025_v9  ;;  %v2529_v59 = vld [vmem:[%s8534_s10 + $0x30] sm:$0xff]  ;;  %v2714_v8 = vld [vmem:[%s8534_s10 + $0x5f8] sm:$0xff] }
 0x526   : > { %3507 = vmatpush.msrb.mxu0 %v2792_v44  ;;  %3540 = vmatpush.msrb.mxu2 %v2593_v11  ;;  %v2849_v24 = vld [vmem:[%s8534_s10 + $0xa30] sm:$0xff]  ;;  %v3034_v9 = vld [vmem:[%s8534_s10 + $0xff8] sm:$0xff] }
 0x527   : > { %3563 = vmatpush.msrb.mxu3 %v2697_v17  ;;  %3595 = vmatpush.msra.mxu1 %v3017_v55  ;;  %v2953_v6 = vld [vmem:[%s8534_s10 + $0xd70] sm:$0xff]  ;;  %v2602_v11 = vld [vmem:[%s8534_s10 + $0x278] sm:$0xff] }
 0x528   : > { %3508 = vmatpush.msrb.mxu0 %v2784_v12  ;;  %3541 = vmatpush.msrb.mxu2 %v2585_v13  ;;  %v2841_v51 = vld [vmem:[%s8534_s10 + $0x9f0] sm:$0xff]  ;;  %v2706_v17 = vld [vmem:[%s8534_s10 + $0x5b8] sm:$0xff] }
 0x529   : > { %3509 = vmatmul.f32.vlgmr.msrb.gmra.mxu0 %v6953_v58  ;;  %3564 = vmatpush.msrb.mxu3 %v2689_v14  ;;  %v2945_v53 = vld [vmem:[%s8534_s10 + $0xd30] sm:$0xff]  ;;  %v3026_v55 = vld [vmem:[%s8534_s10 + $0xfb8] sm:$0xff] }
 0x52a   : > { %3573 = vmatpush.msra.mxu0 %v2905_v15  ;;  %3596 = vmatpush.msra.mxu1 %v3009_v16  ;;  %v2833_v10 = vld [vmem:[%s8534_s10 + $0x9b0] sm:$0xff]  ;;  %v2594_v13 = vld [vmem:[%s8534_s10 + $0x238] sm:$0xff] }
 0x52b   : > { %3542 = vmatpush.msrb.mxu2 %v2577_v18  ;;  %3565 = vmatpush.msrb.mxu3 %v2681_v19  ;;  %v2937_v56 = vld [vmem:[%s8534_s10 + $0xcf0] sm:$0xff]  ;;  %v2698_v14 = vld [vmem:[%s8534_s10 + $0x578] sm:$0xff] }
 0x52c   : > { %3574 = vmatpush.msra.mxu0 %v2897_v22  ;;  %3597 = vmatpush.msra.mxu1 %v3001_v23  ;;  %v2825_v57 = vld [vmem:[%s8534_s10 + $0x970] sm:$0xff]  ;;  %v3018_v15 = vld [vmem:[%s8534_s10 + $0xf78] sm:$0xff] }
 0x52d   : > { %3543 = vmatpush.msrb.mxu2 %v2569_v25  ;;  %3566 = vmatpush.msrb.mxu3 %v2673_v29  ;;  %v2929_v50 = vld [vmem:[%s8534_s10 + $0xcb0] sm:$0xff]  ;;  %v2586_v18 = vld [vmem:[%s8534_s10 + $0x1f8] sm:$0xff] }
 0x52e   : > { %3575 = vmatpush.msra.mxu0 %v2889_v30  ;;  %3598 = vmatpush.msra.mxu1 %v2993_v33  ;;  %v2817_v1 = vld [vmem:[%s8534_s10 + $0x930] sm:$0xff]  ;;  %v2690_v19 = vld [vmem:[%s8534_s10 + $0x538] sm:$0xff] }
 0x52f   : > { %3544 = vmatpush.msrb.mxu2 %v2561_v34  ;;  %3567 = vmatpush.msrb.mxu3 %v2665_v35  ;;  %v2921_v63 = vld [vmem:[%s8534_s10 + $0xc70] sm:$0xff]  ;;  %v2906_v22 = vld [vmem:[%s8534_s10 + $0xbf8] sm:$0xff] }
 0x530   : > { %3576 = vmatpush.msra.mxu0 %v2881_v36  ;;  %3599 = vmatpush.msra.mxu1 %v2985_v31  ;;  %v2809_v52 = vld [vmem:[%s8534_s10 + $0x8f0] sm:$0xff]  ;;  %v3010_v23 = vld [vmem:[%s8534_s10 + $0xf38] sm:$0xff] }
 0x531   : > { %3545 = vmatpush.msrb.mxu2 %v2553_v37  ;;  %3568 = vmatpush.msrb.mxu3 %v2657_v32  ;;  %v2913_v4 = vld [vmem:[%s8534_s10 + $0xc30] sm:$0xff]  ;;  %v2578_v25 = vld [vmem:[%s8534_s10 + $0x1b8] sm:$0xff] }
 0x532   : > { %3577 = vmatpush.msra.mxu0 %v2873_v38  ;;  %3600 = vmatpush.msra.mxu1 %v2977_v39  ;;  %v2801_v44 = vld [vmem:[%s8534_s10 + $0x8b0] sm:$0xff]  ;;  %v2682_v29 = vld [vmem:[%s8534_s10 + $0x4f8] sm:$0xff] }
 0x533   : > { %3569 = vmatmul.f32.vlgmr.msrb.gmra.mxu3 %v6871_v21  ;;  %3546 = vmatpush.msrb.mxu2 %v2545_v40  ;;  %v2793_v12 = vld [vmem:[%s8534_s10 + $0x870] sm:$0xff]  ;;  %v2898_v30 = vld [vmem:[%s8534_s10 + $0xbb8] sm:$0xff] }
 0x534   : > { %3633 = vmatpush.msra.mxu3 %v2778_v41  ;;  %3578 = vmatpush.msra.mxu0 %v2865_v42  ;;  %v2785_v16 = vld [vmem:[%s8534_s10 + $0x830] sm:$0xff]  ;;  %v3002_v33 = vld [vmem:[%s8534_s10 + $0xef8] sm:$0xff] }
 0x535   : > { %3601 = vmatpush.msra.mxu1 %v2969_v26  ;;  %3547 = vmatpush.msrb.mxu2 %v2537_v43  ;;  %v2570_v34 = vld [vmem:[%s8534_s10 + $0x178] sm:$0xff] }
 0x536   : > { %3634 = vmatpush.msra.mxu3 %v2770_v46  ;;  %3579 = vmatpush.msra.mxu0 %v2857_v47  ;;  %v2674_v35 = vld [vmem:[%s8534_s10 + $0x4b8] sm:$0xff] }
 0x537   : > { %3602 = vmatpush.msra.mxu1 %v2961_v48  ;;  %3548 = vmatpush.msrb.mxu2 %v2529_v59  ;;  %v2890_v36 = vld [vmem:[%s8534_s10 + $0xb78] sm:$0xff] }
 0x538   : > { %3635 = vmatpush.msra.mxu3 %v2762_v62  ;;  %3580 = vmatpush.msra.mxu0 %v2849_v24  ;;  %v2994_v31 = vld [vmem:[%s8534_s10 + $0xeb8] sm:$0xff]  ;;  %v3723_v62 = vld [vmem:[%s8536_s12 + $0xf0] sm:$0xff] }
 0x539   : > { %3603 = vmatpush.msra.mxu1 %v2953_v6  ;;  %3549 = vmatmul.f32.vlgmr.msrb.gmra.mxu2 %v6885_v28  ;;  %v2562_v37 = vld [vmem:[%s8534_s10 + $0x138] sm:$0xff] }
 0x53a   : > { %3613 = vmatpush.msra.mxu2 %v2650_v7  ;;  %3636 = vmatpush.msra.mxu3 %v2754_v49  ;;  %v2666_v32 = vld [vmem:[%s8534_s10 + $0x478] sm:$0xff] }
 0x53b   : > { %3581 = vmatpush.msra.mxu0 %v2841_v51  ;;  %3604 = vmatpush.msra.mxu1 %v2945_v53  ;;  %v2882_v38 = vld [vmem:[%s8534_s10 + $0xb38] sm:$0xff] }
 0x53c   : > { %3614 = vmatpush.msra.mxu2 %v2642_v45  ;;  %3637 = vmatpush.msra.mxu3 %v2746_v54  ;;  %v2986_v39 = vld [vmem:[%s8534_s10 + $0xe78] sm:$0xff]  ;;  %v3721_v45 = vld [vmem:[%s8536_s12 + $0xe0] sm:$0xff] }
 0x53d   : > { %3582 = vmatpush.msra.mxu0 %v2833_v10  ;;  %3605 = vmatpush.msra.mxu1 %v2937_v56  ;;  %v2554_v40 = vld [vmem:[%s8534_s10 + $0xf8] sm:$0xff]  ;;  %v3707_v56 = vld [vmem:[%s8536_s12 + $0x70] sm:$0xff] }
 0x53e   : > { %3615 = vmatpush.msra.mxu2 %v2634_v60  ;;  %3638 = vmatpush.msra.mxu3 %v2738_v20  ;;  %v2658_v41 = vld [vmem:[%s8534_s10 + $0x438] sm:$0xff] }
 0x53f   : > { %3583 = vmatpush.msra.mxu0 %v2825_v57  ;;  %3606 = vmatpush.msra.mxu1 %v2929_v50  ;;  %v2874_v42 = vld [vmem:[%s8534_s10 + $0xaf8] sm:$0xff]  ;;  %v3719_v50 = vld [vmem:[%s8536_s12 + $0xd0] sm:$0xff] }
 0x540   : > { %3616 = vmatpush.msra.mxu2 %v2626_v61  ;;  %3639 = vmatpush.msra.mxu3 %v2730_v0  ;;  %v2978_v26 = vld [vmem:[%s8534_s10 + $0xe38] sm:$0xff]  ;;  %v8066_v61 = vpop.f32.mrf.mxu2 }
 0x541   : > { %3584 = vmatpush.msra.mxu0 %v2817_v1  ;;  %3607 = vmatpush.msra.mxu1 %v2921_v63  ;;  %v2546_v43 = vld [vmem:[%s8534_s10 + $0xb8] sm:$0xff]  ;;  %v3705_v63 = vld [vmem:[%s8536_s12 + $0x60] sm:$0xff] }
 0x542   : > { %3617 = vmatpush.msra.mxu2 %v2618_v2  ;;  %3640 = vmatpush.msra.mxu3 %v2722_v3  ;;  %v3724_v46 = vld [vmem:[%s8536_s12 + $0xf8] sm:$0xff]  ;;  %v3718_v2 = vld [vmem:[%s8536_s12 + $0xc8] sm:$0xff] }
 0x543   : > { %3585 = vmatpush.msra.mxu0 %v2809_v52  ;;  %3608 = vmatpush.msra.mxu1 %v2913_v4  ;;  %v2866_v47 = vld [vmem:[%s8534_s10 + $0xab8] sm:$0xff] }
 0x544   : > { %3609 = vmatmul.f32.vlgmr.msra.gmra.mxu1 %v6928_v27  ;;  %3618 = vmatpush.msra.mxu2 %v2610_v5  ;;  %v2970_v48 = vld [vmem:[%s8534_s10 + $0xdf8] sm:$0xff]  ;;  %v3717_v5 = vld [vmem:[%s8536_s12 + $0xc0] sm:$0xff] }
 0x545   : > { %3641 = vmatpush.msra.mxu3 %v2714_v8  ;;  %3673 = vmatpush.msrb.mxu1 %v3034_v9  ;;  %v2538_v59 = vld [vmem:[%s8534_s10 + $0x78] sm:$0xff] }
 0x546   : > { %3586 = vmatpush.msra.mxu0 %v2801_v44  ;;  %3619 = vmatpush.msra.mxu2 %v2602_v11  ;;  %v2858_v24 = vld [vmem:[%s8534_s10 + $0xa78] sm:$0xff]  ;;  %v3703_v44 = vld [vmem:[%s8536_s12 + $0x50] sm:$0xff]  ;;  %v8101_v11 = vpop.f32.mrf.mxu3 }
 0x547   : > { %3642 = vmatpush.msra.mxu3 %v2706_v17  ;;  %3674 = vmatpush.msrb.mxu1 %v3026_v55  ;;  %v2962_v6 = vld [vmem:[%s8534_s10 + $0xdb8] sm:$0xff]  ;;  %v8103_v17 = vpop.f32.mrf.mxu0 }
 0x548   : > { %3587 = vmatpush.msra.mxu0 %v2793_v12  ;;  %3620 = vmatpush.msra.mxu2 %v2594_v13  ;;  %v2530_v7 = vld [vmem:[%s8534_s10 + $0x38] sm:$0xff] }
 0x549   : > { %3643 = vmatpush.msra.mxu3 %v2698_v14  ;;  %3675 = vmatpush.msrb.mxu1 %v3018_v15  ;;  %v2850_v49 = vld [vmem:[%s8534_s10 + $0xa38] sm:$0xff]  ;;  %v3702_v14 = vld [vmem:[%s8536_s12 + $0x48] sm:$0xff]  ;;  %v8120_v15 = vld [vmem:[%s8535_s11] sm:$0xff] }
 0x54a   : > { %3588 = vmatpush.msra.mxu0 %v2785_v16  ;;  %3621 = vmatpush.msra.mxu2 %v2586_v18  ;;  %v2954_v51 = vld [vmem:[%s8534_s10 + $0xd78] sm:$0xff]  ;;  %v3715_v16 = vld [vmem:[%s8536_s12 + $0xb0] sm:$0xff] }
 0x54b   : > { %3589 = vmatmul.f32.vlgmr.msra.gmra.mxu0 %v6953_v58  ;;  %3644 = vmatpush.msra.mxu3 %v2690_v19  ;;  %v3708_v53 = vld [vmem:[%s8536_s12 + $0x78] sm:$0xff]  ;;  %v3755_v18 = vld [vmem:[%s8536_s12 + $0x1f0] sm:$0xff]  ;;  %v3038_v19 = vperm.slane %v8120_v15, 1 }
 0x54c   : > { %3653 = vmatpush.msrb.mxu0 %v2906_v22  ;;  %3676 = vmatpush.msrb.mxu1 %v3010_v23  ;;  %v2842_v54 = vld [vmem:[%s8534_s10 + $0x9f8] sm:$0xff]  ;;  %v3150_v23 = vpop.f32.mrf.mxu2 }
 0x54d   : > { %3622 = vmatpush.msra.mxu2 %v2578_v25  ;;  %3645 = vmatpush.msra.mxu3 %v2682_v29  ;;  %v2946_v10 = vld [vmem:[%s8534_s10 + $0xd38] sm:$0xff]  ;;  %v3714_v25 = vld [vmem:[%s8536_s12 + $0xa8] sm:$0xff] }
 0x54e   : > { %3654 = vmatpush.msrb.mxu0 %v2898_v30  ;;  %3677 = vmatpush.msrb.mxu1 %v3002_v33  ;;  %v3720_v60 = vld [vmem:[%s8536_s12 + $0xd8] sm:$0xff]  ;;  %v3754_v29 = vld [vmem:[%s8536_s12 + $0x1e8] sm:$0xff] }
 0x54f   : > { %3623 = vmatpush.msra.mxu2 %v2570_v34  ;;  %3646 = vmatpush.msra.mxu3 %v2674_v35  ;;  %v2834_v20 = vld [vmem:[%s8534_s10 + $0x9b8] sm:$0xff]  ;;  %v8148_v34 = vpop.f32.mrf.mxu1  ;;  %v3713_v35 = vld [vmem:[%s8536_s12 + $0xa0] sm:$0xff] }
 0x550   : > { %3655 = vmatpush.msrb.mxu0 %v2890_v36  ;;  %3678 = vmatpush.msrb.mxu1 %v2994_v31  ;;  %v2938_v57 = vld [vmem:[%s8534_s10 + $0xcf8] sm:$0xff]  ;;  %v3151_v36 = vadd.f32 %v3150_v23, %v3038_v19  ;;  %v3771_v19 = vld [vmem:[%s8536_s12 + $0x270] sm:$0xff] }
 0x551   : > { %3624 = vmatpush.msra.mxu2 %v2562_v37  ;;  %3647 = vmatpush.msra.mxu3 %v2666_v32  ;;  %v2826_v0 = vld [vmem:[%s8534_s10 + $0x978] sm:$0xff]  ;;  %v3753_v37 = vld [vmem:[%s8536_s12 + $0x1e0] sm:$0xff]  ;;  %v3699_v32 = vld [vmem:[%s8536_s12 + $0x30] sm:$0xff] }
 0x552   : > { %3656 = vmatpush.msrb.mxu0 %v2882_v38  ;;  %3679 = vmatpush.msrb.mxu1 %v2986_v39  ;;  %v2930_v1 = vld [vmem:[%s8534_s10 + $0xcb8] sm:$0xff]  ;;  %v3037_v39 = vperm.slane %v8120_v15, 0 }
 0x553   : > { %3625 = vmatpush.msra.mxu2 %v2554_v40  ;;  %3648 = vmatpush.msra.mxu3 %v2658_v41  ;;  %v2818_v3 = vld [vmem:[%s8534_s10 + $0x938] sm:$0xff]  ;;  %v3739_v40 = vld [vmem:[%s8536_s12 + $0x170] sm:$0xff] }
 0x554   : > { %3657 = vmatpush.msrb.mxu0 %v2874_v42  ;;  %3680 = vmatpush.msrb.mxu1 %v2978_v26  ;;  %v2922_v52 = vld [vmem:[%s8534_s10 + $0xc78] sm:$0xff]  ;;  %v3170_v42 = vpop.f32.mrf.mxu3  ;;  %v3190_v26 = vpop.f32.mrf.mxu0 }
 0x555   : > { %3649 = vmatmul.f32.vlgmr.msra.gmra.mxu3 %v6871_v21  ;;  %3626 = vmatpush.msra.mxu2 %v2546_v43  ;;  %v3722_v21 = vld [vmem:[%s8536_s12 + $0xe8] sm:$0xff]  ;;  %v3704_v4 = vld [vmem:[%s8536_s12 + $0x58] sm:$0xff] }
 0x556   : > { %3842 = vmatpush.msrb.mxu3 %v3724_v46  ;;  %3658 = vmatpush.msrb.mxu0 %v2866_v47  ;;  %v2810_v8 = vld [vmem:[%s8534_s10 + $0x8f8] sm:$0xff]  ;;  %v3698_v43 = vld [vmem:[%s8536_s12 + $0x28] sm:$0xff]  ;;  %v3171_v46 = vadd.f32 %v3170_v42, %v3151_v36  ;;  %v3743_v36 = vld [vmem:[%s8536_s12 + $0x190] sm:$0xff] }
 0x557   : > { %3681 = vmatpush.msrb.mxu1 %v2970_v48  ;;  %3627 = vmatpush.msra.mxu2 %v2538_v59  ;;  %v2914_v9 = vld [vmem:[%s8534_s10 + $0xc38] sm:$0xff]  ;;  %v3738_v47 = vld [vmem:[%s8536_s12 + $0x168] sm:$0xff]  ;;  %v3751_v48 = vld [vmem:[%s8536_s12 + $0x1d0] sm:$0xff] }
 0x558   : > { %3843 = vmatpush.msrb.mxu3 %v3723_v62  ;;  %3659 = vmatpush.msrb.mxu0 %v2858_v24  ;;  %v3716_v55 = vld [vmem:[%s8536_s12 + $0xb8] sm:$0xff]  ;;  %v3697_v59 = vld [vmem:[%s8536_s12 + $0x20] sm:$0xff]  ;;  %v3710_v62 = vld [vmem:[%s8536_s12 + $0x88] sm:$0xff]  ;;  %v3071_v24 = vadd.f32 %v8066_v61, %v3037_v39 }
 0x559   : > { %3682 = vmatpush.msrb.mxu1 %v2962_v6  ;;  %3628 = vmatpush.msra.mxu2 %v2530_v7  ;;  %v3756_v12 = vld [vmem:[%s8536_s12 + $0x1f8] sm:$0xff]  ;;  %v3191_v6 = vadd.f32 %v3190_v26, %v3171_v46  ;;  %v8192_v7 = vpop.f32.mrf.mxu2 }
 0x55a   : > { %3844 = vmatpush.msrb.mxu3 %v3722_v21  ;;  %3660 = vmatpush.msrb.mxu0 %v2850_v49  ;;  %v2802_v13 = vld [vmem:[%s8534_s10 + $0x8b8] sm:$0xff]  ;;  %v3737_v21 = vld [vmem:[%s8536_s12 + $0x160] sm:$0xff]  ;;  %v3750_v49 = vld [vmem:[%s8536_s12 + $0x1c8] sm:$0xff] }
 0x55b   : > { %3683 = vmatpush.msrb.mxu1 %v2954_v51  ;;  %3629 = vmatmul.f32.vlgmr.msra.gmra.mxu2 %v6885_v28  ;;  %v3706_v28 = vld [vmem:[%s8536_s12 + $0x68] sm:$0xff]  ;;  %v2794_v22 = vld [vmem:[%s8534_s10 + $0x878] sm:$0xff] }
 0x55c   : > { %3822 = vmatpush.msrb.mxu2 %v3708_v53  ;;  %3845 = vmatpush.msrb.mxu3 %v3721_v45  ;;  %v2786_v30 = vld [vmem:[%s8534_s10 + $0x838] sm:$0xff]  ;;  %v3709_v53 = vld [vmem:[%s8536_s12 + $0x80] sm:$0xff] }
 0x55d   : > { %3661 = vmatpush.msrb.mxu0 %v2842_v54  ;;  %3684 = vmatpush.msrb.mxu1 %v2946_v10  ;;  %v3700_v33 = vld [vmem:[%s8536_s12 + $0x38] sm:$0xff]  ;;  %v3749_v54 = vld [vmem:[%s8536_s12 + $0x1c0] sm:$0xff]  ;;  %v3210_v10 = vpop.f32.mrf.mxu1 }
 0x55e   : > { %3823 = vmatpush.msrb.mxu2 %v3707_v56  ;;  %3846 = vmatpush.msrb.mxu3 %v3720_v60  ;;  %v3740_v31 = vld [vmem:[%s8536_s12 + $0x178] sm:$0xff]  ;;  %v3695_v56 = vld [vmem:[%s8536_s12 + $0x10] sm:$0xff]  ;;  %v3091_v60 = vadd.f32 %v8101_v11, %v3071_v24  ;;  %v3786_v11 = vld [vmem:[%s8536_s12 + $0x2e8] sm:$0xff] }
 0x55f   : > { %3662 = vmatpush.msrb.mxu0 %v2834_v20  ;;  %3685 = vmatpush.msrb.mxu1 %v2938_v57  ;;  %v3712_v38 = vld [vmem:[%s8536_s12 + $0x98] sm:$0xff]  ;;  %v3211_v20 = vadd.f32 %v3210_v10, %v3191_v6  ;;  %v3735_v57 = vld [vmem:[%s8536_s12 + $0x150] sm:$0xff]  ;;  %v3766_v6 = vld [vmem:[%s8536_s12 + $0x248] sm:$0xff] }
 0x560   : > { %3824 = vmatpush.msrb.mxu2 %v3706_v28  ;;  %3847 = vmatpush.msrb.mxu3 %v3719_v50  ;;  %v3752_v41 = vld [vmem:[%s8536_s12 + $0x1d8] sm:$0xff]  ;;  %v3694_v50 = vld [vmem:[%s8536_s12 + $0x8] sm:$0xff] }
 0x561   : > { %3663 = vmatpush.msrb.mxu0 %v2826_v0  ;;  %3686 = vmatpush.msrb.mxu1 %v2930_v1  ;;  %v3696_v51 = vld [vmem:[%s8536_s12 + $0x18] sm:$0xff]  ;;  %v3111_v0 = vadd.f32 %v8103_v17, %v3091_v60  ;;  %v8229_v1 = vpop.f32.mrf.mxu3 }
 0x562   : > { %3825 = vmatpush.msrb.mxu2 %v3705_v63  ;;  %3848 = vmatpush.msrb.mxu3 %v3718_v2  ;;  %v3736_v45 = vld [vmem:[%s8536_s12 + $0x158] sm:$0xff]  ;;  %v8231_v63 = vpop.f32.mrf.mxu0  ;;  %v3734_v2 = vld [vmem:[%s8536_s12 + $0x148] sm:$0xff] }
 0x563   : > { %3664 = vmatpush.msrb.mxu0 %v2818_v3  ;;  %3687 = vmatpush.msrb.mxu1 %v2922_v52  ;;  %v3748_v28 = vld [vmem:[%s8536_s12 + $0x1b8] sm:$0xff]  ;;  %v3747_v3 = vld [vmem:[%s8536_s12 + $0x1b0] sm:$0xff]  ;;  %v3040_v52 = vperm.slane %v8120_v15, 3  ;;  %v3131_v17 = vadd.f32 %v8148_v34, %v3111_v0  ;;  %v3730_v34 = vld [vmem:[%s8536_s12 + $0x128] sm:$0xff] }
 0x564   : > { %3826 = vmatpush.msrb.mxu2 %v3704_v4  ;;  %3849 = vmatpush.msrb.mxu3 %v3717_v5  ;;  %v3788_v61 = vld [vmem:[%s8536_s12 + $0x2f8] sm:$0xff]  ;;  %v3693_v4 = vld [vmem:[%s8536_s12] sm:$0xff]  ;;  %v3787_v5 = vld [vmem:[%s8536_s12 + $0x2f0] sm:$0xff] }
 0x565   : > { %3665 = vmatpush.msrb.mxu0 %v2810_v8  ;;  %3688 = vmatpush.msrb.mxu1 %v2914_v9  ;;  %v3310_v8 = vpop.f32.mrf.mxu2  ;;  %v3733_v9 = vld [vmem:[%s8536_s12 + $0x140] sm:$0xff]  ;;  %v3744_v23 = vld [vmem:[%s8536_s12 + $0x198] sm:$0xff]  ;;  %v3762_v0 = vld [vmem:[%s8536_s12 + $0x228] sm:$0xff] }
 0x566   : > { %3689 = vmatmul.f32.vlgmr.msrb.gmra.mxu1 %v6928_v27  ;;  %3827 = vmatpush.msrb.mxu2 %v3703_v44  ;;  %v3701_v27 = vld [vmem:[%s8536_s12 + $0x40] sm:$0xff]  ;;  %v3746_v44 = vld [vmem:[%s8536_s12 + $0x1a8] sm:$0xff]  ;;  %v3768_v42 = vld [vmem:[%s8536_s12 + $0x258] sm:$0xff] }
 0x567   : > { %3850 = vmatpush.msrb.mxu3 %v3716_v55  ;;  %3882 = vmatpush.msra.mxu1 %v3756_v12  ;;  %v3772_v55 = vld [vmem:[%s8536_s12 + $0x278] sm:$0xff] }
 0x568   : > { %3666 = vmatpush.msrb.mxu0 %v2802_v13  ;;  %3828 = vmatpush.msrb.mxu2 %v3702_v14  ;;  %v3732_v12 = vld [vmem:[%s8536_s12 + $0x138] sm:$0xff]  ;;  %v3311_v13 = vadd.f32 %v3310_v8, %v3040_v52  ;;  %v3745_v14 = vld [vmem:[%s8536_s12 + $0x1a0] sm:$0xff]  ;;  %v3774_v52 = vld [vmem:[%s8536_s12 + $0x288] sm:$0xff] }
 0x569   : > { %3851 = vmatpush.msrb.mxu3 %v3715_v16  ;;  %3883 = vmatpush.msra.mxu1 %v3755_v18  ;;  %v3785_v16 = vld [vmem:[%s8536_s12 + $0x2e0] sm:$0xff]  ;;  %v8268_v18 = vpop.f32.mrf.mxu1  ;;  %v3728_v26 = vld [vmem:[%s8536_s12 + $0x118] sm:$0xff] }
 0x56a   : > { %3667 = vmatpush.msrb.mxu0 %v2794_v22  ;;  %3829 = vmatpush.msrb.mxu2 %v3701_v27  ;;  %v3731_v22 = vld [vmem:[%s8536_s12 + $0x130] sm:$0xff]  ;;  %v3039_v27 = vperm.slane %v8120_v15, 2  ;;  %v3780_v24 = vld [vmem:[%s8536_s12 + $0x2b8] sm:$0xff] }
 0x56b   : > { %3852 = vmatpush.msrb.mxu3 %v3714_v25  ;;  %3884 = vmatpush.msra.mxu1 %v3754_v29  ;;  %v3784_v25 = vld [vmem:[%s8536_s12 + $0x2d8] sm:$0xff]  ;;  %v3330_v29 = vpop.f32.mrf.mxu3 }
 0x56c   : > { %3668 = vmatpush.msrb.mxu0 %v2786_v30  ;;  %3830 = vmatpush.msrb.mxu2 %v3700_v33  ;;  %v3350_v30 = vpop.f32.mrf.mxu0  ;;  %v3770_v33 = vld [vmem:[%s8536_s12 + $0x268] sm:$0xff]  ;;  %v3804_v60 = vld [vmem:[%s8536_s12 + $0x378] sm:$0xff] }
 0x56d   : > { %3669 = vmatmul.f32.vlgmr.msrb.gmra.mxu0 %v6953_v58  ;;  %3853 = vmatpush.msrb.mxu3 %v3713_v35  ;;  %v3711_v58 = vld [vmem:[%s8536_s12 + $0x90] sm:$0xff]  ;;  %v3331_v35 = vadd.f32 %v3330_v29, %v3311_v13 }
 0x56e   : > { %3862 = vmatpush.msra.mxu0 %v3740_v31  ;;  %3885 = vmatpush.msra.mxu1 %v3753_v37  ;;  %v3783_v31 = vld [vmem:[%s8536_s12 + $0x2d0] sm:$0xff]  ;;  %v3769_v37 = vld [vmem:[%s8536_s12 + $0x260] sm:$0xff] }
 0x56f   : > { %3831 = vmatpush.msrb.mxu2 %v3699_v32  ;;  %3854 = vmatpush.msrb.mxu3 %v3712_v38  ;;  %v3729_v32 = vld [vmem:[%s8536_s12 + $0x120] sm:$0xff]  ;;  %v3231_v38 = vadd.f32 %v8192_v7, %v3039_v27  ;;  %v3351_v39 = vadd.f32 %v3350_v30, %v3331_v35  ;;  %v3795_v30 = vld [vmem:[%s8536_s12 + $0x330] sm:$0xff] }
 0x570   : > { %3863 = vmatpush.msra.mxu0 %v3739_v40  ;;  %3886 = vmatpush.msra.mxu1 %v3752_v41  ;;  %v3742_v40 = vld [vmem:[%s8536_s12 + $0x188] sm:$0xff]  ;;  %v3793_v35 = vld [vmem:[%s8536_s12 + $0x320] sm:$0xff] }
 0x571   : > { %3832 = vmatpush.msrb.mxu2 %v3698_v43  ;;  %3855 = vmatpush.msrb.mxu3 %v3711_v58  ;;  %v3782_v41 = vld [vmem:[%s8536_s12 + $0x2c8] sm:$0xff]  ;;  %v3741_v43 = vld [vmem:[%s8536_s12 + $0x180] sm:$0xff]  ;;  %v3370_v46 = vpop.f32.mrf.mxu1 }
 0x572   : > { %3864 = vmatpush.msra.mxu0 %v3738_v47  ;;  %3887 = vmatpush.msra.mxu1 %v3751_v48  ;;  %v3781_v58 = vld [vmem:[%s8536_s12 + $0x2c0] sm:$0xff]  ;;  %v3767_v47 = vld [vmem:[%s8536_s12 + $0x250] sm:$0xff]  ;;  %v3251_v48 = vadd.f32 %v8229_v1, %v3231_v38 }
 0x573   : > { %3833 = vmatpush.msrb.mxu2 %v3697_v59  ;;  %3856 = vmatpush.msrb.mxu3 %v3710_v62  ;;  %v3371_v59 = vadd.f32 %v3370_v46, %v3351_v39  ;;  %v3727_v62 = vld [vmem:[%s8536_s12 + $0x110] sm:$0xff]  ;;  %v3410_v8 = vpop.f32.mrf.mxu3  ;;  %v3818_v46 = vld [vmem:[%s8536_s12 + $0x3e8] sm:$0xff] }
 0x574   : > { %3865 = vmatpush.msra.mxu0 %v3737_v21  ;;  %3888 = vmatpush.msra.mxu1 %v3750_v49  ;;  %v3271_v7 = vadd.f32 %v8231_v63, %v3251_v48  ;;  %v3726_v21 = vld [vmem:[%s8536_s12 + $0x108] sm:$0xff]  ;;  %v3779_v49 = vld [vmem:[%s8536_s12 + $0x2b0] sm:$0xff]  ;;  %v3816_v48 = vld [vmem:[%s8536_s12 + $0x3d8] sm:$0xff] }
 0x575   : > { %3834 = vmatpush.msrb.mxu2 %v3696_v51  ;;  %3857 = vmatpush.msrb.mxu3 %v3709_v53  ;;  %v3765_v51 = vld [vmem:[%s8536_s12 + $0x240] sm:$0xff]  ;;  %v3775_v1 = vld [vmem:[%s8536_s12 + $0x290] sm:$0xff]  ;;  %v3802_v63 = vld [vmem:[%s8536_s12 + $0x368] sm:$0xff] }
 0x576   : > { %3866 = vmatpush.msra.mxu0 %v3736_v45  ;;  %3889 = vmatpush.msra.mxu1 %v3749_v54  ;;  %v3725_v53 = vld [vmem:[%s8536_s12 + $0x100] sm:$0xff]  ;;  %v3778_v45 = vld [vmem:[%s8536_s12 + $0x2a8] sm:$0xff]  ;;  %v3764_v54 = vld [vmem:[%s8536_s12 + $0x238] sm:$0xff]  ;;  %v3291_v10 = vadd.f32 %v8268_v18, %v3271_v7 }
 0x577   : > { %3858 = vmatmul.f32.vlgmr.msrb.gmra.mxu3 %v3211_v20  ;;  %3835 = vmatpush.msrb.mxu2 %v3695_v56  ;;  %v3777_v56 = vld [vmem:[%s8536_s12 + $0x2a0] sm:$0xff]  ;;  %v3041_v20 = vperm.slane %v8120_v15, 4  ;;  %v3812_v7 = vld [vmem:[%s8536_s12 + $0x3b8] sm:$0xff] }
 0x578   : > { %3867 = vmatpush.msra.mxu0 %v3735_v57  ;;  %3890 = vmatpush.msra.mxu1 %v3748_v28  ;;  %v3763_v57 = vld [vmem:[%s8536_s12 + $0x230] sm:$0xff]  ;;  %v3390_v28 = vpop.f32.mrf.mxu2  ;;  %v3757_v18 = vld [vmem:[%s8536_s12 + $0x200] sm:$0xff] }
 0x579   : > { %3836 = vmatpush.msrb.mxu2 %v3694_v50  ;;  %3922 = vmatpush.msra.mxu3 %v3788_v61  ;;  %v3776_v50 = vld [vmem:[%s8536_s12 + $0x298] sm:$0xff]  ;;  %v3803_v61 = vld [vmem:[%s8536_s12 + $0x370] sm:$0xff] }
 0x57a   : > { %3868 = vmatpush.msra.mxu0 %v3734_v2  ;;  %3891 = vmatpush.msra.mxu1 %v3747_v3  ;;  %v3391_v2 = vadd.f32 %v3390_v28, %v3041_v20  ;;  %v3761_v3 = vld [vmem:[%s8536_s12 + $0x220] sm:$0xff] }
 0x57b   : > { %3837 = vmatpush.msrb.mxu2 %v3693_v4  ;;  %3923 = vmatpush.msra.mxu3 %v3787_v5  ;;  %v3801_v4 = vld [vmem:[%s8536_s12 + $0x360] sm:$0xff]  ;;  %v3760_v5 = vld [vmem:[%s8536_s12 + $0x218] sm:$0xff] }
 0x57c   : > { %3869 = vmatpush.msra.mxu0 %v3733_v9  ;;  %3892 = vmatpush.msra.mxu1 %v3746_v44  ;;  %v3773_v44 = vld [vmem:[%s8536_s12 + $0x280] sm:$0xff] }
 0x57d   : > { %3838 = vmatmul.f32.vlgmr.msrb.gmra.mxu2 %v3131_v17  ;;  %3924 = vmatpush.msra.mxu3 %v3786_v11  ;;  %v3800_v11 = vld [vmem:[%s8536_s12 + $0x358] sm:$0xff]  ;;  %v3411_v17 = vadd.f32 %v3410_v8, %v3391_v2 }
 0x57e   : > { %3902 = vmatpush.msra.mxu2 %v3772_v55  ;;  %3870 = vmatpush.msra.mxu0 %v3732_v12  ;;  %v3759_v55 = vld [vmem:[%s8536_s12 + $0x210] sm:$0xff] }
 0x57f   : > { %3893 = vmatpush.msra.mxu1 %v3745_v14  ;;  %3925 = vmatpush.msra.mxu3 %v3785_v16  ;;  %v3799_v12 = vld [vmem:[%s8536_s12 + $0x350] sm:$0xff]  ;;  %v3758_v14 = vld [vmem:[%s8536_s12 + $0x208] sm:$0xff] }
 0x580   : > { %3903 = vmatpush.msra.mxu2 %v3771_v19  ;;  %3871 = vmatpush.msra.mxu0 %v3731_v22  ;;  %v3798_v16 = vld [vmem:[%s8536_s12 + $0x348] sm:$0xff]  ;;  %v3450_v19 = vpop.f32.mrf.mxu1  ;;  %v3797_v22 = vld [vmem:[%s8536_s12 + $0x340] sm:$0xff] }
 0x581   : > { %3894 = vmatpush.msra.mxu1 %v3744_v23  ;;  %3926 = vmatpush.msra.mxu3 %v3784_v25  ;;  %v3042_v23 = vperm.slane %v8120_v15, 5  ;;  %v3796_v25 = vld [vmem:[%s8536_s12 + $0x338] sm:$0xff] }
 0x582   : > { %3904 = vmatpush.msra.mxu2 %v3770_v33  ;;  %3872 = vmatpush.msra.mxu0 %v3730_v34  ;;  %v3794_v34 = vld [vmem:[%s8536_s12 + $0x328] sm:$0xff] }
 0x583   : > { %3895 = vmatpush.msra.mxu1 %v3743_v36  ;;  %3927 = vmatpush.msra.mxu3 %v3783_v31  ;;  %v3792_v31 = vld [vmem:[%s8536_s12 + $0x318] sm:$0xff] }
 0x584   : > { %3905 = vmatpush.msra.mxu2 %v3769_v37  ;;  %3873 = vmatpush.msra.mxu0 %v3729_v32  ;;  %v3430_v9 = vpop.f32.mrf.mxu0 }
 0x585   : > { %3896 = vmatpush.msra.mxu1 %v3742_v40  ;;  %3928 = vmatpush.msra.mxu3 %v3782_v41  ;;  %v3431_v13 = vadd.f32 %v3430_v9, %v3411_v17  ;;  %v3791_v41 = vld [vmem:[%s8536_s12 + $0x310] sm:$0xff] }
 0x586   : > { %3906 = vmatpush.msra.mxu2 %v3768_v42  ;;  %3874 = vmatpush.msra.mxu0 %v3728_v26  ;;  %v3790_v42 = vld [vmem:[%s8536_s12 + $0x308] sm:$0xff]  ;;  %v3789_v26 = vld [vmem:[%s8536_s12 + $0x300] sm:$0xff] }
 0x587   : > { %3897 = vmatpush.msra.mxu1 %v3741_v43  ;;  %3929 = vmatpush.msra.mxu3 %v3781_v58  ;;  %v3451_v27 = vadd.f32 %v3450_v19, %v3431_v13  ;;  %v3820_v43 = vld [vmem:[%s8536_s12 + $0x3f8] sm:$0xff]  ;;  %v3819_v58 = vld [vmem:[%s8536_s12 + $0x3f0] sm:$0xff] }
 0x588   : > { %3898 = vmatmul.f32.vlgmr.msra.gmra.mxu1 %v3371_v59  ;;  %3907 = vmatpush.msra.mxu2 %v3767_v47  ;;  %v3817_v47 = vld [vmem:[%s8536_s12 + $0x3e0] sm:$0xff]  ;;  %v3815_v59 = vld [vmem:[%s8536_s12 + $0x3d0] sm:$0xff] }
 0x589   : > { %3875 = vmatpush.msra.mxu0 %v3727_v62  ;;  %3930 = vmatpush.msra.mxu3 %v3780_v24  ;;  %v3814_v62 = vld [vmem:[%s8536_s12 + $0x3c8] sm:$0xff]  ;;  %v3813_v24 = vld [vmem:[%s8536_s12 + $0x3c0] sm:$0xff] }
 0x58a   : > { %3908 = vmatpush.msra.mxu2 %v3766_v6  ;;  %3962 = vmatpush.msrb.mxu1 %v3820_v43  ;;  %v3043_v6 = vperm.slane %v8120_v15, 6 }
 0x58b   : > { %3876 = vmatpush.msra.mxu0 %v3726_v21  ;;  %3931 = vmatpush.msra.mxu3 %v3779_v49  ;;  %v3811_v21 = vld [vmem:[%s8536_s12 + $0x3b0] sm:$0xff] }
 0x58c   : > { %3909 = vmatpush.msra.mxu2 %v3765_v51  ;;  %3963 = vmatpush.msrb.mxu1 %v3819_v58 }
 0x58d   : > { %3877 = vmatpush.msra.mxu0 %v3725_v53  ;;  %3932 = vmatpush.msra.mxu3 %v3778_v45  ;;  %v3810_v53 = vld [vmem:[%s8536_s12 + $0x3a8] sm:$0xff]  ;;  %v3809_v45 = vld [vmem:[%s8536_s12 + $0x3a0] sm:$0xff] }
 0x58e   : > { %3878 = vmatmul.f32.vlgmr.msra.gmra.mxu0 %v3291_v10  ;;  %3910 = vmatpush.msra.mxu2 %v3764_v54  ;;  %v3808_v54 = vld [vmem:[%s8536_s12 + $0x398] sm:$0xff] }
 0x58f   : > { %3933 = vmatpush.msra.mxu3 %v3777_v56  ;;  %3942 = vmatpush.msrb.mxu0 %v3804_v60 }
 0x590   : > { %3911 = vmatpush.msra.mxu2 %v3763_v57  ;;  %3964 = vmatpush.msrb.mxu1 %v3818_v46 }
 0x591   : > { %3934 = vmatpush.msra.mxu3 %v3776_v50  ;;  %3943 = vmatpush.msrb.mxu0 %v3803_v61  ;;  %v3807_v50 = vld [vmem:[%s8536_s12 + $0x390] sm:$0xff]  ;;  %v3806_v61 = vld [vmem:[%s8536_s12 + $0x388] sm:$0xff] }
 0x592   : > { %3912 = vmatpush.msra.mxu2 %v3762_v0  ;;  %3965 = vmatpush.msrb.mxu1 %v3817_v47  ;;  %v3805_v0 = vld [vmem:[%s8536_s12 + $0x380] sm:$0xff] }
 0x593   : > { %3935 = vmatpush.msra.mxu3 %v3775_v1  ;;  %3944 = vmatpush.msrb.mxu0 %v3802_v63  ;;  %v3044_v1 = vperm.slane %v8120_v15, 7 }
 0x594   : > { %3913 = vmatpush.msra.mxu2 %v3761_v3  ;;  %v3490_v36 = vpop.f32.mrf.mxu3  ;;  %3966 = vmatpush.msrb.mxu1 %v3816_v48 }
 0x595   : > { %3936 = vmatpush.msra.mxu3 %v3774_v52  ;;  %3945 = vmatpush.msrb.mxu0 %v3801_v4 }
 0x596   : > { %3914 = vmatpush.msra.mxu2 %v3760_v5  ;;  %3967 = vmatpush.msrb.mxu1 %v3815_v59 }
 0x597   : > { %3937 = vmatpush.msra.mxu3 %v3773_v44  ;;  %3946 = vmatpush.msrb.mxu0 %v3800_v11  ;;  %v3821_v44 = vld [vmem:[%s8537_s13] sm:$0x1] }
 0x598   : > { %3915 = vmatpush.msra.mxu2 %v3759_v55  ;;  %3968 = vmatpush.msrb.mxu1 %v3814_v62 }
 0x599   : > { %3947 = vmatpush.msrb.mxu0 %v3799_v12 }
 0x59a   : > { %3916 = vmatpush.msra.mxu2 %v3758_v14  ;;  %v3470_v29 = vpop.f32.mrf.mxu2  ;;  %3969 = vmatpush.msrb.mxu1 %v3813_v24 }
 0x59b   : > { %3948 = vmatpush.msrb.mxu0 %v3798_v16  ;;  %v3471_v33 = vadd.f32 %v3470_v29, %v3042_v23 }
 0x59c   : > { %3917 = vmatpush.msra.mxu2 %v3757_v18  ;;  %3970 = vmatpush.msrb.mxu1 %v3812_v7 }
 0x59d   : > { %3918 = vmatmul.f32.vlgmr.msra.gmra.mxu2 %v3451_v27  ;;  %3949 = vmatpush.msrb.mxu0 %v3797_v22  ;;  %v3491_v37 = vadd.f32 %v3490_v36, %v3471_v33 }
 0x59e   : > { %3971 = vmatpush.msrb.mxu1 %v3811_v21 }
 0x59f   : > { %3950 = vmatpush.msrb.mxu0 %v3796_v25  ;;  %v3530_v39 = vpop.f32.mrf.mxu1 }
 0x5a0   : > { %3972 = vmatpush.msrb.mxu1 %v3810_v53 }
 0x5a1   : > { %3951 = vmatpush.msrb.mxu0 %v3795_v30 }
 0x5a2   : > { %3973 = vmatpush.msrb.mxu1 %v3809_v45 }
 0x5a3   : > { %3952 = vmatpush.msrb.mxu0 %v3794_v34 }
 0x5a4   : > { %3974 = vmatpush.msrb.mxu1 %v3808_v54 }
 0x5a5   : > { %3953 = vmatpush.msrb.mxu0 %v3793_v35 }
 0x5a6   : > { %v3510_v32 = vpop.f32.mrf.mxu0  ;;  %3975 = vmatpush.msrb.mxu1 %v3807_v50 }
 0x5a7   : > { %v3511_v38 = vadd.f32 %v3510_v32, %v3491_v37  ;;  %3954 = vmatpush.msrb.mxu0 %v3792_v31 }
 0x5a8   : > { %3976 = vmatpush.msrb.mxu1 %v3806_v61 }
 0x5a9   : > { %v3531_v40 = vadd.f32 %v3530_v39, %v3511_v38  ;;  %3955 = vmatpush.msrb.mxu0 %v3791_v41 }
 0x5aa   : > { %3977 = vmatpush.msrb.mxu1 %v3805_v0 }
 0x5ab   : > { %3938 = vmatmul.f32.vlgmr.msra.gmra.mxu3 %v3531_v40  ;;  %3956 = vmatpush.msrb.mxu0 %v3790_v42 }
 0x5ad   : > { %3957 = vmatpush.msrb.mxu0 %v3789_v26 }
 0x5b6   : > { %v3570_v10 = vpop.f32.mrf.mxu3 }
 0x5bc   : > { %v3550_v49 = vpop.f32.mrf.mxu2 }
 0x5bd   : > { %v3551_v51 = vadd.f32 %v3550_v49, %v3043_v6 }
 0x5bf   : > { %v3571_v56 = vadd.f32 %v3570_v10, %v3551_v51 }
 0x5c1   : > { %v3610_v57 = vpop.f32.mrf.mxu1 }
 0x5c8   : > { %v3590_v60 = vpop.f32.mrf.mxu0 }
 0x5c9   : > { %v3591_v20 = vadd.f32 %v3590_v60, %v3571_v56 }
 0x5cb   : > { %v3611_v28 = vadd.f32 %v3610_v57, %v3591_v20 }
 0x5cd   : > { %3958 = vmatmul.f32.vlgmr.msrb.gmra.mxu0 %v3611_v28 }
 0x5d8   : > { %v3650_v3 = vpop.f32.mrf.mxu3 }
 0x5de   : > { %v3630_v63 = vpop.f32.mrf.mxu2 }
 0x5df   : > { %v3631_v2 = vadd.f32 %v3630_v63, %v3044_v1 }
 0x5e1   : > { %v3651_v52 = vadd.f32 %v3650_v3, %v3631_v2 }
 0x5e3   : > { %v3690_v8 = vpop.f32.mrf.mxu1 }
 0x5ea   : > { %v3670_v4 = vpop.f32.mrf.mxu0 }
 0x5eb   : > { %v3671_v5 = vadd.f32 %v3670_v4, %v3651_v52 }
 0x5ed   : > { %v3691_v9 = vadd.f32 %v3690_v8, %v3671_v5 }
 0x5ef   : > { %3978 = vmatmul.f32.vlgmr.msrb.gmra.mxu1 %v3691_v9 }
 0x5fa   : > { %v3859_v55 = vpop.f32.mrf.mxu3 }
 0x600   : > { %v3839_v11 = vpop.f32.mrf.mxu2 }
 0x601   : > { %v3840_v17 = vadd.f32 %v3839_v11, %v3821_v44 }
 0x603   : > { %v3860_v15 = vadd.f32 %v3859_v55, %v3840_v17 }
 0x605   : > { %v3899_v14 = vpop.f32.mrf.mxu1 }
 0x60b   : > { %v3879_v12 = vpop.f32.mrf.mxu0 }
 0x60c   : > { %v3880_v13 = vadd.f32 %v3879_v12, %v3860_v15 }
 0x60e   : > { %v3900_v18 = vadd.f32 %v3899_v14, %v3880_v13 }
 0x620   : > { %v3919_v16 = vpop.f32.mrf.mxu2 }
 0x621   : > { %v3920_v22 = vadd.f32 %v3919_v16, %v3900_v18 }
 0x62e   : > { %v3939_v19 = vpop.f32.mrf.mxu3 }
 0x62f   : > { %v3940_v23 = vadd.f32 %v3939_v19, %v3920_v22 }
 0x64a   : > { %v3959_v27 = vpop.f32.mrf.mxu0 }
 0x64b   : > { %v3960_v25 = vadd.f32 %v3959_v27, %v3940_v23 }
 0x66c   : > { %v3979_v29 = vpop.f32.mrf.mxu1 }
 0x66d   : > { %v3980_v30 = vadd.f32 %v3979_v29, %v3960_v25 }
 0x66f   : > { %3982 = vst [vmem:[%s459_s16] sm:$0x1] %v3980_v30 }
 0x670   : > { %5270 = shalt.err (!%p5267_p3)
}
 0x671   : > { %5199 = dma.vmem_to_hbm [thread:$0]  (%p5421_p5), %s3995_s24, 16, %s3997_s18, %s3984_s20  }
 0x672 PF: > { %s8553_s28 = sld [smem:[#allocation7_spill]] }
 0x673   : > { %s8554_s26 = sld [smem:[#allocation5_spill]] }
 0x678   : > { %p5205_p4 = scmp.ge.s32.totalorder %s8553_s28, 2 }
 0x679   : > { %s4008_s16 = sand.u32 1, %s8554_s26  }
 0x67a   : > { %p5202_p7 = pnand %p5205_p4, %p5425_p6  ;;  %s4009_s17 = scalar_lea.sflag [#allocation3], %s4008_s16 }
 0x67c   : > { %p5203_p8 = pneg %p5202_p7 }
 0x67e   : > { %5288 = dma.done.wait (%p5203_p8), %s4009_s17, 16  }
 0x67f   : > { %5290 = vsyncadd (%p5203_p8), %s4009_s17, 4294967280  ;;  %s8556_s16 = sld [smem:[#allocation8_spill]]  ;;  %s8559_s29 = smov %s5297_s30 }
 0x680   : > { %s8557_s22 = sld [smem:[#allocation6_spill]] }
 0x681   : > { %s8558_s15 = sld [smem:[#allocation9_spill]] }
 0x685   : > { %p24_p9 = scmp.ge.s32.totalorder %s8556_s16, 4  }
 0x686   : > { %s8560_s30 = smov %s8557_s22 }
 0x687   :  { %26 = sbr.rel (!%p24_p9) target bundleno = 3 (0x3), region = 127 }
 0x68c   :  { %4014 = vsyncpa [#allocation3], 1 }
 0x68d   :  { %4016 = vsyncpa [#allocation3 + $0x1], 1 }

</bundles_post_ra>
